<compile_context>
chip_gen: v7x
topology: tpu7x:2x2x1
jax: 0.10.0
libtpu: 0.0.40
codegen_flags: <defaults>
</compile_context>

<pallas_src>
import math

import numpy as np
import jax
import jax.numpy as jnp
from jax.experimental import pallas as pl
from jax.experimental.pallas import tpu as pltpu

# ------------------------ small hyper-parameters (module formulas) ------------------
N_MELS = 16                        # spectrogram height
D_MODEL = 32                       # transformer width; divisible by (n_mels // 4)
NHEAD = 4
HEAD_DIM = D_MODEL // NHEAD
NUM_LAYERS = 2
DIM_FF = 64
EMB_DIM = 32
C1, C2 = 32, 64                    # conv1 / conv2 channels
C3 = D_MODEL // (N_MELS // 4)      # conv3 channels (= 8)
H1 = N_MELS // 2                   # height after pool1 (= 8)
H2 = N_MELS // 4                   # height after pool2 (= 4)
BN_EPS = 1e-5
LN_EPS = 1e-5
PE_MAX_LEN = 64
ATTN_SCALE = 1.0 / math.sqrt(HEAD_DIM)
NEG_INF = -1e30


# ========================================= kernel ===================================
def _siamese_kernel(s0_ref, r1_ref, r2_ref, r3_ref,
                    w1_ref, bn1_ref, w2_ref, bn2_ref, w3_ref, bn3_ref,
                    pe_ref, mask_ref, pool_ref,
                    wqkv_ref, bqkv_ref, wo_ref, bo_ref,
                    ln1g_ref, ln1b_ref,
                    wff1_ref, bff1_ref, wff2_ref, bff2_ref,
                    ln2g_ref, ln2b_ref, fcw_ref, fcb_ref,
                    out_ref):
    """Whole TransformerSiameseNet branch forward for one batch block."""
    f32 = jnp.float32
    bf16 = jnp.bfloat16

    def bdot(a, b):  # bf16 MXU matmul with f32 accumulation
        return jnp.dot(a.astype(bf16), b.astype(bf16), preferred_element_type=f32)

    def ln(z, g, beta):  # LayerNorm over last dim, f32
        mu = jnp.mean(z, axis=-1, keepdims=True)
        var = jnp.mean(jnp.square(z - mu), axis=-1, keepdims=True)
        return (z - mu) * jax.lax.rsqrt(var + LN_EPS) * g + beta

    def conv_pool(slab, r_ref, wf_ref, bn_ref, kw_n):
        """Conv('same') -> ReLU -> BN(eval) -> 2x2 max-pool on a width-major slab.

        slab rows = (batch, width), cols = (height, cin).  wf_ref[dh*kw_n + kw] is the
        height-folded weight block; r_ref[j] selects source width rows 2*wp + (j-2).
        Output slab: rows = (batch, pooled width), cols = (pooled height, cout).
        """
        sb = slab.astype(bf16)
        ss = [bdot(r_ref[j], sb).astype(bf16) for j in range(kw_n + 1)]
        bias, scale, shift = bn_ref[0:1, :], bn_ref[1:2, :], bn_ref[2:3, :]
        out = None
        for dh in range(2):
            for dw in range(2):
                v = bias
                for kw in range(kw_n):
                    v = v + bdot(ss[dw + kw], wf_ref[dh * kw_n + kw])
                v = jnp.maximum(v, 0.0) * scale + shift
                out = v if out is None else jnp.maximum(out, v)
        return out

    def conv3_seq(slab, r_ref, wf_ref, bn_ref, kw_n):
        """conv3 -> ReLU -> BN, emitting the (batch*seq, c*h = d_model) layout."""
        sb = slab.astype(bf16)
        ss = [bdot(r_ref[j], sb).astype(bf16) for j in range(kw_n)]
        v = bn_ref[0:1, :]
        for kw in range(kw_n):
            v = v + bdot(ss[kw], wf_ref[kw])
        return jnp.maximum(v, 0.0) * bn_ref[1:2, :] + bn_ref[2:3, :]

    # ------------------------------- CNN front-end ----------------------------------
    s1 = conv_pool(s0_ref[...], r1_ref, w1_ref, bn1_ref, 5)     # (bb*T/2, H1*C1)
    s2 = conv_pool(s1,          r2_ref, w2_ref, bn2_ref, 5)     # (bb*T/4, H2*C2)
    seq = conv3_seq(s2,         r3_ref, w3_ref, bn3_ref, 3)     # (bb*S, D_MODEL)

    # ------------------------- transformer encoder (post-norm) ----------------------
    x = seq + pe_ref[...]                                        # PE add (dropout = id)
    mask = mask_ref[...]                                         # block-diag additive mask
    for l in range(NUM_LAYERS):
        qkv = bdot(x, wqkv_ref[l]) + bqkv_ref[l]                 # (M, 3D)
        attn = bo_ref[l]
        for h in range(NHEAD):
            c0 = h * HEAD_DIM
            q = qkv[:, c0:c0 + HEAD_DIM] * ATTN_SCALE
            k = qkv[:, D_MODEL + c0:D_MODEL + c0 + HEAD_DIM]
            v = qkv[:, 2 * D_MODEL + c0:2 * D_MODEL + c0 + HEAD_DIM]
            sc = jax.lax.dot_general(
                q.astype(bf16), k.astype(bf16),
                (((1,), (1,)), ((), ())),
                preferred_element_type=f32) + mask               # (M, M)
            sc = sc - jnp.max(sc, axis=-1, keepdims=True)
            p = jnp.exp(sc)
            p = p / jnp.sum(p, axis=-1, keepdims=True)
            # output projection folded per head: heads concat @ Wo
            attn = attn + bdot(bdot(p, v), wo_ref[l * NHEAD + h])
        x = ln(x + attn, ln1g_ref[l], ln1b_ref[l])

        h1 = jnp.maximum(bdot(x, wff1_ref[l]) + bff1_ref[l], 0.0)
        x = ln(x + bdot(h1, wff2_ref[l]) + bff2_ref[l], ln2g_ref[l], ln2b_ref[l])

    # -------------------- mean over sequence (precomputed pool) + FC ----------------
    xm = jnp.dot(pool_ref[...], x, preferred_element_type=f32)   # (bb, D)
    out_ref[0] = bdot(xm, fcw_ref[...]) + fcb_ref[...]           # (bb, EMB_DIM)


# =============================== host-side weight folding ===========================
def _fold_pool_conv(w, h_in, h_out, pad_h):
    """Fold the height kernel + height pool tap into the conv weight.

    w: (KH, KW, CIN, COUT).  Returns (2*KW, h_in*CIN, h_out*COUT) bf16 blocks indexed
    by dh*KW + kw.  Slab columns are (h_in, CIN); output columns are (h_out, COUT).
    """
    w = np.asarray(w, np.float32)
    kh_n, kw_n, cin, cout = w.shape
    blocks = np.zeros((2 * kw_n, h_in, cin, h_out, cout), np.float32)
    for dh in range(2):
        for kw in range(kw_n):
            for hp in range(h_out):
                for kh in range(kh_n):
                    h0 = 2 * hp + dh + kh - pad_h
                    if 0 <= h0 < h_in:
                        blocks[dh * kw_n + kw, h0, :, hp, :] = w[kh, kw]
    return jnp.asarray(blocks.reshape(2 * kw_n, h_in * cin, h_out * cout),
                       jnp.bfloat16)


def _fold_seq_conv(w, h_in, pad_h):
    """conv3 fold: output columns ordered (COUT, h) = the transformer feature dim."""
    w = np.asarray(w, np.float32)
    kh_n, kw_n, cin, cout = w.shape
    blocks = np.zeros((kw_n, h_in, cin, cout, h_in), np.float32)
    for kw in range(kw_n):
        for ho in range(h_in):
            for kh in range(kh_n):
                h0 = ho + kh - pad_h
                if 0 <= h0 < h_in:
                    blocks[kw, h0, :, :, ho] = w[kh, kw]
    return jnp.asarray(blocks.reshape(kw_n, h_in * cin, cout * h_in), jnp.bfloat16)


def _bn_cols(conv_bias, gamma, beta, mean, var, reps, layout):
    """(3, cols) = [conv bias, BN scale, BN shift] laid out like the conv output cols."""
    scale = gamma / jnp.sqrt(var + BN_EPS)
    shift = beta - mean * scale
    if layout == "tile":        # column = h * COUT + c
        rep = lambda v: jnp.tile(v, reps)
    else:                       # column = c * reps + h
        rep = lambda v: jnp.repeat(v, reps)
    return jnp.stack([rep(conv_bias), rep(scale), rep(shift)]).astype(jnp.float32)


def _row_select(bb, w_in, w_out, stride, s):
    """(bb*w_out, bb*w_in) 0/1 matrix: row (b, wp) selects source width stride*wp+s."""
    m = np.zeros((bb * w_out, bb * w_in), np.float32)
    for b in range(bb):
        for wp in range(w_out):
            src = stride * wp + s
            if 0 <= src < w_in:
                m[b * w_out + wp, b * w_in + src] = 1.0
    return m


def _build_consts(bb, t):
    """Per-batch-block constants: width-shift selectors, attention mask, mean-pool."""
    s_len = t // 4
    r1 = np.stack([_row_select(bb, t, t // 2, 2, s) for s in range(-2, 4)])
    r2 = np.stack([_row_select(bb, t // 2, t // 4, 2, s) for s in range(-2, 4)])
    r3 = np.stack([_row_select(bb, t // 4, t // 4, 1, s) for s in range(-1, 2)])
    m = bb * s_len
    mask = np.full((m, m), NEG_INF, np.float32)
    pool = np.zeros((bb, m), np.float32)
    for b in range(bb):
        mask[b * s_len:(b + 1) * s_len, b * s_len:(b + 1) * s_len] = 0.0
        pool[b, b * s_len:(b + 1) * s_len] = 1.0 / s_len
    return (jnp.asarray(r1, jnp.bfloat16), jnp.asarray(r2, jnp.bfloat16),
            jnp.asarray(r3, jnp.bfloat16),
            jnp.asarray(mask, jnp.float32), jnp.asarray(pool, jnp.float32))


def _two_tensorcores():
    """True only on chips with 2 TensorCores per device (v4 / v5p / v7x-class)."""
    try:
        kind = jax.devices()[0].device_kind.lower()
    except Exception:
        return False
    return any(tag in kind for tag in ("v4", "v5p", "v7", "tpu7"))


# ======================================= wrapper ====================================
def _forward_batch(params, x):
    """x: (N, n_mels, T) -> (N, EMB_DIM); N = both Siamese branches concatenated."""
    n, n_mels, t = x.shape
    assert n_mels == N_MELS
    assert t % 4 == 0 and t // 4 <= PE_MAX_LEN
    s_len = t // 4

    # one grid block per TensorCore on dual-TC chips; single block on v5e / v6e
    nb = 2 if (_two_tensorcores() and n % 2 == 0) else 1
    bb = n // nb

    # width-major input slab: rows (batch, time), cols mel height  -> (N*T, n_mels)
    s0 = jnp.transpose(x.astype(jnp.float32), (0, 2, 1)).reshape(n * t, n_mels)
    s0 = s0.astype(jnp.bfloat16)

    r1, r2, r3, mask, pool = _build_consts(bb, t)
    pe_tile = jnp.tile(params["pe"][:s_len], (bb, 1))            # (bb*S, D)

    enc = params["enc"]
    rep_args = (r1, r2, r3,
                params["w1f"], params["bn1"],
                params["w2f"], params["bn2"],
                params["w3f"], params["bn3"],
                pe_tile, mask, pool,
                enc["wqkv"], enc["bqkv"], enc["wo"], enc["bo"],
                enc["ln1g"], enc["ln1b"],
                enc["wff1"], enc["bff1"], enc["wff2"], enc["bff2"],
                enc["ln2g"], enc["ln2b"], enc["fcw"], enc["fcb"])

    def _rep(a):
        nd = a.ndim
        return pl.BlockSpec(a.shape, lambda i, _nd=nd: (0,) * _nd)

    out = pl.pallas_call(
        _siamese_kernel,
        out_shape=jax.ShapeDtypeStruct((nb, bb, EMB_DIM), jnp.float32),
        grid=(nb,),
        in_specs=[pl.BlockSpec((bb * t, n_mels), lambda i: (i, 0))]
                 + [_rep(a) for a in rep_args],
        out_specs=pl.BlockSpec((1, bb, EMB_DIM), lambda i: (i, 0, 0)),
        compiler_params=pltpu.CompilerParams(dimension_semantics=("parallel",)),
    )(s0, *rep_args)
    return out.reshape(n, EMB_DIM)


@jax.jit
def transformer_siamese_forward(params, x1, x2):
    """TransformerSiameseNet.forward: shared weights, both branches in one batch."""
    b = x1.shape[0]
    emb = _forward_batch(params, jnp.concatenate([x1, x2], axis=0))
    return emb[:b], emb[b:]


# ====================================== parameters ==================================
def init_params(key):
    def nrm(k, shape, scale=0.05):
        return scale * jax.random.normal(k, shape, jnp.float32)

    ks = iter(jax.random.split(key, 64))
    params = {}

    # ---- conv1: Conv2d(1,32,(3,5),pad=(1,2)) -> ReLU -> BN -> MaxPool(2,2) ----------
    w1 = nrm(next(ks), (3, 5, 1, C1))
    b1 = nrm(next(ks), (C1,))
    g1, be1 = 1.0 + nrm(next(ks), (C1,)), nrm(next(ks), (C1,))
    params["w1f"] = _fold_pool_conv(w1, N_MELS, H1, 1)           # (10, 16, 256)
    params["bn1"] = _bn_cols(b1, g1, be1, jnp.zeros((C1,)), jnp.ones((C1,)),
                             H1, "tile")

    # ---- conv2: Conv2d(32,64,(3,5),pad=(1,2)) -> ReLU -> BN -> MaxPool(2,2) ---------
    w2 = nrm(next(ks), (3, 5, C1, C2))
    b2 = nrm(next(ks), (C2,))
    g2, be2 = 1.0 + nrm(next(ks), (C2,)), nrm(next(ks), (C2,))
    params["w2f"] = _fold_pool_conv(w2, H1, H2, 1)               # (10, 256, 256)
    params["bn2"] = _bn_cols(b2, g2, be2, jnp.zeros((C2,)), jnp.ones((C2,)),
                             H2, "tile")

    # ---- conv3: Conv2d(64,8,(3,3),pad=(1,1)) -> ReLU -> BN --------------------------
    w3 = nrm(next(ks), (3, 3, C2, C3))
    b3 = nrm(next(ks), (C3,))
    g3, be3 = 1.0 + nrm(next(ks), (C3,)), nrm(next(ks), (C3,))
    params["w3f"] = _fold_seq_conv(w3, H2, 1)                    # (3, 256, 32)
    params["bn3"] = _bn_cols(b3, g3, be3, jnp.zeros((C3,)), jnp.ones((C3,)),
                             H2, "repeat")

    # ---- sinusoidal positional encoding (same formula as PositionalEncoding) -------
    pos = jnp.arange(PE_MAX_LEN, dtype=jnp.float32)[:, None]
    div = jnp.exp(jnp.arange(0, D_MODEL, 2, dtype=jnp.float32)
                  * (-math.log(10000.0) / D_MODEL))
    pe = jnp.zeros((PE_MAX_LEN, D_MODEL), jnp.float32)
    pe = pe.at[:, 0::2].set(jnp.sin(pos * div))
    pe = pe.at[:, 1::2].set(jnp.cos(pos * div))
    params["pe"] = pe

    # ---- transformer encoder (post-norm, ReLU FF) + final FC ------------------------
    L, D, F = NUM_LAYERS, D_MODEL, DIM_FF
    params["enc"] = dict(
        wqkv=nrm(next(ks), (L, D, 3 * D)).astype(jnp.bfloat16),
        bqkv=nrm(next(ks), (L, 1, 3 * D)),
        # out-projection stored per head: index = layer*NHEAD + head
        wo=nrm(next(ks), (L * NHEAD, HEAD_DIM, D)).astype(jnp.bfloat16),
        bo=nrm(next(ks), (L, 1, D)),
        ln1g=jnp.ones((L, 1, D), jnp.float32),
        ln1b=jnp.zeros((L, 1, D), jnp.float32),
        wff1=nrm(next(ks), (L, D, F)).astype(jnp.bfloat16),
        bff1=nrm(next(ks), (L, 1, F)),
        wff2=nrm(next(ks), (L, F, D)).astype(jnp.bfloat16),
        bff2=nrm(next(ks), (L, 1, D)),
        ln2g=jnp.ones((L, 1, D), jnp.float32),
        ln2b=jnp.zeros((L, 1, D), jnp.float32),
        fcw=nrm(next(ks), (D, EMB_DIM)).astype(jnp.bfloat16),
        fcb=nrm(next(ks), (1, EMB_DIM)),
    )
    return params


# ========================================== main ====================================
if __name__ == "__main__":
    key = jax.random.PRNGKey(0)
    pkey, k1, k2 = jax.random.split(key, 3)
    params = init_params(pkey)

    B, T = 2, 16
    x1 = jax.random.normal(k1, (B, N_MELS, T), jnp.float32)
    x2 = jax.random.normal(k2, (B, N_MELS, T), jnp.float32)

    emb1, emb2 = transformer_siamese_forward(params, x1, x2)
    jax.block_until_ready((emb1, emb2))

    assert emb1.shape == (B, EMB_DIM) and emb2.shape == (B, EMB_DIM)
    assert bool(jnp.all(jnp.isfinite(emb1))) and bool(jnp.all(jnp.isfinite(emb2)))
    print("KERNEL_OK")
</pallas_src>

<mosaic_0001>
module attributes {stable_mosaic.version = 11 : i64} {
  func.func @_siamese_kernel(%arg0: i32, %arg1: memref<64x16xbf16, #tpu.memory_space<vmem>>, %arg2: memref<6x32x64xbf16, #tpu.memory_space<vmem>>, %arg3: memref<6x16x32xbf16, #tpu.memory_space<vmem>>, %arg4: memref<3x16x16xbf16, #tpu.memory_space<vmem>>, %arg5: memref<10x16x256xbf16, #tpu.memory_space<vmem>>, %arg6: memref<3x256xf32, #tpu.memory_space<vmem>>, %arg7: memref<10x256x256xbf16, #tpu.memory_space<vmem>>, %arg8: memref<3x256xf32, #tpu.memory_space<vmem>>, %arg9: memref<3x256x32xbf16, #tpu.memory_space<vmem>>, %arg10: memref<3x32xf32, #tpu.memory_space<vmem>>, %arg11: memref<16x32xf32, #tpu.memory_space<vmem>>, %arg12: memref<16x16xf32, #tpu.memory_space<vmem>>, %arg13: memref<4x16xf32, #tpu.memory_space<vmem>>, %arg14: memref<2x32x96xbf16, #tpu.memory_space<vmem>>, %arg15: memref<2x1x96xf32, #tpu.memory_space<vmem>>, %arg16: memref<8x8x32xbf16, #tpu.memory_space<vmem>>, %arg17: memref<2x1x32xf32, #tpu.memory_space<vmem>>, %arg18: memref<2x1x32xf32, #tpu.memory_space<vmem>>, %arg19: memref<2x1x32xf32, #tpu.memory_space<vmem>>, %arg20: memref<2x32x64xbf16, #tpu.memory_space<vmem>>, %arg21: memref<2x1x64xf32, #tpu.memory_space<vmem>>, %arg22: memref<2x64x32xbf16, #tpu.memory_space<vmem>>, %arg23: memref<2x1x32xf32, #tpu.memory_space<vmem>>, %arg24: memref<2x1x32xf32, #tpu.memory_space<vmem>>, %arg25: memref<2x1x32xf32, #tpu.memory_space<vmem>>, %arg26: memref<32x32xbf16, #tpu.memory_space<vmem>>, %arg27: memref<1x32xf32, #tpu.memory_space<vmem>>, %arg28: memref<1x4x32xf32, #tpu.memory_space<vmem>>) attributes {dimension_semantics = [#tpu.dimension_semantics<parallel>], iteration_bounds = array<i64: 1>, scalar_prefetch = 0 : i64, scratch_operands = 0 : i64, tpu.core_type = #tpu.core_type<tc>, window_params = [{transform_indices = @transform_0, window_bounds = array<i64: 64, 16>}, {pipeline_mode = #tpu.pipeline_mode<synchronous>, transform_indices = @transform_1, window_bounds = array<i64: 6, 32, 64>}, {pipeline_mode = #tpu.pipeline_mode<synchronous>, transform_indices = @transform_2, window_bounds = array<i64: 6, 16, 32>}, {pipeline_mode = #tpu.pipeline_mode<synchronous>, transform_indices = @transform_3, window_bounds = array<i64: 3, 16, 16>}, {pipeline_mode = #tpu.pipeline_mode<synchronous>, transform_indices = @transform_4, window_bounds = array<i64: 10, 16, 256>}, {pipeline_mode = #tpu.pipeline_mode<synchronous>, transform_indices = @transform_5, window_bounds = array<i64: 3, 256>}, {pipeline_mode = #tpu.pipeline_mode<synchronous>, transform_indices = @transform_6, window_bounds = array<i64: 10, 256, 256>}, {pipeline_mode = #tpu.pipeline_mode<synchronous>, transform_indices = @transform_7, window_bounds = array<i64: 3, 256>}, {pipeline_mode = #tpu.pipeline_mode<synchronous>, transform_indices = @transform_8, window_bounds = array<i64: 3, 256, 32>}, {pipeline_mode = #tpu.pipeline_mode<synchronous>, transform_indices = @transform_9, window_bounds = array<i64: 3, 32>}, {pipeline_mode = #tpu.pipeline_mode<synchronous>, transform_indices = @transform_10, window_bounds = array<i64: 16, 32>}, {pipeline_mode = #tpu.pipeline_mode<synchronous>, transform_indices = @transform_11, window_bounds = array<i64: 16, 16>}, {pipeline_mode = #tpu.pipeline_mode<synchronous>, transform_indices = @transform_12, window_bounds = array<i64: 4, 16>}, {pipeline_mode = #tpu.pipeline_mode<synchronous>, transform_indices = @transform_13, window_bounds = array<i64: 2, 32, 96>}, {pipeline_mode = #tpu.pipeline_mode<synchronous>, transform_indices = @transform_14, window_bounds = array<i64: 2, 1, 96>}, {pipeline_mode = #tpu.pipeline_mode<synchronous>, transform_indices = @transform_15, window_bounds = array<i64: 8, 8, 32>}, {pipeline_mode = #tpu.pipeline_mode<synchronous>, transform_indices = @transform_16, window_bounds = array<i64: 2, 1, 32>}, {pipeline_mode = #tpu.pipeline_mode<synchronous>, transform_indices = @transform_17, window_bounds = array<i64: 2, 1, 32>}, {pipeline_mode = #tpu.pipeline_mode<synchronous>, transform_indices = @transform_18, window_bounds = array<i64: 2, 1, 32>}, {pipeline_mode = #tpu.pipeline_mode<synchronous>, transform_indices = @transform_19, window_bounds = array<i64: 2, 32, 64>}, {pipeline_mode = #tpu.pipeline_mode<synchronous>, transform_indices = @transform_20, window_bounds = array<i64: 2, 1, 64>}, {pipeline_mode = #tpu.pipeline_mode<synchronous>, transform_indices = @transform_21, window_bounds = array<i64: 2, 64, 32>}, {pipeline_mode = #tpu.pipeline_mode<synchronous>, transform_indices = @transform_22, window_bounds = array<i64: 2, 1, 32>}, {pipeline_mode = #tpu.pipeline_mode<synchronous>, transform_indices = @transform_23, window_bounds = array<i64: 2, 1, 32>}, {pipeline_mode = #tpu.pipeline_mode<synchronous>, transform_indices = @transform_24, window_bounds = array<i64: 2, 1, 32>}, {pipeline_mode = #tpu.pipeline_mode<synchronous>, transform_indices = @transform_25, window_bounds = array<i64: 32, 32>}, {pipeline_mode = #tpu.pipeline_mode<synchronous>, transform_indices = @transform_26, window_bounds = array<i64: 1, 32>}, {transform_indices = @transform_27, window_bounds = array<i64: 1, 4, 32>}]} {
    %c0 = arith.constant 0 : index
    %c0_0 = arith.constant 0 : index
    %0 = vector.load %arg1[%c0, %c0_0] : memref<64x16xbf16, #tpu.memory_space<vmem>>, vector<64x16xbf16>
    %c0_1 = arith.constant 0 : index
    %c0_2 = arith.constant 0 : index
    %c0_3 = arith.constant 0 : index
    %1 = vector.load %arg2[%c0_1, %c0_2, %c0_3] : memref<6x32x64xbf16, #tpu.memory_space<vmem>>, vector<1x32x64xbf16>
    %2 = vector.shape_cast %1 : vector<1x32x64xbf16> to vector<32x64xbf16>
    %cst = arith.constant dense<0.000000e+00> : vector<32x16xf32>
    %3 = tpu.matmul %2, %0, %cst {dimension_numbers = #tpu.dot_dimension_numbers<[1], [0], [0], [1], [0, 0, 1, 1], [], []>} : vector<32x64xbf16>, vector<64x16xbf16>, vector<32x16xf32> -> vector<32x16xf32>
    %4 = arith.truncf %3 : vector<32x16xf32> to vector<32x16xbf16>
    %c1 = arith.constant 1 : index
    %c0_4 = arith.constant 0 : index
    %c0_5 = arith.constant 0 : index
    %5 = vector.load %arg2[%c1, %c0_4, %c0_5] : memref<6x32x64xbf16, #tpu.memory_space<vmem>>, vector<1x32x64xbf16>
    %6 = vector.shape_cast %5 : vector<1x32x64xbf16> to vector<32x64xbf16>
    %cst_6 = arith.constant dense<0.000000e+00> : vector<32x16xf32>
    %7 = tpu.matmul %6, %0, %cst_6 {dimension_numbers = #tpu.dot_dimension_numbers<[1], [0], [0], [1], [0, 0, 1, 1], [], []>} : vector<32x64xbf16>, vector<64x16xbf16>, vector<32x16xf32> -> vector<32x16xf32>
    %8 = arith.truncf %7 : vector<32x16xf32> to vector<32x16xbf16>
    %c2 = arith.constant 2 : index
    %c0_7 = arith.constant 0 : index
    %c0_8 = arith.constant 0 : index
    %9 = vector.load %arg2[%c2, %c0_7, %c0_8] : memref<6x32x64xbf16, #tpu.memory_space<vmem>>, vector<1x32x64xbf16>
    %10 = vector.shape_cast %9 : vector<1x32x64xbf16> to vector<32x64xbf16>
    %cst_9 = arith.constant dense<0.000000e+00> : vector<32x16xf32>
    %11 = tpu.matmul %10, %0, %cst_9 {dimension_numbers = #tpu.dot_dimension_numbers<[1], [0], [0], [1], [0, 0, 1, 1], [], []>} : vector<32x64xbf16>, vector<64x16xbf16>, vector<32x16xf32> -> vector<32x16xf32>
    %12 = arith.truncf %11 : vector<32x16xf32> to vector<32x16xbf16>
    %c3 = arith.constant 3 : index
    %c0_10 = arith.constant 0 : index
    %c0_11 = arith.constant 0 : index
    %13 = vector.load %arg2[%c3, %c0_10, %c0_11] : memref<6x32x64xbf16, #tpu.memory_space<vmem>>, vector<1x32x64xbf16>
    %14 = vector.shape_cast %13 : vector<1x32x64xbf16> to vector<32x64xbf16>
    %cst_12 = arith.constant dense<0.000000e+00> : vector<32x16xf32>
    %15 = tpu.matmul %14, %0, %cst_12 {dimension_numbers = #tpu.dot_dimension_numbers<[1], [0], [0], [1], [0, 0, 1, 1], [], []>} : vector<32x64xbf16>, vector<64x16xbf16>, vector<32x16xf32> -> vector<32x16xf32>
    %16 = arith.truncf %15 : vector<32x16xf32> to vector<32x16xbf16>
    %c4 = arith.constant 4 : index
    %c0_13 = arith.constant 0 : index
    %c0_14 = arith.constant 0 : index
    %17 = vector.load %arg2[%c4, %c0_13, %c0_14] : memref<6x32x64xbf16, #tpu.memory_space<vmem>>, vector<1x32x64xbf16>
    %18 = vector.shape_cast %17 : vector<1x32x64xbf16> to vector<32x64xbf16>
    %cst_15 = arith.constant dense<0.000000e+00> : vector<32x16xf32>
    %19 = tpu.matmul %18, %0, %cst_15 {dimension_numbers = #tpu.dot_dimension_numbers<[1], [0], [0], [1], [0, 0, 1, 1], [], []>} : vector<32x64xbf16>, vector<64x16xbf16>, vector<32x16xf32> -> vector<32x16xf32>
    %20 = arith.truncf %19 : vector<32x16xf32> to vector<32x16xbf16>
    %c5 = arith.constant 5 : index
    %c0_16 = arith.constant 0 : index
    %c0_17 = arith.constant 0 : index
    %21 = vector.load %arg2[%c5, %c0_16, %c0_17] : memref<6x32x64xbf16, #tpu.memory_space<vmem>>, vector<1x32x64xbf16>
    %22 = vector.shape_cast %21 : vector<1x32x64xbf16> to vector<32x64xbf16>
    %cst_18 = arith.constant dense<0.000000e+00> : vector<32x16xf32>
    %23 = tpu.matmul %22, %0, %cst_18 {dimension_numbers = #tpu.dot_dimension_numbers<[1], [0], [0], [1], [0, 0, 1, 1], [], []>} : vector<32x64xbf16>, vector<64x16xbf16>, vector<32x16xf32> -> vector<32x16xf32>
    %24 = arith.truncf %23 : vector<32x16xf32> to vector<32x16xbf16>
    %c0_19 = arith.constant 0 : index
    %c0_20 = arith.constant 0 : index
    %25 = vector.load %arg6[%c0_19, %c0_20] : memref<3x256xf32, #tpu.memory_space<vmem>>, vector<1x256xf32>
    %c1_21 = arith.constant 1 : index
    %c0_22 = arith.constant 0 : index
    %26 = vector.load %arg6[%c1_21, %c0_22] : memref<3x256xf32, #tpu.memory_space<vmem>>, vector<1x256xf32>
    %c2_23 = arith.constant 2 : index
    %c0_24 = arith.constant 0 : index
    %27 = vector.load %arg6[%c2_23, %c0_24] : memref<3x256xf32, #tpu.memory_space<vmem>>, vector<1x256xf32>
    %c0_25 = arith.constant 0 : index
    %c0_26 = arith.constant 0 : index
    %c0_27 = arith.constant 0 : index
    %28 = vector.load %arg5[%c0_25, %c0_26, %c0_27] : memref<10x16x256xbf16, #tpu.memory_space<vmem>>, vector<1x16x256xbf16>
    %29 = vector.shape_cast %28 : vector<1x16x256xbf16> to vector<16x256xbf16>
    %cst_28 = arith.constant dense<0.000000e+00> : vector<32x256xf32>
    %30 = tpu.matmul %4, %29, %cst_28 {dimension_numbers = #tpu.dot_dimension_numbers<[1], [0], [0], [1], [0, 0, 1, 1], [], []>} : vector<32x16xbf16>, vector<16x256xbf16>, vector<32x256xf32> -> vector<32x256xf32>
    %31 = vector.broadcast %25 : vector<1x256xf32> to vector<32x256xf32>
    %32 = arith.addf %31, %30 : vector<32x256xf32>
    %c1_29 = arith.constant 1 : index
    %c0_30 = arith.constant 0 : index
    %c0_31 = arith.constant 0 : index
    %33 = vector.load %arg5[%c1_29, %c0_30, %c0_31] : memref<10x16x256xbf16, #tpu.memory_space<vmem>>, vector<1x16x256xbf16>
    %34 = vector.shape_cast %33 : vector<1x16x256xbf16> to vector<16x256xbf16>
    %cst_32 = arith.constant dense<0.000000e+00> : vector<32x256xf32>
    %35 = tpu.matmul %8, %34, %cst_32 {dimension_numbers = #tpu.dot_dimension_numbers<[1], [0], [0], [1], [0, 0, 1, 1], [], []>} : vector<32x16xbf16>, vector<16x256xbf16>, vector<32x256xf32> -> vector<32x256xf32>
    %36 = arith.addf %32, %35 : vector<32x256xf32>
    %c2_33 = arith.constant 2 : index
    %c0_34 = arith.constant 0 : index
    %c0_35 = arith.constant 0 : index
    %37 = vector.load %arg5[%c2_33, %c0_34, %c0_35] : memref<10x16x256xbf16, #tpu.memory_space<vmem>>, vector<1x16x256xbf16>
    %38 = vector.shape_cast %37 : vector<1x16x256xbf16> to vector<16x256xbf16>
    %cst_36 = arith.constant dense<0.000000e+00> : vector<32x256xf32>
    %39 = tpu.matmul %12, %38, %cst_36 {dimension_numbers = #tpu.dot_dimension_numbers<[1], [0], [0], [1], [0, 0, 1, 1], [], []>} : vector<32x16xbf16>, vector<16x256xbf16>, vector<32x256xf32> -> vector<32x256xf32>
    %40 = arith.addf %36, %39 : vector<32x256xf32>
    %c3_37 = arith.constant 3 : index
    %c0_38 = arith.constant 0 : index
    %c0_39 = arith.constant 0 : index
    %41 = vector.load %arg5[%c3_37, %c0_38, %c0_39] : memref<10x16x256xbf16, #tpu.memory_space<vmem>>, vector<1x16x256xbf16>
    %42 = vector.shape_cast %41 : vector<1x16x256xbf16> to vector<16x256xbf16>
    %cst_40 = arith.constant dense<0.000000e+00> : vector<32x256xf32>
    %43 = tpu.matmul %16, %42, %cst_40 {dimension_numbers = #tpu.dot_dimension_numbers<[1], [0], [0], [1], [0, 0, 1, 1], [], []>} : vector<32x16xbf16>, vector<16x256xbf16>, vector<32x256xf32> -> vector<32x256xf32>
    %44 = arith.addf %40, %43 : vector<32x256xf32>
    %c4_41 = arith.constant 4 : index
    %c0_42 = arith.constant 0 : index
    %c0_43 = arith.constant 0 : index
    %45 = vector.load %arg5[%c4_41, %c0_42, %c0_43] : memref<10x16x256xbf16, #tpu.memory_space<vmem>>, vector<1x16x256xbf16>
    %46 = vector.shape_cast %45 : vector<1x16x256xbf16> to vector<16x256xbf16>
    %cst_44 = arith.constant dense<0.000000e+00> : vector<32x256xf32>
    %47 = tpu.matmul %20, %46, %cst_44 {dimension_numbers = #tpu.dot_dimension_numbers<[1], [0], [0], [1], [0, 0, 1, 1], [], []>} : vector<32x16xbf16>, vector<16x256xbf16>, vector<32x256xf32> -> vector<32x256xf32>
    %48 = arith.addf %44, %47 : vector<32x256xf32>
    %cst_45 = arith.constant 0.000000e+00 : f32
    %49 = vector.broadcast %cst_45 : f32 to vector<32x256xf32>
    %50 = arith.maximumf %48, %49 : vector<32x256xf32>
    %51 = vector.broadcast %26 : vector<1x256xf32> to vector<32x256xf32>
    %52 = arith.mulf %50, %51 : vector<32x256xf32>
    %53 = vector.broadcast %27 : vector<1x256xf32> to vector<32x256xf32>
    %54 = arith.addf %52, %53 : vector<32x256xf32>
    %c0_46 = arith.constant 0 : index
    %c0_47 = arith.constant 0 : index
    %c0_48 = arith.constant 0 : index
    %55 = vector.load %arg5[%c0_46, %c0_47, %c0_48] : memref<10x16x256xbf16, #tpu.memory_space<vmem>>, vector<1x16x256xbf16>
    %56 = vector.shape_cast %55 : vector<1x16x256xbf16> to vector<16x256xbf16>
    %cst_49 = arith.constant dense<0.000000e+00> : vector<32x256xf32>
    %57 = tpu.matmul %8, %56, %cst_49 {dimension_numbers = #tpu.dot_dimension_numbers<[1], [0], [0], [1], [0, 0, 1, 1], [], []>} : vector<32x16xbf16>, vector<16x256xbf16>, vector<32x256xf32> -> vector<32x256xf32>
    %58 = vector.broadcast %25 : vector<1x256xf32> to vector<32x256xf32>
    %59 = arith.addf %58, %57 : vector<32x256xf32>
    %c1_50 = arith.constant 1 : index
    %c0_51 = arith.constant 0 : index
    %c0_52 = arith.constant 0 : index
    %60 = vector.load %arg5[%c1_50, %c0_51, %c0_52] : memref<10x16x256xbf16, #tpu.memory_space<vmem>>, vector<1x16x256xbf16>
    %61 = vector.shape_cast %60 : vector<1x16x256xbf16> to vector<16x256xbf16>
    %cst_53 = arith.constant dense<0.000000e+00> : vector<32x256xf32>
    %62 = tpu.matmul %12, %61, %cst_53 {dimension_numbers = #tpu.dot_dimension_numbers<[1], [0], [0], [1], [0, 0, 1, 1], [], []>} : vector<32x16xbf16>, vector<16x256xbf16>, vector<32x256xf32> -> vector<32x256xf32>
    %63 = arith.addf %59, %62 : vector<32x256xf32>
    %c2_54 = arith.constant 2 : index
    %c0_55 = arith.constant 0 : index
    %c0_56 = arith.constant 0 : index
    %64 = vector.load %arg5[%c2_54, %c0_55, %c0_56] : memref<10x16x256xbf16, #tpu.memory_space<vmem>>, vector<1x16x256xbf16>
    %65 = vector.shape_cast %64 : vector<1x16x256xbf16> to vector<16x256xbf16>
    %cst_57 = arith.constant dense<0.000000e+00> : vector<32x256xf32>
    %66 = tpu.matmul %16, %65, %cst_57 {dimension_numbers = #tpu.dot_dimension_numbers<[1], [0], [0], [1], [0, 0, 1, 1], [], []>} : vector<32x16xbf16>, vector<16x256xbf16>, vector<32x256xf32> -> vector<32x256xf32>
    %67 = arith.addf %63, %66 : vector<32x256xf32>
    %c3_58 = arith.constant 3 : index
    %c0_59 = arith.constant 0 : index
    %c0_60 = arith.constant 0 : index
    %68 = vector.load %arg5[%c3_58, %c0_59, %c0_60] : memref<10x16x256xbf16, #tpu.memory_space<vmem>>, vector<1x16x256xbf16>
    %69 = vector.shape_cast %68 : vector<1x16x256xbf16> to vector<16x256xbf16>
    %cst_61 = arith.constant dense<0.000000e+00> : vector<32x256xf32>
    %70 = tpu.matmul %20, %69, %cst_61 {dimension_numbers = #tpu.dot_dimension_numbers<[1], [0], [0], [1], [0, 0, 1, 1], [], []>} : vector<32x16xbf16>, vector<16x256xbf16>, vector<32x256xf32> -> vector<32x256xf32>
    %71 = arith.addf %67, %70 : vector<32x256xf32>
    %c4_62 = arith.constant 4 : index
    %c0_63 = arith.constant 0 : index
    %c0_64 = arith.constant 0 : index
    %72 = vector.load %arg5[%c4_62, %c0_63, %c0_64] : memref<10x16x256xbf16, #tpu.memory_space<vmem>>, vector<1x16x256xbf16>
    %73 = vector.shape_cast %72 : vector<1x16x256xbf16> to vector<16x256xbf16>
    %cst_65 = arith.constant dense<0.000000e+00> : vector<32x256xf32>
    %74 = tpu.matmul %24, %73, %cst_65 {dimension_numbers = #tpu.dot_dimension_numbers<[1], [0], [0], [1], [0, 0, 1, 1], [], []>} : vector<32x16xbf16>, vector<16x256xbf16>, vector<32x256xf32> -> vector<32x256xf32>
    %75 = arith.addf %71, %74 : vector<32x256xf32>
    %cst_66 = arith.constant 0.000000e+00 : f32
    %76 = vector.broadcast %cst_66 : f32 to vector<32x256xf32>
    %77 = arith.maximumf %75, %76 : vector<32x256xf32>
    %78 = vector.broadcast %26 : vector<1x256xf32> to vector<32x256xf32>
    %79 = arith.mulf %77, %78 : vector<32x256xf32>
    %80 = vector.broadcast %27 : vector<1x256xf32> to vector<32x256xf32>
    %81 = arith.addf %79, %80 : vector<32x256xf32>
    %82 = arith.maximumf %54, %81 : vector<32x256xf32>
    %c5_67 = arith.constant 5 : index
    %c0_68 = arith.constant 0 : index
    %c0_69 = arith.constant 0 : index
    %83 = vector.load %arg5[%c5_67, %c0_68, %c0_69] : memref<10x16x256xbf16, #tpu.memory_space<vmem>>, vector<1x16x256xbf16>
    %84 = vector.shape_cast %83 : vector<1x16x256xbf16> to vector<16x256xbf16>
    %cst_70 = arith.constant dense<0.000000e+00> : vector<32x256xf32>
    %85 = tpu.matmul %4, %84, %cst_70 {dimension_numbers = #tpu.dot_dimension_numbers<[1], [0], [0], [1], [0, 0, 1, 1], [], []>} : vector<32x16xbf16>, vector<16x256xbf16>, vector<32x256xf32> -> vector<32x256xf32>
    %86 = vector.broadcast %25 : vector<1x256xf32> to vector<32x256xf32>
    %87 = arith.addf %86, %85 : vector<32x256xf32>
    %c6 = arith.constant 6 : index
    %c0_71 = arith.constant 0 : index
    %c0_72 = arith.constant 0 : index
    %88 = vector.load %arg5[%c6, %c0_71, %c0_72] : memref<10x16x256xbf16, #tpu.memory_space<vmem>>, vector<1x16x256xbf16>
    %89 = vector.shape_cast %88 : vector<1x16x256xbf16> to vector<16x256xbf16>
    %cst_73 = arith.constant dense<0.000000e+00> : vector<32x256xf32>
    %90 = tpu.matmul %8, %89, %cst_73 {dimension_numbers = #tpu.dot_dimension_numbers<[1], [0], [0], [1], [0, 0, 1, 1], [], []>} : vector<32x16xbf16>, vector<16x256xbf16>, vector<32x256xf32> -> vector<32x256xf32>
    %91 = arith.addf %87, %90 : vector<32x256xf32>
    %c7 = arith.constant 7 : index
    %c0_74 = arith.constant 0 : index
    %c0_75 = arith.constant 0 : index
    %92 = vector.load %arg5[%c7, %c0_74, %c0_75] : memref<10x16x256xbf16, #tpu.memory_space<vmem>>, vector<1x16x256xbf16>
    %93 = vector.shape_cast %92 : vector<1x16x256xbf16> to vector<16x256xbf16>
    %cst_76 = arith.constant dense<0.000000e+00> : vector<32x256xf32>
    %94 = tpu.matmul %12, %93, %cst_76 {dimension_numbers = #tpu.dot_dimension_numbers<[1], [0], [0], [1], [0, 0, 1, 1], [], []>} : vector<32x16xbf16>, vector<16x256xbf16>, vector<32x256xf32> -> vector<32x256xf32>
    %95 = arith.addf %91, %94 : vector<32x256xf32>
    %c8 = arith.constant 8 : index
    %c0_77 = arith.constant 0 : index
    %c0_78 = arith.constant 0 : index
    %96 = vector.load %arg5[%c8, %c0_77, %c0_78] : memref<10x16x256xbf16, #tpu.memory_space<vmem>>, vector<1x16x256xbf16>
    %97 = vector.shape_cast %96 : vector<1x16x256xbf16> to vector<16x256xbf16>
    %cst_79 = arith.constant dense<0.000000e+00> : vector<32x256xf32>
    %98 = tpu.matmul %16, %97, %cst_79 {dimension_numbers = #tpu.dot_dimension_numbers<[1], [0], [0], [1], [0, 0, 1, 1], [], []>} : vector<32x16xbf16>, vector<16x256xbf16>, vector<32x256xf32> -> vector<32x256xf32>
    %99 = arith.addf %95, %98 : vector<32x256xf32>
    %c9 = arith.constant 9 : index
    %c0_80 = arith.constant 0 : index
    %c0_81 = arith.constant 0 : index
    %100 = vector.load %arg5[%c9, %c0_80, %c0_81] : memref<10x16x256xbf16, #tpu.memory_space<vmem>>, vector<1x16x256xbf16>
    %101 = vector.shape_cast %100 : vector<1x16x256xbf16> to vector<16x256xbf16>
    %cst_82 = arith.constant dense<0.000000e+00> : vector<32x256xf32>
    %102 = tpu.matmul %20, %101, %cst_82 {dimension_numbers = #tpu.dot_dimension_numbers<[1], [0], [0], [1], [0, 0, 1, 1], [], []>} : vector<32x16xbf16>, vector<16x256xbf16>, vector<32x256xf32> -> vector<32x256xf32>
    %103 = arith.addf %99, %102 : vector<32x256xf32>
    %cst_83 = arith.constant 0.000000e+00 : f32
    %104 = vector.broadcast %cst_83 : f32 to vector<32x256xf32>
    %105 = arith.maximumf %103, %104 : vector<32x256xf32>
    %106 = vector.broadcast %26 : vector<1x256xf32> to vector<32x256xf32>
    %107 = arith.mulf %105, %106 : vector<32x256xf32>
    %108 = vector.broadcast %27 : vector<1x256xf32> to vector<32x256xf32>
    %109 = arith.addf %107, %108 : vector<32x256xf32>
    %110 = arith.maximumf %82, %109 : vector<32x256xf32>
    %c5_84 = arith.constant 5 : index
    %c0_85 = arith.constant 0 : index
    %c0_86 = arith.constant 0 : index
    %111 = vector.load %arg5[%c5_84, %c0_85, %c0_86] : memref<10x16x256xbf16, #tpu.memory_space<vmem>>, vector<1x16x256xbf16>
    %112 = vector.shape_cast %111 : vector<1x16x256xbf16> to vector<16x256xbf16>
    %cst_87 = arith.constant dense<0.000000e+00> : vector<32x256xf32>
    %113 = tpu.matmul %8, %112, %cst_87 {dimension_numbers = #tpu.dot_dimension_numbers<[1], [0], [0], [1], [0, 0, 1, 1], [], []>} : vector<32x16xbf16>, vector<16x256xbf16>, vector<32x256xf32> -> vector<32x256xf32>
    %114 = vector.broadcast %25 : vector<1x256xf32> to vector<32x256xf32>
    %115 = arith.addf %114, %113 : vector<32x256xf32>
    %c6_88 = arith.constant 6 : index
    %c0_89 = arith.constant 0 : index
    %c0_90 = arith.constant 0 : index
    %116 = vector.load %arg5[%c6_88, %c0_89, %c0_90] : memref<10x16x256xbf16, #tpu.memory_space<vmem>>, vector<1x16x256xbf16>
    %117 = vector.shape_cast %116 : vector<1x16x256xbf16> to vector<16x256xbf16>
    %cst_91 = arith.constant dense<0.000000e+00> : vector<32x256xf32>
    %118 = tpu.matmul %12, %117, %cst_91 {dimension_numbers = #tpu.dot_dimension_numbers<[1], [0], [0], [1], [0, 0, 1, 1], [], []>} : vector<32x16xbf16>, vector<16x256xbf16>, vector<32x256xf32> -> vector<32x256xf32>
    %119 = arith.addf %115, %118 : vector<32x256xf32>
    %c7_92 = arith.constant 7 : index
    %c0_93 = arith.constant 0 : index
    %c0_94 = arith.constant 0 : index
    %120 = vector.load %arg5[%c7_92, %c0_93, %c0_94] : memref<10x16x256xbf16, #tpu.memory_space<vmem>>, vector<1x16x256xbf16>
    %121 = vector.shape_cast %120 : vector<1x16x256xbf16> to vector<16x256xbf16>
    %cst_95 = arith.constant dense<0.000000e+00> : vector<32x256xf32>
    %122 = tpu.matmul %16, %121, %cst_95 {dimension_numbers = #tpu.dot_dimension_numbers<[1], [0], [0], [1], [0, 0, 1, 1], [], []>} : vector<32x16xbf16>, vector<16x256xbf16>, vector<32x256xf32> -> vector<32x256xf32>
    %123 = arith.addf %119, %122 : vector<32x256xf32>
    %c8_96 = arith.constant 8 : index
    %c0_97 = arith.constant 0 : index
    %c0_98 = arith.constant 0 : index
    %124 = vector.load %arg5[%c8_96, %c0_97, %c0_98] : memref<10x16x256xbf16, #tpu.memory_space<vmem>>, vector<1x16x256xbf16>
    %125 = vector.shape_cast %124 : vector<1x16x256xbf16> to vector<16x256xbf16>
    %cst_99 = arith.constant dense<0.000000e+00> : vector<32x256xf32>
    %126 = tpu.matmul %20, %125, %cst_99 {dimension_numbers = #tpu.dot_dimension_numbers<[1], [0], [0], [1], [0, 0, 1, 1], [], []>} : vector<32x16xbf16>, vector<16x256xbf16>, vector<32x256xf32> -> vector<32x256xf32>
    %127 = arith.addf %123, %126 : vector<32x256xf32>
    %c9_100 = arith.constant 9 : index
    %c0_101 = arith.constant 0 : index
    %c0_102 = arith.constant 0 : index
    %128 = vector.load %arg5[%c9_100, %c0_101, %c0_102] : memref<10x16x256xbf16, #tpu.memory_space<vmem>>, vector<1x16x256xbf16>
    %129 = vector.shape_cast %128 : vector<1x16x256xbf16> to vector<16x256xbf16>
    %cst_103 = arith.constant dense<0.000000e+00> : vector<32x256xf32>
    %130 = tpu.matmul %24, %129, %cst_103 {dimension_numbers = #tpu.dot_dimension_numbers<[1], [0], [0], [1], [0, 0, 1, 1], [], []>} : vector<32x16xbf16>, vector<16x256xbf16>, vector<32x256xf32> -> vector<32x256xf32>
    %131 = arith.addf %127, %130 : vector<32x256xf32>
    %cst_104 = arith.constant 0.000000e+00 : f32
    %132 = vector.broadcast %cst_104 : f32 to vector<32x256xf32>
    %133 = arith.maximumf %131, %132 : vector<32x256xf32>
    %134 = vector.broadcast %26 : vector<1x256xf32> to vector<32x256xf32>
    %135 = arith.mulf %133, %134 : vector<32x256xf32>
    %136 = vector.broadcast %27 : vector<1x256xf32> to vector<32x256xf32>
    %137 = arith.addf %135, %136 : vector<32x256xf32>
    %138 = arith.maximumf %110, %137 : vector<32x256xf32>
    %139 = arith.truncf %138 : vector<32x256xf32> to vector<32x256xbf16>
    %c0_105 = arith.constant 0 : index
    %c0_106 = arith.constant 0 : index
    %c0_107 = arith.constant 0 : index
    %140 = vector.load %arg3[%c0_105, %c0_106, %c0_107] : memref<6x16x32xbf16, #tpu.memory_space<vmem>>, vector<1x16x32xbf16>
    %141 = vector.shape_cast %140 : vector<1x16x32xbf16> to vector<16x32xbf16>
    %cst_108 = arith.constant dense<0.000000e+00> : vector<16x256xf32>
    %142 = tpu.matmul %141, %139, %cst_108 {dimension_numbers = #tpu.dot_dimension_numbers<[1], [0], [0], [1], [0, 0, 1, 1], [], []>} : vector<16x32xbf16>, vector<32x256xbf16>, vector<16x256xf32> -> vector<16x256xf32>
    %143 = arith.truncf %142 : vector<16x256xf32> to vector<16x256xbf16>
    %c1_109 = arith.constant 1 : index
    %c0_110 = arith.constant 0 : index
    %c0_111 = arith.constant 0 : index
    %144 = vector.load %arg3[%c1_109, %c0_110, %c0_111] : memref<6x16x32xbf16, #tpu.memory_space<vmem>>, vector<1x16x32xbf16>
    %145 = vector.shape_cast %144 : vector<1x16x32xbf16> to vector<16x32xbf16>
    %cst_112 = arith.constant dense<0.000000e+00> : vector<16x256xf32>
    %146 = tpu.matmul %145, %139, %cst_112 {dimension_numbers = #tpu.dot_dimension_numbers<[1], [0], [0], [1], [0, 0, 1, 1], [], []>} : vector<16x32xbf16>, vector<32x256xbf16>, vector<16x256xf32> -> vector<16x256xf32>
    %147 = arith.truncf %146 : vector<16x256xf32> to vector<16x256xbf16>
    %c2_113 = arith.constant 2 : index
    %c0_114 = arith.constant 0 : index
    %c0_115 = arith.constant 0 : index
    %148 = vector.load %arg3[%c2_113, %c0_114, %c0_115] : memref<6x16x32xbf16, #tpu.memory_space<vmem>>, vector<1x16x32xbf16>
    %149 = vector.shape_cast %148 : vector<1x16x32xbf16> to vector<16x32xbf16>
    %cst_116 = arith.constant dense<0.000000e+00> : vector<16x256xf32>
    %150 = tpu.matmul %149, %139, %cst_116 {dimension_numbers = #tpu.dot_dimension_numbers<[1], [0], [0], [1], [0, 0, 1, 1], [], []>} : vector<16x32xbf16>, vector<32x256xbf16>, vector<16x256xf32> -> vector<16x256xf32>
    %151 = arith.truncf %150 : vector<16x256xf32> to vector<16x256xbf16>
    %c3_117 = arith.constant 3 : index
    %c0_118 = arith.constant 0 : index
    %c0_119 = arith.constant 0 : index
    %152 = vector.load %arg3[%c3_117, %c0_118, %c0_119] : memref<6x16x32xbf16, #tpu.memory_space<vmem>>, vector<1x16x32xbf16>
    %153 = vector.shape_cast %152 : vector<1x16x32xbf16> to vector<16x32xbf16>
    %cst_120 = arith.constant dense<0.000000e+00> : vector<16x256xf32>
    %154 = tpu.matmul %153, %139, %cst_120 {dimension_numbers = #tpu.dot_dimension_numbers<[1], [0], [0], [1], [0, 0, 1, 1], [], []>} : vector<16x32xbf16>, vector<32x256xbf16>, vector<16x256xf32> -> vector<16x256xf32>
    %155 = arith.truncf %154 : vector<16x256xf32> to vector<16x256xbf16>
    %c4_121 = arith.constant 4 : index
    %c0_122 = arith.constant 0 : index
    %c0_123 = arith.constant 0 : index
    %156 = vector.load %arg3[%c4_121, %c0_122, %c0_123] : memref<6x16x32xbf16, #tpu.memory_space<vmem>>, vector<1x16x32xbf16>
    %157 = vector.shape_cast %156 : vector<1x16x32xbf16> to vector<16x32xbf16>
    %cst_124 = arith.constant dense<0.000000e+00> : vector<16x256xf32>
    %158 = tpu.matmul %157, %139, %cst_124 {dimension_numbers = #tpu.dot_dimension_numbers<[1], [0], [0], [1], [0, 0, 1, 1], [], []>} : vector<16x32xbf16>, vector<32x256xbf16>, vector<16x256xf32> -> vector<16x256xf32>
    %159 = arith.truncf %158 : vector<16x256xf32> to vector<16x256xbf16>
    %c5_125 = arith.constant 5 : index
    %c0_126 = arith.constant 0 : index
    %c0_127 = arith.constant 0 : index
    %160 = vector.load %arg3[%c5_125, %c0_126, %c0_127] : memref<6x16x32xbf16, #tpu.memory_space<vmem>>, vector<1x16x32xbf16>
    %161 = vector.shape_cast %160 : vector<1x16x32xbf16> to vector<16x32xbf16>
    %cst_128 = arith.constant dense<0.000000e+00> : vector<16x256xf32>
    %162 = tpu.matmul %161, %139, %cst_128 {dimension_numbers = #tpu.dot_dimension_numbers<[1], [0], [0], [1], [0, 0, 1, 1], [], []>} : vector<16x32xbf16>, vector<32x256xbf16>, vector<16x256xf32> -> vector<16x256xf32>
    %163 = arith.truncf %162 : vector<16x256xf32> to vector<16x256xbf16>
    %c0_129 = arith.constant 0 : index
    %c0_130 = arith.constant 0 : index
    %164 = vector.load %arg8[%c0_129, %c0_130] : memref<3x256xf32, #tpu.memory_space<vmem>>, vector<1x256xf32>
    %c1_131 = arith.constant 1 : index
    %c0_132 = arith.constant 0 : index
    %165 = vector.load %arg8[%c1_131, %c0_132] : memref<3x256xf32, #tpu.memory_space<vmem>>, vector<1x256xf32>
    %c2_133 = arith.constant 2 : index
    %c0_134 = arith.constant 0 : index
    %166 = vector.load %arg8[%c2_133, %c0_134] : memref<3x256xf32, #tpu.memory_space<vmem>>, vector<1x256xf32>
    %c0_135 = arith.constant 0 : index
    %c0_136 = arith.constant 0 : index
    %c0_137 = arith.constant 0 : index
    %167 = vector.load %arg7[%c0_135, %c0_136, %c0_137] : memref<10x256x256xbf16, #tpu.memory_space<vmem>>, vector<1x256x256xbf16>
    %168 = vector.shape_cast %167 : vector<1x256x256xbf16> to vector<256x256xbf16>
    %cst_138 = arith.constant dense<0.000000e+00> : vector<16x256xf32>
    %169 = tpu.matmul %143, %168, %cst_138 {dimension_numbers = #tpu.dot_dimension_numbers<[1], [0], [0], [1], [0, 0, 1, 1], [], []>} : vector<16x256xbf16>, vector<256x256xbf16>, vector<16x256xf32> -> vector<16x256xf32>
    %170 = vector.broadcast %164 : vector<1x256xf32> to vector<16x256xf32>
    %171 = arith.addf %170, %169 : vector<16x256xf32>
    %c1_139 = arith.constant 1 : index
    %c0_140 = arith.constant 0 : index
    %c0_141 = arith.constant 0 : index
    %172 = vector.load %arg7[%c1_139, %c0_140, %c0_141] : memref<10x256x256xbf16, #tpu.memory_space<vmem>>, vector<1x256x256xbf16>
    %173 = vector.shape_cast %172 : vector<1x256x256xbf16> to vector<256x256xbf16>
    %cst_142 = arith.constant dense<0.000000e+00> : vector<16x256xf32>
    %174 = tpu.matmul %147, %173, %cst_142 {dimension_numbers = #tpu.dot_dimension_numbers<[1], [0], [0], [1], [0, 0, 1, 1], [], []>} : vector<16x256xbf16>, vector<256x256xbf16>, vector<16x256xf32> -> vector<16x256xf32>
    %175 = arith.addf %171, %174 : vector<16x256xf32>
    %c2_143 = arith.constant 2 : index
    %c0_144 = arith.constant 0 : index
    %c0_145 = arith.constant 0 : index
    %176 = vector.load %arg7[%c2_143, %c0_144, %c0_145] : memref<10x256x256xbf16, #tpu.memory_space<vmem>>, vector<1x256x256xbf16>
    %177 = vector.shape_cast %176 : vector<1x256x256xbf16> to vector<256x256xbf16>
    %cst_146 = arith.constant dense<0.000000e+00> : vector<16x256xf32>
    %178 = tpu.matmul %151, %177, %cst_146 {dimension_numbers = #tpu.dot_dimension_numbers<[1], [0], [0], [1], [0, 0, 1, 1], [], []>} : vector<16x256xbf16>, vector<256x256xbf16>, vector<16x256xf32> -> vector<16x256xf32>
    %179 = arith.addf %175, %178 : vector<16x256xf32>
    %c3_147 = arith.constant 3 : index
    %c0_148 = arith.constant 0 : index
    %c0_149 = arith.constant 0 : index
    %180 = vector.load %arg7[%c3_147, %c0_148, %c0_149] : memref<10x256x256xbf16, #tpu.memory_space<vmem>>, vector<1x256x256xbf16>
    %181 = vector.shape_cast %180 : vector<1x256x256xbf16> to vector<256x256xbf16>
    %cst_150 = arith.constant dense<0.000000e+00> : vector<16x256xf32>
    %182 = tpu.matmul %155, %181, %cst_150 {dimension_numbers = #tpu.dot_dimension_numbers<[1], [0], [0], [1], [0, 0, 1, 1], [], []>} : vector<16x256xbf16>, vector<256x256xbf16>, vector<16x256xf32> -> vector<16x256xf32>
    %183 = arith.addf %179, %182 : vector<16x256xf32>
    %c4_151 = arith.constant 4 : index
    %c0_152 = arith.constant 0 : index
    %c0_153 = arith.constant 0 : index
    %184 = vector.load %arg7[%c4_151, %c0_152, %c0_153] : memref<10x256x256xbf16, #tpu.memory_space<vmem>>, vector<1x256x256xbf16>
    %185 = vector.shape_cast %184 : vector<1x256x256xbf16> to vector<256x256xbf16>
    %cst_154 = arith.constant dense<0.000000e+00> : vector<16x256xf32>
    %186 = tpu.matmul %159, %185, %cst_154 {dimension_numbers = #tpu.dot_dimension_numbers<[1], [0], [0], [1], [0, 0, 1, 1], [], []>} : vector<16x256xbf16>, vector<256x256xbf16>, vector<16x256xf32> -> vector<16x256xf32>
    %187 = arith.addf %183, %186 : vector<16x256xf32>
    %cst_155 = arith.constant 0.000000e+00 : f32
    %188 = vector.broadcast %cst_155 : f32 to vector<16x256xf32>
    %189 = arith.maximumf %187, %188 : vector<16x256xf32>
    %190 = vector.broadcast %165 : vector<1x256xf32> to vector<16x256xf32>
    %191 = arith.mulf %189, %190 : vector<16x256xf32>
    %192 = vector.broadcast %166 : vector<1x256xf32> to vector<16x256xf32>
    %193 = arith.addf %191, %192 : vector<16x256xf32>
    %c0_156 = arith.constant 0 : index
    %c0_157 = arith.constant 0 : index
    %c0_158 = arith.constant 0 : index
    %194 = vector.load %arg7[%c0_156, %c0_157, %c0_158] : memref<10x256x256xbf16, #tpu.memory_space<vmem>>, vector<1x256x256xbf16>
    %195 = vector.shape_cast %194 : vector<1x256x256xbf16> to vector<256x256xbf16>
    %cst_159 = arith.constant dense<0.000000e+00> : vector<16x256xf32>
    %196 = tpu.matmul %147, %195, %cst_159 {dimension_numbers = #tpu.dot_dimension_numbers<[1], [0], [0], [1], [0, 0, 1, 1], [], []>} : vector<16x256xbf16>, vector<256x256xbf16>, vector<16x256xf32> -> vector<16x256xf32>
    %197 = vector.broadcast %164 : vector<1x256xf32> to vector<16x256xf32>
    %198 = arith.addf %197, %196 : vector<16x256xf32>
    %c1_160 = arith.constant 1 : index
    %c0_161 = arith.constant 0 : index
    %c0_162 = arith.constant 0 : index
    %199 = vector.load %arg7[%c1_160, %c0_161, %c0_162] : memref<10x256x256xbf16, #tpu.memory_space<vmem>>, vector<1x256x256xbf16>
    %200 = vector.shape_cast %199 : vector<1x256x256xbf16> to vector<256x256xbf16>
    %cst_163 = arith.constant dense<0.000000e+00> : vector<16x256xf32>
    %201 = tpu.matmul %151, %200, %cst_163 {dimension_numbers = #tpu.dot_dimension_numbers<[1], [0], [0], [1], [0, 0, 1, 1], [], []>} : vector<16x256xbf16>, vector<256x256xbf16>, vector<16x256xf32> -> vector<16x256xf32>
    %202 = arith.addf %198, %201 : vector<16x256xf32>
    %c2_164 = arith.constant 2 : index
    %c0_165 = arith.constant 0 : index
    %c0_166 = arith.constant 0 : index
    %203 = vector.load %arg7[%c2_164, %c0_165, %c0_166] : memref<10x256x256xbf16, #tpu.memory_space<vmem>>, vector<1x256x256xbf16>
    %204 = vector.shape_cast %203 : vector<1x256x256xbf16> to vector<256x256xbf16>
    %cst_167 = arith.constant dense<0.000000e+00> : vector<16x256xf32>
    %205 = tpu.matmul %155, %204, %cst_167 {dimension_numbers = #tpu.dot_dimension_numbers<[1], [0], [0], [1], [0, 0, 1, 1], [], []>} : vector<16x256xbf16>, vector<256x256xbf16>, vector<16x256xf32> -> vector<16x256xf32>
    %206 = arith.addf %202, %205 : vector<16x256xf32>
    %c3_168 = arith.constant 3 : index
    %c0_169 = arith.constant 0 : index
    %c0_170 = arith.constant 0 : index
    %207 = vector.load %arg7[%c3_168, %c0_169, %c0_170] : memref<10x256x256xbf16, #tpu.memory_space<vmem>>, vector<1x256x256xbf16>
    %208 = vector.shape_cast %207 : vector<1x256x256xbf16> to vector<256x256xbf16>
    %cst_171 = arith.constant dense<0.000000e+00> : vector<16x256xf32>
    %209 = tpu.matmul %159, %208, %cst_171 {dimension_numbers = #tpu.dot_dimension_numbers<[1], [0], [0], [1], [0, 0, 1, 1], [], []>} : vector<16x256xbf16>, vector<256x256xbf16>, vector<16x256xf32> -> vector<16x256xf32>
    %210 = arith.addf %206, %209 : vector<16x256xf32>
    %c4_172 = arith.constant 4 : index
    %c0_173 = arith.constant 0 : index
    %c0_174 = arith.constant 0 : index
    %211 = vector.load %arg7[%c4_172, %c0_173, %c0_174] : memref<10x256x256xbf16, #tpu.memory_space<vmem>>, vector<1x256x256xbf16>
    %212 = vector.shape_cast %211 : vector<1x256x256xbf16> to vector<256x256xbf16>
    %cst_175 = arith.constant dense<0.000000e+00> : vector<16x256xf32>
    %213 = tpu.matmul %163, %212, %cst_175 {dimension_numbers = #tpu.dot_dimension_numbers<[1], [0], [0], [1], [0, 0, 1, 1], [], []>} : vector<16x256xbf16>, vector<256x256xbf16>, vector<16x256xf32> -> vector<16x256xf32>
    %214 = arith.addf %210, %213 : vector<16x256xf32>
    %cst_176 = arith.constant 0.000000e+00 : f32
    %215 = vector.broadcast %cst_176 : f32 to vector<16x256xf32>
    %216 = arith.maximumf %214, %215 : vector<16x256xf32>
    %217 = vector.broadcast %165 : vector<1x256xf32> to vector<16x256xf32>
    %218 = arith.mulf %216, %217 : vector<16x256xf32>
    %219 = vector.broadcast %166 : vector<1x256xf32> to vector<16x256xf32>
    %220 = arith.addf %218, %219 : vector<16x256xf32>
    %221 = arith.maximumf %193, %220 : vector<16x256xf32>
    %c5_177 = arith.constant 5 : index
    %c0_178 = arith.constant 0 : index
    %c0_179 = arith.constant 0 : index
    %222 = vector.load %arg7[%c5_177, %c0_178, %c0_179] : memref<10x256x256xbf16, #tpu.memory_space<vmem>>, vector<1x256x256xbf16>
    %223 = vector.shape_cast %222 : vector<1x256x256xbf16> to vector<256x256xbf16>
    %cst_180 = arith.constant dense<0.000000e+00> : vector<16x256xf32>
    %224 = tpu.matmul %143, %223, %cst_180 {dimension_numbers = #tpu.dot_dimension_numbers<[1], [0], [0], [1], [0, 0, 1, 1], [], []>} : vector<16x256xbf16>, vector<256x256xbf16>, vector<16x256xf32> -> vector<16x256xf32>
    %225 = vector.broadcast %164 : vector<1x256xf32> to vector<16x256xf32>
    %226 = arith.addf %225, %224 : vector<16x256xf32>
    %c6_181 = arith.constant 6 : index
    %c0_182 = arith.constant 0 : index
    %c0_183 = arith.constant 0 : index
    %227 = vector.load %arg7[%c6_181, %c0_182, %c0_183] : memref<10x256x256xbf16, #tpu.memory_space<vmem>>, vector<1x256x256xbf16>
    %228 = vector.shape_cast %227 : vector<1x256x256xbf16> to vector<256x256xbf16>
    %cst_184 = arith.constant dense<0.000000e+00> : vector<16x256xf32>
    %229 = tpu.matmul %147, %228, %cst_184 {dimension_numbers = #tpu.dot_dimension_numbers<[1], [0], [0], [1], [0, 0, 1, 1], [], []>} : vector<16x256xbf16>, vector<256x256xbf16>, vector<16x256xf32> -> vector<16x256xf32>
    %230 = arith.addf %226, %229 : vector<16x256xf32>
    %c7_185 = arith.constant 7 : index
    %c0_186 = arith.constant 0 : index
    %c0_187 = arith.constant 0 : index
    %231 = vector.load %arg7[%c7_185, %c0_186, %c0_187] : memref<10x256x256xbf16, #tpu.memory_space<vmem>>, vector<1x256x256xbf16>
    %232 = vector.shape_cast %231 : vector<1x256x256xbf16> to vector<256x256xbf16>
    %cst_188 = arith.constant dense<0.000000e+00> : vector<16x256xf32>
    %233 = tpu.matmul %151, %232, %cst_188 {dimension_numbers = #tpu.dot_dimension_numbers<[1], [0], [0], [1], [0, 0, 1, 1], [], []>} : vector<16x256xbf16>, vector<256x256xbf16>, vector<16x256xf32> -> vector<16x256xf32>
    %234 = arith.addf %230, %233 : vector<16x256xf32>
    %c8_189 = arith.constant 8 : index
    %c0_190 = arith.constant 0 : index
    %c0_191 = arith.constant 0 : index
    %235 = vector.load %arg7[%c8_189, %c0_190, %c0_191] : memref<10x256x256xbf16, #tpu.memory_space<vmem>>, vector<1x256x256xbf16>
    %236 = vector.shape_cast %235 : vector<1x256x256xbf16> to vector<256x256xbf16>
    %cst_192 = arith.constant dense<0.000000e+00> : vector<16x256xf32>
    %237 = tpu.matmul %155, %236, %cst_192 {dimension_numbers = #tpu.dot_dimension_numbers<[1], [0], [0], [1], [0, 0, 1, 1], [], []>} : vector<16x256xbf16>, vector<256x256xbf16>, vector<16x256xf32> -> vector<16x256xf32>
    %238 = arith.addf %234, %237 : vector<16x256xf32>
    %c9_193 = arith.constant 9 : index
    %c0_194 = arith.constant 0 : index
    %c0_195 = arith.constant 0 : index
    %239 = vector.load %arg7[%c9_193, %c0_194, %c0_195] : memref<10x256x256xbf16, #tpu.memory_space<vmem>>, vector<1x256x256xbf16>
    %240 = vector.shape_cast %239 : vector<1x256x256xbf16> to vector<256x256xbf16>
    %cst_196 = arith.constant dense<0.000000e+00> : vector<16x256xf32>
    %241 = tpu.matmul %159, %240, %cst_196 {dimension_numbers = #tpu.dot_dimension_numbers<[1], [0], [0], [1], [0, 0, 1, 1], [], []>} : vector<16x256xbf16>, vector<256x256xbf16>, vector<16x256xf32> -> vector<16x256xf32>
    %242 = arith.addf %238, %241 : vector<16x256xf32>
    %cst_197 = arith.constant 0.000000e+00 : f32
    %243 = vector.broadcast %cst_197 : f32 to vector<16x256xf32>
    %244 = arith.maximumf %242, %243 : vector<16x256xf32>
    %245 = vector.broadcast %165 : vector<1x256xf32> to vector<16x256xf32>
    %246 = arith.mulf %244, %245 : vector<16x256xf32>
    %247 = vector.broadcast %166 : vector<1x256xf32> to vector<16x256xf32>
    %248 = arith.addf %246, %247 : vector<16x256xf32>
    %249 = arith.maximumf %221, %248 : vector<16x256xf32>
    %c5_198 = arith.constant 5 : index
    %c0_199 = arith.constant 0 : index
    %c0_200 = arith.constant 0 : index
    %250 = vector.load %arg7[%c5_198, %c0_199, %c0_200] : memref<10x256x256xbf16, #tpu.memory_space<vmem>>, vector<1x256x256xbf16>
    %251 = vector.shape_cast %250 : vector<1x256x256xbf16> to vector<256x256xbf16>
    %cst_201 = arith.constant dense<0.000000e+00> : vector<16x256xf32>
    %252 = tpu.matmul %147, %251, %cst_201 {dimension_numbers = #tpu.dot_dimension_numbers<[1], [0], [0], [1], [0, 0, 1, 1], [], []>} : vector<16x256xbf16>, vector<256x256xbf16>, vector<16x256xf32> -> vector<16x256xf32>
    %253 = vector.broadcast %164 : vector<1x256xf32> to vector<16x256xf32>
    %254 = arith.addf %253, %252 : vector<16x256xf32>
    %c6_202 = arith.constant 6 : index
    %c0_203 = arith.constant 0 : index
    %c0_204 = arith.constant 0 : index
    %255 = vector.load %arg7[%c6_202, %c0_203, %c0_204] : memref<10x256x256xbf16, #tpu.memory_space<vmem>>, vector<1x256x256xbf16>
    %256 = vector.shape_cast %255 : vector<1x256x256xbf16> to vector<256x256xbf16>
    %cst_205 = arith.constant dense<0.000000e+00> : vector<16x256xf32>
    %257 = tpu.matmul %151, %256, %cst_205 {dimension_numbers = #tpu.dot_dimension_numbers<[1], [0], [0], [1], [0, 0, 1, 1], [], []>} : vector<16x256xbf16>, vector<256x256xbf16>, vector<16x256xf32> -> vector<16x256xf32>
    %258 = arith.addf %254, %257 : vector<16x256xf32>
    %c7_206 = arith.constant 7 : index
    %c0_207 = arith.constant 0 : index
    %c0_208 = arith.constant 0 : index
    %259 = vector.load %arg7[%c7_206, %c0_207, %c0_208] : memref<10x256x256xbf16, #tpu.memory_space<vmem>>, vector<1x256x256xbf16>
    %260 = vector.shape_cast %259 : vector<1x256x256xbf16> to vector<256x256xbf16>
    %cst_209 = arith.constant dense<0.000000e+00> : vector<16x256xf32>
    %261 = tpu.matmul %155, %260, %cst_209 {dimension_numbers = #tpu.dot_dimension_numbers<[1], [0], [0], [1], [0, 0, 1, 1], [], []>} : vector<16x256xbf16>, vector<256x256xbf16>, vector<16x256xf32> -> vector<16x256xf32>
    %262 = arith.addf %258, %261 : vector<16x256xf32>
    %c8_210 = arith.constant 8 : index
    %c0_211 = arith.constant 0 : index
    %c0_212 = arith.constant 0 : index
    %263 = vector.load %arg7[%c8_210, %c0_211, %c0_212] : memref<10x256x256xbf16, #tpu.memory_space<vmem>>, vector<1x256x256xbf16>
    %264 = vector.shape_cast %263 : vector<1x256x256xbf16> to vector<256x256xbf16>
    %cst_213 = arith.constant dense<0.000000e+00> : vector<16x256xf32>
    %265 = tpu.matmul %159, %264, %cst_213 {dimension_numbers = #tpu.dot_dimension_numbers<[1], [0], [0], [1], [0, 0, 1, 1], [], []>} : vector<16x256xbf16>, vector<256x256xbf16>, vector<16x256xf32> -> vector<16x256xf32>
    %266 = arith.addf %262, %265 : vector<16x256xf32>
    %c9_214 = arith.constant 9 : index
    %c0_215 = arith.constant 0 : index
    %c0_216 = arith.constant 0 : index
    %267 = vector.load %arg7[%c9_214, %c0_215, %c0_216] : memref<10x256x256xbf16, #tpu.memory_space<vmem>>, vector<1x256x256xbf16>
    %268 = vector.shape_cast %267 : vector<1x256x256xbf16> to vector<256x256xbf16>
    %cst_217 = arith.constant dense<0.000000e+00> : vector<16x256xf32>
    %269 = tpu.matmul %163, %268, %cst_217 {dimension_numbers = #tpu.dot_dimension_numbers<[1], [0], [0], [1], [0, 0, 1, 1], [], []>} : vector<16x256xbf16>, vector<256x256xbf16>, vector<16x256xf32> -> vector<16x256xf32>
    %270 = arith.addf %266, %269 : vector<16x256xf32>
    %cst_218 = arith.constant 0.000000e+00 : f32
    %271 = vector.broadcast %cst_218 : f32 to vector<16x256xf32>
    %272 = arith.maximumf %270, %271 : vector<16x256xf32>
    %273 = vector.broadcast %165 : vector<1x256xf32> to vector<16x256xf32>
    %274 = arith.mulf %272, %273 : vector<16x256xf32>
    %275 = vector.broadcast %166 : vector<1x256xf32> to vector<16x256xf32>
    %276 = arith.addf %274, %275 : vector<16x256xf32>
    %277 = arith.maximumf %249, %276 : vector<16x256xf32>
    %278 = arith.truncf %277 : vector<16x256xf32> to vector<16x256xbf16>
    %c0_219 = arith.constant 0 : index
    %c0_220 = arith.constant 0 : index
    %c0_221 = arith.constant 0 : index
    %279 = vector.load %arg4[%c0_219, %c0_220, %c0_221] : memref<3x16x16xbf16, #tpu.memory_space<vmem>>, vector<1x16x16xbf16>
    %280 = vector.shape_cast %279 : vector<1x16x16xbf16> to vector<16x16xbf16>
    %cst_222 = arith.constant dense<0.000000e+00> : vector<16x256xf32>
    %281 = tpu.matmul %280, %278, %cst_222 {dimension_numbers = #tpu.dot_dimension_numbers<[1], [0], [0], [1], [0, 0, 1, 1], [], []>} : vector<16x16xbf16>, vector<16x256xbf16>, vector<16x256xf32> -> vector<16x256xf32>
    %282 = arith.truncf %281 : vector<16x256xf32> to vector<16x256xbf16>
    %c1_223 = arith.constant 1 : index
    %c0_224 = arith.constant 0 : index
    %c0_225 = arith.constant 0 : index
    %283 = vector.load %arg4[%c1_223, %c0_224, %c0_225] : memref<3x16x16xbf16, #tpu.memory_space<vmem>>, vector<1x16x16xbf16>
    %284 = vector.shape_cast %283 : vector<1x16x16xbf16> to vector<16x16xbf16>
    %cst_226 = arith.constant dense<0.000000e+00> : vector<16x256xf32>
    %285 = tpu.matmul %284, %278, %cst_226 {dimension_numbers = #tpu.dot_dimension_numbers<[1], [0], [0], [1], [0, 0, 1, 1], [], []>} : vector<16x16xbf16>, vector<16x256xbf16>, vector<16x256xf32> -> vector<16x256xf32>
    %286 = arith.truncf %285 : vector<16x256xf32> to vector<16x256xbf16>
    %c2_227 = arith.constant 2 : index
    %c0_228 = arith.constant 0 : index
    %c0_229 = arith.constant 0 : index
    %287 = vector.load %arg4[%c2_227, %c0_228, %c0_229] : memref<3x16x16xbf16, #tpu.memory_space<vmem>>, vector<1x16x16xbf16>
    %288 = vector.shape_cast %287 : vector<1x16x16xbf16> to vector<16x16xbf16>
    %cst_230 = arith.constant dense<0.000000e+00> : vector<16x256xf32>
    %289 = tpu.matmul %288, %278, %cst_230 {dimension_numbers = #tpu.dot_dimension_numbers<[1], [0], [0], [1], [0, 0, 1, 1], [], []>} : vector<16x16xbf16>, vector<16x256xbf16>, vector<16x256xf32> -> vector<16x256xf32>
    %290 = arith.truncf %289 : vector<16x256xf32> to vector<16x256xbf16>
    %c0_231 = arith.constant 0 : index
    %c0_232 = arith.constant 0 : index
    %291 = vector.load %arg10[%c0_231, %c0_232] : memref<3x32xf32, #tpu.memory_space<vmem>>, vector<1x32xf32>
    %c0_233 = arith.constant 0 : index
    %c0_234 = arith.constant 0 : index
    %c0_235 = arith.constant 0 : index
    %292 = vector.load %arg9[%c0_233, %c0_234, %c0_235] : memref<3x256x32xbf16, #tpu.memory_space<vmem>>, vector<1x256x32xbf16>
    %293 = vector.shape_cast %292 : vector<1x256x32xbf16> to vector<256x32xbf16>
    %cst_236 = arith.constant dense<0.000000e+00> : vector<16x32xf32>
    %294 = tpu.matmul %282, %293, %cst_236 {dimension_numbers = #tpu.dot_dimension_numbers<[1], [0], [0], [1], [0, 0, 1, 1], [], []>} : vector<16x256xbf16>, vector<256x32xbf16>, vector<16x32xf32> -> vector<16x32xf32>
    %295 = vector.broadcast %291 : vector<1x32xf32> to vector<16x32xf32>
    %296 = arith.addf %295, %294 : vector<16x32xf32>
    %c1_237 = arith.constant 1 : index
    %c0_238 = arith.constant 0 : index
    %c0_239 = arith.constant 0 : index
    %297 = vector.load %arg9[%c1_237, %c0_238, %c0_239] : memref<3x256x32xbf16, #tpu.memory_space<vmem>>, vector<1x256x32xbf16>
    %298 = vector.shape_cast %297 : vector<1x256x32xbf16> to vector<256x32xbf16>
    %cst_240 = arith.constant dense<0.000000e+00> : vector<16x32xf32>
    %299 = tpu.matmul %286, %298, %cst_240 {dimension_numbers = #tpu.dot_dimension_numbers<[1], [0], [0], [1], [0, 0, 1, 1], [], []>} : vector<16x256xbf16>, vector<256x32xbf16>, vector<16x32xf32> -> vector<16x32xf32>
    %300 = arith.addf %296, %299 : vector<16x32xf32>
    %c2_241 = arith.constant 2 : index
    %c0_242 = arith.constant 0 : index
    %c0_243 = arith.constant 0 : index
    %301 = vector.load %arg9[%c2_241, %c0_242, %c0_243] : memref<3x256x32xbf16, #tpu.memory_space<vmem>>, vector<1x256x32xbf16>
    %302 = vector.shape_cast %301 : vector<1x256x32xbf16> to vector<256x32xbf16>
    %cst_244 = arith.constant dense<0.000000e+00> : vector<16x32xf32>
    %303 = tpu.matmul %290, %302, %cst_244 {dimension_numbers = #tpu.dot_dimension_numbers<[1], [0], [0], [1], [0, 0, 1, 1], [], []>} : vector<16x256xbf16>, vector<256x32xbf16>, vector<16x32xf32> -> vector<16x32xf32>
    %304 = arith.addf %300, %303 : vector<16x32xf32>
    %cst_245 = arith.constant 0.000000e+00 : f32
    %305 = vector.broadcast %cst_245 : f32 to vector<16x32xf32>
    %306 = arith.maximumf %304, %305 : vector<16x32xf32>
    %c1_246 = arith.constant 1 : index
    %c0_247 = arith.constant 0 : index
    %307 = vector.load %arg10[%c1_246, %c0_247] : memref<3x32xf32, #tpu.memory_space<vmem>>, vector<1x32xf32>
    %308 = vector.broadcast %307 : vector<1x32xf32> to vector<16x32xf32>
    %309 = arith.mulf %306, %308 : vector<16x32xf32>
    %c2_248 = arith.constant 2 : index
    %c0_249 = arith.constant 0 : index
    %310 = vector.load %arg10[%c2_248, %c0_249] : memref<3x32xf32, #tpu.memory_space<vmem>>, vector<1x32xf32>
    %311 = vector.broadcast %310 : vector<1x32xf32> to vector<16x32xf32>
    %312 = arith.addf %309, %311 : vector<16x32xf32>
    %c0_250 = arith.constant 0 : index
    %c0_251 = arith.constant 0 : index
    %313 = vector.load %arg11[%c0_250, %c0_251] : memref<16x32xf32, #tpu.memory_space<vmem>>, vector<16x32xf32>
    %314 = arith.addf %312, %313 : vector<16x32xf32>
    %c0_252 = arith.constant 0 : index
    %c0_253 = arith.constant 0 : index
    %315 = vector.load %arg12[%c0_252, %c0_253] : memref<16x16xf32, #tpu.memory_space<vmem>>, vector<16x16xf32>
    %c0_254 = arith.constant 0 : index
    %c0_255 = arith.constant 0 : index
    %c0_256 = arith.constant 0 : index
    %316 = vector.load %arg14[%c0_254, %c0_255, %c0_256] : memref<2x32x96xbf16, #tpu.memory_space<vmem>>, vector<1x32x96xbf16>
    %317 = vector.shape_cast %316 : vector<1x32x96xbf16> to vector<32x96xbf16>
    %318 = arith.truncf %314 : vector<16x32xf32> to vector<16x32xbf16>
    %cst_257 = arith.constant dense<0.000000e+00> : vector<16x96xf32>
    %319 = tpu.matmul %318, %317, %cst_257 {dimension_numbers = #tpu.dot_dimension_numbers<[1], [0], [0], [1], [0, 0, 1, 1], [], []>} : vector<16x32xbf16>, vector<32x96xbf16>, vector<16x96xf32> -> vector<16x96xf32>
    %c0_258 = arith.constant 0 : index
    %c0_259 = arith.constant 0 : index
    %c0_260 = arith.constant 0 : index
    %320 = vector.load %arg15[%c0_258, %c0_259, %c0_260] : memref<2x1x96xf32, #tpu.memory_space<vmem>>, vector<1x1x96xf32>
    %321 = vector.shape_cast %320 : vector<1x1x96xf32> to vector<1x96xf32>
    %322 = vector.broadcast %321 : vector<1x96xf32> to vector<16x96xf32>
    %323 = arith.addf %319, %322 : vector<16x96xf32>
    %c0_261 = arith.constant 0 : index
    %c0_262 = arith.constant 0 : index
    %c0_263 = arith.constant 0 : index
    %324 = vector.load %arg17[%c0_261, %c0_262, %c0_263] : memref<2x1x32xf32, #tpu.memory_space<vmem>>, vector<1x1x32xf32>
    %325 = vector.shape_cast %324 : vector<1x1x32xf32> to vector<1x32xf32>
    %326 = vector.extract_strided_slice %323 {offsets = [0, 0], sizes = [16, 8], strides = [1, 1]} : vector<16x96xf32> to vector<16x8xf32>
    %cst_264 = arith.constant 0.353553385 : f32
    %327 = vector.broadcast %cst_264 : f32 to vector<16x8xf32>
    %328 = arith.mulf %326, %327 : vector<16x8xf32>
    %329 = vector.extract_strided_slice %323 {offsets = [0, 32], sizes = [16, 8], strides = [1, 1]} : vector<16x96xf32> to vector<16x8xf32>
    %330 = vector.extract_strided_slice %323 {offsets = [0, 64], sizes = [16, 8], strides = [1, 1]} : vector<16x96xf32> to vector<16x8xf32>
    %331 = arith.truncf %328 : vector<16x8xf32> to vector<16x8xbf16>
    %332 = arith.truncf %329 : vector<16x8xf32> to vector<16x8xbf16>
    %cst_265 = arith.constant dense<0.000000e+00> : vector<16x16xf32>
    %333 = tpu.matmul %331, %332, %cst_265 {dimension_numbers = #tpu.dot_dimension_numbers<[1], [1], [0], [0], [0, 0, 1, 0], [], []>} : vector<16x8xbf16>, vector<16x8xbf16>, vector<16x16xf32> -> vector<16x16xf32>
    %334 = arith.addf %333, %315 : vector<16x16xf32>
    %cst_266 = arith.constant dense<0xFF800000> : vector<16xf32>
    %335 = vector.multi_reduction <maximumf>, %334, %cst_266 [1] : vector<16x16xf32> to vector<16xf32>
    %336 = vector.shape_cast %335 : vector<16xf32> to vector<16x1xf32>
    %337 = vector.broadcast %336 : vector<16x1xf32> to vector<16x16xf32>
    %338 = arith.subf %334, %337 : vector<16x16xf32>
    %339 = math.exp %338 : vector<16x16xf32>
    %cst_267 = arith.constant dense<0.000000e+00> : vector<16xf32>
    %340 = vector.multi_reduction <add>, %339, %cst_267 [1] : vector<16x16xf32> to vector<16xf32>
    %341 = vector.shape_cast %340 : vector<16xf32> to vector<16x1xf32>
    %342 = vector.broadcast %341 : vector<16x1xf32> to vector<16x16xf32>
    %343 = arith.divf %339, %342 : vector<16x16xf32>
    %344 = arith.truncf %343 : vector<16x16xf32> to vector<16x16xbf16>
    %345 = arith.truncf %330 : vector<16x8xf32> to vector<16x8xbf16>
    %cst_268 = arith.constant dense<0.000000e+00> : vector<16x8xf32>
    %346 = tpu.matmul %344, %345, %cst_268 {dimension_numbers = #tpu.dot_dimension_numbers<[1], [0], [0], [1], [0, 0, 1, 1], [], []>} : vector<16x16xbf16>, vector<16x8xbf16>, vector<16x8xf32> -> vector<16x8xf32>
    %c0_269 = arith.constant 0 : index
    %c0_270 = arith.constant 0 : index
    %c0_271 = arith.constant 0 : index
    %347 = vector.load %arg16[%c0_269, %c0_270, %c0_271] : memref<8x8x32xbf16, #tpu.memory_space<vmem>>, vector<1x8x32xbf16>
    %348 = vector.shape_cast %347 : vector<1x8x32xbf16> to vector<8x32xbf16>
    %349 = arith.truncf %346 : vector<16x8xf32> to vector<16x8xbf16>
    %cst_272 = arith.constant dense<0.000000e+00> : vector<16x32xf32>
    %350 = tpu.matmul %349, %348, %cst_272 {dimension_numbers = #tpu.dot_dimension_numbers<[1], [0], [0], [1], [0, 0, 1, 1], [], []>} : vector<16x8xbf16>, vector<8x32xbf16>, vector<16x32xf32> -> vector<16x32xf32>
    %351 = vector.broadcast %325 : vector<1x32xf32> to vector<16x32xf32>
    %352 = arith.addf %351, %350 : vector<16x32xf32>
    %353 = vector.extract_strided_slice %323 {offsets = [0, 8], sizes = [16, 8], strides = [1, 1]} : vector<16x96xf32> to vector<16x8xf32>
    %cst_273 = arith.constant 0.353553385 : f32
    %354 = vector.broadcast %cst_273 : f32 to vector<16x8xf32>
    %355 = arith.mulf %353, %354 : vector<16x8xf32>
    %356 = vector.extract_strided_slice %323 {offsets = [0, 40], sizes = [16, 8], strides = [1, 1]} : vector<16x96xf32> to vector<16x8xf32>
    %357 = vector.extract_strided_slice %323 {offsets = [0, 72], sizes = [16, 8], strides = [1, 1]} : vector<16x96xf32> to vector<16x8xf32>
    %358 = arith.truncf %355 : vector<16x8xf32> to vector<16x8xbf16>
    %359 = arith.truncf %356 : vector<16x8xf32> to vector<16x8xbf16>
    %cst_274 = arith.constant dense<0.000000e+00> : vector<16x16xf32>
    %360 = tpu.matmul %358, %359, %cst_274 {dimension_numbers = #tpu.dot_dimension_numbers<[1], [1], [0], [0], [0, 0, 1, 0], [], []>} : vector<16x8xbf16>, vector<16x8xbf16>, vector<16x16xf32> -> vector<16x16xf32>
    %361 = arith.addf %360, %315 : vector<16x16xf32>
    %cst_275 = arith.constant dense<0xFF800000> : vector<16xf32>
    %362 = vector.multi_reduction <maximumf>, %361, %cst_275 [1] : vector<16x16xf32> to vector<16xf32>
    %363 = vector.shape_cast %362 : vector<16xf32> to vector<16x1xf32>
    %364 = vector.broadcast %363 : vector<16x1xf32> to vector<16x16xf32>
    %365 = arith.subf %361, %364 : vector<16x16xf32>
    %366 = math.exp %365 : vector<16x16xf32>
    %cst_276 = arith.constant dense<0.000000e+00> : vector<16xf32>
    %367 = vector.multi_reduction <add>, %366, %cst_276 [1] : vector<16x16xf32> to vector<16xf32>
    %368 = vector.shape_cast %367 : vector<16xf32> to vector<16x1xf32>
    %369 = vector.broadcast %368 : vector<16x1xf32> to vector<16x16xf32>
    %370 = arith.divf %366, %369 : vector<16x16xf32>
    %371 = arith.truncf %370 : vector<16x16xf32> to vector<16x16xbf16>
    %372 = arith.truncf %357 : vector<16x8xf32> to vector<16x8xbf16>
    %cst_277 = arith.constant dense<0.000000e+00> : vector<16x8xf32>
    %373 = tpu.matmul %371, %372, %cst_277 {dimension_numbers = #tpu.dot_dimension_numbers<[1], [0], [0], [1], [0, 0, 1, 1], [], []>} : vector<16x16xbf16>, vector<16x8xbf16>, vector<16x8xf32> -> vector<16x8xf32>
    %c1_278 = arith.constant 1 : index
    %c0_279 = arith.constant 0 : index
    %c0_280 = arith.constant 0 : index
    %374 = vector.load %arg16[%c1_278, %c0_279, %c0_280] : memref<8x8x32xbf16, #tpu.memory_space<vmem>>, vector<1x8x32xbf16>
    %375 = vector.shape_cast %374 : vector<1x8x32xbf16> to vector<8x32xbf16>
    %376 = arith.truncf %373 : vector<16x8xf32> to vector<16x8xbf16>
    %cst_281 = arith.constant dense<0.000000e+00> : vector<16x32xf32>
    %377 = tpu.matmul %376, %375, %cst_281 {dimension_numbers = #tpu.dot_dimension_numbers<[1], [0], [0], [1], [0, 0, 1, 1], [], []>} : vector<16x8xbf16>, vector<8x32xbf16>, vector<16x32xf32> -> vector<16x32xf32>
    %378 = arith.addf %352, %377 : vector<16x32xf32>
    %379 = vector.extract_strided_slice %323 {offsets = [0, 16], sizes = [16, 8], strides = [1, 1]} : vector<16x96xf32> to vector<16x8xf32>
    %cst_282 = arith.constant 0.353553385 : f32
    %380 = vector.broadcast %cst_282 : f32 to vector<16x8xf32>
    %381 = arith.mulf %379, %380 : vector<16x8xf32>
    %382 = vector.extract_strided_slice %323 {offsets = [0, 48], sizes = [16, 8], strides = [1, 1]} : vector<16x96xf32> to vector<16x8xf32>
    %383 = vector.extract_strided_slice %323 {offsets = [0, 80], sizes = [16, 8], strides = [1, 1]} : vector<16x96xf32> to vector<16x8xf32>
    %384 = arith.truncf %381 : vector<16x8xf32> to vector<16x8xbf16>
    %385 = arith.truncf %382 : vector<16x8xf32> to vector<16x8xbf16>
    %cst_283 = arith.constant dense<0.000000e+00> : vector<16x16xf32>
    %386 = tpu.matmul %384, %385, %cst_283 {dimension_numbers = #tpu.dot_dimension_numbers<[1], [1], [0], [0], [0, 0, 1, 0], [], []>} : vector<16x8xbf16>, vector<16x8xbf16>, vector<16x16xf32> -> vector<16x16xf32>
    %387 = arith.addf %386, %315 : vector<16x16xf32>
    %cst_284 = arith.constant dense<0xFF800000> : vector<16xf32>
    %388 = vector.multi_reduction <maximumf>, %387, %cst_284 [1] : vector<16x16xf32> to vector<16xf32>
    %389 = vector.shape_cast %388 : vector<16xf32> to vector<16x1xf32>
    %390 = vector.broadcast %389 : vector<16x1xf32> to vector<16x16xf32>
    %391 = arith.subf %387, %390 : vector<16x16xf32>
    %392 = math.exp %391 : vector<16x16xf32>
    %cst_285 = arith.constant dense<0.000000e+00> : vector<16xf32>
    %393 = vector.multi_reduction <add>, %392, %cst_285 [1] : vector<16x16xf32> to vector<16xf32>
    %394 = vector.shape_cast %393 : vector<16xf32> to vector<16x1xf32>
    %395 = vector.broadcast %394 : vector<16x1xf32> to vector<16x16xf32>
    %396 = arith.divf %392, %395 : vector<16x16xf32>
    %397 = arith.truncf %396 : vector<16x16xf32> to vector<16x16xbf16>
    %398 = arith.truncf %383 : vector<16x8xf32> to vector<16x8xbf16>
    %cst_286 = arith.constant dense<0.000000e+00> : vector<16x8xf32>
    %399 = tpu.matmul %397, %398, %cst_286 {dimension_numbers = #tpu.dot_dimension_numbers<[1], [0], [0], [1], [0, 0, 1, 1], [], []>} : vector<16x16xbf16>, vector<16x8xbf16>, vector<16x8xf32> -> vector<16x8xf32>
    %c2_287 = arith.constant 2 : index
    %c0_288 = arith.constant 0 : index
    %c0_289 = arith.constant 0 : index
    %400 = vector.load %arg16[%c2_287, %c0_288, %c0_289] : memref<8x8x32xbf16, #tpu.memory_space<vmem>>, vector<1x8x32xbf16>
    %401 = vector.shape_cast %400 : vector<1x8x32xbf16> to vector<8x32xbf16>
    %402 = arith.truncf %399 : vector<16x8xf32> to vector<16x8xbf16>
    %cst_290 = arith.constant dense<0.000000e+00> : vector<16x32xf32>
    %403 = tpu.matmul %402, %401, %cst_290 {dimension_numbers = #tpu.dot_dimension_numbers<[1], [0], [0], [1], [0, 0, 1, 1], [], []>} : vector<16x8xbf16>, vector<8x32xbf16>, vector<16x32xf32> -> vector<16x32xf32>
    %404 = arith.addf %378, %403 : vector<16x32xf32>
    %405 = vector.extract_strided_slice %323 {offsets = [0, 24], sizes = [16, 8], strides = [1, 1]} : vector<16x96xf32> to vector<16x8xf32>
    %cst_291 = arith.constant 0.353553385 : f32
    %406 = vector.broadcast %cst_291 : f32 to vector<16x8xf32>
    %407 = arith.mulf %405, %406 : vector<16x8xf32>
    %408 = vector.extract_strided_slice %323 {offsets = [0, 56], sizes = [16, 8], strides = [1, 1]} : vector<16x96xf32> to vector<16x8xf32>
    %409 = vector.extract_strided_slice %323 {offsets = [0, 88], sizes = [16, 8], strides = [1, 1]} : vector<16x96xf32> to vector<16x8xf32>
    %410 = arith.truncf %407 : vector<16x8xf32> to vector<16x8xbf16>
    %411 = arith.truncf %408 : vector<16x8xf32> to vector<16x8xbf16>
    %cst_292 = arith.constant dense<0.000000e+00> : vector<16x16xf32>
    %412 = tpu.matmul %410, %411, %cst_292 {dimension_numbers = #tpu.dot_dimension_numbers<[1], [1], [0], [0], [0, 0, 1, 0], [], []>} : vector<16x8xbf16>, vector<16x8xbf16>, vector<16x16xf32> -> vector<16x16xf32>
    %413 = arith.addf %412, %315 : vector<16x16xf32>
    %cst_293 = arith.constant dense<0xFF800000> : vector<16xf32>
    %414 = vector.multi_reduction <maximumf>, %413, %cst_293 [1] : vector<16x16xf32> to vector<16xf32>
    %415 = vector.shape_cast %414 : vector<16xf32> to vector<16x1xf32>
    %416 = vector.broadcast %415 : vector<16x1xf32> to vector<16x16xf32>
    %417 = arith.subf %413, %416 : vector<16x16xf32>
    %418 = math.exp %417 : vector<16x16xf32>
    %cst_294 = arith.constant dense<0.000000e+00> : vector<16xf32>
    %419 = vector.multi_reduction <add>, %418, %cst_294 [1] : vector<16x16xf32> to vector<16xf32>
    %420 = vector.shape_cast %419 : vector<16xf32> to vector<16x1xf32>
    %421 = vector.broadcast %420 : vector<16x1xf32> to vector<16x16xf32>
    %422 = arith.divf %418, %421 : vector<16x16xf32>
    %423 = arith.truncf %422 : vector<16x16xf32> to vector<16x16xbf16>
    %424 = arith.truncf %409 : vector<16x8xf32> to vector<16x8xbf16>
    %cst_295 = arith.constant dense<0.000000e+00> : vector<16x8xf32>
    %425 = tpu.matmul %423, %424, %cst_295 {dimension_numbers = #tpu.dot_dimension_numbers<[1], [0], [0], [1], [0, 0, 1, 1], [], []>} : vector<16x16xbf16>, vector<16x8xbf16>, vector<16x8xf32> -> vector<16x8xf32>
    %c3_296 = arith.constant 3 : index
    %c0_297 = arith.constant 0 : index
    %c0_298 = arith.constant 0 : index
    %426 = vector.load %arg16[%c3_296, %c0_297, %c0_298] : memref<8x8x32xbf16, #tpu.memory_space<vmem>>, vector<1x8x32xbf16>
    %427 = vector.shape_cast %426 : vector<1x8x32xbf16> to vector<8x32xbf16>
    %428 = arith.truncf %425 : vector<16x8xf32> to vector<16x8xbf16>
    %cst_299 = arith.constant dense<0.000000e+00> : vector<16x32xf32>
    %429 = tpu.matmul %428, %427, %cst_299 {dimension_numbers = #tpu.dot_dimension_numbers<[1], [0], [0], [1], [0, 0, 1, 1], [], []>} : vector<16x8xbf16>, vector<8x32xbf16>, vector<16x32xf32> -> vector<16x32xf32>
    %430 = arith.addf %404, %429 : vector<16x32xf32>
    %431 = arith.addf %314, %430 : vector<16x32xf32>
    %c0_300 = arith.constant 0 : index
    %c0_301 = arith.constant 0 : index
    %c0_302 = arith.constant 0 : index
    %432 = vector.load %arg18[%c0_300, %c0_301, %c0_302] : memref<2x1x32xf32, #tpu.memory_space<vmem>>, vector<1x1x32xf32>
    %433 = vector.shape_cast %432 : vector<1x1x32xf32> to vector<1x32xf32>
    %c0_303 = arith.constant 0 : index
    %c0_304 = arith.constant 0 : index
    %c0_305 = arith.constant 0 : index
    %434 = vector.load %arg19[%c0_303, %c0_304, %c0_305] : memref<2x1x32xf32, #tpu.memory_space<vmem>>, vector<1x1x32xf32>
    %435 = vector.shape_cast %434 : vector<1x1x32xf32> to vector<1x32xf32>
    %cst_306 = arith.constant dense<0.000000e+00> : vector<16xf32>
    %436 = vector.multi_reduction <add>, %431, %cst_306 [1] : vector<16x32xf32> to vector<16xf32>
    %437 = vector.shape_cast %436 : vector<16xf32> to vector<16x1xf32>
    %cst_307 = arith.constant 3.200000e+01 : f32
    %438 = vector.broadcast %cst_307 : f32 to vector<16x1xf32>
    %439 = arith.divf %437, %438 : vector<16x1xf32>
    %440 = vector.broadcast %439 : vector<16x1xf32> to vector<16x32xf32>
    %441 = arith.subf %431, %440 : vector<16x32xf32>
    %442 = arith.mulf %441, %441 : vector<16x32xf32>
    %cst_308 = arith.constant dense<0.000000e+00> : vector<16xf32>
    %443 = vector.multi_reduction <add>, %442, %cst_308 [1] : vector<16x32xf32> to vector<16xf32>
    %444 = vector.shape_cast %443 : vector<16xf32> to vector<16x1xf32>
    %cst_309 = arith.constant 3.200000e+01 : f32
    %445 = vector.broadcast %cst_309 : f32 to vector<16x1xf32>
    %446 = arith.divf %444, %445 : vector<16x1xf32>
    %447 = vector.broadcast %439 : vector<16x1xf32> to vector<16x32xf32>
    %448 = arith.subf %431, %447 : vector<16x32xf32>
    %cst_310 = arith.constant 9.99999974E-6 : f32
    %449 = vector.broadcast %cst_310 : f32 to vector<16x1xf32>
    %450 = arith.addf %446, %449 : vector<16x1xf32>
    %451 = math.rsqrt %450 : vector<16x1xf32>
    %452 = vector.broadcast %451 : vector<16x1xf32> to vector<16x32xf32>
    %453 = arith.mulf %448, %452 : vector<16x32xf32>
    %454 = vector.broadcast %433 : vector<1x32xf32> to vector<16x32xf32>
    %455 = arith.mulf %453, %454 : vector<16x32xf32>
    %456 = vector.broadcast %435 : vector<1x32xf32> to vector<16x32xf32>
    %457 = arith.addf %455, %456 : vector<16x32xf32>
    %c0_311 = arith.constant 0 : index
    %c0_312 = arith.constant 0 : index
    %c0_313 = arith.constant 0 : index
    %458 = vector.load %arg20[%c0_311, %c0_312, %c0_313] : memref<2x32x64xbf16, #tpu.memory_space<vmem>>, vector<1x32x64xbf16>
    %459 = vector.shape_cast %458 : vector<1x32x64xbf16> to vector<32x64xbf16>
    %460 = arith.truncf %457 : vector<16x32xf32> to vector<16x32xbf16>
    %cst_314 = arith.constant dense<0.000000e+00> : vector<16x64xf32>
    %461 = tpu.matmul %460, %459, %cst_314 {dimension_numbers = #tpu.dot_dimension_numbers<[1], [0], [0], [1], [0, 0, 1, 1], [], []>} : vector<16x32xbf16>, vector<32x64xbf16>, vector<16x64xf32> -> vector<16x64xf32>
    %c0_315 = arith.constant 0 : index
    %c0_316 = arith.constant 0 : index
    %c0_317 = arith.constant 0 : index
    %462 = vector.load %arg21[%c0_315, %c0_316, %c0_317] : memref<2x1x64xf32, #tpu.memory_space<vmem>>, vector<1x1x64xf32>
    %463 = vector.shape_cast %462 : vector<1x1x64xf32> to vector<1x64xf32>
    %464 = vector.broadcast %463 : vector<1x64xf32> to vector<16x64xf32>
    %465 = arith.addf %461, %464 : vector<16x64xf32>
    %cst_318 = arith.constant 0.000000e+00 : f32
    %466 = vector.broadcast %cst_318 : f32 to vector<16x64xf32>
    %467 = arith.maximumf %465, %466 : vector<16x64xf32>
    %c0_319 = arith.constant 0 : index
    %c0_320 = arith.constant 0 : index
    %c0_321 = arith.constant 0 : index
    %468 = vector.load %arg22[%c0_319, %c0_320, %c0_321] : memref<2x64x32xbf16, #tpu.memory_space<vmem>>, vector<1x64x32xbf16>
    %469 = vector.shape_cast %468 : vector<1x64x32xbf16> to vector<64x32xbf16>
    %470 = arith.truncf %467 : vector<16x64xf32> to vector<16x64xbf16>
    %cst_322 = arith.constant dense<0.000000e+00> : vector<16x32xf32>
    %471 = tpu.matmul %470, %469, %cst_322 {dimension_numbers = #tpu.dot_dimension_numbers<[1], [0], [0], [1], [0, 0, 1, 1], [], []>} : vector<16x64xbf16>, vector<64x32xbf16>, vector<16x32xf32> -> vector<16x32xf32>
    %472 = arith.addf %457, %471 : vector<16x32xf32>
    %c0_323 = arith.constant 0 : index
    %c0_324 = arith.constant 0 : index
    %c0_325 = arith.constant 0 : index
    %473 = vector.load %arg23[%c0_323, %c0_324, %c0_325] : memref<2x1x32xf32, #tpu.memory_space<vmem>>, vector<1x1x32xf32>
    %474 = vector.shape_cast %473 : vector<1x1x32xf32> to vector<1x32xf32>
    %475 = vector.broadcast %474 : vector<1x32xf32> to vector<16x32xf32>
    %476 = arith.addf %472, %475 : vector<16x32xf32>
    %c0_326 = arith.constant 0 : index
    %c0_327 = arith.constant 0 : index
    %c0_328 = arith.constant 0 : index
    %477 = vector.load %arg24[%c0_326, %c0_327, %c0_328] : memref<2x1x32xf32, #tpu.memory_space<vmem>>, vector<1x1x32xf32>
    %478 = vector.shape_cast %477 : vector<1x1x32xf32> to vector<1x32xf32>
    %c0_329 = arith.constant 0 : index
    %c0_330 = arith.constant 0 : index
    %c0_331 = arith.constant 0 : index
    %479 = vector.load %arg25[%c0_329, %c0_330, %c0_331] : memref<2x1x32xf32, #tpu.memory_space<vmem>>, vector<1x1x32xf32>
    %480 = vector.shape_cast %479 : vector<1x1x32xf32> to vector<1x32xf32>
    %cst_332 = arith.constant dense<0.000000e+00> : vector<16xf32>
    %481 = vector.multi_reduction <add>, %476, %cst_332 [1] : vector<16x32xf32> to vector<16xf32>
    %482 = vector.shape_cast %481 : vector<16xf32> to vector<16x1xf32>
    %cst_333 = arith.constant 3.200000e+01 : f32
    %483 = vector.broadcast %cst_333 : f32 to vector<16x1xf32>
    %484 = arith.divf %482, %483 : vector<16x1xf32>
    %485 = vector.broadcast %484 : vector<16x1xf32> to vector<16x32xf32>
    %486 = arith.subf %476, %485 : vector<16x32xf32>
    %487 = arith.mulf %486, %486 : vector<16x32xf32>
    %cst_334 = arith.constant dense<0.000000e+00> : vector<16xf32>
    %488 = vector.multi_reduction <add>, %487, %cst_334 [1] : vector<16x32xf32> to vector<16xf32>
    %489 = vector.shape_cast %488 : vector<16xf32> to vector<16x1xf32>
    %cst_335 = arith.constant 3.200000e+01 : f32
    %490 = vector.broadcast %cst_335 : f32 to vector<16x1xf32>
    %491 = arith.divf %489, %490 : vector<16x1xf32>
    %492 = vector.broadcast %484 : vector<16x1xf32> to vector<16x32xf32>
    %493 = arith.subf %476, %492 : vector<16x32xf32>
    %cst_336 = arith.constant 9.99999974E-6 : f32
    %494 = vector.broadcast %cst_336 : f32 to vector<16x1xf32>
    %495 = arith.addf %491, %494 : vector<16x1xf32>
    %496 = math.rsqrt %495 : vector<16x1xf32>
    %497 = vector.broadcast %496 : vector<16x1xf32> to vector<16x32xf32>
    %498 = arith.mulf %493, %497 : vector<16x32xf32>
    %499 = vector.broadcast %478 : vector<1x32xf32> to vector<16x32xf32>
    %500 = arith.mulf %498, %499 : vector<16x32xf32>
    %501 = vector.broadcast %480 : vector<1x32xf32> to vector<16x32xf32>
    %502 = arith.addf %500, %501 : vector<16x32xf32>
    %c1_337 = arith.constant 1 : index
    %c0_338 = arith.constant 0 : index
    %c0_339 = arith.constant 0 : index
    %503 = vector.load %arg14[%c1_337, %c0_338, %c0_339] : memref<2x32x96xbf16, #tpu.memory_space<vmem>>, vector<1x32x96xbf16>
    %504 = vector.shape_cast %503 : vector<1x32x96xbf16> to vector<32x96xbf16>
    %505 = arith.truncf %502 : vector<16x32xf32> to vector<16x32xbf16>
    %cst_340 = arith.constant dense<0.000000e+00> : vector<16x96xf32>
    %506 = tpu.matmul %505, %504, %cst_340 {dimension_numbers = #tpu.dot_dimension_numbers<[1], [0], [0], [1], [0, 0, 1, 1], [], []>} : vector<16x32xbf16>, vector<32x96xbf16>, vector<16x96xf32> -> vector<16x96xf32>
    %c1_341 = arith.constant 1 : index
    %c0_342 = arith.constant 0 : index
    %c0_343 = arith.constant 0 : index
    %507 = vector.load %arg15[%c1_341, %c0_342, %c0_343] : memref<2x1x96xf32, #tpu.memory_space<vmem>>, vector<1x1x96xf32>
    %508 = vector.shape_cast %507 : vector<1x1x96xf32> to vector<1x96xf32>
    %509 = vector.broadcast %508 : vector<1x96xf32> to vector<16x96xf32>
    %510 = arith.addf %506, %509 : vector<16x96xf32>
    %c1_344 = arith.constant 1 : index
    %c0_345 = arith.constant 0 : index
    %c0_346 = arith.constant 0 : index
    %511 = vector.load %arg17[%c1_344, %c0_345, %c0_346] : memref<2x1x32xf32, #tpu.memory_space<vmem>>, vector<1x1x32xf32>
    %512 = vector.shape_cast %511 : vector<1x1x32xf32> to vector<1x32xf32>
    %513 = vector.extract_strided_slice %510 {offsets = [0, 0], sizes = [16, 8], strides = [1, 1]} : vector<16x96xf32> to vector<16x8xf32>
    %cst_347 = arith.constant 0.353553385 : f32
    %514 = vector.broadcast %cst_347 : f32 to vector<16x8xf32>
    %515 = arith.mulf %513, %514 : vector<16x8xf32>
    %516 = vector.extract_strided_slice %510 {offsets = [0, 32], sizes = [16, 8], strides = [1, 1]} : vector<16x96xf32> to vector<16x8xf32>
    %517 = vector.extract_strided_slice %510 {offsets = [0, 64], sizes = [16, 8], strides = [1, 1]} : vector<16x96xf32> to vector<16x8xf32>
    %518 = arith.truncf %515 : vector<16x8xf32> to vector<16x8xbf16>
    %519 = arith.truncf %516 : vector<16x8xf32> to vector<16x8xbf16>
    %cst_348 = arith.constant dense<0.000000e+00> : vector<16x16xf32>
    %520 = tpu.matmul %518, %519, %cst_348 {dimension_numbers = #tpu.dot_dimension_numbers<[1], [1], [0], [0], [0, 0, 1, 0], [], []>} : vector<16x8xbf16>, vector<16x8xbf16>, vector<16x16xf32> -> vector<16x16xf32>
    %521 = arith.addf %520, %315 : vector<16x16xf32>
    %cst_349 = arith.constant dense<0xFF800000> : vector<16xf32>
    %522 = vector.multi_reduction <maximumf>, %521, %cst_349 [1] : vector<16x16xf32> to vector<16xf32>
    %523 = vector.shape_cast %522 : vector<16xf32> to vector<16x1xf32>
    %524 = vector.broadcast %523 : vector<16x1xf32> to vector<16x16xf32>
    %525 = arith.subf %521, %524 : vector<16x16xf32>
    %526 = math.exp %525 : vector<16x16xf32>
    %cst_350 = arith.constant dense<0.000000e+00> : vector<16xf32>
    %527 = vector.multi_reduction <add>, %526, %cst_350 [1] : vector<16x16xf32> to vector<16xf32>
    %528 = vector.shape_cast %527 : vector<16xf32> to vector<16x1xf32>
    %529 = vector.broadcast %528 : vector<16x1xf32> to vector<16x16xf32>
    %530 = arith.divf %526, %529 : vector<16x16xf32>
    %531 = arith.truncf %530 : vector<16x16xf32> to vector<16x16xbf16>
    %532 = arith.truncf %517 : vector<16x8xf32> to vector<16x8xbf16>
    %cst_351 = arith.constant dense<0.000000e+00> : vector<16x8xf32>
    %533 = tpu.matmul %531, %532, %cst_351 {dimension_numbers = #tpu.dot_dimension_numbers<[1], [0], [0], [1], [0, 0, 1, 1], [], []>} : vector<16x16xbf16>, vector<16x8xbf16>, vector<16x8xf32> -> vector<16x8xf32>
    %c4_352 = arith.constant 4 : index
    %c0_353 = arith.constant 0 : index
    %c0_354 = arith.constant 0 : index
    %534 = vector.load %arg16[%c4_352, %c0_353, %c0_354] : memref<8x8x32xbf16, #tpu.memory_space<vmem>>, vector<1x8x32xbf16>
    %535 = vector.shape_cast %534 : vector<1x8x32xbf16> to vector<8x32xbf16>
    %536 = arith.truncf %533 : vector<16x8xf32> to vector<16x8xbf16>
    %cst_355 = arith.constant dense<0.000000e+00> : vector<16x32xf32>
    %537 = tpu.matmul %536, %535, %cst_355 {dimension_numbers = #tpu.dot_dimension_numbers<[1], [0], [0], [1], [0, 0, 1, 1], [], []>} : vector<16x8xbf16>, vector<8x32xbf16>, vector<16x32xf32> -> vector<16x32xf32>
    %538 = vector.broadcast %512 : vector<1x32xf32> to vector<16x32xf32>
    %539 = arith.addf %538, %537 : vector<16x32xf32>
    %540 = vector.extract_strided_slice %510 {offsets = [0, 8], sizes = [16, 8], strides = [1, 1]} : vector<16x96xf32> to vector<16x8xf32>
    %cst_356 = arith.constant 0.353553385 : f32
    %541 = vector.broadcast %cst_356 : f32 to vector<16x8xf32>
    %542 = arith.mulf %540, %541 : vector<16x8xf32>
    %543 = vector.extract_strided_slice %510 {offsets = [0, 40], sizes = [16, 8], strides = [1, 1]} : vector<16x96xf32> to vector<16x8xf32>
    %544 = vector.extract_strided_slice %510 {offsets = [0, 72], sizes = [16, 8], strides = [1, 1]} : vector<16x96xf32> to vector<16x8xf32>
    %545 = arith.truncf %542 : vector<16x8xf32> to vector<16x8xbf16>
    %546 = arith.truncf %543 : vector<16x8xf32> to vector<16x8xbf16>
    %cst_357 = arith.constant dense<0.000000e+00> : vector<16x16xf32>
    %547 = tpu.matmul %545, %546, %cst_357 {dimension_numbers = #tpu.dot_dimension_numbers<[1], [1], [0], [0], [0, 0, 1, 0], [], []>} : vector<16x8xbf16>, vector<16x8xbf16>, vector<16x16xf32> -> vector<16x16xf32>
    %548 = arith.addf %547, %315 : vector<16x16xf32>
    %cst_358 = arith.constant dense<0xFF800000> : vector<16xf32>
    %549 = vector.multi_reduction <maximumf>, %548, %cst_358 [1] : vector<16x16xf32> to vector<16xf32>
    %550 = vector.shape_cast %549 : vector<16xf32> to vector<16x1xf32>
    %551 = vector.broadcast %550 : vector<16x1xf32> to vector<16x16xf32>
    %552 = arith.subf %548, %551 : vector<16x16xf32>
    %553 = math.exp %552 : vector<16x16xf32>
    %cst_359 = arith.constant dense<0.000000e+00> : vector<16xf32>
    %554 = vector.multi_reduction <add>, %553, %cst_359 [1] : vector<16x16xf32> to vector<16xf32>
    %555 = vector.shape_cast %554 : vector<16xf32> to vector<16x1xf32>
    %556 = vector.broadcast %555 : vector<16x1xf32> to vector<16x16xf32>
    %557 = arith.divf %553, %556 : vector<16x16xf32>
    %558 = arith.truncf %557 : vector<16x16xf32> to vector<16x16xbf16>
    %559 = arith.truncf %544 : vector<16x8xf32> to vector<16x8xbf16>
    %cst_360 = arith.constant dense<0.000000e+00> : vector<16x8xf32>
    %560 = tpu.matmul %558, %559, %cst_360 {dimension_numbers = #tpu.dot_dimension_numbers<[1], [0], [0], [1], [0, 0, 1, 1], [], []>} : vector<16x16xbf16>, vector<16x8xbf16>, vector<16x8xf32> -> vector<16x8xf32>
    %c5_361 = arith.constant 5 : index
    %c0_362 = arith.constant 0 : index
    %c0_363 = arith.constant 0 : index
    %561 = vector.load %arg16[%c5_361, %c0_362, %c0_363] : memref<8x8x32xbf16, #tpu.memory_space<vmem>>, vector<1x8x32xbf16>
    %562 = vector.shape_cast %561 : vector<1x8x32xbf16> to vector<8x32xbf16>
    %563 = arith.truncf %560 : vector<16x8xf32> to vector<16x8xbf16>
    %cst_364 = arith.constant dense<0.000000e+00> : vector<16x32xf32>
    %564 = tpu.matmul %563, %562, %cst_364 {dimension_numbers = #tpu.dot_dimension_numbers<[1], [0], [0], [1], [0, 0, 1, 1], [], []>} : vector<16x8xbf16>, vector<8x32xbf16>, vector<16x32xf32> -> vector<16x32xf32>
    %565 = arith.addf %539, %564 : vector<16x32xf32>
    %566 = vector.extract_strided_slice %510 {offsets = [0, 16], sizes = [16, 8], strides = [1, 1]} : vector<16x96xf32> to vector<16x8xf32>
    %cst_365 = arith.constant 0.353553385 : f32
    %567 = vector.broadcast %cst_365 : f32 to vector<16x8xf32>
    %568 = arith.mulf %566, %567 : vector<16x8xf32>
    %569 = vector.extract_strided_slice %510 {offsets = [0, 48], sizes = [16, 8], strides = [1, 1]} : vector<16x96xf32> to vector<16x8xf32>
    %570 = vector.extract_strided_slice %510 {offsets = [0, 80], sizes = [16, 8], strides = [1, 1]} : vector<16x96xf32> to vector<16x8xf32>
    %571 = arith.truncf %568 : vector<16x8xf32> to vector<16x8xbf16>
    %572 = arith.truncf %569 : vector<16x8xf32> to vector<16x8xbf16>
    %cst_366 = arith.constant dense<0.000000e+00> : vector<16x16xf32>
    %573 = tpu.matmul %571, %572, %cst_366 {dimension_numbers = #tpu.dot_dimension_numbers<[1], [1], [0], [0], [0, 0, 1, 0], [], []>} : vector<16x8xbf16>, vector<16x8xbf16>, vector<16x16xf32> -> vector<16x16xf32>
    %574 = arith.addf %573, %315 : vector<16x16xf32>
    %cst_367 = arith.constant dense<0xFF800000> : vector<16xf32>
    %575 = vector.multi_reduction <maximumf>, %574, %cst_367 [1] : vector<16x16xf32> to vector<16xf32>
    %576 = vector.shape_cast %575 : vector<16xf32> to vector<16x1xf32>
    %577 = vector.broadcast %576 : vector<16x1xf32> to vector<16x16xf32>
    %578 = arith.subf %574, %577 : vector<16x16xf32>
    %579 = math.exp %578 : vector<16x16xf32>
    %cst_368 = arith.constant dense<0.000000e+00> : vector<16xf32>
    %580 = vector.multi_reduction <add>, %579, %cst_368 [1] : vector<16x16xf32> to vector<16xf32>
    %581 = vector.shape_cast %580 : vector<16xf32> to vector<16x1xf32>
    %582 = vector.broadcast %581 : vector<16x1xf32> to vector<16x16xf32>
    %583 = arith.divf %579, %582 : vector<16x16xf32>
    %584 = arith.truncf %583 : vector<16x16xf32> to vector<16x16xbf16>
    %585 = arith.truncf %570 : vector<16x8xf32> to vector<16x8xbf16>
    %cst_369 = arith.constant dense<0.000000e+00> : vector<16x8xf32>
    %586 = tpu.matmul %584, %585, %cst_369 {dimension_numbers = #tpu.dot_dimension_numbers<[1], [0], [0], [1], [0, 0, 1, 1], [], []>} : vector<16x16xbf16>, vector<16x8xbf16>, vector<16x8xf32> -> vector<16x8xf32>
    %c6_370 = arith.constant 6 : index
    %c0_371 = arith.constant 0 : index
    %c0_372 = arith.constant 0 : index
    %587 = vector.load %arg16[%c6_370, %c0_371, %c0_372] : memref<8x8x32xbf16, #tpu.memory_space<vmem>>, vector<1x8x32xbf16>
    %588 = vector.shape_cast %587 : vector<1x8x32xbf16> to vector<8x32xbf16>
    %589 = arith.truncf %586 : vector<16x8xf32> to vector<16x8xbf16>
    %cst_373 = arith.constant dense<0.000000e+00> : vector<16x32xf32>
    %590 = tpu.matmul %589, %588, %cst_373 {dimension_numbers = #tpu.dot_dimension_numbers<[1], [0], [0], [1], [0, 0, 1, 1], [], []>} : vector<16x8xbf16>, vector<8x32xbf16>, vector<16x32xf32> -> vector<16x32xf32>
    %591 = arith.addf %565, %590 : vector<16x32xf32>
    %592 = vector.extract_strided_slice %510 {offsets = [0, 24], sizes = [16, 8], strides = [1, 1]} : vector<16x96xf32> to vector<16x8xf32>
    %cst_374 = arith.constant 0.353553385 : f32
    %593 = vector.broadcast %cst_374 : f32 to vector<16x8xf32>
    %594 = arith.mulf %592, %593 : vector<16x8xf32>
    %595 = vector.extract_strided_slice %510 {offsets = [0, 56], sizes = [16, 8], strides = [1, 1]} : vector<16x96xf32> to vector<16x8xf32>
    %596 = vector.extract_strided_slice %510 {offsets = [0, 88], sizes = [16, 8], strides = [1, 1]} : vector<16x96xf32> to vector<16x8xf32>
    %597 = arith.truncf %594 : vector<16x8xf32> to vector<16x8xbf16>
    %598 = arith.truncf %595 : vector<16x8xf32> to vector<16x8xbf16>
    %cst_375 = arith.constant dense<0.000000e+00> : vector<16x16xf32>
    %599 = tpu.matmul %597, %598, %cst_375 {dimension_numbers = #tpu.dot_dimension_numbers<[1], [1], [0], [0], [0, 0, 1, 0], [], []>} : vector<16x8xbf16>, vector<16x8xbf16>, vector<16x16xf32> -> vector<16x16xf32>
    %600 = arith.addf %599, %315 : vector<16x16xf32>
    %cst_376 = arith.constant dense<0xFF800000> : vector<16xf32>
    %601 = vector.multi_reduction <maximumf>, %600, %cst_376 [1] : vector<16x16xf32> to vector<16xf32>
    %602 = vector.shape_cast %601 : vector<16xf32> to vector<16x1xf32>
    %603 = vector.broadcast %602 : vector<16x1xf32> to vector<16x16xf32>
    %604 = arith.subf %600, %603 : vector<16x16xf32>
    %605 = math.exp %604 : vector<16x16xf32>
    %cst_377 = arith.constant dense<0.000000e+00> : vector<16xf32>
    %606 = vector.multi_reduction <add>, %605, %cst_377 [1] : vector<16x16xf32> to vector<16xf32>
    %607 = vector.shape_cast %606 : vector<16xf32> to vector<16x1xf32>
    %608 = vector.broadcast %607 : vector<16x1xf32> to vector<16x16xf32>
    %609 = arith.divf %605, %608 : vector<16x16xf32>
    %610 = arith.truncf %609 : vector<16x16xf32> to vector<16x16xbf16>
    %611 = arith.truncf %596 : vector<16x8xf32> to vector<16x8xbf16>
    %cst_378 = arith.constant dense<0.000000e+00> : vector<16x8xf32>
    %612 = tpu.matmul %610, %611, %cst_378 {dimension_numbers = #tpu.dot_dimension_numbers<[1], [0], [0], [1], [0, 0, 1, 1], [], []>} : vector<16x16xbf16>, vector<16x8xbf16>, vector<16x8xf32> -> vector<16x8xf32>
    %c7_379 = arith.constant 7 : index
    %c0_380 = arith.constant 0 : index
    %c0_381 = arith.constant 0 : index
    %613 = vector.load %arg16[%c7_379, %c0_380, %c0_381] : memref<8x8x32xbf16, #tpu.memory_space<vmem>>, vector<1x8x32xbf16>
    %614 = vector.shape_cast %613 : vector<1x8x32xbf16> to vector<8x32xbf16>
    %615 = arith.truncf %612 : vector<16x8xf32> to vector<16x8xbf16>
    %cst_382 = arith.constant dense<0.000000e+00> : vector<16x32xf32>
    %616 = tpu.matmul %615, %614, %cst_382 {dimension_numbers = #tpu.dot_dimension_numbers<[1], [0], [0], [1], [0, 0, 1, 1], [], []>} : vector<16x8xbf16>, vector<8x32xbf16>, vector<16x32xf32> -> vector<16x32xf32>
    %617 = arith.addf %591, %616 : vector<16x32xf32>
    %618 = arith.addf %502, %617 : vector<16x32xf32>
    %c1_383 = arith.constant 1 : index
    %c0_384 = arith.constant 0 : index
    %c0_385 = arith.constant 0 : index
    %619 = vector.load %arg18[%c1_383, %c0_384, %c0_385] : memref<2x1x32xf32, #tpu.memory_space<vmem>>, vector<1x1x32xf32>
    %620 = vector.shape_cast %619 : vector<1x1x32xf32> to vector<1x32xf32>
    %c1_386 = arith.constant 1 : index
    %c0_387 = arith.constant 0 : index
    %c0_388 = arith.constant 0 : index
    %621 = vector.load %arg19[%c1_386, %c0_387, %c0_388] : memref<2x1x32xf32, #tpu.memory_space<vmem>>, vector<1x1x32xf32>
    %622 = vector.shape_cast %621 : vector<1x1x32xf32> to vector<1x32xf32>
    %cst_389 = arith.constant dense<0.000000e+00> : vector<16xf32>
    %623 = vector.multi_reduction <add>, %618, %cst_389 [1] : vector<16x32xf32> to vector<16xf32>
    %624 = vector.shape_cast %623 : vector<16xf32> to vector<16x1xf32>
    %cst_390 = arith.constant 3.200000e+01 : f32
    %625 = vector.broadcast %cst_390 : f32 to vector<16x1xf32>
    %626 = arith.divf %624, %625 : vector<16x1xf32>
    %627 = vector.broadcast %626 : vector<16x1xf32> to vector<16x32xf32>
    %628 = arith.subf %618, %627 : vector<16x32xf32>
    %629 = arith.mulf %628, %628 : vector<16x32xf32>
    %cst_391 = arith.constant dense<0.000000e+00> : vector<16xf32>
    %630 = vector.multi_reduction <add>, %629, %cst_391 [1] : vector<16x32xf32> to vector<16xf32>
    %631 = vector.shape_cast %630 : vector<16xf32> to vector<16x1xf32>
    %cst_392 = arith.constant 3.200000e+01 : f32
    %632 = vector.broadcast %cst_392 : f32 to vector<16x1xf32>
    %633 = arith.divf %631, %632 : vector<16x1xf32>
    %634 = vector.broadcast %626 : vector<16x1xf32> to vector<16x32xf32>
    %635 = arith.subf %618, %634 : vector<16x32xf32>
    %cst_393 = arith.constant 9.99999974E-6 : f32
    %636 = vector.broadcast %cst_393 : f32 to vector<16x1xf32>
    %637 = arith.addf %633, %636 : vector<16x1xf32>
    %638 = math.rsqrt %637 : vector<16x1xf32>
    %639 = vector.broadcast %638 : vector<16x1xf32> to vector<16x32xf32>
    %640 = arith.mulf %635, %639 : vector<16x32xf32>
    %641 = vector.broadcast %620 : vector<1x32xf32> to vector<16x32xf32>
    %642 = arith.mulf %640, %641 : vector<16x32xf32>
    %643 = vector.broadcast %622 : vector<1x32xf32> to vector<16x32xf32>
    %644 = arith.addf %642, %643 : vector<16x32xf32>
    %c1_394 = arith.constant 1 : index
    %c0_395 = arith.constant 0 : index
    %c0_396 = arith.constant 0 : index
    %645 = vector.load %arg20[%c1_394, %c0_395, %c0_396] : memref<2x32x64xbf16, #tpu.memory_space<vmem>>, vector<1x32x64xbf16>
    %646 = vector.shape_cast %645 : vector<1x32x64xbf16> to vector<32x64xbf16>
    %647 = arith.truncf %644 : vector<16x32xf32> to vector<16x32xbf16>
    %cst_397 = arith.constant dense<0.000000e+00> : vector<16x64xf32>
    %648 = tpu.matmul %647, %646, %cst_397 {dimension_numbers = #tpu.dot_dimension_numbers<[1], [0], [0], [1], [0, 0, 1, 1], [], []>} : vector<16x32xbf16>, vector<32x64xbf16>, vector<16x64xf32> -> vector<16x64xf32>
    %c1_398 = arith.constant 1 : index
    %c0_399 = arith.constant 0 : index
    %c0_400 = arith.constant 0 : index
    %649 = vector.load %arg21[%c1_398, %c0_399, %c0_400] : memref<2x1x64xf32, #tpu.memory_space<vmem>>, vector<1x1x64xf32>
    %650 = vector.shape_cast %649 : vector<1x1x64xf32> to vector<1x64xf32>
    %651 = vector.broadcast %650 : vector<1x64xf32> to vector<16x64xf32>
    %652 = arith.addf %648, %651 : vector<16x64xf32>
    %cst_401 = arith.constant 0.000000e+00 : f32
    %653 = vector.broadcast %cst_401 : f32 to vector<16x64xf32>
    %654 = arith.maximumf %652, %653 : vector<16x64xf32>
    %c1_402 = arith.constant 1 : index
    %c0_403 = arith.constant 0 : index
    %c0_404 = arith.constant 0 : index
    %655 = vector.load %arg22[%c1_402, %c0_403, %c0_404] : memref<2x64x32xbf16, #tpu.memory_space<vmem>>, vector<1x64x32xbf16>
    %656 = vector.shape_cast %655 : vector<1x64x32xbf16> to vector<64x32xbf16>
    %657 = arith.truncf %654 : vector<16x64xf32> to vector<16x64xbf16>
    %cst_405 = arith.constant dense<0.000000e+00> : vector<16x32xf32>
    %658 = tpu.matmul %657, %656, %cst_405 {dimension_numbers = #tpu.dot_dimension_numbers<[1], [0], [0], [1], [0, 0, 1, 1], [], []>} : vector<16x64xbf16>, vector<64x32xbf16>, vector<16x32xf32> -> vector<16x32xf32>
    %659 = arith.addf %644, %658 : vector<16x32xf32>
    %c1_406 = arith.constant 1 : index
    %c0_407 = arith.constant 0 : index
    %c0_408 = arith.constant 0 : index
    %660 = vector.load %arg23[%c1_406, %c0_407, %c0_408] : memref<2x1x32xf32, #tpu.memory_space<vmem>>, vector<1x1x32xf32>
    %661 = vector.shape_cast %660 : vector<1x1x32xf32> to vector<1x32xf32>
    %662 = vector.broadcast %661 : vector<1x32xf32> to vector<16x32xf32>
    %663 = arith.addf %659, %662 : vector<16x32xf32>
    %c1_409 = arith.constant 1 : index
    %c0_410 = arith.constant 0 : index
    %c0_411 = arith.constant 0 : index
    %664 = vector.load %arg24[%c1_409, %c0_410, %c0_411] : memref<2x1x32xf32, #tpu.memory_space<vmem>>, vector<1x1x32xf32>
    %665 = vector.shape_cast %664 : vector<1x1x32xf32> to vector<1x32xf32>
    %c1_412 = arith.constant 1 : index
    %c0_413 = arith.constant 0 : index
    %c0_414 = arith.constant 0 : index
    %666 = vector.load %arg25[%c1_412, %c0_413, %c0_414] : memref<2x1x32xf32, #tpu.memory_space<vmem>>, vector<1x1x32xf32>
    %667 = vector.shape_cast %666 : vector<1x1x32xf32> to vector<1x32xf32>
    %cst_415 = arith.constant dense<0.000000e+00> : vector<16xf32>
    %668 = vector.multi_reduction <add>, %663, %cst_415 [1] : vector<16x32xf32> to vector<16xf32>
    %669 = vector.shape_cast %668 : vector<16xf32> to vector<16x1xf32>
    %cst_416 = arith.constant 3.200000e+01 : f32
    %670 = vector.broadcast %cst_416 : f32 to vector<16x1xf32>
    %671 = arith.divf %669, %670 : vector<16x1xf32>
    %672 = vector.broadcast %671 : vector<16x1xf32> to vector<16x32xf32>
    %673 = arith.subf %663, %672 : vector<16x32xf32>
    %674 = arith.mulf %673, %673 : vector<16x32xf32>
    %cst_417 = arith.constant dense<0.000000e+00> : vector<16xf32>
    %675 = vector.multi_reduction <add>, %674, %cst_417 [1] : vector<16x32xf32> to vector<16xf32>
    %676 = vector.shape_cast %675 : vector<16xf32> to vector<16x1xf32>
    %cst_418 = arith.constant 3.200000e+01 : f32
    %677 = vector.broadcast %cst_418 : f32 to vector<16x1xf32>
    %678 = arith.divf %676, %677 : vector<16x1xf32>
    %679 = vector.broadcast %671 : vector<16x1xf32> to vector<16x32xf32>
    %680 = arith.subf %663, %679 : vector<16x32xf32>
    %cst_419 = arith.constant 9.99999974E-6 : f32
    %681 = vector.broadcast %cst_419 : f32 to vector<16x1xf32>
    %682 = arith.addf %678, %681 : vector<16x1xf32>
    %683 = math.rsqrt %682 : vector<16x1xf32>
    %684 = vector.broadcast %683 : vector<16x1xf32> to vector<16x32xf32>
    %685 = arith.mulf %680, %684 : vector<16x32xf32>
    %686 = vector.broadcast %665 : vector<1x32xf32> to vector<16x32xf32>
    %687 = arith.mulf %685, %686 : vector<16x32xf32>
    %688 = vector.broadcast %667 : vector<1x32xf32> to vector<16x32xf32>
    %689 = arith.addf %687, %688 : vector<16x32xf32>
    %c0_420 = arith.constant 0 : index
    %c0_421 = arith.constant 0 : index
    %690 = vector.load %arg13[%c0_420, %c0_421] : memref<4x16xf32, #tpu.memory_space<vmem>>, vector<4x16xf32>
    %cst_422 = arith.constant dense<0.000000e+00> : vector<4x32xf32>
    %691 = tpu.matmul %690, %689, %cst_422 {dimension_numbers = #tpu.dot_dimension_numbers<[1], [0], [0], [1], [0, 0, 1, 1], [], []>} : vector<4x16xf32>, vector<16x32xf32>, vector<4x32xf32> -> vector<4x32xf32>
    %c0_423 = arith.constant 0 : index
    %c0_424 = arith.constant 0 : index
    %692 = vector.load %arg26[%c0_423, %c0_424] : memref<32x32xbf16, #tpu.memory_space<vmem>>, vector<32x32xbf16>
    %693 = arith.truncf %691 : vector<4x32xf32> to vector<4x32xbf16>
    %cst_425 = arith.constant dense<0.000000e+00> : vector<4x32xf32>
    %694 = tpu.matmul %693, %692, %cst_425 {dimension_numbers = #tpu.dot_dimension_numbers<[1], [0], [0], [1], [0, 0, 1, 1], [], []>} : vector<4x32xbf16>, vector<32x32xbf16>, vector<4x32xf32> -> vector<4x32xf32>
    %c0_426 = arith.constant 0 : index
    %c0_427 = arith.constant 0 : index
    %695 = vector.load %arg27[%c0_426, %c0_427] : memref<1x32xf32, #tpu.memory_space<vmem>>, vector<1x32xf32>
    %696 = vector.broadcast %695 : vector<1x32xf32> to vector<4x32xf32>
    %697 = arith.addf %694, %696 : vector<4x32xf32>
    %c0_428 = arith.constant 0 : index
    %c0_429 = arith.constant 0 : index
    %c0_430 = arith.constant 0 : index
    %698 = vector.load %arg28[%c0_428, %c0_429, %c0_430] : memref<1x4x32xf32, #tpu.memory_space<vmem>>, vector<1x4x32xf32>
    %699 = vector.shape_cast %698 : vector<1x4x32xf32> to vector<4x32xf32>
    %700 = vector.shape_cast %697 : vector<4x32xf32> to vector<1x4x32xf32>
    tpu.vector_store %arg28[%c0_428, %c0_429, %c0_430], %700 {strides = array<i32>} : memref<1x4x32xf32, #tpu.memory_space<vmem>>, vector<1x4x32xf32>,
    return
  }
  func.func @transform_0(%arg0: i32) -> (i32, i32) {
    %c0_i32 = arith.constant 0 : i32
    %c0_i32_0 = arith.constant 0 : i32
    return %arg0, %c0_i32 : i32, i32
  }
  func.func @transform_1(%arg0: i32) -> (i32, i32, i32) {
    %c0_i32 = arith.constant 0 : i32
    %c0_i32_0 = arith.constant 0 : i32
    %c0_i32_1 = arith.constant 0 : i32
    %c0_i32_2 = arith.constant 0 : i32
    return %c0_i32, %c0_i32_0, %c0_i32_1 : i32, i32, i32
  }
  func.func @transform_2(%arg0: i32) -> (i32, i32, i32) {
    %c0_i32 = arith.constant 0 : i32
    %c0_i32_0 = arith.constant 0 : i32
    %c0_i32_1 = arith.constant 0 : i32
    %c0_i32_2 = arith.constant 0 : i32
    return %c0_i32, %c0_i32_0, %c0_i32_1 : i32, i32, i32
  }
  func.func @transform_3(%arg0: i32) -> (i32, i32, i32) {
    %c0_i32 = arith.constant 0 : i32
    %c0_i32_0 = arith.constant 0 : i32
    %c0_i32_1 = arith.constant 0 : i32
    %c0_i32_2 = arith.constant 0 : i32
    return %c0_i32, %c0_i32_0, %c0_i32_1 : i32, i32, i32
  }
  func.func @transform_4(%arg0: i32) -> (i32, i32, i32) {
    %c0_i32 = arith.constant 0 : i32
    %c0_i32_0 = arith.constant 0 : i32
    %c0_i32_1 = arith.constant 0 : i32
    %c0_i32_2 = arith.constant 0 : i32
    return %c0_i32, %c0_i32_0, %c0_i32_1 : i32, i32, i32
  }
  func.func @transform_5(%arg0: i32) -> (i32, i32) {
    %c0_i32 = arith.constant 0 : i32
    %c0_i32_0 = arith.constant 0 : i32
    %c0_i32_1 = arith.constant 0 : i32
    return %c0_i32, %c0_i32_0 : i32, i32
  }
  func.func @transform_6(%arg0: i32) -> (i32, i32, i32) {
    %c0_i32 = arith.constant 0 : i32
    %c0_i32_0 = arith.constant 0 : i32
    %c0_i32_1 = arith.constant 0 : i32
    %c0_i32_2 = arith.constant 0 : i32
    return %c0_i32, %c0_i32_0, %c0_i32_1 : i32, i32, i32
  }
  func.func @transform_7(%arg0: i32) -> (i32, i32) {
    %c0_i32 = arith.constant 0 : i32
    %c0_i32_0 = arith.constant 0 : i32
    %c0_i32_1 = arith.constant 0 : i32
    return %c0_i32, %c0_i32_0 : i32, i32
  }
  func.func @transform_8(%arg0: i32) -> (i32, i32, i32) {
    %c0_i32 = arith.constant 0 : i32
    %c0_i32_0 = arith.constant 0 : i32
    %c0_i32_1 = arith.constant 0 : i32
    %c0_i32_2 = arith.constant 0 : i32
    return %c0_i32, %c0_i32_0, %c0_i32_1 : i32, i32, i32
  }
  func.func @transform_9(%arg0: i32) -> (i32, i32) {
    %c0_i32 = arith.constant 0 : i32
    %c0_i32_0 = arith.constant 0 : i32
    %c0_i32_1 = arith.constant 0 : i32
    return %c0_i32, %c0_i32_0 : i32, i32
  }
  func.func @transform_10(%arg0: i32) -> (i32, i32) {
    %c0_i32 = arith.constant 0 : i32
    %c0_i32_0 = arith.constant 0 : i32
    %c0_i32_1 = arith.constant 0 : i32
    return %c0_i32, %c0_i32_0 : i32, i32
  }
  func.func @transform_11(%arg0: i32) -> (i32, i32) {
    %c0_i32 = arith.constant 0 : i32
    %c0_i32_0 = arith.constant 0 : i32
    %c0_i32_1 = arith.constant 0 : i32
    return %c0_i32, %c0_i32_0 : i32, i32
  }
  func.func @transform_12(%arg0: i32) -> (i32, i32) {
    %c0_i32 = arith.constant 0 : i32
    %c0_i32_0 = arith.constant 0 : i32
    %c0_i32_1 = arith.constant 0 : i32
    return %c0_i32, %c0_i32_0 : i32, i32
  }
  func.func @transform_13(%arg0: i32) -> (i32, i32, i32) {
    %c0_i32 = arith.constant 0 : i32
    %c0_i32_0 = arith.constant 0 : i32
    %c0_i32_1 = arith.constant 0 : i32
    %c0_i32_2 = arith.constant 0 : i32
    return %c0_i32, %c0_i32_0, %c0_i32_1 : i32, i32, i32
  }
  func.func @transform_14(%arg0: i32) -> (i32, i32, i32) {
    %c0_i32 = arith.constant 0 : i32
    %c0_i32_0 = arith.constant 0 : i32
    %c0_i32_1 = arith.constant 0 : i32
    %c0_i32_2 = arith.constant 0 : i32
    return %c0_i32, %c0_i32_0, %c0_i32_1 : i32, i32, i32
  }
  func.func @transform_15(%arg0: i32) -> (i32, i32, i32) {
    %c0_i32 = arith.constant 0 : i32
    %c0_i32_0 = arith.constant 0 : i32
    %c0_i32_1 = arith.constant 0 : i32
    %c0_i32_2 = arith.constant 0 : i32
    return %c0_i32, %c0_i32_0, %c0_i32_1 : i32, i32, i32
  }
  func.func @transform_16(%arg0: i32) -> (i32, i32, i32) {
    %c0_i32 = arith.constant 0 : i32
    %c0_i32_0 = arith.constant 0 : i32
    %c0_i32_1 = arith.constant 0 : i32
    %c0_i32_2 = arith.constant 0 : i32
    return %c0_i32, %c0_i32_0, %c0_i32_1 : i32, i32, i32
  }
  func.func @transform_17(%arg0: i32) -> (i32, i32, i32) {
    %c0_i32 = arith.constant 0 : i32
    %c0_i32_0 = arith.constant 0 : i32
    %c0_i32_1 = arith.constant 0 : i32
    %c0_i32_2 = arith.constant 0 : i32
    return %c0_i32, %c0_i32_0, %c0_i32_1 : i32, i32, i32
  }
  func.func @transform_18(%arg0: i32) -> (i32, i32, i32) {
    %c0_i32 = arith.constant 0 : i32
    %c0_i32_0 = arith.constant 0 : i32
    %c0_i32_1 = arith.constant 0 : i32
    %c0_i32_2 = arith.constant 0 : i32
    return %c0_i32, %c0_i32_0, %c0_i32_1 : i32, i32, i32
  }
  func.func @transform_19(%arg0: i32) -> (i32, i32, i32) {
    %c0_i32 = arith.constant 0 : i32
    %c0_i32_0 = arith.constant 0 : i32
    %c0_i32_1 = arith.constant 0 : i32
    %c0_i32_2 = arith.constant 0 : i32
    return %c0_i32, %c0_i32_0, %c0_i32_1 : i32, i32, i32
  }
  func.func @transform_20(%arg0: i32) -> (i32, i32, i32) {
    %c0_i32 = arith.constant 0 : i32
    %c0_i32_0 = arith.constant 0 : i32
    %c0_i32_1 = arith.constant 0 : i32
    %c0_i32_2 = arith.constant 0 : i32
    return %c0_i32, %c0_i32_0, %c0_i32_1 : i32, i32, i32
  }
  func.func @transform_21(%arg0: i32) -> (i32, i32, i32) {
    %c0_i32 = arith.constant 0 : i32
    %c0_i32_0 = arith.constant 0 : i32
    %c0_i32_1 = arith.constant 0 : i32
    %c0_i32_2 = arith.constant 0 : i32
    return %c0_i32, %c0_i32_0, %c0_i32_1 : i32, i32, i32
  }
  func.func @transform_22(%arg0: i32) -> (i32, i32, i32) {
    %c0_i32 = arith.constant 0 : i32
    %c0_i32_0 = arith.constant 0 : i32
    %c0_i32_1 = arith.constant 0 : i32
    %c0_i32_2 = arith.constant 0 : i32
    return %c0_i32, %c0_i32_0, %c0_i32_1 : i32, i32, i32
  }
  func.func @transform_23(%arg0: i32) -> (i32, i32, i32) {
    %c0_i32 = arith.constant 0 : i32
    %c0_i32_0 = arith.constant 0 : i32
    %c0_i32_1 = arith.constant 0 : i32
    %c0_i32_2 = arith.constant 0 : i32
    return %c0_i32, %c0_i32_0, %c0_i32_1 : i32, i32, i32
  }
  func.func @transform_24(%arg0: i32) -> (i32, i32, i32) {
    %c0_i32 = arith.constant 0 : i32
    %c0_i32_0 = arith.constant 0 : i32
    %c0_i32_1 = arith.constant 0 : i32
    %c0_i32_2 = arith.constant 0 : i32
    return %c0_i32, %c0_i32_0, %c0_i32_1 : i32, i32, i32
  }
  func.func @transform_25(%arg0: i32) -> (i32, i32) {
    %c0_i32 = arith.constant 0 : i32
    %c0_i32_0 = arith.constant 0 : i32
    %c0_i32_1 = arith.constant 0 : i32
    return %c0_i32, %c0_i32_0 : i32, i32
  }
  func.func @transform_26(%arg0: i32) -> (i32, i32) {
    %c0_i32 = arith.constant 0 : i32
    %c0_i32_0 = arith.constant 0 : i32
    %c0_i32_1 = arith.constant 0 : i32
    return %c0_i32, %c0_i32_0 : i32, i32
  }
  func.func @transform_27(%arg0: i32) -> (i32, i32, i32) {
    %c0_i32 = arith.constant 0 : i32
    %c0_i32_0 = arith.constant 0 : i32
    %c0_i32_1 = arith.constant 0 : i32
    return %arg0, %c0_i32, %c0_i32_0 : i32, i32, i32
  }
}

</mosaic_0001>

<bundles_post_ra>
// kernel: transformer_siamese_forward.1
= control target key start
LH: loop header
LB: loop body
LE: loop exit
PB: predicated region body
PF: predicated region fallthrough
CT: control target
= control target key end

     0   :  { %s12841_s0 = inlined_call_operand.vmem [shape: bf16[64,16], index: 0, kind: input, shape index: {}]   ;;  %s12842_s1 = inlined_call_operand.hbm [shape: bf16[6,32,64], index: 1, kind: input, shape index: {}]   ;;  %s12843_s2 = inlined_call_operand.hbm [shape: bf16[6,16,32], index: 2, kind: input, shape index: {}]   ;;  %s12844_s3 = inlined_call_operand.hbm [shape: bf16[3,16,16], index: 3, kind: input, shape index: {}]   ;;  %s12845_s4 = inlined_call_operand.hbm [shape: bf16[10,16,256], index: 4, kind: input, shape index: {}]   ;;  %s12846_s5 = inlined_call_operand.hbm [shape: f32[3,256], index: 5, kind: input, shape index: {}]   ;;  %s12847_s6 = inlined_call_operand.hbm [shape: bf16[10,256,256], index: 6, kind: input, shape index: {}]   ;;  %s12848_s7 = inlined_call_operand.hbm [shape: f32[3,256], index: 7, kind: input, shape index: {}]   ;;  %s12849_s8 = inlined_call_operand.vmem [shape: bf16[3,256,32], index: 8, kind: input, shape index: {}]   ;;  %s12850_s9 = inlined_call_operand.hbm [shape: f32[3,32], index: 9, kind: input, shape index: {}]   ;;  %s12851_s10 = inlined_call_operand.vmem [shape: f32[16,32], index: 10, kind: input, shape index: {}]   ;;  %s12852_s11 = inlined_call_operand.hbm [shape: f32[16,16], index: 11, kind: input, shape index: {}]   ;;  %s12853_s12 = inlined_call_operand.hbm [shape: f32[4,16], index: 12, kind: input, shape index: {}]   ;;  %s12854_s13 = inlined_call_operand.hbm [shape: bf16[2,32,96], index: 13, kind: input, shape index: {}]   ;;  %s12855_s14 = inlined_call_operand.hbm [shape: f32[2,1,96], index: 14, kind: input, shape index: {}]   ;;  %s12856_s15 = inlined_call_operand.hbm [shape: bf16[8,8,32], index: 15, kind: input, shape index: {}]   ;;  %s12857_s16 = inlined_call_operand.hbm [shape: f32[2,1,32], index: 16, kind: input, shape index: {}]   ;;  %s12858_s17 = inlined_call_operand.hbm [shape: f32[2,1,32], index: 17, kind: input, shape index: {}]   ;;  %s12859_s18 = inlined_call_operand.hbm [shape: f32[2,1,32], index: 18, kind: input, shape index: {}]   ;;  %s12860_s19 = inlined_call_operand.hbm [shape: bf16[2,32,64], index: 19, kind: input, shape index: {}]   ;;  %s12861_s20 = inlined_call_operand.hbm [shape: f32[2,1,64], index: 20, kind: input, shape index: {}]   ;;  %s12862_s21 = inlined_call_operand.vmem [shape: bf16[2,64,32], index: 21, kind: input, shape index: {}]   ;;  %s12863_s22 = inlined_call_operand.hbm [shape: f32[2,1,32], index: 22, kind: input, shape index: {}]   ;;  %s12864_s23 = inlined_call_operand.hbm [shape: f32[2,1,32], index: 23, kind: input, shape index: {}]   ;;  %s12865_s24 = inlined_call_operand.hbm [shape: f32[2,1,32], index: 24, kind: input, shape index: {}]   ;;  %s12866_s25 = inlined_call_operand.hbm [shape: bf16[32,32], index: 25, kind: input, shape index: {}]   ;;  %s12867_s26 = inlined_call_operand.hbm [shape: f32[1,32], index: 26, kind: input, shape index: {}]   ;;  %s12868_s27 = inlined_call_operand.vmem [shape: f32[1,4,32], index: 27, kind: output, shape index: {}]  }
   0x1   :  { %12887 = sst [smem:[#allocation49_spill]] %s12841_s0 }
   0x2   :  { %12888 = sst [smem:[#allocation50_spill]] %s12842_s1 }
   0x3   :  { %12889 = sst [smem:[#allocation51_spill]] %s12843_s2 }
   0x4   :  { %12890 = sst [smem:[#allocation52_spill]] %s12844_s3 }
   0x5   :  { %12891 = sst [smem:[#allocation53_spill]] %s12845_s4 }
   0x6   :  { %12892 = sst [smem:[#allocation54_spill]] %s12846_s5 }
   0x7   :  { %12893 = sst [smem:[#allocation55_spill]] %s12847_s6 }
   0x8   :  { %12894 = sst [smem:[#allocation56_spill]] %s12848_s7 }
   0x9   :  { %12895 = sst [smem:[#allocation57_spill]] %s12849_s8 }
   0xa   :  { %12896 = sst [smem:[#allocation58_spill]] %s12850_s9 }
   0xb   :  { %12897 = sst [smem:[#allocation59_spill]] %s12851_s10 }
   0xc   :  { %12898 = sst [smem:[#allocation60_spill]] %s12852_s11 }
   0xd   :  { %12899 = sst [smem:[#allocation61_spill]] %s12862_s21 }
   0xe   :  { %12900 = sst [smem:[#allocation62_spill]] %s12867_s26 }
   0xf   :  { %12901 = sst [smem:[#allocation63_spill]] %s12868_s27 }
  0x10   :  { %32 = vsyncpa [#allocation3], 0 }
  0x11   :  { %33 = vsyncpa [#allocation5], 0 }
  0x12   :  { %34 = vsyncpa [#allocation8], 0 }
  0x13   :  { %35 = vsyncpa [#allocation11], 0 }
  0x14   :  { %36 = vsyncpa [#allocation14], 0 }
  0x15   :  { %37 = vsyncpa [#allocation17], 0 }
  0x16   :  { %38 = vsyncpa [#allocation20], 0 }
  0x17   :  { %39 = vsyncpa [#allocation23], 0 }
  0x18   :  { %40 = vsyncpa [#allocation26], 0 }
  0x19   :  { %41 = vsyncpa [#allocation29], 0 }
  0x1a   :  { %42 = vsyncpa [#allocation32], 0 }
  0x1b   :  { %43 = vsyncpa [#allocation35], 0  ;;  %s11204_s7 = smov [#allocation4]   ;;  %s11205_s8 = smov [#allocation7]  }
  0x1c   :  { %s63_s4 = sshll.u32 %s11204_s7, 4  ;;  %s87_s30 = sshll.u32 %s11205_s8, 4  ;;  %s64_s4 = int_to_ptr.vmem [resolvable:$true] %s63_s4  ;;  %s11387_s30 = int_to_ptr.vmem [resolvable:$true] %s87_s30 }
  0x1d   :  { %s12902_s28 = sld [smem:[#allocation51_spill]] }
  0x23   :  { %s10674_s0 = scalar_lea.hbm %s12902_s28, 768 }
  0x24   :  { %p10675_p0 = scmp.ne.s32.totalorder %s12902_s28, %s10674_s0  ;;  %p10678_p1 = scmp.lt.u32.totalorder %s10674_s0, %s12902_s28 }
  0x26   :  { %p10680_p2 = pnand %p10678_p1, %p10675_p0 }
  0x28   :  { %10683 = shalt.err (!%p10680_p2)
}
  0x29   :  { %s10684_s11 = scalar_lea.vmem %s64_s4, 768  ;;  %p10689_p4 = scmp.lt.s32.totalorder %s64_s4, %s64_s4 }
  0x2a   :  { %p10685_p3 = scmp.ne.s32.totalorder %s64_s4, %s10684_s11  ;;  %p10690_p5 = scmp.lt.s32.totalorder %s10684_s11, %s10684_s11 }
  0x2c   :  { %p10691_p6 = por %p10690_p5, %p10689_p4 }
  0x2e   :  { %p10692_p7 = pnand %p10691_p6, %p10685_p3 }
  0x30   :  { %10695 = shalt.err (!%p10692_p7)
}
  0x31   :  { %s12881_s2 = smov 64   ;;  %s12883_s3 = smov 4  }
  0x32   :  { %69 = dma.hbm_to_vmem [thread:$0]  %s12902_s28, 768, %s64_s4, [#allocation5], %s12881_s2, %s12881_s2, %s12883_s3  }
  0x33   :  { %s12903_s0 = sld [smem:[#allocation53_spill]] }
  0x39   :  { %s10696_s10 = scalar_lea.hbm %s12903_s0, 2560 }
  0x3a   :  { %p10697_p8 = scmp.ne.s32.totalorder %s12903_s0, %s10696_s10  ;;  %p10700_p9 = scmp.lt.u32.totalorder %s10696_s10, %s12903_s0 }
  0x3c   :  { %p10702_p10 = pnand %p10700_p9, %p10697_p8 }
  0x3e   :  { %10705 = shalt.err (!%p10702_p10)
}
  0x3f   :  { %s10706_s27 = scalar_lea.vmem %s11387_s30, 2560  ;;  %p10711_p12 = scmp.lt.s32.totalorder %s11387_s30, %s11387_s30 }
  0x40   :  { %p10707_p11 = scmp.ne.s32.totalorder %s11387_s30, %s10706_s27  ;;  %p10712_p13 = scmp.lt.s32.totalorder %s10706_s27, %s10706_s27 }
  0x42   :  { %p10713_p0 = por %p10712_p13, %p10711_p12 }
  0x44   :  { %p10714_p1 = pnand %p10713_p0, %p10707_p11 }
  0x46   :  { %10717 = shalt.err (!%p10714_p1)
}
  0x47   :  { %s11208_s4 = smov 128   ;;  %s11209_s28 = smov 8  }
  0x48   :  { %93 = dma.hbm_to_vmem [thread:$0]  %s12903_s0, 2560, %s11387_s30, [#allocation8], %s11208_s4, %s11208_s4, %s11209_s28  }
  0x49   :  { %s11210_s9 = smov [#allocation10]   ;;  %s11211_s10 = smov [#allocation13]  }
  0x4a   :  { %s109_s5 = sshll.u32 %s11210_s9, 4  ;;  %s134_s29 = sshll.u32 %s11211_s10, 4  ;;  %s110_s5 = int_to_ptr.vmem [resolvable:$true] %s109_s5  ;;  %s135_s29 = int_to_ptr.vmem [resolvable:$true] %s134_s29 }
  0x4b   :  { %s12904_s6 = sld [smem:[#allocation55_spill]] }
  0x51   :  { %s10718_s11 = scalar_lea.hbm %s12904_s6, 40960 }
  0x52   :  { %p10719_p2 = scmp.ne.s32.totalorder %s12904_s6, %s10718_s11  ;;  %p10722_p3 = scmp.lt.u32.totalorder %s10718_s11, %s12904_s6 }
  0x54   :  { %p10724_p4 = pnand %p10722_p3, %p10719_p2 }
  0x56   :  { %10727 = shalt.err (!%p10724_p4)
}
  0x57   :  { %s10728_s30 = scalar_lea.vmem %s110_s5, 40960  ;;  %p10733_p6 = scmp.lt.s32.totalorder %s110_s5, %s110_s5 }
  0x58   :  { %p10729_p5 = scmp.ne.s32.totalorder %s110_s5, %s10728_s30  ;;  %p10734_p7 = scmp.lt.s32.totalorder %s10728_s30, %s10728_s30 }
  0x5a   :  { %p10735_p8 = por %p10734_p7, %p10733_p6 }
  0x5c   :  { %p10736_p9 = pnand %p10735_p8, %p10729_p5 }
  0x5e   :  { %10739 = shalt.err (!%p10736_p9)
}
  0x5f   :  { %115 = dma.hbm_to_vmem [thread:$0]  %s12904_s6, 40960, %s110_s5, [#allocation11], %s11208_s4, %s11208_s4, %s11209_s28  }
  0x60   :  { %s12905_s21 = sld [smem:[#allocation58_spill]] }
  0x66   :  { %s10740_s26 = scalar_lea.hbm %s12905_s21, 64 }
  0x67   :  { %p10741_p10 = scmp.ne.s32.totalorder %s12905_s21, %s10740_s26  ;;  %p10744_p11 = scmp.lt.u32.totalorder %s10740_s26, %s12905_s21 }
  0x69   :  { %p10746_p12 = pnand %p10744_p11, %p10741_p10 }
  0x6b   :  { %10749 = shalt.err (!%p10746_p12)
}
  0x6c   :  { %s10750_s1 = scalar_lea.vmem %s135_s29, 64  ;;  %p10755_p0 = scmp.lt.s32.totalorder %s135_s29, %s135_s29 }
  0x6d   :  { %p10751_p13 = scmp.ne.s32.totalorder %s135_s29, %s10750_s1  ;;  %p10756_p1 = scmp.lt.s32.totalorder %s10750_s1, %s10750_s1 }
  0x6f   :  { %p10757_p2 = por %p10756_p1, %p10755_p0 }
  0x71   :  { %p10758_p3 = pnand %p10757_p2, %p10751_p13 }
  0x73   :  { %10761 = shalt.err (!%p10758_p3)
}
  0x74   :  { %137 = dma.hbm_to_vmem [thread:$0]  %s12905_s21, 64, %s135_s29, [#allocation14]  }
  0x75   :  { %s11212_s11 = smov [#allocation16]   ;;  %s11213_s0 = smov [#allocation19]  }
  0x76   :  { %s158_s30 = sshll.u32 %s11212_s11, 4  ;;  %s179_s7 = sshll.u32 %s11213_s0, 4  ;;  %s159_s30 = int_to_ptr.vmem [resolvable:$true] %s158_s30  ;;  %s11451_s7 = int_to_ptr.vmem [resolvable:$true] %s179_s7 }
  0x77   :  { %s10762_s26 = scalar_lea.hbm %s12853_s12, 64 }
  0x78   :  { %p10763_p4 = scmp.ne.s32.totalorder %s12853_s12, %s10762_s26  ;;  %p10766_p5 = scmp.lt.u32.totalorder %s10762_s26, %s12853_s12 }
  0x7a   :  { %p10768_p6 = pnand %p10766_p5, %p10763_p4 }
  0x7c   :  { %10771 = shalt.err (!%p10768_p6)
}
  0x7d   :  { %s10772_s29 = scalar_lea.vmem %s159_s30, 64  ;;  %p10777_p8 = scmp.lt.s32.totalorder %s159_s30, %s159_s30 }
  0x7e   :  { %p10773_p7 = scmp.ne.s32.totalorder %s159_s30, %s10772_s29  ;;  %p10778_p9 = scmp.lt.s32.totalorder %s10772_s29, %s10772_s29 }
  0x80   :  { %p10779_p10 = por %p10778_p9, %p10777_p8 }
  0x82   :  { %p10780_p11 = pnand %p10779_p10, %p10773_p7 }
  0x84   :  { %10783 = shalt.err (!%p10780_p11)
}
  0x85   :  { %161 = dma.hbm_to_vmem [thread:$0]  %s12853_s12, 64, %s159_s30, [#allocation17]  }
  0x86   :  { %s10784_s11 = scalar_lea.hbm %s12855_s14, 32 }
  0x87   :  { %p10785_p12 = scmp.ne.s32.totalorder %s12855_s14, %s10784_s11  ;;  %p10788_p13 = scmp.lt.u32.totalorder %s10784_s11, %s12855_s14 }
  0x89   :  { %p10790_p0 = pnand %p10788_p13, %p10785_p12 }
  0x8b   :  { %10793 = shalt.err (!%p10790_p0)
}
  0x8c   :  { %s10794_s8 = scalar_lea.vmem %s11451_s7, 32  ;;  %p10799_p2 = scmp.lt.s32.totalorder %s11451_s7, %s11451_s7 }
  0x8d   :  { %p10795_p1 = scmp.ne.s32.totalorder %s11451_s7, %s10794_s8  ;;  %p10800_p3 = scmp.lt.s32.totalorder %s10794_s8, %s10794_s8 }
  0x8f   :  { %p10801_p4 = por %p10800_p3, %p10799_p2 }
  0x91   :  { %p10802_p5 = pnand %p10801_p4, %p10795_p1 }
  0x93   :  { %10805 = shalt.err (!%p10802_p5)
}
  0x94   :  { %s11214_s12 = smov 16   ;;  %s11215_s30 = smov 1  }
  0x95   :  { %185 = dma.hbm_to_vmem [thread:$0]  %s12855_s14, 32, %s11451_s7, [#allocation20], %s11214_s12, %s11214_s12, %s11215_s30  }
  0x96   :  { %s11216_s27 = smov [#allocation22]   ;;  %s11217_s21 = smov [#allocation25]  }
  0x97   :  { %s203_s29 = sshll.u32 %s11216_s27, 4  ;;  %s227_s1 = sshll.u32 %s11217_s21, 4  ;;  %s204_s29 = int_to_ptr.vmem [resolvable:$true] %s203_s29  ;;  %s11485_s1 = int_to_ptr.vmem [resolvable:$true] %s227_s1 }
  0x98   :  { %s10806_s11 = scalar_lea.hbm %s12857_s16, 32 }
  0x99   :  { %p10807_p6 = scmp.ne.s32.totalorder %s12857_s16, %s10806_s11  ;;  %p10810_p7 = scmp.lt.u32.totalorder %s10806_s11, %s12857_s16 }
  0x9b   :  { %p10812_p8 = pnand %p10810_p7, %p10807_p6 }
  0x9d   :  { %10815 = shalt.err (!%p10812_p8)
}
  0x9e   :  { %s10816_s14 = scalar_lea.vmem %s204_s29, 32  ;;  %p10821_p10 = scmp.lt.s32.totalorder %s204_s29, %s204_s29 }
  0x9f   :  { %p10817_p9 = scmp.ne.s32.totalorder %s204_s29, %s10816_s14  ;;  %p10822_p11 = scmp.lt.s32.totalorder %s10816_s14, %s10816_s14 }
  0xa1   :  { %p10823_p12 = por %p10822_p11, %p10821_p10 }
  0xa3   :  { %p10824_p13 = pnand %p10823_p12, %p10817_p9 }
  0xa5   :  { %10827 = shalt.err (!%p10824_p13)
}
  0xa6   :  { %209 = dma.hbm_to_vmem [thread:$0]  %s12857_s16, 32, %s204_s29, [#allocation23], %s11214_s12, %s11214_s12, %s11215_s30  }
  0xa7   :  { %s10828_s27 = scalar_lea.hbm %s12859_s18, 32 }
  0xa8   :  { %p10829_p0 = scmp.ne.s32.totalorder %s12859_s18, %s10828_s27  ;;  %p10832_p1 = scmp.lt.u32.totalorder %s10828_s27, %s12859_s18 }
  0xaa   :  { %p10834_p2 = pnand %p10832_p1, %p10829_p0 }
  0xac   :  { %10837 = shalt.err (!%p10834_p2)
}
  0xad   :  { %s10838_s0 = scalar_lea.vmem %s11485_s1, 32  ;;  %p10843_p4 = scmp.lt.s32.totalorder %s11485_s1, %s11485_s1 }
  0xae   :  { %p10839_p3 = scmp.ne.s32.totalorder %s11485_s1, %s10838_s0  ;;  %p10844_p5 = scmp.lt.s32.totalorder %s10838_s0, %s10838_s0 }
  0xb0   :  { %p10845_p6 = por %p10844_p5, %p10843_p4 }
  0xb2   :  { %p10846_p7 = pnand %p10845_p6, %p10839_p3 }
  0xb4   :  { %10849 = shalt.err (!%p10846_p7)
}
  0xb5   :  { %233 = dma.hbm_to_vmem [thread:$0]  %s12859_s18, 32, %s11485_s1, [#allocation26], %s11214_s12, %s11214_s12, %s11215_s30  }
  0xb6   :  { %s11218_s2 = smov [#allocation28]   ;;  %s11219_s26 = smov [#allocation31]  }
  0xb7   :  { %s251_s3 = sshll.u32 %s11218_s2, 4  ;;  %s277_s14 = sshll.u32 %s11219_s26, 4  ;;  %s252_s3 = int_to_ptr.vmem [resolvable:$true] %s251_s3  ;;  %s11522_s14 = int_to_ptr.vmem [resolvable:$true] %s277_s14 }
  0xb8   :  { %s10850_s9 = scalar_lea.hbm %s12861_s20, 32 }
  0xb9   :  { %p10851_p8 = scmp.ne.s32.totalorder %s12861_s20, %s10850_s9  ;;  %p10854_p9 = scmp.lt.u32.totalorder %s10850_s9, %s12861_s20 }
  0xbb   :  { %p10856_p10 = pnand %p10854_p9, %p10851_p8 }
  0xbd   :  { %10859 = shalt.err (!%p10856_p10)
}
  0xbe   :  { %s10860_s18 = scalar_lea.vmem %s252_s3, 32  ;;  %p10865_p12 = scmp.lt.s32.totalorder %s252_s3, %s252_s3 }
  0xbf   :  { %p10861_p11 = scmp.ne.s32.totalorder %s252_s3, %s10860_s18  ;;  %p10866_p13 = scmp.lt.s32.totalorder %s10860_s18, %s10860_s18 }
  0xc1   :  { %p10867_p0 = por %p10866_p13, %p10865_p12 }
  0xc3   :  { %p10868_p1 = pnand %p10867_p0, %p10861_p11 }
  0xc5   :  { %10871 = shalt.err (!%p10868_p1)
}
  0xc6   :  { %257 = dma.hbm_to_vmem [thread:$0]  %s12861_s20, 32, %s252_s3, [#allocation29], %s11214_s12, %s11214_s12, %s11215_s30  }
  0xc7   :  { %s10872_s16 = scalar_lea.hbm %s12864_s23, 32 }
  0xc8   :  { %p10873_p2 = scmp.ne.s32.totalorder %s12864_s23, %s10872_s16  ;;  %p10876_p3 = scmp.lt.u32.totalorder %s10872_s16, %s12864_s23 }
  0xca   :  { %p10878_p4 = pnand %p10876_p3, %p10873_p2 }
  0xcc   :  { %10881 = shalt.err (!%p10878_p4)
}
  0xcd   :  { %s10882_s8 = scalar_lea.vmem %s11522_s14, 32  ;;  %p10887_p6 = scmp.lt.s32.totalorder %s11522_s14, %s11522_s14 }
  0xce   :  { %p10883_p5 = scmp.ne.s32.totalorder %s11522_s14, %s10882_s8  ;;  %p10888_p7 = scmp.lt.s32.totalorder %s10882_s8, %s10882_s8 }
  0xd0   :  { %p10889_p8 = por %p10888_p7, %p10887_p6 }
  0xd2   :  { %p10890_p9 = pnand %p10889_p8, %p10883_p5 }
  0xd4   :  { %10893 = shalt.err (!%p10890_p9)
}
  0xd5   :  { %283 = dma.hbm_to_vmem [thread:$0]  %s12864_s23, 32, %s11522_s14, [#allocation32], %s11214_s12, %s11214_s12, %s11215_s30  }
  0xd6   :  { %s11220_s9 = smov [#allocation34]   ;;  %s11221_s27 = smov [#allocation2]  }
  0xd7   :  { %s301_s10 = sshll.u32 %s11220_s9, 4  ;;  %s51_s21 = sshll.u32 %s11221_s27, 4  ;;  %s302_s10 = int_to_ptr.vmem [resolvable:$true] %s301_s10  ;;  %s11559_s21 = int_to_ptr.vmem [resolvable:$true] %s51_s21 }
  0xd8   :  { %s10894_s1 = scalar_lea.hbm %s12866_s25, 256 }
  0xd9   :  { %p10895_p10 = scmp.ne.s32.totalorder %s12866_s25, %s10894_s1  ;;  %p10898_p11 = scmp.lt.u32.totalorder %s10894_s1, %s12866_s25 }
  0xdb   :  { %p10900_p12 = pnand %p10898_p11, %p10895_p10 }
  0xdd   :  { %10903 = shalt.err (!%p10900_p12)
}
  0xde   :  { %s10904_s23 = scalar_lea.vmem %s302_s10, 256  ;;  %p10909_p0 = scmp.lt.s32.totalorder %s302_s10, %s302_s10 }
  0xdf   :  { %p10905_p13 = scmp.ne.s32.totalorder %s302_s10, %s10904_s23  ;;  %p10910_p1 = scmp.lt.s32.totalorder %s10904_s23, %s10904_s23 }
  0xe1   :  { %p10911_p2 = por %p10910_p1, %p10909_p0 }
  0xe3   :  { %p10912_p3 = pnand %p10911_p2, %p10905_p13 }
  0xe5   :  { %10915 = shalt.err (!%p10912_p3)
}
  0xe6   :  { %s12906_s14 = smov 4   ;;  %s12907_s29 = smov 64  }
  0xe7   :  { %307 = dma.hbm_to_vmem [thread:$0]  %s12866_s25, 256, %s302_s10, [#allocation35], %s12907_s29, %s12907_s29, %s12906_s14  }
  0xe8   :  { %s12908_s20 = sld [smem:[#allocation50_spill]] }
  0xee   :  { %s10916_s3 = scalar_lea.hbm %s12908_s20, 1536 }
  0xef   :  { %p10917_p4 = scmp.ne.s32.totalorder %s12908_s20, %s10916_s3  ;;  %p10920_p5 = scmp.lt.u32.totalorder %s10916_s3, %s12908_s20 }
  0xf1   :  { %p10922_p6 = pnand %p10920_p5, %p10917_p4 }
  0xf3   :  { %10925 = shalt.err (!%p10922_p6)
}
  0xf4   :  { %s10926_s1 = scalar_lea.vmem %s11559_s21, 1536  ;;  %p10931_p8 = scmp.lt.s32.totalorder %s11559_s21, %s11559_s21 }
  0xf5   :  { %p10927_p7 = scmp.ne.s32.totalorder %s11559_s21, %s10926_s1  ;;  %p10932_p9 = scmp.lt.s32.totalorder %s10926_s1, %s10926_s1 }
  0xf7   :  { %p10933_p10 = por %p10932_p9, %p10931_p8 }
  0xf9   :  { %p10934_p11 = pnand %p10933_p10, %p10927_p7 }
  0xfb   :  { %10937 = shalt.err (!%p10934_p11)
}
  0xfc   :  { %57 = dma.hbm_to_vmem [thread:$0]  %s12908_s20, 1536, %s11559_s21, [#allocation3], %s12907_s29, %s12907_s29, %s12906_s14  }
  0xfd   :  { %s11222_s6 = smov [#allocation6]   ;;  %s11223_s0 = smov [#allocation9]  }
  0xfe   :  { %s75_s11 = sshll.u32 %s11222_s6, 4  ;;  %s100_s16 = sshll.u32 %s11223_s0, 4  ;;  %s76_s11 = int_to_ptr.vmem [resolvable:$true] %s75_s11  ;;  %s101_s16 = int_to_ptr.vmem [resolvable:$true] %s100_s16 }
  0xff   :  { %s12909_s26 = sld [smem:[#allocation52_spill]] }
 0x105   :  { %s10938_s7 = scalar_lea.hbm %s12909_s26, 384 }
 0x106   :  { %p10939_p12 = scmp.ne.s32.totalorder %s12909_s26, %s10938_s7  ;;  %p10942_p13 = scmp.lt.u32.totalorder %s10938_s7, %s12909_s26 }
 0x108   :  { %p10944_p0 = pnand %p10942_p13, %p10939_p12 }
 0x10a   :  { %10947 = shalt.err (!%p10944_p0)
}
 0x10b   :  { %s10948_s21 = scalar_lea.vmem %s76_s11, 384  ;;  %p10953_p2 = scmp.lt.s32.totalorder %s76_s11, %s76_s11 }
 0x10c   :  { %p10949_p1 = scmp.ne.s32.totalorder %s76_s11, %s10948_s21  ;;  %p10954_p3 = scmp.lt.s32.totalorder %s10948_s21, %s10948_s21 }
 0x10e   :  { %p10955_p4 = por %p10954_p3, %p10953_p2 }
 0x110   :  { %p10956_p5 = pnand %p10955_p4, %p10949_p1 }
 0x112   :  { %10959 = shalt.err (!%p10956_p5)
}
 0x113   :  { %81 = dma.hbm_to_vmem [thread:$0]  %s12909_s26, 384, %s76_s11, [#allocation5], %s12907_s29, %s12907_s29, %s12906_s14  }
 0x114   :  { %s12910_s25 = sld [smem:[#allocation54_spill]] }
 0x11a   :  { %s10960_s10 = scalar_lea.hbm %s12910_s25, 128 }
 0x11b   :  { %p10961_p6 = scmp.ne.s32.totalorder %s12910_s25, %s10960_s10  ;;  %p10964_p7 = scmp.lt.u32.totalorder %s10960_s10, %s12910_s25 }
 0x11d   :  { %p10966_p8 = pnand %p10964_p7, %p10961_p6 }
 0x11f   :  { %10969 = shalt.err (!%p10966_p8)
}
 0x120   :  { %s10970_s7 = scalar_lea.vmem %s101_s16, 128  ;;  %p10975_p10 = scmp.lt.s32.totalorder %s101_s16, %s101_s16 }
 0x121   :  { %p10971_p9 = scmp.ne.s32.totalorder %s101_s16, %s10970_s7  ;;  %p10976_p11 = scmp.lt.s32.totalorder %s10970_s7, %s10970_s7 }
 0x123   :  { %p10977_p12 = por %p10976_p11, %p10975_p10 }
 0x125   :  { %p10978_p13 = pnand %p10977_p12, %p10971_p9 }
 0x127   :  { %10981 = shalt.err (!%p10978_p13)
}
 0x128   :  { %103 = dma.hbm_to_vmem [thread:$0]  %s12910_s25, 128, %s101_s16, [#allocation8]  }
 0x129   :  { %s11224_s8 = smov [#allocation12]   ;;  %s11225_s9 = smov [#allocation15]  }
 0x12a   :  { %s122_s3 = sshll.u32 %s11224_s8, 4  ;;  %s145_s27 = sshll.u32 %s11225_s9, 4  ;;  %s123_s3 = int_to_ptr.vmem [resolvable:$true] %s122_s3  ;;  %s11623_s27 = int_to_ptr.vmem [resolvable:$true] %s145_s27 }
 0x12b   :  { %s12911_s5 = sld [smem:[#allocation56_spill]] }
 0x131   :  { %s10982_s18 = scalar_lea.hbm %s12911_s5, 128 }
 0x132   :  { %p10983_p0 = scmp.ne.s32.totalorder %s12911_s5, %s10982_s18  ;;  %p10986_p1 = scmp.lt.u32.totalorder %s10982_s18, %s12911_s5 }
 0x134   :  { %p10988_p2 = pnand %p10986_p1, %p10983_p0 }
 0x136   :  { %10991 = shalt.err (!%p10988_p2)
}
 0x137   :  { %s10992_s16 = scalar_lea.vmem %s123_s3, 128  ;;  %p10997_p4 = scmp.lt.s32.totalorder %s123_s3, %s123_s3 }
 0x138   :  { %p10993_p3 = scmp.ne.s32.totalorder %s123_s3, %s10992_s16  ;;  %p10998_p5 = scmp.lt.s32.totalorder %s10992_s16, %s10992_s16 }
 0x13a   :  { %p10999_p6 = por %p10998_p5, %p10997_p4 }
 0x13c   :  { %p11000_p7 = pnand %p10999_p6, %p10993_p3 }
 0x13e   :  { %11003 = shalt.err (!%p11000_p7)
}
 0x13f   :  { %125 = dma.hbm_to_vmem [thread:$0]  %s12911_s5, 128, %s123_s3, [#allocation11]  }
 0x140   :  { %s12912_s11 = sld [smem:[#allocation60_spill]] }
 0x146   :  { %s11004_s26 = scalar_lea.hbm %s12912_s11, 256 }
 0x147   :  { %p11005_p8 = scmp.ne.s32.totalorder %s12912_s11, %s11004_s26  ;;  %p11008_p9 = scmp.lt.u32.totalorder %s11004_s26, %s12912_s11 }
 0x149   :  { %p11010_p10 = pnand %p11008_p9, %p11005_p8 }
 0x14b   :  { %11013 = shalt.err (!%p11010_p10)
}
 0x14c   :  { %s11014_s18 = scalar_lea.vmem %s11623_s27, 256  ;;  %p11019_p12 = scmp.lt.s32.totalorder %s11623_s27, %s11623_s27 }
 0x14d   :  { %p11015_p11 = scmp.ne.s32.totalorder %s11623_s27, %s11014_s18  ;;  %p11020_p13 = scmp.lt.s32.totalorder %s11014_s18, %s11014_s18 }
 0x14f   :  { %p11021_p0 = por %p11020_p13, %p11019_p12 }
 0x151   :  { %p11022_p1 = pnand %p11021_p0, %p11015_p11 }
 0x153   :  { %11025 = shalt.err (!%p11022_p1)
}
 0x154   :  { %151 = dma.hbm_to_vmem [thread:$0]  %s12912_s11, 256, %s11623_s27, [#allocation14], %s11208_s4, %s11208_s4, %s11209_s28  }
 0x155   :  { %s11226_s1 = smov [#allocation18]   ;;  %s11227_s6 = smov [#allocation21]  }
 0x156   :  { %s167_s10 = sshll.u32 %s11226_s1, 4  ;;  %s191_s0 = sshll.u32 %s11227_s6, 4  ;;  %s168_s10 = int_to_ptr.vmem [resolvable:$true] %s167_s10  ;;  %s11657_s0 = int_to_ptr.vmem [resolvable:$true] %s191_s0 }
 0x157   :  { %s11026_s23 = scalar_lea.hbm %s12854_s13, 512 }
 0x158   :  { %p11027_p2 = scmp.ne.s32.totalorder %s12854_s13, %s11026_s23  ;;  %p11030_p3 = scmp.lt.u32.totalorder %s11026_s23, %s12854_s13 }
 0x15a   :  { %p11032_p4 = pnand %p11030_p3, %p11027_p2 }
 0x15c   :  { %11035 = shalt.err (!%p11032_p4)
}
 0x15d   :  { %s11036_s4 = scalar_lea.vmem %s168_s10, 512  ;;  %p11041_p6 = scmp.lt.s32.totalorder %s168_s10, %s168_s10 }
 0x15e   :  { %p11037_p5 = scmp.ne.s32.totalorder %s168_s10, %s11036_s4  ;;  %p11042_p7 = scmp.lt.s32.totalorder %s11036_s4, %s11036_s4 }
 0x160   :  { %p11043_p8 = por %p11042_p7, %p11041_p6 }
 0x162   :  { %p11044_p9 = pnand %p11043_p8, %p11037_p5 }
 0x164   :  { %11047 = shalt.err (!%p11044_p9)
}
 0x165   :  { %173 = dma.hbm_to_vmem [thread:$0]  %s12854_s13, 512, %s168_s10, [#allocation17], %s12907_s29, %s12907_s29, %s12906_s14  }
 0x166   :  { %s11048_s21 = scalar_lea.hbm %s12856_s15, 512 }
 0x167   :  { %p11049_p10 = scmp.ne.s32.totalorder %s12856_s15, %s11048_s21  ;;  %p11052_p11 = scmp.lt.u32.totalorder %s11048_s21, %s12856_s15 }
 0x169   :  { %p11054_p12 = pnand %p11052_p11, %p11049_p10 }
 0x16b   :  { %11057 = shalt.err (!%p11054_p12)
}
 0x16c   :  { %s11058_s1 = scalar_lea.vmem %s11657_s0, 512  ;;  %p11063_p0 = scmp.lt.s32.totalorder %s11657_s0, %s11657_s0 }
 0x16d   :  { %p11059_p13 = scmp.ne.s32.totalorder %s11657_s0, %s11058_s1  ;;  %p11064_p1 = scmp.lt.s32.totalorder %s11058_s1, %s11058_s1 }
 0x16f   :  { %p11065_p2 = por %p11064_p1, %p11063_p0 }
 0x171   :  { %p11066_p3 = pnand %p11065_p2, %p11059_p13 }
 0x173   :  { %11069 = shalt.err (!%p11066_p3)
}
 0x174   :  { %197 = dma.hbm_to_vmem [thread:$0]  %s12856_s15, 512, %s11657_s0, [#allocation20], %s12907_s29, %s12907_s29, %s12906_s14  }
 0x175   :  { %s11228_s6 = smov [#allocation24]   ;;  %s11229_s25 = smov [#allocation27]  }
 0x176   :  { %s215_s16 = sshll.u32 %s11228_s6, 4  ;;  %s239_s23 = sshll.u32 %s11229_s25, 4  ;;  %s216_s16 = int_to_ptr.vmem [resolvable:$true] %s215_s16  ;;  %s11694_s23 = int_to_ptr.vmem [resolvable:$true] %s239_s23 }
 0x177   :  { %s11070_s26 = scalar_lea.hbm %s12858_s17, 32 }
 0x178   :  { %p11071_p4 = scmp.ne.s32.totalorder %s12858_s17, %s11070_s26  ;;  %p11074_p5 = scmp.lt.u32.totalorder %s11070_s26, %s12858_s17 }
 0x17a   :  { %p11076_p6 = pnand %p11074_p5, %p11071_p4 }
 0x17c   :  { %11079 = shalt.err (!%p11076_p6)
}
 0x17d   :  { %s11080_s15 = scalar_lea.vmem %s216_s16, 32  ;;  %p11085_p8 = scmp.lt.s32.totalorder %s216_s16, %s216_s16 }
 0x17e   :  { %p11081_p7 = scmp.ne.s32.totalorder %s216_s16, %s11080_s15  ;;  %p11086_p9 = scmp.lt.s32.totalorder %s11080_s15, %s11080_s15 }
 0x180   :  { %p11087_p10 = por %p11086_p9, %p11085_p8 }
 0x182   :  { %p11088_p11 = pnand %p11087_p10, %p11081_p7 }
 0x184   :  { %11091 = shalt.err (!%p11088_p11)
}
 0x185   :  { %221 = dma.hbm_to_vmem [thread:$0]  %s12858_s17, 32, %s216_s16, [#allocation23], %s11214_s12, %s11214_s12, %s11215_s30  }
 0x186   :  { %s11092_s20 = scalar_lea.hbm %s12860_s19, 512 }
 0x187   :  { %p11093_p12 = scmp.ne.s32.totalorder %s12860_s19, %s11092_s20  ;;  %p11096_p13 = scmp.lt.u32.totalorder %s11092_s20, %s12860_s19 }
 0x189   :  { %p11098_p0 = pnand %p11096_p13, %p11093_p12 }
 0x18b   :  { %11101 = shalt.err (!%p11098_p0)
}
 0x18c   :  { %s11102_s13 = scalar_lea.vmem %s11694_s23, 512  ;;  %p11107_p2 = scmp.lt.s32.totalorder %s11694_s23, %s11694_s23 }
 0x18d   :  { %p11103_p1 = scmp.ne.s32.totalorder %s11694_s23, %s11102_s13  ;;  %p11108_p3 = scmp.lt.s32.totalorder %s11102_s13, %s11102_s13 }
 0x18f   :  { %p11109_p4 = por %p11108_p3, %p11107_p2 }
 0x191   :  { %p11110_p5 = pnand %p11109_p4, %p11103_p1 }
 0x193   :  { %11113 = shalt.err (!%p11110_p5)
}
 0x194   :  { %245 = dma.hbm_to_vmem [thread:$0]  %s12860_s19, 512, %s11694_s23, [#allocation26], %s12907_s29, %s12907_s29, %s12906_s14  }
 0x195   :  { %s11230_s6 = smov [#allocation30]   ;;  %s11231_s25 = smov [#allocation33]  }
 0x196   :  { %s265_s16 = sshll.u32 %s11230_s6, 4  ;;  %s289_s2 = sshll.u32 %s11231_s25, 4  ;;  %s266_s16 = int_to_ptr.vmem [resolvable:$true] %s265_s16  ;;  %s11731_s2 = int_to_ptr.vmem [resolvable:$true] %s289_s2 }
 0x197   :  { %s11114_s8 = scalar_lea.hbm %s12863_s22, 32 }
 0x198   :  { %p11115_p6 = scmp.ne.s32.totalorder %s12863_s22, %s11114_s8  ;;  %p11118_p7 = scmp.lt.u32.totalorder %s11114_s8, %s12863_s22 }
 0x19a   :  { %p11120_p8 = pnand %p11118_p7, %p11115_p6 }
 0x19c   :  { %11123 = shalt.err (!%p11120_p8)
}
 0x19d   :  { %s11124_s19 = scalar_lea.vmem %s266_s16, 32  ;;  %p11129_p10 = scmp.lt.s32.totalorder %s266_s16, %s266_s16 }
 0x19e   :  { %p11125_p9 = scmp.ne.s32.totalorder %s266_s16, %s11124_s19  ;;  %p11130_p11 = scmp.lt.s32.totalorder %s11124_s19, %s11124_s19 }
 0x1a0   :  { %p11131_p12 = por %p11130_p11, %p11129_p10 }
 0x1a2   :  { %p11132_p13 = pnand %p11131_p12, %p11125_p9 }
 0x1a4   :  { %11135 = shalt.err (!%p11132_p13)
}
 0x1a5   :  { %271 = dma.hbm_to_vmem [thread:$0]  %s12863_s22, 32, %s266_s16, [#allocation29], %s11214_s12, %s11214_s12, %s11215_s30  }
 0x1a6   :  { %s11136_s9 = scalar_lea.hbm %s12865_s24, 32 }
 0x1a7   :  { %p11137_p0 = scmp.ne.s32.totalorder %s12865_s24, %s11136_s9  ;;  %p11140_p1 = scmp.lt.u32.totalorder %s11136_s9, %s12865_s24 }
 0x1a9   :  { %p11142_p2 = pnand %p11140_p1, %p11137_p0 }
 0x1ab   :  { %11145 = shalt.err (!%p11142_p2)
}
 0x1ac   :  { %s11146_s5 = scalar_lea.vmem %s11731_s2, 32  ;;  %p11151_p4 = scmp.lt.s32.totalorder %s11731_s2, %s11731_s2 }
 0x1ad   :  { %p11147_p3 = scmp.ne.s32.totalorder %s11731_s2, %s11146_s5  ;;  %p11152_p5 = scmp.lt.s32.totalorder %s11146_s5, %s11146_s5 }
 0x1af   :  { %p11153_p6 = por %p11152_p5, %p11151_p4 }
 0x1b1   :  { %p11154_p7 = pnand %p11153_p6, %p11147_p3 }
 0x1b3   :  { %11157 = shalt.err (!%p11154_p7)
}
 0x1b4   :  { %295 = dma.hbm_to_vmem [thread:$0]  %s12865_s24, 32, %s11731_s2, [#allocation32], %s11214_s12, %s11214_s12, %s11215_s30  }
 0x1b5   :  { %s11232_s13 = smov [#allocation36]   ;;  %s12913_s16 = sld [smem:[#allocation62_spill]] }
 0x1b6   :  { %s314_s17 = sshll.u32 %s11232_s13, 4  ;;  %s315_s17 = int_to_ptr.vmem [resolvable:$true] %s314_s17 }
 0x1bb   :  { %s11158_s25 = scalar_lea.hbm %s12913_s16, 16 }
 0x1bc   :  { %p11159_p8 = scmp.ne.s32.totalorder %s12913_s16, %s11158_s25  ;;  %p11162_p9 = scmp.lt.u32.totalorder %s11158_s25, %s12913_s16 }
 0x1be   :  { %p11164_p10 = pnand %p11162_p9, %p11159_p8 }
 0x1c0   :  { %11167 = shalt.err (!%p11164_p10)
}
 0x1c1   :  { %s11168_s28 = scalar_lea.vmem %s315_s17, 16  ;;  %s11172_s24 = scalar_lea.vmem %s315_s17, 32 }
 0x1c2   :  { %p11169_p11 = scmp.ne.s32.totalorder %s315_s17, %s11168_s28  ;;  %p11173_p12 = scmp.lt.s32.totalorder %s315_s17, %s315_s17 }
 0x1c3   :  { %p11174_p13 = scmp.lt.s32.totalorder %s11172_s24, %s11168_s28 }
 0x1c5   :  { %p11175_p0 = por %p11174_p13, %p11173_p12 }
 0x1c7   :  { %p11176_p1 = pnand %p11175_p0, %p11169_p11 }
 0x1c9   :  { %11179 = shalt.err (!%p11176_p1)
}
 0x1ca   :  { %317 = dma.hbm_to_vmem [thread:$0]  %s12913_s16, 16, %s315_s17, [#allocation35]  }
 0x1cb   :  { %11180 = dma.done.wait [#allocation3], 1536  }
 0x1cc   :  { %11181 = vsyncadd [#allocation3], 4294965760 }
 0x1cd   :  { %11182 = dma.done.wait [#allocation5], 1152  }
 0x1ce   :  { %11183 = vsyncadd [#allocation5], 4294966144 }
 0x1cf   :  { %11184 = dma.done.wait [#allocation8], 2688  }
 0x1d0   :  { %11185 = vsyncadd [#allocation8], 4294964608 }
 0x1d1   :  { %11186 = dma.done.wait [#allocation11], 41088  }
 0x1d2   :  { %11187 = vsyncadd [#allocation11], 4294926208 }
 0x1d3   :  { %11188 = dma.done.wait [#allocation14], 320  }
 0x1d4   :  { %11189 = vsyncadd [#allocation14], 4294966976 }
 0x1d5   :  { %11190 = dma.done.wait [#allocation17], 576  }
 0x1d6   :  { %11191 = vsyncadd [#allocation17], 4294966720 }
 0x1d7   :  { %11192 = dma.done.wait [#allocation20], 544  }
 0x1d8   :  { %11193 = vsyncadd [#allocation20], 4294966752 }
 0x1d9   :  { %11194 = dma.done.wait [#allocation23], 64  }
 0x1da   :  { %11195 = vsyncadd [#allocation23], 4294967232 }
 0x1db   :  { %11196 = dma.done.wait [#allocation26], 544  }
 0x1dc   :  { %11197 = vsyncadd [#allocation26], 4294966752 }
 0x1dd   :  { %11198 = dma.done.wait [#allocation29], 64  }
 0x1de   :  { %11199 = vsyncadd [#allocation29], 4294967232 }
 0x1df   :  { %11200 = dma.done.wait [#allocation32], 64  }
 0x1e0   :  { %11201 = vsyncadd [#allocation32], 4294967232 }
 0x1e1   :  { %11202 = dma.done.wait [#allocation35], 272  }
 0x1e2   :  { %11203 = vsyncadd [#allocation35], 4294967024  ;;  %s12914_s15 = sld [smem:[#allocation49_spill]]  ;;  %vm434_vm0 = vcmask 523264   ;;  %v9995_v3 = vld [vmem:[#allocation2] sm:$0xff]   ;;  %v9996_v4 = vld [vmem:[#allocation2 + $0x10] sm:$0xff]  }
 0x1e3   :  { %9426 = vmatprep.mubr.msk.bf16.mxu0 %vm434_vm0, %v9995_v3  ;;  %9438 = vmatprep.mubr.msk.bf16.mxu1 %vm434_vm0, %v9996_v4  ;;  %v9997_v6 = vld [vmem:[#allocation2 + $0x8] sm:$0xff]   ;;  %v9998_v7 = vld [vmem:[#allocation2 + $0x18] sm:$0xff]   ;;  %v9999_v8 = vld [vmem:[#allocation2 + $0x20] sm:$0xff]   ;;  %v11233_v18 = vmov 0   ;;  %vm869_vm1 = vcmask 130048   ;;  %vm2407_vm2 = vcmask 261120  }
 0x1e4   :  { %v10001_v9 = vld [vmem:[#allocation2 + $0x30] sm:$0xff]   ;;  %v10000_v10 = vld [vmem:[#allocation2 + $0x28] sm:$0xff]   ;;  %v10002_v11 = vld [vmem:[#allocation2 + $0x38] sm:$0xff]   ;;  %s12915_s18 = sld [smem:[#allocation57_spill]]  ;;  %vm11235_vm3 = vmmov 0   ;;  %s12916_s16 = sld [smem:[#allocation59_spill]] }
 0x1e5   :  { %v10003_v12 = vld [vmem:[#allocation2 + $0x40] sm:$0xff]   ;;  %v10005_v13 = vld [vmem:[#allocation2 + $0x50] sm:$0xff]   ;;  %v10004_v14 = vld [vmem:[#allocation2 + $0x48] sm:$0xff]   ;;  %s11236_s26 = smov 96   ;;  %s11237_s8 = smov 120   ;;  %vm6490_vm4 = vcmask 64512  }
 0x1e6   :  { %v10006_v15 = vld [vmem:[#allocation2 + $0x58] sm:$0xff]   ;;  %v10009_v16 = vld [vmem:[#allocation7 + $0x4] ss:$8 sps:$4 sm:$0xff]   ;;  %v10007_v17 = vld [vmem:[#allocation7] ss:$8 sps:$4 sm:$0xff]   ;;  %s11238_s4 = smov 88  }
 0x1e7   :  { %v10012_v19 = vld [vmem:[#allocation7 + $0x14] ss:$8 sps:$4 sm:$0xff]   ;;  %v10010_v30 = vld [vmem:[#allocation7 + $0x10] ss:$8 sps:$4 sm:$0xff]   ;;  %v10015_v33 = vld [vmem:[#allocation7 + $0x24] ss:$8 sps:$4 sm:$0xff]  }
 0x1e8   :  { %v9991_v0 = vld [vmem:[%s12914_s15] sm:$0xff]   ;;  %v11786_v1 = vld [vmem:[%s12914_s15 + $0x8] sm:$0xff]   ;;  %v11791_v2 = vld [vmem:[%s12914_s15 + $0x10] sm:$0xff]   ;;  %s11239_s28 = smov 80   ;;  %s11240_s24 = smov 112   ;;  %vm6613_vm5 = vcmask 1043456  }
 0x1e9   :  { %9418 = vmatprep.subr.bf16.mxu0 %v9991_v0  ;;  %9430 = vmatprep.subr.bf16.mxu1 %v9991_v0  ;;  %v9994_v5 = vld [vmem:[%s12914_s15 + $0x18] sm:$0xff]   ;;  %v10013_v41 = vld [vmem:[#allocation7 + $0x20] ss:$8 sps:$4 sm:$0xff]   ;;  %v10021_v58 = vld [vmem:[#allocation7 + $0x44] ss:$8 sps:$4 sm:$0xff]   ;;  %s11241_s12 = smov 56  }
 0x1ea   :  { %9419 = vmatpush3.bf16.msra.mxu0 %v9991_v0  ;;  %9431 = vmatpush3.bf16.msra.mxu1 %v9991_v0  ;;  %v10018_v47 = vld [vmem:[#allocation7 + $0x34] ss:$8 sps:$4 sm:$0xff]   ;;  %v10016_v52 = vld [vmem:[#allocation7 + $0x30] ss:$8 sps:$4 sm:$0xff]   ;;  %v10019_v62 = vld [vmem:[#allocation7 + $0x40] ss:$8 sps:$4 sm:$0xff]  }
 0x1eb   :  { %9420 = vmatprep.subr.bf16.mxu0 %v11786_v1  ;;  %9432 = vmatprep.subr.bf16.mxu1 %v11786_v1  ;;  %v10024_v63 = vld [vmem:[#allocation7 + $0x54] ss:$8 sps:$4 sm:$0xff]   ;;  %v10028_v4 = vld [vmem:[#allocation7 + $0x70] ss:$8 sps:$4 sm:$0xff]   ;;  %s11242_s30 = smov 72   ;;  %s11243_s2 = smov 104  }
 0x1ec   :  { %v10030_v3 = vld [vmem:[#allocation7 + $0x74] ss:$8 sps:$4 sm:$0xff]   ;;  %s11244_s27 = smov 48   ;;  %s11245_s15 = smov 40   ;;  %vm8606_vm6 = vcmask 257024  }
 0x1ed   :  { %s12917_s23 = sld [smem:[#allocation61_spill]]  ;;  %s12918_s25 = sld [smem:[#allocation63_spill]] }
 0x1ee   :  { %9421 = vmatpush3.bf16.msra.mxu0 %v11786_v1  ;;  %9433 = vmatpush3.bf16.msra.mxu1 %v11786_v1 }
 0x1ef   :  { %9422 = vmatprep.subr.bf16.mxu0 %v11791_v2  ;;  %9434 = vmatprep.subr.bf16.mxu1 %v11791_v2 }
 0x1f2   :  { %9423 = vmatpush3.bf16.msra.mxu0 %v11791_v2  ;;  %9435 = vmatpush3.bf16.msra.mxu1 %v11791_v2 }
 0x1f3   :  { %9424 = vmatprep.subr.bf16.mxu0 %v9994_v5  ;;  %9436 = vmatprep.subr.bf16.mxu1 %v9994_v5 }
 0x1f6   :  { %9425 = vmatpush3.bf16.msra.mxu0 %v9994_v5  ;;  %9437 = vmatpush3.bf16.msra.mxu1 %v9994_v5 }
 0x1f7   :  { %9442 = vmatprep.subr.bf16.mxu0 %v9991_v0  ;;  %9454 = vmatprep.subr.bf16.mxu1 %v9991_v0 }
 0x1f9   :  { %9427 = vmatmul.mubr.msk.bf16.vlgmr.msra.gmra.mrb[0].mxu0 %vm434_vm0, %v9997_v6  ;;  %9439 = vmatmul.mubr.msk.bf16.vlgmr.msra.gmra.mrb[0].mxu1 %vm434_vm0, %v9998_v7  ;;  %v10031_v6 = vld [vmem:[#allocation7 + $0x80] ss:$8 sps:$4 sm:$0xff]   ;;  %v10036_v7 = vld [vmem:[#allocation7 + $0x94] ss:$8 sps:$4 sm:$0xff]  }
 0x1fa   :  { %9443 = vmatpush3.bf16.msra.mxu0 %v9991_v0  ;;  %9450 = vmatprep.mubr.msk.bf16.mxu0 %vm434_vm0, %v9999_v8  ;;  %v10034_v8 = vld [vmem:[#allocation7 + $0x90] ss:$8 sps:$4 sm:$0xff]  }
 0x1fb   :  { %9444 = vmatprep.subr.bf16.mxu0 %v11786_v1  ;;  %9455 = vmatpush3.bf16.msra.mxu1 %v9991_v0 }
 0x1fc   :  { %9456 = vmatprep.subr.bf16.mxu1 %v11786_v1  ;;  %9462 = vmatprep.mubr.msk.bf16.mxu1 %vm434_vm0, %v10001_v9  ;;  %v930_v9 = vlaneseq }
 0x1fe   :  { %9445 = vmatpush3.bf16.msra.mxu0 %v11786_v1 }
 0x1ff   :  { %9446 = vmatprep.subr.bf16.mxu0 %v11791_v2  ;;  %9457 = vmatpush3.bf16.msra.mxu1 %v11786_v1 }
 0x200   :  { %9458 = vmatprep.subr.bf16.mxu1 %v11791_v2 }
 0x202   :  { %9447 = vmatpush3.bf16.msra.mxu0 %v11791_v2 }
 0x203   :  { %9448 = vmatprep.subr.bf16.mxu0 %v9994_v5  ;;  %9459 = vmatpush3.bf16.msra.mxu1 %v11791_v2 }
 0x204   :  { %9460 = vmatprep.subr.bf16.mxu1 %v9994_v5 }
 0x206   :  { %9449 = vmatpush3.bf16.msra.mxu0 %v9994_v5 }
 0x207   :  { %9461 = vmatpush3.bf16.msra.mxu1 %v9994_v5  ;;  %9466 = vmatprep.subr.bf16.mxu0 %v9991_v0 }
 0x208   :  { %9478 = vmatprep.subr.bf16.mxu1 %v9991_v0 }
 0x209   :  { %9451 = vmatmul.mubr.msk.bf16.vlgmr.msra.gmra.mrb[4].mxu0 %vm434_vm0, %v10000_v10  ;;  %v931_v10 = vshrl.u32 %v930_v9, 7 }
 0x20a   :  { %9463 = vmatmul.mubr.msk.bf16.vlgmr.msra.gmra.mrb[4].mxu1 %vm434_vm0, %v10002_v11  ;;  %9467 = vmatpush3.bf16.msra.mxu0 %v9991_v0 }
 0x20b   :  { %9468 = vmatprep.subr.bf16.mxu0 %v11786_v1  ;;  %9474 = vmatprep.mubr.msk.bf16.mxu0 %vm434_vm0, %v10003_v12  ;;  %v11978_v11 = vsub.s32 0, %v931_v10  ;;  %v852_v12 = vld [vmem:[#allocation9] ss:$4 sm:$0x3] }
 0x20c   :  { %9479 = vmatpush3.bf16.msra.mxu1 %v9991_v0  ;;  %9486 = vmatprep.mubr.msk.bf16.mxu1 %vm434_vm0, %v10005_v13  ;;  %v10022_v0 = vld [vmem:[#allocation7 + $0x50] ss:$8 sps:$4 sm:$0xff]   ;;  %v11980_v13 = vsub.s32 1, %v931_v10 }
 0x20d   :  { %9480 = vmatprep.subr.bf16.mxu1 %v11786_v1 }
 0x20e   :  { %9469 = vmatpush3.bf16.msra.mxu0 %v11786_v1 }
 0x20f   :  { %9470 = vmatprep.subr.bf16.mxu0 %v11791_v2 }
 0x210   :  { %9481 = vmatpush3.bf16.msra.mxu1 %v11786_v1  ;;  %v10027_v1 = vld [vmem:[#allocation7 + $0x64] ss:$8 sps:$4 sm:$0xff]  }
 0x211   :  { %9482 = vmatprep.subr.bf16.mxu1 %v11791_v2 }
 0x212   :  { %9471 = vmatpush3.bf16.msra.mxu0 %v11791_v2 }
 0x213   :  { %9472 = vmatprep.subr.bf16.mxu0 %v9994_v5 }
 0x214   :  { %9483 = vmatpush3.bf16.msra.mxu1 %v11791_v2  ;;  %v10025_v2 = vld [vmem:[#allocation7 + $0x60] ss:$8 sps:$4 sm:$0xff]  }
 0x215   :  { %9484 = vmatprep.subr.bf16.mxu1 %v9994_v5 }
 0x216   :  { %9473 = vmatpush3.bf16.msra.mxu0 %v9994_v5 }
 0x217   :  { %876 = vmatprep.subr.bf16.mxu0 %v10009_v16 }
 0x218   :  { %9485 = vmatpush3.bf16.msra.mxu1 %v9994_v5  ;;  %v10033_v5 = vld [vmem:[#allocation7 + $0x84] ss:$8 sps:$4 sm:$0xff]  }
 0x219   :  { %9475 = vmatmul.mubr.msk.bf16.vlgmr.msra.gmra.mrb[8].mxu0 %vm434_vm0, %v10004_v14  ;;  %1314 = vmatprep.subr.bf16.mxu1 %v10009_v16  ;;  %v11983_v14 = vrot.slane %v852_v12, %v11978_v11  ;;  %v11986_v16 = vrot.slane %v852_v12, %v11980_v13 }
 0x21a   :  { %877 = vmatpush1.bf16.msra.mxu0 %v10007_v17  ;;  %908 = vmatprep.mubr.bf16.mxu0 %v11233_v18 }
 0x21b   :  { %9487 = vmatmul.mubr.msk.bf16.vlgmr.msra.gmra.mrb[8].mxu1 %vm434_vm0, %v10006_v15  ;;  %967 = vmatprep.subr.bf16.mxu0 %v10012_v19  ;;  %v854_v15 = vld [vmem:[#allocation9 + $0x1] ss:$4 sm:$0x3] }
 0x21c   :  { %1315 = vmatpush1.bf16.msra.mxu1 %v10007_v17  ;;  %1346 = vmatprep.mubr.bf16.mxu1 %v11233_v18  ;;  %v856_v17 = vld [vmem:[#allocation9 + $0x2] ss:$4 sm:$0x3] }
 0x21d   :  { %1375 = vmatprep.subr.bf16.mxu1 %v10012_v19 }
 0x2cc   :  { %v9428_v20 = vpop.f32.mrb[0].mxu0  ;;  %v9440_v21 = vpop.f32.mrb[0].mxu1 }
 0x2cd   :  { %v475_v22 = vpop.f32.mrb[1].mxu0  ;;  %v547_v23 = vpop.f32.mrb[1].mxu1 }
 0x2ce   :  { %v9429_v24 = vpop.f32.mrb[2].mxu0  ;;  %v9441_v25 = vpop.f32.mrb[2].mxu1 }
 0x2cf   :  { %v11834_v26 = vpack.c.bf16 %v9429_v24, %v9428_v20  ;;  %v11836_v27 = vpack.c.bf16 %v9441_v25, %v9440_v21  ;;  %v478_v28 = vpop.f32.mrb[3].mxu0  ;;  %v550_v29 = vpop.f32.mrb[3].mxu1  ;;  %v11994_v25 = vrot.slane %v854_v15, %v11980_v13 }
 0x2d0   :  { %v11838_v31 = vpack.c.bf16 %v478_v28, %v475_v22  ;;  %v11840_v32 = vpack.c.bf16 %v550_v29, %v547_v23  ;;  %v11990_v22 = vrot.slane %v854_v15, %v11978_v11  ;;  %v12001_v29 = vrot.slane %v856_v17, %v11980_v13 }
 0x2d2   :  { %8654 = vmatmul.mubr.msk.bf16.vlgmr.msra.gmra.mrb[12].mxu0 %vm869_vm1, %v11838_v31  ;;  %8672 = vmatmul.mubr.msk.bf16.vlgmr.msra.gmra.mrb[12].mxu1 %vm869_vm1, %v11840_v32 }
 0x2d3   :  { %968 = vmatpush1.bf16.msra.mxu0 %v10010_v30  ;;  %918 = vmatprep.mubr.bf16.mxu0 %v11233_v18 }
 0x2d4   :  { %1356 = vmatprep.mubr.bf16.mxu1 %v11233_v18  ;;  %1376 = vmatpush1.bf16.msra.mxu1 %v10010_v30 }
 0x2d5   :  { %1047 = vmatprep.subr.bf16.mxu0 %v10015_v33  ;;  %1436 = vmatprep.subr.bf16.mxu1 %v10015_v33 }
 0x2da   :  { %8655 = vmatmul.mubr.msk.bf16.gmra.mrb[16].mxu0 %vm869_vm1, %v11834_v26  ;;  %8673 = vmatmul.mubr.msk.bf16.gmra.mrb[16].mxu1 %vm869_vm1, %v11836_v27 }
 0x2db   :  { %999 = vmatprep.mubr.bf16.mxu0 %v11233_v18  ;;  %1407 = vmatprep.mubr.bf16.mxu1 %v11233_v18 }
 0x2dc   :  { %v9452_v34 = vpop.f32.mrb[4].mxu0 }
 0x2dd   :  { %v619_v35 = vpop.f32.mrb[5].mxu0  ;;  %v9464_v36 = vpop.f32.mrb[4].mxu1 }
 0x2de   :  { %v9453_v37 = vpop.f32.mrb[6].mxu0  ;;  %v691_v38 = vpop.f32.mrb[5].mxu1 }
 0x2df   :  { %v11854_v39 = vpack.c.bf16 %v9453_v37, %v9452_v34  ;;  %v622_v40 = vpop.f32.mrb[7].mxu0  ;;  %v9465_v42 = vpop.f32.mrb[6].mxu1 }
 0x2e0   :  { %v11856_v43 = vpack.c.bf16 %v622_v40, %v619_v35  ;;  %v11858_v44 = vpack.c.bf16 %v9465_v42, %v9464_v36  ;;  %v694_v45 = vpop.f32.mrb[7].mxu1 }
 0x2e1   :  { %v11860_v46 = vpack.c.bf16 %v694_v45, %v691_v38 }
 0x2e2   :  { %8658 = vmatmul.mubr.msk.bf16.vlgmr.msra.gmra.mrb[12].mxu0 %vm869_vm1, %v11840_v32  ;;  %8674 = vmatmul.mubr.msk.bf16.vlgmr.msra.gmra.mrb[12].mxu1 %vm869_vm1, %v11856_v43 }
 0x2e3   :  { %1048 = vmatpush1.bf16.msra.mxu0 %v10013_v41  ;;  %1009 = vmatprep.mubr.bf16.mxu0 %v11233_v18 }
 0x2e4   :  { %1417 = vmatprep.mubr.bf16.mxu1 %v11233_v18  ;;  %1437 = vmatpush1.bf16.msra.mxu1 %v10013_v41 }
 0x2e5   :  { %1127 = vmatprep.subr.bf16.mxu0 %v10018_v47  ;;  %1497 = vmatprep.subr.bf16.mxu1 %v10018_v47 }
 0x2ea   :  { %8659 = vmatmul.mubr.msk.bf16.gmra.mrb[16].mxu0 %vm869_vm1, %v11836_v27  ;;  %8675 = vmatmul.mubr.msk.bf16.gmra.mrb[16].mxu1 %vm869_vm1, %v11854_v39 }
 0x2eb   :  { %1079 = vmatprep.mubr.bf16.mxu0 %v11233_v18  ;;  %1468 = vmatprep.mubr.bf16.mxu1 %v11233_v18 }
 0x2ec   :  { %v9476_v48 = vpop.f32.mrb[8].mxu0 }
 0x2ed   :  { %v763_v49 = vpop.f32.mrb[9].mxu0 }
 0x2ee   :  { %v9477_v50 = vpop.f32.mrb[10].mxu0  ;;  %v9488_v51 = vpop.f32.mrb[8].mxu1 }
 0x2ef   :  { %v11874_v53 = vpack.c.bf16 %v9477_v50, %v9476_v48  ;;  %v766_v54 = vpop.f32.mrb[11].mxu0  ;;  %v835_v55 = vpop.f32.mrb[9].mxu1 }
 0x2f0   :  { %v11876_v56 = vpack.c.bf16 %v766_v54, %v763_v49  ;;  %v9489_v57 = vpop.f32.mrb[10].mxu1 }
 0x2f1   :  { %v11878_v59 = vpack.c.bf16 %v9489_v57, %v9488_v51  ;;  %v838_v60 = vpop.f32.mrb[11].mxu1 }
 0x2f2   :  { %8662 = vmatmul.mubr.msk.bf16.vlgmr.msra.gmra.mrb[12].mxu0 %vm869_vm1, %v11856_v43  ;;  %8676 = vmatmul.mubr.msk.bf16.vlgmr.msra.gmra.mrb[12].mxu1 %vm869_vm1, %v11860_v46  ;;  %v11884_v61 = vpack.c.bf16 %v838_v60, %v835_v55 }
 0x2f3   :  { %1128 = vmatpush1.bf16.msra.mxu0 %v10016_v52  ;;  %1089 = vmatprep.mubr.bf16.mxu0 %v11233_v18 }
 0x2f4   :  { %1478 = vmatprep.mubr.bf16.mxu1 %v11233_v18  ;;  %1498 = vmatpush1.bf16.msra.mxu1 %v10016_v52 }
 0x2f5   :  { %1207 = vmatprep.subr.bf16.mxu0 %v10021_v58  ;;  %1564 = vmatprep.subr.bf16.mxu1 %v10021_v58 }
 0x2fa   :  { %8663 = vmatmul.mubr.msk.bf16.gmra.mrb[16].mxu0 %vm869_vm1, %v11854_v39  ;;  %8677 = vmatmul.mubr.msk.bf16.gmra.mrb[16].mxu1 %vm869_vm1, %v11858_v44 }
 0x2fb   :  { %1159 = vmatprep.mubr.bf16.mxu0 %v11233_v18  ;;  %1529 = vmatprep.mubr.bf16.mxu1 %v11233_v18 }
 0x302   :  { %8666 = vmatmul.mubr.msk.bf16.vlgmr.msra.gmra.mrb[12].mxu0 %vm869_vm1, %v11860_v46  ;;  %8678 = vmatmul.mubr.msk.bf16.vlgmr.msra.gmra.mrb[12].mxu1 %vm869_vm1, %v11876_v56 }
 0x303   :  { %1208 = vmatpush1.bf16.msra.mxu0 %v10019_v62  ;;  %1169 = vmatprep.mubr.bf16.mxu0 %v11233_v18 }
 0x304   :  { %1539 = vmatprep.mubr.bf16.mxu1 %v11233_v18  ;;  %1565 = vmatpush1.bf16.msra.mxu1 %v10019_v62 }
 0x305   :  { %1670 = vmatprep.subr.bf16.mxu0 %v10024_v63  ;;  %2059 = vmatprep.subr.bf16.mxu1 %v10024_v63 }
 0x30a   :  { %8667 = vmatmul.mubr.msk.bf16.gmra.mrb[16].mxu0 %vm869_vm1, %v11858_v44  ;;  %8679 = vmatmul.mubr.msk.bf16.gmra.mrb[16].mxu1 %vm869_vm1, %v11874_v53 }
 0x30b   :  { %1239 = vmatprep.mubr.bf16.mxu0 %v11233_v18  ;;  %1596 = vmatprep.mubr.bf16.mxu1 %v11233_v18 }
 0x312   :  { %8670 = vmatmul.mubr.msk.bf16.vlgmr.msra.gmra.mrb[12].mxu0 %vm869_vm1, %v11876_v56  ;;  %8680 = vmatmul.mubr.msk.bf16.vlgmr.msra.gmra.mrb[12].mxu1 %vm869_vm1, %v11884_v61 }
 0x313   :  { %1671 = vmatpush1.bf16.msra.mxu0 %v10022_v0  ;;  %1249 = vmatprep.mubr.bf16.mxu0 %v11233_v18 }
 0x314   :  { %1606 = vmatprep.mubr.bf16.mxu1 %v11233_v18  ;;  %2060 = vmatpush1.bf16.msra.mxu1 %v10022_v0 }
 0x315   :  { %1744 = vmatprep.subr.bf16.mxu0 %v10027_v1  ;;  %2120 = vmatprep.subr.bf16.mxu1 %v10027_v1 }
 0x31a   :  { %8671 = vmatmul.mubr.msk.bf16.gmra.mrb[16].mxu0 %vm869_vm1, %v11874_v53  ;;  %8681 = vmatmul.mubr.msk.bf16.gmra.mrb[16].mxu1 %vm869_vm1, %v11878_v59 }
 0x31b   :  { %1702 = vmatprep.mubr.bf16.mxu0 %v11233_v18  ;;  %2091 = vmatprep.mubr.bf16.mxu1 %v11233_v18 }
 0x322   :  { %8684 = vmatmul.mubr.msk.bf16.vlgmr.msra.gmra.mrb[20].mxu0 %vm869_vm1, %v11838_v31  ;;  %8702 = vmatmul.mubr.msk.bf16.vlgmr.msra.gmra.mrb[20].mxu1 %vm869_vm1, %v11840_v32 }
 0x323   :  { %1745 = vmatpush1.bf16.msra.mxu0 %v10025_v2  ;;  %1712 = vmatprep.mubr.bf16.mxu0 %v11233_v18 }
 0x324   :  { %2101 = vmatprep.mubr.bf16.mxu1 %v11233_v18  ;;  %2121 = vmatpush1.bf16.msra.mxu1 %v10025_v2 }
 0x325   :  { %1818 = vmatprep.subr.bf16.mxu0 %v10030_v3  ;;  %2181 = vmatprep.subr.bf16.mxu1 %v10030_v3 }
 0x32a   :  { %8685 = vmatmul.mubr.msk.bf16.gmra.mrb[24].mxu0 %vm869_vm1, %v11834_v26  ;;  %8703 = vmatmul.mubr.msk.bf16.gmra.mrb[24].mxu1 %vm869_vm1, %v11836_v27 }
 0x32b   :  { %1776 = vmatprep.mubr.bf16.mxu0 %v11233_v18  ;;  %2152 = vmatprep.mubr.bf16.mxu1 %v11233_v18 }
 0x332   :  { %8688 = vmatmul.mubr.msk.bf16.vlgmr.msra.gmra.mrb[20].mxu0 %vm869_vm1, %v11840_v32  ;;  %8704 = vmatmul.mubr.msk.bf16.vlgmr.msra.gmra.mrb[20].mxu1 %vm869_vm1, %v11856_v43 }
 0x333   :  { %1819 = vmatpush1.bf16.msra.mxu0 %v10028_v4  ;;  %1786 = vmatprep.mubr.bf16.mxu0 %v11233_v18 }
 0x334   :  { %2162 = vmatprep.mubr.bf16.mxu1 %v11233_v18  ;;  %2182 = vmatpush1.bf16.msra.mxu1 %v10028_v4 }
 0x335   :  { %1892 = vmatprep.subr.bf16.mxu0 %v10033_v5  ;;  %2242 = vmatprep.subr.bf16.mxu1 %v10033_v5 }
 0x33a   :  { %8689 = vmatmul.mubr.msk.bf16.gmra.mrb[24].mxu0 %vm869_vm1, %v11836_v27  ;;  %8705 = vmatmul.mubr.msk.bf16.gmra.mrb[24].mxu1 %vm869_vm1, %v11854_v39  ;;  %v11997_v27 = vrot.slane %v856_v17, %v11978_v11 }
 0x33b   :  { %1850 = vmatprep.mubr.bf16.mxu0 %v11233_v18  ;;  %2213 = vmatprep.mubr.bf16.mxu1 %v11233_v18 }
 0x342   :  { %8692 = vmatmul.mubr.msk.bf16.vlgmr.msra.gmra.mrb[20].mxu0 %vm869_vm1, %v11856_v43  ;;  %8706 = vmatmul.mubr.msk.bf16.vlgmr.msra.gmra.mrb[20].mxu1 %vm869_vm1, %v11860_v46 }
 0x343   :  { %1893 = vmatpush1.bf16.msra.mxu0 %v10031_v6  ;;  %1860 = vmatprep.mubr.bf16.mxu0 %v11233_v18 }
 0x344   :  { %2223 = vmatprep.mubr.bf16.mxu1 %v11233_v18  ;;  %2243 = vmatpush1.bf16.msra.mxu1 %v10031_v6 }
 0x345   :  { %1966 = vmatprep.subr.bf16.mxu0 %v10036_v7  ;;  %2303 = vmatprep.subr.bf16.mxu1 %v10036_v7 }
 0x34a   :  { %8693 = vmatmul.mubr.msk.bf16.gmra.mrb[24].mxu0 %vm869_vm1, %v11854_v39  ;;  %8707 = vmatmul.mubr.msk.bf16.gmra.mrb[24].mxu1 %vm869_vm1, %v11858_v44 }
 0x34b   :  { %1924 = vmatprep.mubr.bf16.mxu0 %v11233_v18  ;;  %2274 = vmatprep.mubr.bf16.mxu1 %v11233_v18 }
 0x352   :  { %8696 = vmatmul.mubr.msk.bf16.vlgmr.msra.gmra.mrb[20].mxu0 %vm869_vm1, %v11860_v46  ;;  %8708 = vmatmul.mubr.msk.bf16.vlgmr.msra.gmra.mrb[20].mxu1 %vm869_vm1, %v11876_v56 }
 0x353   :  { %1967 = vmatpush1.bf16.msra.mxu0 %v10034_v8  ;;  %1934 = vmatprep.mubr.bf16.mxu0 %v11233_v18 }
 0x354   :  { %2284 = vmatprep.mubr.bf16.mxu1 %v11233_v18  ;;  %2304 = vmatpush1.bf16.msra.mxu1 %v10034_v8 }
 0x35a   :  { %8697 = vmatmul.mubr.msk.bf16.gmra.mrb[24].mxu0 %vm869_vm1, %v11858_v44  ;;  %8709 = vmatmul.mubr.msk.bf16.gmra.mrb[24].mxu1 %vm869_vm1, %v11874_v53 }
 0x35b   :  { %1998 = vmatprep.mubr.bf16.mxu0 %v11233_v18  ;;  %2335 = vmatprep.mubr.bf16.mxu1 %v11233_v18 }
 0x362   :  { %8700 = vmatmul.mubr.msk.bf16.vlgmr.msra.gmra.mrb[20].mxu0 %vm869_vm1, %v11876_v56  ;;  %8710 = vmatmul.mubr.msk.bf16.vlgmr.msra.gmra.mrb[20].mxu1 %vm869_vm1, %v11884_v61 }
 0x363   :  { %2008 = vmatprep.mubr.bf16.mxu0 %v11233_v18  ;;  %2345 = vmatprep.mubr.bf16.mxu1 %v11233_v18 }
 0x36a   :  { %8701 = vmatmul.mubr.msk.bf16.gmra.mrb[24].mxu0 %vm869_vm1, %v11874_v53  ;;  %8711 = vmatmul.mubr.msk.bf16.gmra.mrb[24].mxu1 %vm869_vm1, %v11878_v59 }
 0x36b   :  { %2443 = vmatprep.mubr.bf16.mxu0 %v11233_v18  ;;  %2499 = vmatprep.mubr.bf16.mxu1 %v11233_v18 }
 0x3e5   :  { %v1241_v19 = vpop.f32.mrb[12].mxu0  ;;  %v1598_v20 = vpop.f32.mrb[12].mxu1 }
 0x3e6   :  { %v9708_v21 = vadd.f32 %v1241_v19, %v11983_v14  ;;  %v9716_v23 = vadd.f32 %v1598_v20, %v11983_v14  ;;  %v1243_v24 = vpop.f32.mrb[13].mxu0  ;;  %v1600_v26 = vpop.f32.mrb[13].mxu1 }
 0x3e7   :  { %v9709_v28 = vadd.f32 %v1243_v24, %v11986_v16  ;;  %v9717_v30 = vadd.f32 %v1600_v26, %v11986_v16  ;;  %v1245_v31 = vpop.f32.mrb[14].mxu0  ;;  %v1602_v32 = vpop.f32.mrb[14].mxu1 }
 0x3e8   :  { %v1268_v33 = vmax.f32 %v9708_v21, 0.0  ;;  %v1625_v34 = vmax.f32 %v9716_v23, 0.0  ;;  %v9710_v35 = vadd.f32 %v1245_v31, %v11983_v14  ;;  %v9718_v36 = vadd.f32 %v1602_v32, %v11983_v14  ;;  %v1247_v37 = vpop.f32.mrb[15].mxu0  ;;  %v1604_v38 = vpop.f32.mrb[15].mxu1 }
 0x3e9   :  { %v1269_v39 = vmax.f32 %v9709_v28, 0.0  ;;  %v1626_v40 = vmax.f32 %v9717_v30, 0.0  ;;  %v9711_v41 = vadd.f32 %v1247_v37, %v11986_v16  ;;  %v9719_v42 = vadd.f32 %v1604_v38, %v11986_v16 }
 0x3ea   :  { %v1287_v43 = vmul.f32 %v11990_v22, %v1268_v33  ;;  %v1633_v44 = vmul.f32 %v1625_v34, %v11990_v22  ;;  %v1270_v45 = vmax.f32 %v9710_v35, 0.0  ;;  %v1627_v46 = vmax.f32 %v9718_v36, 0.0 }
 0x3eb   :  { %v1288_v47 = vmul.f32 %v11994_v25, %v1269_v39  ;;  %v1634_v48 = vmul.f32 %v1626_v40, %v11994_v25  ;;  %v1271_v49 = vmax.f32 %v9711_v41, 0.0  ;;  %v1628_v50 = vmax.f32 %v9719_v42, 0.0 }
 0x3ec   :  { %v12013_v51 = vadd.f32 %v11997_v27, %v1287_v43  ;;  %v12016_v52 = vadd.f32 %v1633_v44, %v11997_v27  ;;  %v1289_v53 = vmul.f32 %v11990_v22, %v1270_v45  ;;  %v1635_v54 = vmul.f32 %v1627_v46, %v11990_v22 }
 0x3ed   :  { %v12021_v55 = vadd.f32 %v12001_v29, %v1288_v47  ;;  %v12024_v56 = vadd.f32 %v1634_v48, %v12001_v29  ;;  %v1290_v57 = vmul.f32 %v11994_v25, %v1271_v49  ;;  %v1636_v58 = vmul.f32 %v1628_v50, %v11994_v25  ;;  %v1251_v59 = vpop.f32.mrb[16].mxu0  ;;  %v1608_v60 = vpop.f32.mrb[16].mxu1 }
 0x3ee   :  { %v1649_v61 = vmax.f32 %v12013_v51, %v12016_v52  ;;  %v12031_v62 = vadd.f32 %v11997_v27, %v1289_v53  ;;  %v12034_v63 = vadd.f32 %v1635_v54, %v11997_v27  ;;  %v9712_v0 = vadd.f32 %v1251_v59, %v11983_v14  ;;  %v1253_v1 = vpop.f32.mrb[17].mxu0  ;;  %v1610_v2 = vpop.f32.mrb[17].mxu1 }
 0x3ef   :  { %v1650_v3 = vmax.f32 %v12021_v55, %v12024_v56  ;;  %v12040_v4 = vadd.f32 %v12001_v29, %v1290_v57  ;;  %v12043_v5 = vadd.f32 %v1636_v58, %v12001_v29  ;;  %v9720_v6 = vadd.f32 %v1608_v60, %v11983_v14  ;;  %v1255_v7 = vpop.f32.mrb[18].mxu0  ;;  %v1612_v8 = vpop.f32.mrb[18].mxu1 }
 0x3f0   :  { %v1651_v9 = vmax.f32 %v12031_v62, %v12034_v63  ;;  %v1272_v10 = vmax.f32 %v9712_v0, 0.0  ;;  %v9713_v12 = vadd.f32 %v1253_v1, %v11986_v16  ;;  %v9721_v15 = vadd.f32 %v1610_v2, %v11986_v16  ;;  %v1257_v17 = vpop.f32.mrb[19].mxu0  ;;  %v1614_v19 = vpop.f32.mrb[19].mxu1 }
 0x3f1   :  { %v1652_v20 = vmax.f32 %v12040_v4, %v12043_v5  ;;  %v1629_v21 = vmax.f32 %v9720_v6, 0.0  ;;  %v9714_v23 = vadd.f32 %v1255_v7, %v11983_v14  ;;  %v9722_v24 = vadd.f32 %v1612_v8, %v11983_v14 }
 0x3f2   :  { %v1291_v26 = vmul.f32 %v11990_v22, %v1272_v10  ;;  %v1273_v28 = vmax.f32 %v9713_v12, 0.0  ;;  %v1630_v30 = vmax.f32 %v9721_v15, 0.0  ;;  %v9715_v31 = vadd.f32 %v1257_v17, %v11986_v16 }
 0x3f3   :  { %v1637_v32 = vmul.f32 %v1629_v21, %v11990_v22  ;;  %v1274_v33 = vmax.f32 %v9714_v23, 0.0  ;;  %v1631_v34 = vmax.f32 %v9722_v24, 0.0  ;;  %v9723_v35 = vadd.f32 %v1614_v19, %v11986_v16 }
 0x3f4   :  { %v12059_v36 = vadd.f32 %v11997_v27, %v1291_v26  ;;  %v1292_v37 = vmul.f32 %v11994_v25, %v1273_v28  ;;  %v1638_v38 = vmul.f32 %v1630_v30, %v11994_v25  ;;  %v1275_v39 = vmax.f32 %v9715_v31, 0.0 }
 0x3f5   :  { %v12064_v40 = vadd.f32 %v1637_v32, %v11997_v27  ;;  %v1293_v41 = vmul.f32 %v11990_v22, %v1274_v33  ;;  %v1639_v42 = vmul.f32 %v1631_v34, %v11990_v22  ;;  %v1632_v43 = vmax.f32 %v9723_v35, 0.0 }
 0x3f6   :  { %v12069_v44 = vadd.f32 %v12001_v29, %v1292_v37  ;;  %v12072_v45 = vadd.f32 %v1638_v38, %v12001_v29  ;;  %v1294_v46 = vmul.f32 %v11994_v25, %v1275_v39 }
 0x3f7   :  { %v1653_v47 = vmax.f32 %v12059_v36, %v12064_v40  ;;  %v12078_v48 = vadd.f32 %v11997_v27, %v1293_v41  ;;  %v12081_v49 = vadd.f32 %v1639_v42, %v11997_v27  ;;  %v1640_v50 = vmul.f32 %v1632_v43, %v11994_v25 }
 0x3f8   :  { %v1654_v53 = vmax.f32 %v12069_v44, %v12072_v45  ;;  %v12087_v54 = vadd.f32 %v12001_v29, %v1294_v46 }
 0x3f9   :  { %v1655_v57 = vmax.f32 %v12078_v48, %v12081_v49  ;;  %v12092_v58 = vadd.f32 %v1640_v50, %v12001_v29  ;;  %v10037_v48 = vld [vmem:[#allocation4] sm:$0xff]   ;;  %v10045_v49 = vld [vmem:[#allocation10 + $0x4] ss:$8 sps:$4 sm:$0xff]  }
 0x3fb   :  { %v1656_v59 = vmax.f32 %v12087_v54, %v12092_v58  ;;  %v10041_v54 = vld [vmem:[#allocation4 + $0x20] sm:$0xff]   ;;  %v10043_v58 = vld [vmem:[#allocation10] ss:$8 sps:$4 sm:$0xff]  }
 0x435   :  { %v2000_v60 = vpop.f32.mrb[20].mxu0  ;;  %v2337_v0 = vpop.f32.mrb[20].mxu1 }
 0x436   :  { %v9724_v1 = vadd.f32 %v2000_v60, %v11983_v14  ;;  %v9732_v2 = vadd.f32 %v2337_v0, %v11983_v14  ;;  %v2002_v6 = vpop.f32.mrb[21].mxu0  ;;  %v2339_v7 = vpop.f32.mrb[21].mxu1 }
 0x437   :  { %v9725_v8 = vadd.f32 %v2002_v6, %v11986_v16  ;;  %v9733_v10 = vadd.f32 %v2339_v7, %v11986_v16  ;;  %v2004_v12 = vpop.f32.mrb[22].mxu0  ;;  %v2341_v15 = vpop.f32.mrb[22].mxu1 }
 0x438   :  { %v2027_v17 = vmax.f32 %v9724_v1, 0.0  ;;  %v2364_v19 = vmax.f32 %v9732_v2, 0.0  ;;  %v9726_v21 = vadd.f32 %v2004_v12, %v11983_v14  ;;  %v9734_v23 = vadd.f32 %v2341_v15, %v11983_v14  ;;  %v2006_v24 = vpop.f32.mrb[23].mxu0  ;;  %v2343_v26 = vpop.f32.mrb[23].mxu1 }
 0x439   :  { %v2028_v28 = vmax.f32 %v9725_v8, 0.0  ;;  %v2365_v30 = vmax.f32 %v9733_v10, 0.0  ;;  %v9727_v31 = vadd.f32 %v2006_v24, %v11986_v16  ;;  %v9735_v32 = vadd.f32 %v2343_v26, %v11986_v16 }
 0x43a   :  { %v2035_v33 = vmul.f32 %v2027_v17, %v11990_v22  ;;  %v2372_v34 = vmul.f32 %v2364_v19, %v11990_v22  ;;  %v2029_v35 = vmax.f32 %v9726_v21, 0.0  ;;  %v2366_v37 = vmax.f32 %v9734_v23, 0.0 }
 0x43b   :  { %v2036_v38 = vmul.f32 %v2028_v28, %v11994_v25  ;;  %v2373_v39 = vmul.f32 %v2365_v30, %v11994_v25  ;;  %v2030_v41 = vmax.f32 %v9727_v31, 0.0  ;;  %v2367_v42 = vmax.f32 %v9735_v32, 0.0 }
 0x43c   :  { %v2043_v43 = vadd.f32 %v2035_v33, %v11997_v27  ;;  %v2380_v46 = vadd.f32 %v2372_v34, %v11997_v27  ;;  %v2037_v50 = vmul.f32 %v2029_v35, %v11990_v22  ;;  %v2374_v60 = vmul.f32 %v2366_v37, %v11990_v22 }
 0x43d   :  { %v2044_v0 = vadd.f32 %v2036_v38, %v12001_v29  ;;  %v2381_v1 = vadd.f32 %v2373_v39, %v12001_v29  ;;  %v2038_v2 = vmul.f32 %v2030_v41, %v11994_v25  ;;  %v2375_v6 = vmul.f32 %v2367_v42, %v11994_v25  ;;  %v2010_v7 = vpop.f32.mrb[24].mxu0  ;;  %v2347_v8 = vpop.f32.mrb[24].mxu1 }
 0x43e   :  { %v2051_v10 = vmax.f32 %v1649_v61, %v2043_v43  ;;  %v2045_v12 = vadd.f32 %v2037_v50, %v11997_v27  ;;  %v2382_v15 = vadd.f32 %v2374_v60, %v11997_v27  ;;  %v9728_v17 = vadd.f32 %v2010_v7, %v11983_v14  ;;  %v2012_v19 = vpop.f32.mrb[25].mxu0  ;;  %v2349_v21 = vpop.f32.mrb[25].mxu1 }
 0x43f   :  { %v2052_v23 = vmax.f32 %v1650_v3, %v2044_v0  ;;  %v2046_v24 = vadd.f32 %v2038_v2, %v12001_v29  ;;  %v2383_v26 = vadd.f32 %v2375_v6, %v12001_v29  ;;  %v9736_v28 = vadd.f32 %v2347_v8, %v11983_v14  ;;  %v2014_v51 = vpop.f32.mrb[26].mxu0  ;;  %v2351_v52 = vpop.f32.mrb[26].mxu1 }
 0x440   :  { %v2388_v61 = vmax.f32 %v2051_v10, %v2380_v46  ;;  %v2053_v30 = vmax.f32 %v1651_v9, %v2045_v12  ;;  %v2031_v31 = vmax.f32 %v9728_v17, 0.0  ;;  %v9729_v32 = vadd.f32 %v2012_v19, %v11986_v16  ;;  %v2016_v33 = vpop.f32.mrb[27].mxu0  ;;  %v2353_v34 = vpop.f32.mrb[27].mxu1 }
 0x441   :  { %v2389_v55 = vmax.f32 %v2052_v23, %v2381_v1  ;;  %v2054_v56 = vmax.f32 %v1652_v20, %v2046_v24  ;;  %v2368_v3 = vmax.f32 %v9736_v28, 0.0  ;;  %v9737_v35 = vadd.f32 %v2349_v21, %v11986_v16 }
 0x442   :  { %v2390_v37 = vmax.f32 %v2053_v30, %v2382_v15  ;;  %v2039_v38 = vmul.f32 %v2031_v31, %v11990_v22  ;;  %v2032_v39 = vmax.f32 %v9729_v32, 0.0  ;;  %v9730_v62 = vadd.f32 %v2014_v51, %v11983_v14  ;;  %v10046_v51 = vld [vmem:[#allocation10 + $0x10] ss:$8 sps:$4 sm:$0xff]   ;;  %v10054_v30 = vld [vmem:[#allocation10 + $0x34] ss:$8 sps:$4 sm:$0xff]  }
 0x443   :  { %v2391_v63 = vmax.f32 %v2054_v56, %v2383_v26  ;;  %v2376_v9 = vmul.f32 %v2368_v3, %v11990_v22  ;;  %v2369_v41 = vmax.f32 %v9737_v35, 0.0  ;;  %v9738_v42 = vadd.f32 %v2351_v52, %v11983_v14  ;;  %v10051_v52 = vld [vmem:[#allocation10 + $0x24] ss:$8 sps:$4 sm:$0xff]   ;;  %v10052_v31 = vld [vmem:[#allocation10 + $0x30] ss:$8 sps:$4 sm:$0xff]  }
 0x444   :  { %v2396_v43 = vpack.c.bf16 %v2390_v37, %v2388_v61  ;;  %v2047_v46 = vadd.f32 %v2039_v38, %v11997_v27  ;;  %v2040_v4 = vmul.f32 %v2032_v39, %v11994_v25  ;;  %v2033_v5 = vmax.f32 %v9730_v62, 0.0  ;;  %v10049_v61 = vld [vmem:[#allocation10 + $0x20] ss:$8 sps:$4 sm:$0xff]   ;;  %v10057_v32 = vld [vmem:[#allocation10 + $0x44] ss:$8 sps:$4 sm:$0xff]  }
 0x445   :  { %v2397_v20 = vpack.c.bf16 %v2391_v63, %v2389_v55  ;;  %v2384_v50 = vadd.f32 %v2376_v9, %v11997_v27  ;;  %v2377_v60 = vmul.f32 %v2369_v41, %v11994_v25  ;;  %v2370_v0 = vmax.f32 %v9738_v42, 0.0  ;;  %v10058_v55 = vld [vmem:[#allocation10 + $0x50] ss:$8 sps:$4 sm:$0xff]   ;;  %v10063_v56 = vld [vmem:[#allocation10 + $0x64] ss:$8 sps:$4 sm:$0xff]  }
 0x446   :  { %v2055_v1 = vmax.f32 %v1653_v47, %v2047_v46  ;;  %v2048_v2 = vadd.f32 %v2040_v4, %v12001_v29  ;;  %v2041_v14 = vmul.f32 %v2033_v5, %v11990_v22  ;;  %v9731_v6 = vadd.f32 %v2016_v33, %v11986_v16  ;;  %v10055_v33 = vld [vmem:[#allocation10 + $0x40] ss:$8 sps:$4 sm:$0xff]   ;;  %v10066_v35 = vld [vmem:[#allocation10 + $0x74] ss:$8 sps:$4 sm:$0xff]   ;;  %v10064_v37 = vld [vmem:[#allocation10 + $0x70] ss:$8 sps:$4 sm:$0xff]  }
 0x447   :  { %v2385_v7 = vadd.f32 %v2377_v60, %v12001_v29  ;;  %v2378_v8 = vmul.f32 %v2370_v0, %v11990_v22  ;;  %v9739_v10 = vadd.f32 %v2353_v34, %v11986_v16  ;;  %2411 = vmatprep.subr.bf16.mxu0 %v2397_v20  ;;  %2467 = vmatprep.subr.bf16.mxu1 %v2397_v20  ;;  %v10060_v34 = vld [vmem:[#allocation10 + $0x54] ss:$8 sps:$4 sm:$0xff]   ;;  %v10061_v3 = vld [vmem:[#allocation10 + $0x60] ss:$8 sps:$4 sm:$0xff]   ;;  %v10069_v38 = vld [vmem:[#allocation10 + $0x84] ss:$8 sps:$4 sm:$0xff]  }
 0x448   :  { %v2392_v12 = vmax.f32 %v2055_v1, %v2384_v50  ;;  %v2056_v36 = vmax.f32 %v1654_v53, %v2048_v2  ;;  %v2049_v40 = vadd.f32 %v2041_v14, %v11997_v27  ;;  %v2034_v47 = vmax.f32 %v9731_v6, 0.0  ;;  %2412 = vmatpush1.bf16.msra.mxu0 %v2396_v43  ;;  %2468 = vmatpush1.bf16.msra.mxu1 %v2396_v43  ;;  %v10067_v39 = vld [vmem:[#allocation10 + $0x80] ss:$8 sps:$4 sm:$0xff]   ;;  %v10072_v62 = vld [vmem:[#allocation10 + $0x94] ss:$8 sps:$4 sm:$0xff]  }
 0x449   :  { %v2371_v15 = vmax.f32 %v9739_v10, 0.0  ;;  %v2386_v16 = vadd.f32 %v2378_v8, %v11997_v27  ;;  %v10038_v27 = vld [vmem:[#allocation4 + $0x8] sm:$0xff]   ;;  %v10075_v9 = vld [vmem:[#allocation10 + $0xa4] ss:$8 sps:$4 sm:$0xff]   ;;  %v10073_v41 = vld [vmem:[#allocation10 + $0xa0] ss:$8 sps:$4 sm:$0xff]  }
 0x44a   :  { %v2393_v17 = vmax.f32 %v2056_v36, %v2385_v7  ;;  %v2057_v22 = vmax.f32 %v1655_v57, %v2049_v40  ;;  %v2042_v19 = vmul.f32 %v2034_v47, %v11994_v25  ;;  %v10042_v57 = vld [vmem:[#allocation4 + $0x28] sm:$0xff]   ;;  %v10081_v46 = vld [vmem:[#allocation10 + $0xc4] ss:$8 sps:$4 sm:$0xff]   ;;  %v10079_v4 = vld [vmem:[#allocation10 + $0xc0] ss:$8 sps:$4 sm:$0xff]  }
 0x44b   :  { %v2379_v21 = vmul.f32 %v2371_v15, %v11994_v25  ;;  %v10039_v25 = vld [vmem:[#allocation4 + $0x10] sm:$0xff]   ;;  %v10070_v63 = vld [vmem:[#allocation10 + $0x90] ss:$8 sps:$4 sm:$0xff]   ;;  %v10078_v42 = vld [vmem:[#allocation10 + $0xb4] ss:$8 sps:$4 sm:$0xff]  }
 0x44c   :  { %v2394_v23 = vmax.f32 %v2057_v22, %v2386_v16  ;;  %v2050_v44 = vadd.f32 %v2042_v19, %v12001_v29  ;;  %v10084_v5 = vld [vmem:[#allocation10 + $0xd4] ss:$8 sps:$4 sm:$0xff]   ;;  %v10087_v50 = vld [vmem:[#allocation10 + $0xe4] ss:$8 sps:$4 sm:$0xff]   ;;  %v10085_v60 = vld [vmem:[#allocation10 + $0xe0] ss:$8 sps:$4 sm:$0xff]  }
 0x44d   :  { %v2387_v24 = vadd.f32 %v2379_v21, %v12001_v29  ;;  %v10040_v29 = vld [vmem:[#allocation4 + $0x18] sm:$0xff]   ;;  %v10090_v0 = vld [vmem:[#allocation10 + $0xf4] ss:$8 sps:$4 sm:$0xff]   ;;  %v10088_v1 = vld [vmem:[#allocation10 + $0xf0] ss:$8 sps:$4 sm:$0xff]  }
 0x44e   :  { %v2398_v45 = vpack.c.bf16 %v2394_v23, %v2392_v12  ;;  %v2058_v53 = vmax.f32 %v1656_v59, %v2050_v44  ;;  %v10048_v59 = vld [vmem:[#allocation10 + $0x14] ss:$8 sps:$4 sm:$0xff]   ;;  %v10093_v2 = vld [vmem:[#allocation10 + $0x104] ss:$8 sps:$4 sm:$0xff]   ;;  %v10091_v16 = vld [vmem:[#allocation10 + $0x100] ss:$8 sps:$4 sm:$0xff]  }
 0x44f   :  { %v10096_v19 = vld [vmem:[#allocation10 + $0x114] ss:$8 sps:$4 sm:$0xff]   ;;  %v10094_v21 = vld [vmem:[#allocation10 + $0x110] ss:$8 sps:$4 sm:$0xff]  }
 0x450   :  { %v2395_v26 = vmax.f32 %v2058_v53, %v2387_v24 }
 0x452   :  { %v2399_v28 = vpack.c.bf16 %v2395_v26, %v2393_v17 }
 0x454   :  { %2413 = vmatprep.subr.bf16.mxu0 %v2399_v28  ;;  %2469 = vmatprep.subr.bf16.mxu1 %v2399_v28 }
 0x455   :  { %2414 = vmatpush1.bf16.msra.mxu0 %v2398_v45  ;;  %2470 = vmatpush1.bf16.msra.mxu1 %v2398_v45 }
 0x456   :  { %2523 = vmatprep.subr.bf16.mxu0 %v2397_v20  ;;  %2579 = vmatprep.subr.bf16.mxu1 %v2397_v20 }
 0x458   :  { %8713 = vmatmul.mubr.msk.bf16.vlgmr.msra.gmra.mrb[28].mxu0 %vm2407_vm2, %v10037_v48  ;;  %8715 = vmatmul.mubr.msk.bf16.vlgmr.msra.gmra.mrb[28].mxu1 %vm2407_vm2, %v10038_v27 }
 0x459   :  { %2524 = vmatpush1.bf16.msra.mxu0 %v2396_v43  ;;  %2580 = vmatpush1.bf16.msra.mxu1 %v2396_v43 }
 0x45a   :  { %2525 = vmatprep.subr.bf16.mxu0 %v2399_v28  ;;  %2581 = vmatprep.subr.bf16.mxu1 %v2399_v28 }
 0x45b   :  { %2555 = vmatprep.mubr.bf16.mxu0 %v11233_v18  ;;  %2611 = vmatprep.mubr.bf16.mxu1 %v11233_v18 }
 0x45d   :  { %2526 = vmatpush1.bf16.msra.mxu0 %v2398_v45  ;;  %2582 = vmatpush1.bf16.msra.mxu1 %v2398_v45 }
 0x45e   :  { %2635 = vmatprep.subr.bf16.mxu0 %v2397_v20  ;;  %2691 = vmatprep.subr.bf16.mxu1 %v2397_v20  ;;  %v10082_v20 = vld [vmem:[#allocation10 + $0xd0] ss:$8 sps:$4 sm:$0xff]  }
 0x460   :  { %8717 = vmatmul.mubr.msk.bf16.vlgmr.msra.gmra.mrb[32].mxu0 %vm2407_vm2, %v10039_v25  ;;  %8719 = vmatmul.mubr.msk.bf16.vlgmr.msra.gmra.mrb[32].mxu1 %vm2407_vm2, %v10040_v29 }
 0x461   :  { %2636 = vmatpush1.bf16.msra.mxu0 %v2396_v43  ;;  %2692 = vmatpush1.bf16.msra.mxu1 %v2396_v43  ;;  %v10076_v43 = vld [vmem:[#allocation10 + $0xb0] ss:$8 sps:$4 sm:$0xff]  }
 0x462   :  { %2637 = vmatprep.subr.bf16.mxu0 %v2399_v28  ;;  %2693 = vmatprep.subr.bf16.mxu1 %v2399_v28 }
 0x463   :  { %2667 = vmatprep.mubr.bf16.mxu0 %v11233_v18  ;;  %2723 = vmatprep.mubr.bf16.mxu1 %v11233_v18 }
 0x465   :  { %2638 = vmatpush1.bf16.msra.mxu0 %v2398_v45  ;;  %2694 = vmatpush1.bf16.msra.mxu1 %v2398_v45  ;;  %v10099_v45 = vld [vmem:[#allocation10 + $0x124] ss:$8 sps:$4 sm:$0xff]  }
 0x466   :  { %2933 = vmatprep.subr.bf16.mxu0 %v10045_v49  ;;  %3985 = vmatprep.subr.bf16.mxu1 %v10045_v49  ;;  %v10097_v49 = vld [vmem:[#allocation10 + $0x120] ss:$8 sps:$4 sm:$0xff]  }
 0x468   :  { %8721 = vmatmul.mubr.msk.bf16.vlgmr.msra.gmra.mrb[36].mxu0 %vm2407_vm2, %v10041_v54  ;;  %8723 = vmatmul.mubr.msk.bf16.vlgmr.msra.gmra.mrb[36].mxu1 %vm2407_vm2, %v10042_v57 }
 0x469   :  { %2934 = vmatpush1.bf16.msra.mxu0 %v10043_v58  ;;  %3986 = vmatpush1.bf16.msra.mxu1 %v10043_v58  ;;  %v10102_v58 = vld [vmem:[#allocation10 + $0x134] ss:$8 sps:$4 sm:$0xff]  }
 0x46a   :  { %2935 = vmatprep.subr.bf16.mxu0 %v10048_v59  ;;  %3987 = vmatprep.subr.bf16.mxu1 %v10048_v59  ;;  %v10100_v59 = vld [vmem:[#allocation10 + $0x130] ss:$8 sps:$4 sm:$0xff]  }
 0x46d   :  { %2936 = vmatpush1.bf16.msra.mxu0 %v10046_v51  ;;  %3988 = vmatpush1.bf16.msra.mxu1 %v10046_v51  ;;  %v10105_v51 = vld [vmem:[#allocation10 + $0x144] ss:$8 sps:$4 sm:$0xff]  }
 0x46e   :  { %2937 = vmatprep.subr.bf16.mxu0 %v10051_v52  ;;  %3989 = vmatprep.subr.bf16.mxu1 %v10051_v52  ;;  %v10103_v52 = vld [vmem:[#allocation10 + $0x140] ss:$8 sps:$4 sm:$0xff]  }
 0x471   :  { %2938 = vmatpush1.bf16.msra.mxu0 %v10049_v61  ;;  %3990 = vmatpush1.bf16.msra.mxu1 %v10049_v61  ;;  %v10108_v61 = vld [vmem:[#allocation10 + $0x154] ss:$8 sps:$4 sm:$0xff]  }
 0x472   :  { %2939 = vmatprep.subr.bf16.mxu0 %v10054_v30  ;;  %3991 = vmatprep.subr.bf16.mxu1 %v10054_v30 }
 0x475   :  { %2940 = vmatpush1.bf16.msra.mxu0 %v10052_v31  ;;  %3992 = vmatpush1.bf16.msra.mxu1 %v10052_v31  ;;  %v10106_v31 = vld [vmem:[#allocation10 + $0x150] ss:$8 sps:$4 sm:$0xff]  }
 0x476   :  { %2941 = vmatprep.subr.bf16.mxu0 %v10057_v32  ;;  %3993 = vmatprep.subr.bf16.mxu1 %v10057_v32  ;;  %v10111_v32 = vld [vmem:[#allocation10 + $0x164] ss:$8 sps:$4 sm:$0xff]  }
 0x479   :  { %2942 = vmatpush1.bf16.msra.mxu0 %v10055_v33  ;;  %3994 = vmatpush1.bf16.msra.mxu1 %v10055_v33 }
 0x47a   :  { %2943 = vmatprep.subr.bf16.mxu0 %v10060_v34  ;;  %3995 = vmatprep.subr.bf16.mxu1 %v10060_v34 }
 0x47d   :  { %2944 = vmatpush1.bf16.msra.mxu0 %v10058_v55  ;;  %3996 = vmatpush1.bf16.msra.mxu1 %v10058_v55 }
 0x47e   :  { %2945 = vmatprep.subr.bf16.mxu0 %v10063_v56  ;;  %3997 = vmatprep.subr.bf16.mxu1 %v10063_v56 }
 0x481   :  { %2946 = vmatpush1.bf16.msra.mxu0 %v10061_v3  ;;  %3998 = vmatpush1.bf16.msra.mxu1 %v10061_v3 }
 0x482   :  { %2947 = vmatprep.subr.bf16.mxu0 %v10066_v35  ;;  %3999 = vmatprep.subr.bf16.mxu1 %v10066_v35 }
 0x485   :  { %2948 = vmatpush1.bf16.msra.mxu0 %v10064_v37  ;;  %4000 = vmatpush1.bf16.msra.mxu1 %v10064_v37 }
 0x486   :  { %2949 = vmatprep.subr.bf16.mxu0 %v10069_v38  ;;  %4001 = vmatprep.subr.bf16.mxu1 %v10069_v38  ;;  %v10109_v38 = vld [vmem:[#allocation10 + $0x160] ss:$8 sps:$4 sm:$0xff]  }
 0x489   :  { %2950 = vmatpush1.bf16.msra.mxu0 %v10067_v39  ;;  %4002 = vmatpush1.bf16.msra.mxu1 %v10067_v39 }
 0x48a   :  { %2951 = vmatprep.subr.bf16.mxu0 %v10072_v62  ;;  %4003 = vmatprep.subr.bf16.mxu1 %v10072_v62 }
 0x48d   :  { %2952 = vmatpush1.bf16.msra.mxu0 %v10070_v63  ;;  %4004 = vmatpush1.bf16.msra.mxu1 %v10070_v63  ;;  %v10114_v63 = vld [vmem:[#allocation10 + $0x174] ss:$8 sps:$4 sm:$0xff]  }
 0x48e   :  { %2953 = vmatprep.subr.bf16.mxu0 %v10075_v9  ;;  %4005 = vmatprep.subr.bf16.mxu1 %v10075_v9 }
 0x491   :  { %2954 = vmatpush1.bf16.msra.mxu0 %v10073_v41  ;;  %4006 = vmatpush1.bf16.msra.mxu1 %v10073_v41 }
 0x492   :  { %2955 = vmatprep.subr.bf16.mxu0 %v10078_v42  ;;  %4007 = vmatprep.subr.bf16.mxu1 %v10078_v42  ;;  %v10112_v42 = vld [vmem:[#allocation10 + $0x170] ss:$8 sps:$4 sm:$0xff]  }
 0x495   :  { %2956 = vmatpush1.bf16.msra.mxu0 %v10076_v43  ;;  %4008 = vmatpush1.bf16.msra.mxu1 %v10076_v43  ;;  %v10117_v43 = vld [vmem:[#allocation10 + $0x184] ss:$8 sps:$4 sm:$0xff]  }
 0x496   :  { %2957 = vmatprep.subr.bf16.mxu0 %v10081_v46  ;;  %4009 = vmatprep.subr.bf16.mxu1 %v10081_v46  ;;  %v10115_v46 = vld [vmem:[#allocation10 + $0x180] ss:$8 sps:$4 sm:$0xff]  }
 0x499   :  { %2958 = vmatpush1.bf16.msra.mxu0 %v10079_v4  ;;  %4010 = vmatpush1.bf16.msra.mxu1 %v10079_v4  ;;  %v10120_v4 = vld [vmem:[#allocation10 + $0x194] ss:$8 sps:$4 sm:$0xff]  }
 0x49a   :  { %2959 = vmatprep.subr.bf16.mxu0 %v10084_v5  ;;  %4011 = vmatprep.subr.bf16.mxu1 %v10084_v5  ;;  %v10118_v5 = vld [vmem:[#allocation10 + $0x190] ss:$8 sps:$4 sm:$0xff]  }
 0x49d   :  { %2960 = vmatpush1.bf16.msra.mxu0 %v10082_v20  ;;  %4012 = vmatpush1.bf16.msra.mxu1 %v10082_v20  ;;  %v10123_v20 = vld [vmem:[#allocation10 + $0x1a4] ss:$8 sps:$4 sm:$0xff]  }
 0x49e   :  { %2961 = vmatprep.subr.bf16.mxu0 %v10087_v50  ;;  %4013 = vmatprep.subr.bf16.mxu1 %v10087_v50  ;;  %v10121_v50 = vld [vmem:[#allocation10 + $0x1a0] ss:$8 sps:$4 sm:$0xff]  }
 0x4a1   :  { %2962 = vmatpush1.bf16.msra.mxu0 %v10085_v60  ;;  %4014 = vmatpush1.bf16.msra.mxu1 %v10085_v60  ;;  %v10126_v60 = vld [vmem:[#allocation10 + $0x1b4] ss:$8 sps:$4 sm:$0xff]  }
 0x4a2   :  { %2963 = vmatprep.subr.bf16.mxu0 %v10090_v0  ;;  %4015 = vmatprep.subr.bf16.mxu1 %v10090_v0  ;;  %v10124_v0 = vld [vmem:[#allocation10 + $0x1b0] ss:$8 sps:$4 sm:$0xff]  }
 0x4a5   :  { %2964 = vmatpush1.bf16.msra.mxu0 %v10088_v1  ;;  %4016 = vmatpush1.bf16.msra.mxu1 %v10088_v1  ;;  %v10129_v1 = vld [vmem:[#allocation10 + $0x1c4] ss:$8 sps:$4 sm:$0xff]  }
 0x4a6   :  { %3184 = vmatprep.subr.bf16.mxu0 %v10093_v2  ;;  %4032 = vmatprep.subr.bf16.mxu1 %v10093_v2  ;;  %v10127_v2 = vld [vmem:[#allocation10 + $0x1c0] ss:$8 sps:$4 sm:$0xff]  }
 0x52b   :  { %v2445_v14 = vpop.f32.mrb[28].mxu0  ;;  %v2501_v6 = vpop.f32.mrb[28].mxu1 }
 0x52c   :  { %v2447_v7 = vpop.f32.mrb[29].mxu0  ;;  %v2503_v8 = vpop.f32.mrb[29].mxu1 }
 0x52d   :  { %v2449_v10 = vpop.f32.mrb[30].mxu0  ;;  %v2505_v12 = vpop.f32.mrb[30].mxu1 }
 0x52e   :  { %v12178_v36 = vpack.c.bf16 %v2449_v10, %v2445_v14  ;;  %v12180_v40 = vpack.c.bf16 %v2505_v12, %v2501_v6  ;;  %v2451_v47 = vpop.f32.mrb[31].mxu0  ;;  %v2507_v15 = vpop.f32.mrb[31].mxu1  ;;  %v10132_v14 = vld [vmem:[#allocation10 + $0x1d4] ss:$8 sps:$4 sm:$0xff]   ;;  %v10130_v6 = vld [vmem:[#allocation10 + $0x1d0] ss:$8 sps:$4 sm:$0xff]  }
 0x52f   :  { %v12182_v17 = vpack.c.bf16 %v2451_v47, %v2447_v7  ;;  %v12184_v22 = vpack.c.bf16 %v2507_v15, %v2503_v8  ;;  %v10135_v7 = vld [vmem:[#allocation10 + $0x1e4] ss:$8 sps:$4 sm:$0xff]   ;;  %v10133_v8 = vld [vmem:[#allocation10 + $0x1e0] ss:$8 sps:$4 sm:$0xff]   ;;  %v10138_v10 = vld [vmem:[#allocation10 + $0x1f4] ss:$8 sps:$4 sm:$0xff]  }
 0x530   :  { %v10136_v12 = vld [vmem:[#allocation10 + $0x1f0] ss:$8 sps:$4 sm:$0xff]   ;;  %v10141_v47 = vld [vmem:[#allocation10 + $0x204] ss:$8 sps:$4 sm:$0xff]   ;;  %v10139_v15 = vld [vmem:[#allocation10 + $0x200] ss:$8 sps:$4 sm:$0xff]  }
 0x531   :  { %2965 = vmatprep.mubr.bf16.mxu0 %v12182_v17  ;;  %4017 = vmatprep.mubr.bf16.mxu1 %v12184_v22 }
 0x532   :  { %2966 = vmatmul.mubr.bf16.vlgmr.msra.gmra.mrb[40].mxu0 %v12178_v36  ;;  %4018 = vmatmul.mubr.bf16.vlgmr.msra.gmra.mrb[40].mxu1 %v12180_v40 }
 0x533   :  { %3185 = vmatpush1.bf16.msra.mxu0 %v10091_v16  ;;  %4033 = vmatpush1.bf16.msra.mxu1 %v10091_v16  ;;  %v2557_v23 = vpop.f32.mrb[32].mxu0  ;;  %v2613_v44 = vpop.f32.mrb[32].mxu1  ;;  %v10144_v16 = vld [vmem:[#allocation10 + $0x214] ss:$8 sps:$4 sm:$0xff]  }
 0x534   :  { %3216 = vmatprep.mubr.bf16.mxu0 %v12184_v22  ;;  %3186 = vmatprep.subr.bf16.mxu0 %v10096_v19  ;;  %v2559_v53 = vpop.f32.mrb[33].mxu0  ;;  %v2615_v24 = vpop.f32.mrb[33].mxu1 }
 0x535   :  { %4034 = vmatprep.subr.bf16.mxu1 %v10096_v19  ;;  %v2561_v26 = vpop.f32.mrb[34].mxu0  ;;  %v2617_v28 = vpop.f32.mrb[34].mxu1  ;;  %v10142_v19 = vld [vmem:[#allocation10 + $0x210] ss:$8 sps:$4 sm:$0xff]  }
 0x536   :  { %v12191_v48 = vpack.c.bf16 %v2561_v26, %v2557_v23  ;;  %v2563_v27 = vpop.f32.mrb[35].mxu0  ;;  %v12193_v25 = vpack.c.bf16 %v2617_v28, %v2613_v44  ;;  %v2619_v29 = vpop.f32.mrb[35].mxu1  ;;  %v10145_v23 = vld [vmem:[#allocation10 + $0x220] ss:$8 sps:$4 sm:$0xff]   ;;  %v10150_v44 = vld [vmem:[#allocation10 + $0x234] ss:$8 sps:$4 sm:$0xff]  }
 0x537   :  { %3187 = vmatpush1.bf16.msra.mxu0 %v10094_v21  ;;  %4035 = vmatpush1.bf16.msra.mxu1 %v10094_v21  ;;  %v12195_v54 = vpack.c.bf16 %v2563_v27, %v2559_v53  ;;  %v12197_v57 = vpack.c.bf16 %v2619_v29, %v2615_v24  ;;  %v10147_v21 = vld [vmem:[#allocation10 + $0x224] ss:$8 sps:$4 sm:$0xff]   ;;  %v10151_v24 = vld [vmem:[#allocation10 + $0x240] ss:$8 sps:$4 sm:$0xff]   ;;  %v10156_v26 = vld [vmem:[#allocation10 + $0x254] ss:$8 sps:$4 sm:$0xff]  }
 0x538   :  { %3188 = vmatprep.subr.bf16.mxu0 %v10099_v45  ;;  %4036 = vmatprep.subr.bf16.mxu1 %v10099_v45  ;;  %v10148_v45 = vld [vmem:[#allocation10 + $0x230] ss:$8 sps:$4 sm:$0xff]   ;;  %v10153_v53 = vld [vmem:[#allocation10 + $0x244] ss:$8 sps:$4 sm:$0xff]   ;;  %v10157_v29 = vld [vmem:[#allocation10 + $0x260] ss:$8 sps:$4 sm:$0xff]  }
 0x539   :  { %4064 = vmatprep.mubr.bf16.mxu1 %v12195_v54  ;;  %v10154_v28 = vld [vmem:[#allocation10 + $0x250] ss:$8 sps:$4 sm:$0xff]   ;;  %v10159_v27 = vld [vmem:[#allocation10 + $0x264] ss:$8 sps:$4 sm:$0xff]  }
 0x53b   :  { %3189 = vmatpush1.bf16.msra.mxu0 %v10097_v49  ;;  %4037 = vmatpush1.bf16.msra.mxu1 %v10097_v49  ;;  %v2669_v30 = vpop.f32.mrb[36].mxu0  ;;  %v2725_v34 = vpop.f32.mrb[36].mxu1  ;;  %v10162_v49 = vld [vmem:[#allocation10 + $0x274] ss:$8 sps:$4 sm:$0xff]  }
 0x53c   :  { %3190 = vmatprep.subr.bf16.mxu0 %v10102_v58  ;;  %4038 = vmatprep.subr.bf16.mxu1 %v10102_v58  ;;  %v2671_v33 = vpop.f32.mrb[37].mxu0  ;;  %v2727_v56 = vpop.f32.mrb[37].mxu1  ;;  %v10160_v58 = vld [vmem:[#allocation10 + $0x270] ss:$8 sps:$4 sm:$0xff]  }
 0x53d   :  { %v2673_v55 = vpop.f32.mrb[38].mxu0  ;;  %v2729_v37 = vpop.f32.mrb[38].mxu1 }
 0x53e   :  { %v12200_v3 = vpack.c.bf16 %v2673_v55, %v2669_v30  ;;  %v2675_v35 = vpop.f32.mrb[39].mxu0  ;;  %v12204_v62 = vpack.c.bf16 %v2729_v37, %v2725_v34  ;;  %v2731_v9 = vpop.f32.mrb[39].mxu1  ;;  %v10171_v30 = vld [vmem:[#allocation10 + $0x2a4] ss:$8 sps:$4 sm:$0xff]   ;;  %v10175_v55 = vld [vmem:[#allocation10 + $0x2c0] ss:$8 sps:$4 sm:$0xff]  }
 0x53f   :  { %3191 = vmatpush1.bf16.msra.mxu0 %v10100_v59  ;;  %4039 = vmatpush1.bf16.msra.mxu1 %v10100_v59  ;;  %v12202_v39 = vpack.c.bf16 %v2675_v35, %v2671_v33  ;;  %v12206_v41 = vpack.c.bf16 %v2731_v9, %v2727_v56  ;;  %v10165_v59 = vld [vmem:[#allocation10 + $0x284] ss:$8 sps:$4 sm:$0xff]   ;;  %v10172_v33 = vld [vmem:[#allocation10 + $0x2b0] ss:$8 sps:$4 sm:$0xff]   ;;  %v10180_v56 = vld [vmem:[#allocation10 + $0x2d4] ss:$8 sps:$4 sm:$0xff]  }
 0x540   :  { %3192 = vmatprep.subr.bf16.mxu0 %v10105_v51  ;;  %4040 = vmatprep.subr.bf16.mxu1 %v10105_v51  ;;  %v10163_v51 = vld [vmem:[#allocation10 + $0x280] ss:$8 sps:$4 sm:$0xff]   ;;  %v10177_v34 = vld [vmem:[#allocation10 + $0x2c4] ss:$8 sps:$4 sm:$0xff]   ;;  %v10178_v35 = vld [vmem:[#allocation10 + $0x2d0] ss:$8 sps:$4 sm:$0xff]  }
 0x541   :  { %v10183_v37 = vld [vmem:[#allocation10 + $0x2e4] ss:$8 sps:$4 sm:$0xff]   ;;  %v10184_v9 = vld [vmem:[#allocation10 + $0x2f0] ss:$8 sps:$4 sm:$0xff]  }
 0x543   :  { %3193 = vmatpush1.bf16.msra.mxu0 %v10103_v52  ;;  %4041 = vmatpush1.bf16.msra.mxu1 %v10103_v52  ;;  %v10168_v52 = vld [vmem:[#allocation10 + $0x294] ss:$8 sps:$4 sm:$0xff]  }
 0x544   :  { %3194 = vmatprep.subr.bf16.mxu0 %v10108_v61  ;;  %4042 = vmatprep.subr.bf16.mxu1 %v10108_v61  ;;  %v10166_v61 = vld [vmem:[#allocation10 + $0x290] ss:$8 sps:$4 sm:$0xff]  }
 0x547   :  { %3195 = vmatpush1.bf16.msra.mxu0 %v10106_v31  ;;  %4043 = vmatpush1.bf16.msra.mxu1 %v10106_v31  ;;  %v10169_v31 = vld [vmem:[#allocation10 + $0x2a0] ss:$8 sps:$4 sm:$0xff]  }
 0x548   :  { %3196 = vmatprep.subr.bf16.mxu0 %v10111_v32  ;;  %4044 = vmatprep.subr.bf16.mxu1 %v10111_v32  ;;  %v10174_v32 = vld [vmem:[#allocation10 + $0x2b4] ss:$8 sps:$4 sm:$0xff]  }
 0x54b   :  { %3197 = vmatpush1.bf16.msra.mxu0 %v10109_v38  ;;  %4045 = vmatpush1.bf16.msra.mxu1 %v10109_v38  ;;  %v10181_v38 = vld [vmem:[#allocation10 + $0x2e0] ss:$8 sps:$4 sm:$0xff]  }
 0x54c   :  { %3198 = vmatprep.subr.bf16.mxu0 %v10114_v63  ;;  %4046 = vmatprep.subr.bf16.mxu1 %v10114_v63  ;;  %v10186_v63 = vld [vmem:[#allocation10 + $0x2f4] ss:$8 sps:$4 sm:$0xff]  }
 0x54f   :  { %3199 = vmatpush1.bf16.msra.mxu0 %v10112_v42  ;;  %4047 = vmatpush1.bf16.msra.mxu1 %v10112_v42  ;;  %v10189_v42 = vld [vmem:[#allocation10 + $0x304] ss:$8 sps:$4 sm:$0xff]  }
 0x550   :  { %3200 = vmatprep.subr.bf16.mxu0 %v10117_v43  ;;  %4048 = vmatprep.subr.bf16.mxu1 %v10117_v43  ;;  %v10187_v43 = vld [vmem:[#allocation10 + $0x300] ss:$8 sps:$4 sm:$0xff]  }
 0x553   :  { %3201 = vmatpush1.bf16.msra.mxu0 %v10115_v46  ;;  %4049 = vmatpush1.bf16.msra.mxu1 %v10115_v46  ;;  %v10192_v46 = vld [vmem:[#allocation10 + $0x314] ss:$8 sps:$4 sm:$0xff]  }
 0x554   :  { %3202 = vmatprep.subr.bf16.mxu0 %v10120_v4  ;;  %4050 = vmatprep.subr.bf16.mxu1 %v10120_v4  ;;  %v10190_v4 = vld [vmem:[#allocation10 + $0x310] ss:$8 sps:$4 sm:$0xff]  }
 0x557   :  { %3203 = vmatpush1.bf16.msra.mxu0 %v10118_v5  ;;  %4051 = vmatpush1.bf16.msra.mxu1 %v10118_v5  ;;  %v10195_v5 = vld [vmem:[#allocation10 + $0x324] ss:$8 sps:$4 sm:$0xff]  }
 0x558   :  { %3204 = vmatprep.subr.bf16.mxu0 %v10123_v20  ;;  %4052 = vmatprep.subr.bf16.mxu1 %v10123_v20  ;;  %v10193_v20 = vld [vmem:[#allocation10 + $0x320] ss:$8 sps:$4 sm:$0xff]  }
 0x55b   :  { %3205 = vmatpush1.bf16.msra.mxu0 %v10121_v50  ;;  %4053 = vmatpush1.bf16.msra.mxu1 %v10121_v50  ;;  %v10198_v50 = vld [vmem:[#allocation10 + $0x334] ss:$8 sps:$4 sm:$0xff]  }
 0x55c   :  { %3206 = vmatprep.subr.bf16.mxu0 %v10126_v60  ;;  %4054 = vmatprep.subr.bf16.mxu1 %v10126_v60  ;;  %v10196_v60 = vld [vmem:[#allocation10 + $0x330] ss:$8 sps:$4 sm:$0xff]  }
 0x55f   :  { %3207 = vmatpush1.bf16.msra.mxu0 %v10124_v0  ;;  %4055 = vmatpush1.bf16.msra.mxu1 %v10124_v0  ;;  %v10201_v0 = vld [vmem:[#allocation10 + $0x344] ss:$8 sps:$4 sm:$0xff]  }
 0x560   :  { %3208 = vmatprep.subr.bf16.mxu0 %v10129_v1  ;;  %4056 = vmatprep.subr.bf16.mxu1 %v10129_v1  ;;  %v10199_v1 = vld [vmem:[#allocation10 + $0x340] ss:$8 sps:$4 sm:$0xff]  }
 0x563   :  { %3209 = vmatpush1.bf16.msra.mxu0 %v10127_v2  ;;  %4057 = vmatpush1.bf16.msra.mxu1 %v10127_v2  ;;  %v10204_v2 = vld [vmem:[#allocation10 + $0x354] ss:$8 sps:$4 sm:$0xff]  }
 0x564   :  { %3210 = vmatprep.subr.bf16.mxu0 %v10132_v14  ;;  %4058 = vmatprep.subr.bf16.mxu1 %v10132_v14  ;;  %v10202_v14 = vld [vmem:[#allocation10 + $0x350] ss:$8 sps:$4 sm:$0xff]  }
 0x567   :  { %3211 = vmatpush1.bf16.msra.mxu0 %v10130_v6  ;;  %4059 = vmatpush1.bf16.msra.mxu1 %v10130_v6  ;;  %v10207_v6 = vld [vmem:[#allocation10 + $0x364] ss:$8 sps:$4 sm:$0xff]  }
 0x568   :  { %3212 = vmatprep.subr.bf16.mxu0 %v10135_v7  ;;  %4060 = vmatprep.subr.bf16.mxu1 %v10135_v7  ;;  %v10205_v7 = vld [vmem:[#allocation10 + $0x360] ss:$8 sps:$4 sm:$0xff]  }
 0x56b   :  { %3213 = vmatpush1.bf16.msra.mxu0 %v10133_v8  ;;  %4061 = vmatpush1.bf16.msra.mxu1 %v10133_v8  ;;  %v10210_v8 = vld [vmem:[#allocation10 + $0x374] ss:$8 sps:$4 sm:$0xff]  }
 0x56c   :  { %3214 = vmatprep.subr.bf16.mxu0 %v10138_v10  ;;  %4062 = vmatprep.subr.bf16.mxu1 %v10138_v10  ;;  %v10208_v10 = vld [vmem:[#allocation10 + $0x370] ss:$8 sps:$4 sm:$0xff]  }
 0x56f   :  { %3215 = vmatpush1.bf16.msra.mxu0 %v10136_v12  ;;  %4063 = vmatpush1.bf16.msra.mxu1 %v10136_v12  ;;  %v10213_v12 = vld [vmem:[#allocation10 + $0x384] ss:$8 sps:$4 sm:$0xff]  }
 0x570   :  { %3424 = vmatprep.subr.bf16.mxu0 %v10141_v47  ;;  %4079 = vmatprep.subr.bf16.mxu1 %v10141_v47  ;;  %v10211_v47 = vld [vmem:[#allocation10 + $0x380] ss:$8 sps:$4 sm:$0xff]  }
 0x572   :  { %3217 = vmatmul.mubr.bf16.vlgmr.msra.gmra.mrb[40].mxu0 %v12180_v40  ;;  %4065 = vmatmul.mubr.bf16.vlgmr.msra.gmra.mrb[40].mxu1 %v12191_v48 }
 0x573   :  { %3425 = vmatpush1.bf16.msra.mxu0 %v10139_v15  ;;  %3456 = vmatprep.mubr.bf16.mxu0 %v12195_v54 }
 0x574   :  { %4080 = vmatpush1.bf16.msra.mxu1 %v10139_v15  ;;  %3426 = vmatprep.subr.bf16.mxu0 %v10144_v16  ;;  %v10216_v15 = vld [vmem:[#allocation10 + $0x394] ss:$8 sps:$4 sm:$0xff]  }
 0x575   :  { %4081 = vmatprep.subr.bf16.mxu1 %v10144_v16  ;;  %4111 = vmatprep.mubr.bf16.mxu1 %v12197_v57  ;;  %v10214_v16 = vld [vmem:[#allocation10 + $0x390] ss:$8 sps:$4 sm:$0xff]  }
 0x577   :  { %3427 = vmatpush1.bf16.msra.mxu0 %v10142_v19 }
 0x578   :  { %4082 = vmatpush1.bf16.msra.mxu1 %v10142_v19  ;;  %3428 = vmatprep.subr.bf16.mxu0 %v10147_v21  ;;  %v10219_v19 = vld [vmem:[#allocation10 + $0x3a4] ss:$8 sps:$4 sm:$0xff]  }
 0x579   :  { %4083 = vmatprep.subr.bf16.mxu1 %v10147_v21  ;;  %v10217_v21 = vld [vmem:[#allocation10 + $0x3a0] ss:$8 sps:$4 sm:$0xff]  }
 0x57b   :  { %3429 = vmatpush1.bf16.msra.mxu0 %v10145_v23 }
 0x57c   :  { %4084 = vmatpush1.bf16.msra.mxu1 %v10145_v23  ;;  %3430 = vmatprep.subr.bf16.mxu0 %v10150_v44  ;;  %v10222_v23 = vld [vmem:[#allocation10 + $0x3b4] ss:$8 sps:$4 sm:$0xff]  }
 0x57d   :  { %4085 = vmatprep.subr.bf16.mxu1 %v10150_v44  ;;  %v10220_v44 = vld [vmem:[#allocation10 + $0x3b0] ss:$8 sps:$4 sm:$0xff]  }
 0x57f   :  { %3431 = vmatpush1.bf16.msra.mxu0 %v10148_v45 }
 0x580   :  { %4086 = vmatpush1.bf16.msra.mxu1 %v10148_v45  ;;  %3432 = vmatprep.subr.bf16.mxu0 %v10153_v53  ;;  %v10225_v45 = vld [vmem:[#allocation10 + $0x3c4] ss:$8 sps:$4 sm:$0xff]  }
 0x581   :  { %4087 = vmatprep.subr.bf16.mxu1 %v10153_v53  ;;  %v10223_v53 = vld [vmem:[#allocation10 + $0x3c0] ss:$8 sps:$4 sm:$0xff]  }
 0x583   :  { %3433 = vmatpush1.bf16.msra.mxu0 %v10151_v24 }
 0x584   :  { %4088 = vmatpush1.bf16.msra.mxu1 %v10151_v24  ;;  %3434 = vmatprep.subr.bf16.mxu0 %v10156_v26  ;;  %v10228_v24 = vld [vmem:[#allocation10 + $0x3d4] ss:$8 sps:$4 sm:$0xff]  }
 0x585   :  { %4089 = vmatprep.subr.bf16.mxu1 %v10156_v26  ;;  %v10226_v26 = vld [vmem:[#allocation10 + $0x3d0] ss:$8 sps:$4 sm:$0xff]  }
 0x587   :  { %3435 = vmatpush1.bf16.msra.mxu0 %v10154_v28 }
 0x588   :  { %4090 = vmatpush1.bf16.msra.mxu1 %v10154_v28  ;;  %3436 = vmatprep.subr.bf16.mxu0 %v10159_v27  ;;  %v10231_v28 = vld [vmem:[#allocation10 + $0x3e4] ss:$8 sps:$4 sm:$0xff]  }
 0x589   :  { %4091 = vmatprep.subr.bf16.mxu1 %v10159_v27  ;;  %v10229_v27 = vld [vmem:[#allocation10 + $0x3e0] ss:$8 sps:$4 sm:$0xff]  }
 0x58b   :  { %3437 = vmatpush1.bf16.msra.mxu0 %v10157_v29 }
 0x58c   :  { %4092 = vmatpush1.bf16.msra.mxu1 %v10157_v29  ;;  %3438 = vmatprep.subr.bf16.mxu0 %v10162_v49  ;;  %v10234_v29 = vld [vmem:[#allocation10 + $0x3f4] ss:$8 sps:$4 sm:$0xff]  }
 0x58d   :  { %4093 = vmatprep.subr.bf16.mxu1 %v10162_v49  ;;  %v10232_v49 = vld [vmem:[#allocation10 + $0x3f0] ss:$8 sps:$4 sm:$0xff]  }
 0x58f   :  { %3439 = vmatpush1.bf16.msra.mxu0 %v10160_v58 }
 0x590   :  { %4094 = vmatpush1.bf16.msra.mxu1 %v10160_v58  ;;  %3440 = vmatprep.subr.bf16.mxu0 %v10165_v59  ;;  %v10237_v58 = vld [vmem:[#allocation10 + $0x404] ss:$8 sps:$4 sm:$0xff]  }
 0x591   :  { %4095 = vmatprep.subr.bf16.mxu1 %v10165_v59  ;;  %v10235_v59 = vld [vmem:[#allocation10 + $0x400] ss:$8 sps:$4 sm:$0xff]  }
 0x593   :  { %3441 = vmatpush1.bf16.msra.mxu0 %v10163_v51 }
 0x594   :  { %4096 = vmatpush1.bf16.msra.mxu1 %v10163_v51  ;;  %3442 = vmatprep.subr.bf16.mxu0 %v10168_v52  ;;  %v10240_v51 = vld [vmem:[#allocation10 + $0x414] ss:$8 sps:$4 sm:$0xff]  }
 0x595   :  { %4097 = vmatprep.subr.bf16.mxu1 %v10168_v52  ;;  %v10238_v52 = vld [vmem:[#allocation10 + $0x410] ss:$8 sps:$4 sm:$0xff]  }
 0x597   :  { %3443 = vmatpush1.bf16.msra.mxu0 %v10166_v61 }
 0x598   :  { %4098 = vmatpush1.bf16.msra.mxu1 %v10166_v61  ;;  %3444 = vmatprep.subr.bf16.mxu0 %v10171_v30  ;;  %v10243_v61 = vld [vmem:[#allocation10 + $0x424] ss:$8 sps:$4 sm:$0xff]  }
 0x599   :  { %4099 = vmatprep.subr.bf16.mxu1 %v10171_v30  ;;  %v10241_v30 = vld [vmem:[#allocation10 + $0x420] ss:$8 sps:$4 sm:$0xff]  }
 0x59b   :  { %3445 = vmatpush1.bf16.msra.mxu0 %v10169_v31 }
 0x59c   :  { %4100 = vmatpush1.bf16.msra.mxu1 %v10169_v31  ;;  %3446 = vmatprep.subr.bf16.mxu0 %v10174_v32  ;;  %v10246_v31 = vld [vmem:[#allocation10 + $0x434] ss:$8 sps:$4 sm:$0xff]  }
 0x59d   :  { %4101 = vmatprep.subr.bf16.mxu1 %v10174_v32  ;;  %v10244_v32 = vld [vmem:[#allocation10 + $0x430] ss:$8 sps:$4 sm:$0xff]  }
 0x59f   :  { %3447 = vmatpush1.bf16.msra.mxu0 %v10172_v33 }
 0x5a0   :  { %4102 = vmatpush1.bf16.msra.mxu1 %v10172_v33  ;;  %3448 = vmatprep.subr.bf16.mxu0 %v10177_v34  ;;  %v10249_v33 = vld [vmem:[#allocation10 + $0x444] ss:$8 sps:$4 sm:$0xff]  }
 0x5a1   :  { %4103 = vmatprep.subr.bf16.mxu1 %v10177_v34  ;;  %v10247_v34 = vld [vmem:[#allocation10 + $0x440] ss:$8 sps:$4 sm:$0xff]  }
 0x5a3   :  { %3449 = vmatpush1.bf16.msra.mxu0 %v10175_v55 }
 0x5a4   :  { %4104 = vmatpush1.bf16.msra.mxu1 %v10175_v55  ;;  %3450 = vmatprep.subr.bf16.mxu0 %v10180_v56  ;;  %v10252_v55 = vld [vmem:[#allocation10 + $0x454] ss:$8 sps:$4 sm:$0xff]  }
 0x5a5   :  { %4105 = vmatprep.subr.bf16.mxu1 %v10180_v56  ;;  %v10250_v56 = vld [vmem:[#allocation10 + $0x450] ss:$8 sps:$4 sm:$0xff]  }
 0x5a7   :  { %3451 = vmatpush1.bf16.msra.mxu0 %v10178_v35 }
 0x5a8   :  { %4106 = vmatpush1.bf16.msra.mxu1 %v10178_v35  ;;  %3452 = vmatprep.subr.bf16.mxu0 %v10183_v37  ;;  %v10255_v35 = vld [vmem:[#allocation10 + $0x464] ss:$8 sps:$4 sm:$0xff]  }
 0x5a9   :  { %4107 = vmatprep.subr.bf16.mxu1 %v10183_v37  ;;  %v10253_v37 = vld [vmem:[#allocation10 + $0x460] ss:$8 sps:$4 sm:$0xff]  }
 0x5ab   :  { %3453 = vmatpush1.bf16.msra.mxu0 %v10181_v38 }
 0x5ac   :  { %4108 = vmatpush1.bf16.msra.mxu1 %v10181_v38  ;;  %3454 = vmatprep.subr.bf16.mxu0 %v10186_v63  ;;  %v10258_v38 = vld [vmem:[#allocation10 + $0x474] ss:$8 sps:$4 sm:$0xff]  }
 0x5ad   :  { %4109 = vmatprep.subr.bf16.mxu1 %v10186_v63  ;;  %v10256_v63 = vld [vmem:[#allocation10 + $0x470] ss:$8 sps:$4 sm:$0xff]  }
 0x5af   :  { %3455 = vmatpush1.bf16.msra.mxu0 %v10184_v9 }
 0x5b0   :  { %4110 = vmatpush1.bf16.msra.mxu1 %v10184_v9  ;;  %3664 = vmatprep.subr.bf16.mxu0 %v10189_v42  ;;  %v10261_v9 = vld [vmem:[#allocation10 + $0x484] ss:$8 sps:$4 sm:$0xff]  }
 0x5b1   :  { %4126 = vmatprep.subr.bf16.mxu1 %v10189_v42  ;;  %v10259_v42 = vld [vmem:[#allocation10 + $0x480] ss:$8 sps:$4 sm:$0xff]  }
 0x5b2   :  { %3457 = vmatmul.mubr.bf16.vlgmr.msra.gmra.mrb[40].mxu0 %v12191_v48 }
 0x5b3   :  { %4112 = vmatmul.mubr.bf16.vlgmr.msra.gmra.mrb[40].mxu1 %v12193_v25  ;;  %3665 = vmatpush1.bf16.msra.mxu0 %v10187_v43 }
 0x5b4   :  { %3696 = vmatprep.mubr.bf16.mxu0 %v12197_v57  ;;  %4127 = vmatpush1.bf16.msra.mxu1 %v10187_v43  ;;  %v10264_v43 = vld [vmem:[#allocation10 + $0x494] ss:$8 sps:$4 sm:$0xff]  }
 0x5b5   :  { %3666 = vmatprep.subr.bf16.mxu0 %v10192_v46  ;;  %4128 = vmatprep.subr.bf16.mxu1 %v10192_v46  ;;  %v10262_v46 = vld [vmem:[#allocation10 + $0x490] ss:$8 sps:$4 sm:$0xff]  }
 0x5b6   :  { %4158 = vmatprep.mubr.bf16.mxu1 %v12202_v39 }
 0x5b7   :  { %3667 = vmatpush1.bf16.msra.mxu0 %v10190_v4 }
 0x5b8   :  { %4129 = vmatpush1.bf16.msra.mxu1 %v10190_v4  ;;  %3668 = vmatprep.subr.bf16.mxu0 %v10195_v5  ;;  %v10267_v4 = vld [vmem:[#allocation10 + $0x4a4] ss:$8 sps:$4 sm:$0xff]  }
 0x5b9   :  { %4130 = vmatprep.subr.bf16.mxu1 %v10195_v5  ;;  %v10265_v5 = vld [vmem:[#allocation10 + $0x4a0] ss:$8 sps:$4 sm:$0xff]  }
 0x5bb   :  { %3669 = vmatpush1.bf16.msra.mxu0 %v10193_v20 }
 0x5bc   :  { %4131 = vmatpush1.bf16.msra.mxu1 %v10193_v20  ;;  %3670 = vmatprep.subr.bf16.mxu0 %v10198_v50  ;;  %v10270_v20 = vld [vmem:[#allocation10 + $0x4b4] ss:$8 sps:$4 sm:$0xff]  }
 0x5bd   :  { %4132 = vmatprep.subr.bf16.mxu1 %v10198_v50  ;;  %v10268_v50 = vld [vmem:[#allocation10 + $0x4b0] ss:$8 sps:$4 sm:$0xff]  }
 0x5bf   :  { %3671 = vmatpush1.bf16.msra.mxu0 %v10196_v60 }
 0x5c0   :  { %4133 = vmatpush1.bf16.msra.mxu1 %v10196_v60  ;;  %3672 = vmatprep.subr.bf16.mxu0 %v10201_v0  ;;  %v10273_v60 = vld [vmem:[#allocation10 + $0x4c4] ss:$8 sps:$4 sm:$0xff]  }
 0x5c1   :  { %4134 = vmatprep.subr.bf16.mxu1 %v10201_v0  ;;  %v10271_v0 = vld [vmem:[#allocation10 + $0x4c0] ss:$8 sps:$4 sm:$0xff]  }
 0x5c3   :  { %3673 = vmatpush1.bf16.msra.mxu0 %v10199_v1 }
 0x5c4   :  { %4135 = vmatpush1.bf16.msra.mxu1 %v10199_v1  ;;  %3674 = vmatprep.subr.bf16.mxu0 %v10204_v2  ;;  %v10276_v1 = vld [vmem:[#allocation10 + $0x4d4] ss:$8 sps:$4 sm:$0xff]  }
 0x5c5   :  { %4136 = vmatprep.subr.bf16.mxu1 %v10204_v2  ;;  %v10274_v2 = vld [vmem:[#allocation10 + $0x4d0] ss:$8 sps:$4 sm:$0xff]  }
 0x5c7   :  { %3675 = vmatpush1.bf16.msra.mxu0 %v10202_v14 }
 0x5c8   :  { %4137 = vmatpush1.bf16.msra.mxu1 %v10202_v14  ;;  %3676 = vmatprep.subr.bf16.mxu0 %v10207_v6  ;;  %v10279_v14 = vld [vmem:[#allocation10 + $0x4e4] ss:$8 sps:$4 sm:$0xff]  }
 0x5c9   :  { %4138 = vmatprep.subr.bf16.mxu1 %v10207_v6  ;;  %v10277_v6 = vld [vmem:[#allocation10 + $0x4e0] ss:$8 sps:$4 sm:$0xff]  }
 0x5cb   :  { %3677 = vmatpush1.bf16.msra.mxu0 %v10205_v7 }
 0x5cc   :  { %4139 = vmatpush1.bf16.msra.mxu1 %v10205_v7  ;;  %3678 = vmatprep.subr.bf16.mxu0 %v10210_v8  ;;  %v10282_v7 = vld [vmem:[#allocation10 + $0x4f4] ss:$8 sps:$4 sm:$0xff]  }
 0x5cd   :  { %4140 = vmatprep.subr.bf16.mxu1 %v10210_v8  ;;  %v10280_v8 = vld [vmem:[#allocation10 + $0x4f0] ss:$8 sps:$4 sm:$0xff]  }
 0x5cf   :  { %3679 = vmatpush1.bf16.msra.mxu0 %v10208_v10 }
 0x5d0   :  { %4141 = vmatpush1.bf16.msra.mxu1 %v10208_v10  ;;  %3680 = vmatprep.subr.bf16.mxu0 %v10213_v12  ;;  %v10285_v10 = vld [vmem:[#allocation10 + $0x504] ss:$8 sps:$4 sm:$0xff]  }
 0x5d1   :  { %4142 = vmatprep.subr.bf16.mxu1 %v10213_v12  ;;  %v10283_v12 = vld [vmem:[#allocation10 + $0x500] ss:$8 sps:$4 sm:$0xff]  }
 0x5d3   :  { %3681 = vmatpush1.bf16.msra.mxu0 %v10211_v47 }
 0x5d4   :  { %4143 = vmatpush1.bf16.msra.mxu1 %v10211_v47  ;;  %3682 = vmatprep.subr.bf16.mxu0 %v10216_v15  ;;  %v10288_v47 = vld [vmem:[#allocation10 + $0x514] ss:$8 sps:$4 sm:$0xff]  }
 0x5d5   :  { %4144 = vmatprep.subr.bf16.mxu1 %v10216_v15  ;;  %v10286_v15 = vld [vmem:[#allocation10 + $0x510] ss:$8 sps:$4 sm:$0xff]  }
 0x5d7   :  { %3683 = vmatpush1.bf16.msra.mxu0 %v10214_v16 }
 0x5d8   :  { %4145 = vmatpush1.bf16.msra.mxu1 %v10214_v16  ;;  %3684 = vmatprep.subr.bf16.mxu0 %v10219_v19  ;;  %v10291_v16 = vld [vmem:[#allocation10 + $0x524] ss:$8 sps:$4 sm:$0xff]  }
 0x5d9   :  { %4146 = vmatprep.subr.bf16.mxu1 %v10219_v19  ;;  %v10289_v19 = vld [vmem:[#allocation10 + $0x520] ss:$8 sps:$4 sm:$0xff]  }
 0x5db   :  { %3685 = vmatpush1.bf16.msra.mxu0 %v10217_v21 }
 0x5dc   :  { %4147 = vmatpush1.bf16.msra.mxu1 %v10217_v21  ;;  %3686 = vmatprep.subr.bf16.mxu0 %v10222_v23  ;;  %v10294_v21 = vld [vmem:[#allocation10 + $0x534] ss:$8 sps:$4 sm:$0xff]  }
 0x5dd   :  { %4148 = vmatprep.subr.bf16.mxu1 %v10222_v23  ;;  %v10292_v23 = vld [vmem:[#allocation10 + $0x530] ss:$8 sps:$4 sm:$0xff]  }
 0x5df   :  { %3687 = vmatpush1.bf16.msra.mxu0 %v10220_v44 }
 0x5e0   :  { %4149 = vmatpush1.bf16.msra.mxu1 %v10220_v44  ;;  %3688 = vmatprep.subr.bf16.mxu0 %v10225_v45  ;;  %v10297_v44 = vld [vmem:[#allocation10 + $0x544] ss:$8 sps:$4 sm:$0xff]  }
 0x5e1   :  { %4150 = vmatprep.subr.bf16.mxu1 %v10225_v45  ;;  %v10300_v45 = vld [vmem:[#allocation10 + $0x554] ss:$8 sps:$4 sm:$0xff]  }
 0x5e3   :  { %3689 = vmatpush1.bf16.msra.mxu0 %v10223_v53 }
 0x5e4   :  { %4151 = vmatpush1.bf16.msra.mxu1 %v10223_v53  ;;  %3690 = vmatprep.subr.bf16.mxu0 %v10228_v24  ;;  %v10298_v53 = vld [vmem:[#allocation10 + $0x550] ss:$8 sps:$4 sm:$0xff]  }
 0x5e5   :  { %4152 = vmatprep.subr.bf16.mxu1 %v10228_v24  ;;  %v10303_v24 = vld [vmem:[#allocation10 + $0x564] ss:$8 sps:$4 sm:$0xff]  }
 0x5e7   :  { %3691 = vmatpush1.bf16.msra.mxu0 %v10226_v26 }
 0x5e8   :  { %4153 = vmatpush1.bf16.msra.mxu1 %v10226_v26  ;;  %3692 = vmatprep.subr.bf16.mxu0 %v10231_v28  ;;  %v10301_v26 = vld [vmem:[#allocation10 + $0x560] ss:$8 sps:$4 sm:$0xff]  }
 0x5e9   :  { %4154 = vmatprep.subr.bf16.mxu1 %v10231_v28  ;;  %v10306_v28 = vld [vmem:[#allocation10 + $0x574] ss:$8 sps:$4 sm:$0xff]  }
 0x5eb   :  { %3693 = vmatpush1.bf16.msra.mxu0 %v10229_v27 }
 0x5ec   :  { %4155 = vmatpush1.bf16.msra.mxu1 %v10229_v27  ;;  %3694 = vmatprep.subr.bf16.mxu0 %v10234_v29  ;;  %v10304_v27 = vld [vmem:[#allocation10 + $0x570] ss:$8 sps:$4 sm:$0xff]  }
 0x5ed   :  { %4156 = vmatprep.subr.bf16.mxu1 %v10234_v29  ;;  %v10309_v29 = vld [vmem:[#allocation10 + $0x584] ss:$8 sps:$4 sm:$0xff]  }
 0x5ef   :  { %3695 = vmatpush1.bf16.msra.mxu0 %v10232_v49 }
 0x5f0   :  { %4157 = vmatpush1.bf16.msra.mxu1 %v10232_v49  ;;  %3904 = vmatprep.subr.bf16.mxu0 %v10237_v58  ;;  %v10307_v49 = vld [vmem:[#allocation10 + $0x580] ss:$8 sps:$4 sm:$0xff]  }
 0x5f1   :  { %4173 = vmatprep.subr.bf16.mxu1 %v10237_v58  ;;  %v10312_v58 = vld [vmem:[#allocation10 + $0x594] ss:$8 sps:$4 sm:$0xff]  }
 0x5f2   :  { %3697 = vmatmul.mubr.bf16.vlgmr.msra.gmra.mrb[40].mxu0 %v12193_v25 }
 0x5f3   :  { %4159 = vmatmul.mubr.bf16.vlgmr.msra.gmra.mrb[40].mxu1 %v12200_v3  ;;  %3905 = vmatpush1.bf16.msra.mxu0 %v10235_v59 }
 0x5f4   :  { %3936 = vmatprep.mubr.bf16.mxu0 %v12202_v39  ;;  %4174 = vmatpush1.bf16.msra.mxu1 %v10235_v59  ;;  %v10310_v59 = vld [vmem:[#allocation10 + $0x590] ss:$8 sps:$4 sm:$0xff]  }
 0x5f5   :  { %4205 = vmatprep.mubr.bf16.mxu1 %v12206_v41  ;;  %3906 = vmatprep.subr.bf16.mxu0 %v10240_v51 }
 0x5f6   :  { %4175 = vmatprep.subr.bf16.mxu1 %v10240_v51  ;;  %v10315_v51 = vld [vmem:[#allocation10 + $0x5a4] ss:$8 sps:$4 sm:$0xff]  }
 0x5f7   :  { %3907 = vmatpush1.bf16.msra.mxu0 %v10238_v52 }
 0x5f8   :  { %4176 = vmatpush1.bf16.msra.mxu1 %v10238_v52  ;;  %3908 = vmatprep.subr.bf16.mxu0 %v10243_v61  ;;  %v10313_v52 = vld [vmem:[#allocation10 + $0x5a0] ss:$8 sps:$4 sm:$0xff]  }
 0x5f9   :  { %4177 = vmatprep.subr.bf16.mxu1 %v10243_v61  ;;  %v10318_v61 = vld [vmem:[#allocation10 + $0x5b4] ss:$8 sps:$4 sm:$0xff]  }
 0x5fb   :  { %3909 = vmatpush1.bf16.msra.mxu0 %v10241_v30 }
 0x5fc   :  { %4178 = vmatpush1.bf16.msra.mxu1 %v10241_v30  ;;  %3910 = vmatprep.subr.bf16.mxu0 %v10246_v31  ;;  %v10316_v30 = vld [vmem:[#allocation10 + $0x5b0] ss:$8 sps:$4 sm:$0xff]  }
 0x5fd   :  { %4179 = vmatprep.subr.bf16.mxu1 %v10246_v31  ;;  %v10321_v31 = vld [vmem:[#allocation10 + $0x5c4] ss:$8 sps:$4 sm:$0xff]  }
 0x5ff   :  { %3911 = vmatpush1.bf16.msra.mxu0 %v10244_v32 }
 0x600   :  { %4180 = vmatpush1.bf16.msra.mxu1 %v10244_v32  ;;  %3912 = vmatprep.subr.bf16.mxu0 %v10249_v33  ;;  %v10319_v32 = vld [vmem:[#allocation10 + $0x5c0] ss:$8 sps:$4 sm:$0xff]  }
 0x601   :  { %4181 = vmatprep.subr.bf16.mxu1 %v10249_v33  ;;  %v10324_v33 = vld [vmem:[#allocation10 + $0x5d4] ss:$8 sps:$4 sm:$0xff]  }
 0x603   :  { %3913 = vmatpush1.bf16.msra.mxu0 %v10247_v34 }
 0x604   :  { %4182 = vmatpush1.bf16.msra.mxu1 %v10247_v34  ;;  %3914 = vmatprep.subr.bf16.mxu0 %v10252_v55  ;;  %v10322_v34 = vld [vmem:[#allocation10 + $0x5d0] ss:$8 sps:$4 sm:$0xff]  }
 0x605   :  { %4183 = vmatprep.subr.bf16.mxu1 %v10252_v55  ;;  %v10327_v55 = vld [vmem:[#allocation10 + $0x5e4] ss:$8 sps:$4 sm:$0xff]  }
 0x607   :  { %3915 = vmatpush1.bf16.msra.mxu0 %v10250_v56 }
 0x608   :  { %4184 = vmatpush1.bf16.msra.mxu1 %v10250_v56  ;;  %3916 = vmatprep.subr.bf16.mxu0 %v10255_v35  ;;  %v10325_v56 = vld [vmem:[#allocation10 + $0x5e0] ss:$8 sps:$4 sm:$0xff]  }
 0x609   :  { %4185 = vmatprep.subr.bf16.mxu1 %v10255_v35  ;;  %v10330_v35 = vld [vmem:[#allocation10 + $0x5f4] ss:$8 sps:$4 sm:$0xff]  }
 0x60b   :  { %3917 = vmatpush1.bf16.msra.mxu0 %v10253_v37 }
 0x60c   :  { %4186 = vmatpush1.bf16.msra.mxu1 %v10253_v37  ;;  %3918 = vmatprep.subr.bf16.mxu0 %v10258_v38  ;;  %v10328_v37 = vld [vmem:[#allocation10 + $0x5f0] ss:$8 sps:$4 sm:$0xff]  }
 0x60d   :  { %4187 = vmatprep.subr.bf16.mxu1 %v10258_v38  ;;  %v10333_v38 = vld [vmem:[#allocation10 + $0x604] ss:$8 sps:$4 sm:$0xff]  }
 0x60f   :  { %3919 = vmatpush1.bf16.msra.mxu0 %v10256_v63 }
 0x610   :  { %4188 = vmatpush1.bf16.msra.mxu1 %v10256_v63  ;;  %3920 = vmatprep.subr.bf16.mxu0 %v10261_v9  ;;  %v10331_v63 = vld [vmem:[#allocation10 + $0x600] ss:$8 sps:$4 sm:$0xff]  }
 0x611   :  { %4189 = vmatprep.subr.bf16.mxu1 %v10261_v9  ;;  %v10336_v9 = vld [vmem:[#allocation10 + $0x614] ss:$8 sps:$4 sm:$0xff]  }
 0x613   :  { %3921 = vmatpush1.bf16.msra.mxu0 %v10259_v42 }
 0x614   :  { %4190 = vmatpush1.bf16.msra.mxu1 %v10259_v42  ;;  %3922 = vmatprep.subr.bf16.mxu0 %v10264_v43  ;;  %v10334_v42 = vld [vmem:[#allocation10 + $0x610] ss:$8 sps:$4 sm:$0xff]  }
 0x615   :  { %4191 = vmatprep.subr.bf16.mxu1 %v10264_v43  ;;  %v10339_v43 = vld [vmem:[#allocation10 + $0x624] ss:$8 sps:$4 sm:$0xff]  }
 0x617   :  { %3923 = vmatpush1.bf16.msra.mxu0 %v10262_v46 }
 0x618   :  { %4192 = vmatpush1.bf16.msra.mxu1 %v10262_v46  ;;  %3924 = vmatprep.subr.bf16.mxu0 %v10267_v4  ;;  %v10337_v46 = vld [vmem:[#allocation10 + $0x620] ss:$8 sps:$4 sm:$0xff]  }
 0x619   :  { %4193 = vmatprep.subr.bf16.mxu1 %v10267_v4  ;;  %v10342_v4 = vld [vmem:[#allocation10 + $0x634] ss:$8 sps:$4 sm:$0xff]  }
 0x61b   :  { %3925 = vmatpush1.bf16.msra.mxu0 %v10265_v5 }
 0x61c   :  { %4194 = vmatpush1.bf16.msra.mxu1 %v10265_v5  ;;  %3926 = vmatprep.subr.bf16.mxu0 %v10270_v20  ;;  %v10345_v5 = vld [vmem:[#allocation10 + $0x644] ss:$8 sps:$4 sm:$0xff]  }
 0x61d   :  { %4195 = vmatprep.subr.bf16.mxu1 %v10270_v20  ;;  %v10348_v20 = vld [vmem:[#allocation10 + $0x654] ss:$8 sps:$4 sm:$0xff]  }
 0x61f   :  { %3927 = vmatpush1.bf16.msra.mxu0 %v10268_v50 }
 0x620   :  { %4196 = vmatpush1.bf16.msra.mxu1 %v10268_v50  ;;  %3928 = vmatprep.subr.bf16.mxu0 %v10273_v60  ;;  %v10346_v50 = vld [vmem:[#allocation10 + $0x650] ss:$8 sps:$4 sm:$0xff]  }
 0x621   :  { %4197 = vmatprep.subr.bf16.mxu1 %v10273_v60  ;;  %v10351_v60 = vld [vmem:[#allocation10 + $0x664] ss:$8 sps:$4 sm:$0xff]  }
 0x623   :  { %3929 = vmatpush1.bf16.msra.mxu0 %v10271_v0 }
 0x624   :  { %4198 = vmatpush1.bf16.msra.mxu1 %v10271_v0  ;;  %3930 = vmatprep.subr.bf16.mxu0 %v10276_v1  ;;  %v10349_v0 = vld [vmem:[#allocation10 + $0x660] ss:$8 sps:$4 sm:$0xff]  }
 0x625   :  { %4199 = vmatprep.subr.bf16.mxu1 %v10276_v1  ;;  %v10354_v1 = vld [vmem:[#allocation10 + $0x674] ss:$8 sps:$4 sm:$0xff]  }
 0x627   :  { %3931 = vmatpush1.bf16.msra.mxu0 %v10274_v2 }
 0x628   :  { %4200 = vmatpush1.bf16.msra.mxu1 %v10274_v2  ;;  %3932 = vmatprep.subr.bf16.mxu0 %v10279_v14  ;;  %v10352_v2 = vld [vmem:[#allocation10 + $0x670] ss:$8 sps:$4 sm:$0xff]  }
 0x629   :  { %4201 = vmatprep.subr.bf16.mxu1 %v10279_v14  ;;  %v10357_v14 = vld [vmem:[#allocation10 + $0x684] ss:$8 sps:$4 sm:$0xff]  }
 0x62b   :  { %3933 = vmatpush1.bf16.msra.mxu0 %v10277_v6 }
 0x62c   :  { %4202 = vmatpush1.bf16.msra.mxu1 %v10277_v6  ;;  %3934 = vmatprep.subr.bf16.mxu0 %v10282_v7  ;;  %v10355_v6 = vld [vmem:[#allocation10 + $0x680] ss:$8 sps:$4 sm:$0xff]  }
 0x62d   :  { %4203 = vmatprep.subr.bf16.mxu1 %v10282_v7  ;;  %v10360_v7 = vld [vmem:[#allocation10 + $0x694] ss:$8 sps:$4 sm:$0xff]  }
 0x62f   :  { %3935 = vmatpush1.bf16.msra.mxu0 %v10280_v8 }
 0x630   :  { %4204 = vmatpush1.bf16.msra.mxu1 %v10280_v8  ;;  %4429 = vmatprep.subr.bf16.mxu0 %v10285_v10  ;;  %v10358_v8 = vld [vmem:[#allocation10 + $0x690] ss:$8 sps:$4 sm:$0xff]  }
 0x631   :  { %5452 = vmatprep.subr.bf16.mxu1 %v10285_v10  ;;  %v10363_v10 = vld [vmem:[#allocation10 + $0x6a4] ss:$8 sps:$4 sm:$0xff]  }
 0x632   :  { %3937 = vmatmul.mubr.bf16.vlgmr.msra.gmra.mrb[40].mxu0 %v12200_v3 }
 0x633   :  { %4206 = vmatmul.mubr.bf16.vlgmr.msra.gmra.mrb[40].mxu1 %v12204_v62  ;;  %4430 = vmatpush1.bf16.msra.mxu0 %v10283_v12 }
 0x634   :  { %4461 = vmatprep.mubr.bf16.mxu0 %v12182_v17  ;;  %5453 = vmatpush1.bf16.msra.mxu1 %v10283_v12  ;;  %v10295_v17 = vld [vmem:[#allocation10 + $0x540] ss:$8 sps:$4 sm:$0xff]  }
 0x635   :  { %5484 = vmatprep.mubr.bf16.mxu1 %v12184_v22  ;;  %4431 = vmatprep.subr.bf16.mxu0 %v10288_v47  ;;  %v10361_v12 = vld [vmem:[#allocation10 + $0x6a0] ss:$8 sps:$4 sm:$0xff]  }
 0x636   :  { %5454 = vmatprep.subr.bf16.mxu1 %v10288_v47  ;;  %v10366_v47 = vld [vmem:[#allocation10 + $0x6b4] ss:$8 sps:$4 sm:$0xff]  }
 0x637   :  { %4432 = vmatpush1.bf16.msra.mxu0 %v10286_v15 }
 0x638   :  { %5455 = vmatpush1.bf16.msra.mxu1 %v10286_v15  ;;  %4433 = vmatprep.subr.bf16.mxu0 %v10291_v16  ;;  %v10364_v15 = vld [vmem:[#allocation10 + $0x6b0] ss:$8 sps:$4 sm:$0xff]  }
 0x639   :  { %5456 = vmatprep.subr.bf16.mxu1 %v10291_v16  ;;  %v10369_v16 = vld [vmem:[#allocation10 + $0x6c4] ss:$8 sps:$4 sm:$0xff]  }
 0x63b   :  { %4434 = vmatpush1.bf16.msra.mxu0 %v10289_v19 }
 0x63c   :  { %5457 = vmatpush1.bf16.msra.mxu1 %v10289_v19  ;;  %4435 = vmatprep.subr.bf16.mxu0 %v10294_v21  ;;  %v10367_v19 = vld [vmem:[#allocation10 + $0x6c0] ss:$8 sps:$4 sm:$0xff]  }
 0x63d   :  { %5458 = vmatprep.subr.bf16.mxu1 %v10294_v21  ;;  %v10372_v21 = vld [vmem:[#allocation10 + $0x6d4] ss:$8 sps:$4 sm:$0xff]  }
 0x63f   :  { %4436 = vmatpush1.bf16.msra.mxu0 %v10292_v23 }
 0x640   :  { %5459 = vmatpush1.bf16.msra.mxu1 %v10292_v23  ;;  %4437 = vmatprep.subr.bf16.mxu0 %v10297_v44  ;;  %v10370_v23 = vld [vmem:[#allocation10 + $0x6d0] ss:$8 sps:$4 sm:$0xff]  }
 0x641   :  { %5460 = vmatprep.subr.bf16.mxu1 %v10297_v44  ;;  %v10375_v44 = vld [vmem:[#allocation10 + $0x6e4] ss:$8 sps:$4 sm:$0xff]  }
 0x643   :  { %4438 = vmatpush1.bf16.msra.mxu0 %v10295_v17 }
 0x644   :  { %5461 = vmatpush1.bf16.msra.mxu1 %v10295_v17  ;;  %4439 = vmatprep.subr.bf16.mxu0 %v10300_v45  ;;  %v10373_v17 = vld [vmem:[#allocation10 + $0x6e0] ss:$8 sps:$4 sm:$0xff]  }
 0x645   :  { %5462 = vmatprep.subr.bf16.mxu1 %v10300_v45  ;;  %v10378_v45 = vld [vmem:[#allocation10 + $0x6f4] ss:$8 sps:$4 sm:$0xff]  }
 0x647   :  { %4440 = vmatpush1.bf16.msra.mxu0 %v10298_v53 }
 0x648   :  { %5463 = vmatpush1.bf16.msra.mxu1 %v10298_v53  ;;  %4441 = vmatprep.subr.bf16.mxu0 %v10303_v24  ;;  %v10376_v53 = vld [vmem:[#allocation10 + $0x6f0] ss:$8 sps:$4 sm:$0xff]  }
 0x649   :  { %5464 = vmatprep.subr.bf16.mxu1 %v10303_v24  ;;  %v10381_v24 = vld [vmem:[#allocation10 + $0x704] ss:$8 sps:$4 sm:$0xff]  }
 0x64b   :  { %4442 = vmatpush1.bf16.msra.mxu0 %v10301_v26 }
 0x64c   :  { %5465 = vmatpush1.bf16.msra.mxu1 %v10301_v26  ;;  %4443 = vmatprep.subr.bf16.mxu0 %v10306_v28  ;;  %v10379_v26 = vld [vmem:[#allocation10 + $0x700] ss:$8 sps:$4 sm:$0xff]  }
 0x64d   :  { %5466 = vmatprep.subr.bf16.mxu1 %v10306_v28  ;;  %v10384_v28 = vld [vmem:[#allocation10 + $0x714] ss:$8 sps:$4 sm:$0xff]  }
 0x64f   :  { %4444 = vmatpush1.bf16.msra.mxu0 %v10304_v27 }
 0x650   :  { %5467 = vmatpush1.bf16.msra.mxu1 %v10304_v27  ;;  %4445 = vmatprep.subr.bf16.mxu0 %v10309_v29  ;;  %v10382_v27 = vld [vmem:[#allocation10 + $0x710] ss:$8 sps:$4 sm:$0xff]  }
 0x651   :  { %5468 = vmatprep.subr.bf16.mxu1 %v10309_v29  ;;  %v10387_v29 = vld [vmem:[#allocation10 + $0x724] ss:$8 sps:$4 sm:$0xff]  }
 0x653   :  { %4446 = vmatpush1.bf16.msra.mxu0 %v10307_v49 }
 0x654   :  { %5469 = vmatpush1.bf16.msra.mxu1 %v10307_v49  ;;  %4447 = vmatprep.subr.bf16.mxu0 %v10312_v58  ;;  %v10385_v49 = vld [vmem:[#allocation10 + $0x720] ss:$8 sps:$4 sm:$0xff]  }
 0x655   :  { %5470 = vmatprep.subr.bf16.mxu1 %v10312_v58  ;;  %v10390_v58 = vld [vmem:[#allocation10 + $0x734] ss:$8 sps:$4 sm:$0xff]  }
 0x657   :  { %4448 = vmatpush1.bf16.msra.mxu0 %v10310_v59 }
 0x658   :  { %5471 = vmatpush1.bf16.msra.mxu1 %v10310_v59  ;;  %4449 = vmatprep.subr.bf16.mxu0 %v10315_v51  ;;  %v10393_v59 = vld [vmem:[#allocation10 + $0x744] ss:$8 sps:$4 sm:$0xff]  }
 0x659   :  { %5472 = vmatprep.subr.bf16.mxu1 %v10315_v51  ;;  %v10396_v51 = vld [vmem:[#allocation10 + $0x754] ss:$8 sps:$4 sm:$0xff]  }
 0x65b   :  { %4450 = vmatpush1.bf16.msra.mxu0 %v10313_v52 }
 0x65c   :  { %5473 = vmatpush1.bf16.msra.mxu1 %v10313_v52  ;;  %4451 = vmatprep.subr.bf16.mxu0 %v10318_v61  ;;  %v10394_v52 = vld [vmem:[#allocation10 + $0x750] ss:$8 sps:$4 sm:$0xff]  }
 0x65d   :  { %5474 = vmatprep.subr.bf16.mxu1 %v10318_v61  ;;  %v10399_v61 = vld [vmem:[#allocation10 + $0x764] ss:$8 sps:$4 sm:$0xff]  }
 0x65f   :  { %4452 = vmatpush1.bf16.msra.mxu0 %v10316_v30 }
 0x660   :  { %5475 = vmatpush1.bf16.msra.mxu1 %v10316_v30  ;;  %4453 = vmatprep.subr.bf16.mxu0 %v10321_v31  ;;  %v10397_v30 = vld [vmem:[#allocation10 + $0x760] ss:$8 sps:$4 sm:$0xff]  }
 0x661   :  { %5476 = vmatprep.subr.bf16.mxu1 %v10321_v31  ;;  %v10402_v31 = vld [vmem:[#allocation10 + $0x774] ss:$8 sps:$4 sm:$0xff]  }
 0x663   :  { %4454 = vmatpush1.bf16.msra.mxu0 %v10319_v32 }
 0x664   :  { %5477 = vmatpush1.bf16.msra.mxu1 %v10319_v32  ;;  %4455 = vmatprep.subr.bf16.mxu0 %v10324_v33  ;;  %v10400_v32 = vld [vmem:[#allocation10 + $0x770] ss:$8 sps:$4 sm:$0xff]  }
 0x665   :  { %5478 = vmatprep.subr.bf16.mxu1 %v10324_v33  ;;  %v10405_v33 = vld [vmem:[#allocation10 + $0x784] ss:$8 sps:$4 sm:$0xff]  }
 0x667   :  { %4456 = vmatpush1.bf16.msra.mxu0 %v10322_v34 }
 0x668   :  { %5479 = vmatpush1.bf16.msra.mxu1 %v10322_v34  ;;  %4457 = vmatprep.subr.bf16.mxu0 %v10327_v55  ;;  %v10403_v34 = vld [vmem:[#allocation10 + $0x780] ss:$8 sps:$4 sm:$0xff]  }
 0x669   :  { %5480 = vmatprep.subr.bf16.mxu1 %v10327_v55  ;;  %v10408_v55 = vld [vmem:[#allocation10 + $0x794] ss:$8 sps:$4 sm:$0xff]  }
 0x66b   :  { %4458 = vmatpush1.bf16.msra.mxu0 %v10325_v56 }
 0x66c   :  { %5481 = vmatpush1.bf16.msra.mxu1 %v10325_v56  ;;  %4459 = vmatprep.subr.bf16.mxu0 %v10330_v35  ;;  %v10406_v56 = vld [vmem:[#allocation10 + $0x790] ss:$8 sps:$4 sm:$0xff]  }
 0x66d   :  { %5482 = vmatprep.subr.bf16.mxu1 %v10330_v35  ;;  %v10411_v35 = vld [vmem:[#allocation10 + $0x7a4] ss:$8 sps:$4 sm:$0xff]  }
 0x66f   :  { %4460 = vmatpush1.bf16.msra.mxu0 %v10328_v37 }
 0x670   :  { %5483 = vmatpush1.bf16.msra.mxu1 %v10328_v37  ;;  %4669 = vmatprep.subr.bf16.mxu0 %v10333_v38  ;;  %v10409_v37 = vld [vmem:[#allocation10 + $0x7a0] ss:$8 sps:$4 sm:$0xff]  }
 0x671   :  { %5499 = vmatprep.subr.bf16.mxu1 %v10333_v38  ;;  %v10414_v38 = vld [vmem:[#allocation10 + $0x7b4] ss:$8 sps:$4 sm:$0xff]  }
 0x672   :  { %4462 = vmatmul.mubr.bf16.vlgmr.msra.gmra.mrb[44].mxu0 %v12178_v36  ;;  %v10340_v36 = vld [vmem:[#allocation10 + $0x630] ss:$8 sps:$4 sm:$0xff]  }
 0x673   :  { %5485 = vmatmul.mubr.bf16.vlgmr.msra.gmra.mrb[44].mxu1 %v12180_v40  ;;  %4670 = vmatpush1.bf16.msra.mxu0 %v10331_v63 }
 0x674   :  { %4701 = vmatprep.mubr.bf16.mxu0 %v12184_v22  ;;  %5500 = vmatpush1.bf16.msra.mxu1 %v10331_v63  ;;  %v10343_v22 = vld [vmem:[#allocation10 + $0x640] ss:$8 sps:$4 sm:$0xff]   ;;  %v10412_v63 = vld [vmem:[#allocation10 + $0x7b0] ss:$8 sps:$4 sm:$0xff]  }
 0x675   :  { %5531 = vmatprep.mubr.bf16.mxu1 %v12195_v54  ;;  %4671 = vmatprep.subr.bf16.mxu0 %v10336_v9 }
 0x676   :  { %5501 = vmatprep.subr.bf16.mxu1 %v10336_v9  ;;  %v10417_v9 = vld [vmem:[#allocation10 + $0x7c4] ss:$8 sps:$4 sm:$0xff]  }
 0x677   :  { %4672 = vmatpush1.bf16.msra.mxu0 %v10334_v42 }
 0x678   :  { %5502 = vmatpush1.bf16.msra.mxu1 %v10334_v42  ;;  %4673 = vmatprep.subr.bf16.mxu0 %v10339_v43  ;;  %v10415_v42 = vld [vmem:[#allocation10 + $0x7c0] ss:$8 sps:$4 sm:$0xff]  }
 0x679   :  { %5503 = vmatprep.subr.bf16.mxu1 %v10339_v43  ;;  %v10420_v43 = vld [vmem:[#allocation10 + $0x7d4] ss:$8 sps:$4 sm:$0xff]  }
 0x67b   :  { %4674 = vmatpush1.bf16.msra.mxu0 %v10337_v46 }
 0x67c   :  { %5504 = vmatpush1.bf16.msra.mxu1 %v10337_v46  ;;  %4675 = vmatprep.subr.bf16.mxu0 %v10342_v4  ;;  %v10418_v46 = vld [vmem:[#allocation10 + $0x7d0] ss:$8 sps:$4 sm:$0xff]  }
 0x67d   :  { %5505 = vmatprep.subr.bf16.mxu1 %v10342_v4  ;;  %v10423_v4 = vld [vmem:[#allocation10 + $0x7e4] ss:$8 sps:$4 sm:$0xff]  }
 0x67f   :  { %4676 = vmatpush1.bf16.msra.mxu0 %v10340_v36 }
 0x680   :  { %5506 = vmatpush1.bf16.msra.mxu1 %v10340_v36  ;;  %4677 = vmatprep.subr.bf16.mxu0 %v10345_v5  ;;  %v10421_v36 = vld [vmem:[#allocation10 + $0x7e0] ss:$8 sps:$4 sm:$0xff]  }
 0x681   :  { %5507 = vmatprep.subr.bf16.mxu1 %v10345_v5  ;;  %v10426_v5 = vld [vmem:[#allocation10 + $0x7f4] ss:$8 sps:$4 sm:$0xff]  }
 0x683   :  { %4678 = vmatpush1.bf16.msra.mxu0 %v10343_v22 }
 0x684   :  { %5508 = vmatpush1.bf16.msra.mxu1 %v10343_v22  ;;  %4679 = vmatprep.subr.bf16.mxu0 %v10348_v20  ;;  %v10424_v22 = vld [vmem:[#allocation10 + $0x7f0] ss:$8 sps:$4 sm:$0xff]  }
 0x685   :  { %5509 = vmatprep.subr.bf16.mxu1 %v10348_v20  ;;  %v10429_v20 = vld [vmem:[#allocation10 + $0x804] ss:$8 sps:$4 sm:$0xff]  }
 0x687   :  { %4680 = vmatpush1.bf16.msra.mxu0 %v10346_v50 }
 0x688   :  { %5510 = vmatpush1.bf16.msra.mxu1 %v10346_v50  ;;  %4681 = vmatprep.subr.bf16.mxu0 %v10351_v60  ;;  %v10427_v50 = vld [vmem:[#allocation10 + $0x800] ss:$8 sps:$4 sm:$0xff]  }
 0x689   :  { %5511 = vmatprep.subr.bf16.mxu1 %v10351_v60  ;;  %v10432_v60 = vld [vmem:[#allocation10 + $0x814] ss:$8 sps:$4 sm:$0xff]  }
 0x68b   :  { %4682 = vmatpush1.bf16.msra.mxu0 %v10349_v0 }
 0x68c   :  { %5512 = vmatpush1.bf16.msra.mxu1 %v10349_v0  ;;  %4683 = vmatprep.subr.bf16.mxu0 %v10354_v1  ;;  %v10430_v0 = vld [vmem:[#allocation10 + $0x810] ss:$8 sps:$4 sm:$0xff]  }
 0x68d   :  { %5513 = vmatprep.subr.bf16.mxu1 %v10354_v1  ;;  %v10435_v1 = vld [vmem:[#allocation10 + $0x824] ss:$8 sps:$4 sm:$0xff]  }
 0x68f   :  { %4684 = vmatpush1.bf16.msra.mxu0 %v10352_v2 }
 0x690   :  { %5514 = vmatpush1.bf16.msra.mxu1 %v10352_v2  ;;  %4685 = vmatprep.subr.bf16.mxu0 %v10357_v14  ;;  %v10433_v2 = vld [vmem:[#allocation10 + $0x820] ss:$8 sps:$4 sm:$0xff]  }
 0x691   :  { %5515 = vmatprep.subr.bf16.mxu1 %v10357_v14  ;;  %v10438_v14 = vld [vmem:[#allocation10 + $0x834] ss:$8 sps:$4 sm:$0xff]  }
 0x693   :  { %4686 = vmatpush1.bf16.msra.mxu0 %v10355_v6 }
 0x694   :  { %5516 = vmatpush1.bf16.msra.mxu1 %v10355_v6  ;;  %4687 = vmatprep.subr.bf16.mxu0 %v10360_v7  ;;  %v10441_v6 = vld [vmem:[#allocation10 + $0x844] ss:$8 sps:$4 sm:$0xff]  }
 0x695   :  { %5517 = vmatprep.subr.bf16.mxu1 %v10360_v7  ;;  %v2736_v7 = vld [vmem:[#allocation12] ss:$4 sm:$0x3] }
 0x697   :  { %4688 = vmatpush1.bf16.msra.mxu0 %v10358_v8 }
 0x698   :  { %5518 = vmatpush1.bf16.msra.mxu1 %v10358_v8  ;;  %4689 = vmatprep.subr.bf16.mxu0 %v10363_v10  ;;  %v10444_v8 = vld [vmem:[#allocation10 + $0x854] ss:$8 sps:$4 sm:$0xff]  }
 0x699   :  { %5519 = vmatprep.subr.bf16.mxu1 %v10363_v10  ;;  %v12237_v10 = vrot.slane %v2736_v7, %v11978_v11 }
 0x69b   :  { %4690 = vmatpush1.bf16.msra.mxu0 %v10361_v12 }
 0x69c   :  { %5520 = vmatpush1.bf16.msra.mxu1 %v10361_v12  ;;  %4691 = vmatprep.subr.bf16.mxu0 %v10366_v47  ;;  %v2738_v12 = vld [vmem:[#allocation12 + $0x1] ss:$4 sm:$0x3] }
 0x69d   :  { %5521 = vmatprep.subr.bf16.mxu1 %v10366_v47  ;;  %v12240_v47 = vrot.slane %v2736_v7, %v11980_v13 }
 0x69f   :  { %4692 = vmatpush1.bf16.msra.mxu0 %v10364_v15 }
 0x6a0   :  { %5522 = vmatpush1.bf16.msra.mxu1 %v10364_v15  ;;  %4693 = vmatprep.subr.bf16.mxu0 %v10369_v16  ;;  %v10442_v15 = vld [vmem:[#allocation10 + $0x850] ss:$8 sps:$4 sm:$0xff]  }
 0x6a1   :  { %5523 = vmatprep.subr.bf16.mxu1 %v10369_v16  ;;  %v2740_v16 = vld [vmem:[#allocation12 + $0x2] ss:$4 sm:$0x3] }
 0x6a3   :  { %4694 = vmatpush1.bf16.msra.mxu0 %v10367_v19 }
 0x6a4   :  { %5524 = vmatpush1.bf16.msra.mxu1 %v10367_v19  ;;  %4695 = vmatprep.subr.bf16.mxu0 %v10372_v21  ;;  %v10447_v19 = vld [vmem:[#allocation10 + $0x864] ss:$8 sps:$4 sm:$0xff]  }
 0x6a5   :  { %5525 = vmatprep.subr.bf16.mxu1 %v10372_v21 }
 0x6a7   :  { %4696 = vmatpush1.bf16.msra.mxu0 %v10370_v23 }
 0x6a8   :  { %5526 = vmatpush1.bf16.msra.mxu1 %v10370_v23  ;;  %4697 = vmatprep.subr.bf16.mxu0 %v10375_v44 }
 0x6a9   :  { %5527 = vmatprep.subr.bf16.mxu1 %v10375_v44  ;;  %v12244_v44 = vrot.slane %v2738_v12, %v11978_v11 }
 0x6ab   :  { %4698 = vmatpush1.bf16.msra.mxu0 %v10373_v17 }
 0x6ac   :  { %5528 = vmatpush1.bf16.msra.mxu1 %v10373_v17  ;;  %4699 = vmatprep.subr.bf16.mxu0 %v10378_v45 }
 0x6ad   :  { %5529 = vmatprep.subr.bf16.mxu1 %v10378_v45 }
 0x6af   :  { %4700 = vmatpush1.bf16.msra.mxu0 %v10376_v53 }
 0x6b0   :  { %5530 = vmatpush1.bf16.msra.mxu1 %v10376_v53  ;;  %4909 = vmatprep.subr.bf16.mxu0 %v10381_v24  ;;  %v12247_v53 = vrot.slane %v2740_v16, %v11978_v11 }
 0x6b1   :  { %5546 = vmatprep.subr.bf16.mxu1 %v10381_v24 }
 0x6b2   :  { %4702 = vmatmul.mubr.bf16.vlgmr.msra.gmra.mrb[44].mxu0 %v12180_v40  ;;  %v10388_v40 = vld [vmem:[#allocation10 + $0x730] ss:$8 sps:$4 sm:$0xff]  }
 0x6b3   :  { %5532 = vmatmul.mubr.bf16.vlgmr.msra.gmra.mrb[44].mxu1 %v12191_v48  ;;  %4910 = vmatpush1.bf16.msra.mxu0 %v10379_v26 }
 0x6b4   :  { %4941 = vmatprep.mubr.bf16.mxu0 %v12195_v54  ;;  %5547 = vmatpush1.bf16.msra.mxu1 %v10379_v26  ;;  %v10391_v54 = vld [vmem:[#allocation10 + $0x740] ss:$8 sps:$4 sm:$0xff]  }
 0x6b5   :  { %5578 = vmatprep.mubr.bf16.mxu1 %v12197_v57  ;;  %4911 = vmatprep.subr.bf16.mxu0 %v10384_v28 }
 0x6b6   :  { %5548 = vmatprep.subr.bf16.mxu1 %v10384_v28  ;;  %v12252_v28 = vrot.slane %v2738_v12, %v11980_v13 }
 0x6b7   :  { %4912 = vmatpush1.bf16.msra.mxu0 %v10382_v27 }
 0x6b8   :  { %5549 = vmatpush1.bf16.msra.mxu1 %v10382_v27  ;;  %4913 = vmatprep.subr.bf16.mxu0 %v10387_v29 }
 0x6b9   :  { %5550 = vmatprep.subr.bf16.mxu1 %v10387_v29 }
 0x6bb   :  { %4914 = vmatpush1.bf16.msra.mxu0 %v10385_v49 }
 0x6bc   :  { %5551 = vmatpush1.bf16.msra.mxu1 %v10385_v49  ;;  %4915 = vmatprep.subr.bf16.mxu0 %v10390_v58  ;;  %v10445_v49 = vld [vmem:[#allocation10 + $0x860] ss:$8 sps:$4 sm:$0xff]  }
 0x6bd   :  { %5552 = vmatprep.subr.bf16.mxu1 %v10390_v58 }
 0x6bf   :  { %4916 = vmatpush1.bf16.msra.mxu0 %v10388_v40 }
 0x6c0   :  { %5553 = vmatpush1.bf16.msra.mxu1 %v10388_v40  ;;  %4917 = vmatprep.subr.bf16.mxu0 %v10393_v59  ;;  %v12255_v40 = vrot.slane %v2740_v16, %v11980_v13  ;;  %v10454_v16 = vld [vmem:[#allocation10 + $0x890] ss:$8 sps:$4 sm:$0xff]  }
 0x6c1   :  { %5554 = vmatprep.subr.bf16.mxu1 %v10393_v59 }
 0x6c3   :  { %4918 = vmatpush1.bf16.msra.mxu0 %v10391_v54 }
 0x6c4   :  { %5555 = vmatpush1.bf16.msra.mxu1 %v10391_v54  ;;  %4919 = vmatprep.subr.bf16.mxu0 %v10396_v51 }
 0x6c5   :  { %5556 = vmatprep.subr.bf16.mxu1 %v10396_v51 }
 0x6c7   :  { %4920 = vmatpush1.bf16.msra.mxu0 %v10394_v52 }
 0x6c8   :  { %5557 = vmatpush1.bf16.msra.mxu1 %v10394_v52  ;;  %4921 = vmatprep.subr.bf16.mxu0 %v10399_v61  ;;  %v10450_v52 = vld [vmem:[#allocation10 + $0x874] ss:$8 sps:$4 sm:$0xff]  }
 0x6c9   :  { %5558 = vmatprep.subr.bf16.mxu1 %v10399_v61 }
 0x6cb   :  { %4922 = vmatpush1.bf16.msra.mxu0 %v10397_v30 }
 0x6cc   :  { %5559 = vmatpush1.bf16.msra.mxu1 %v10397_v30  ;;  %4923 = vmatprep.subr.bf16.mxu0 %v10402_v31 }
 0x6cd   :  { %5560 = vmatprep.subr.bf16.mxu1 %v10402_v31 }
 0x6cf   :  { %4924 = vmatpush1.bf16.msra.mxu0 %v10400_v32 }
 0x6d0   :  { %5561 = vmatpush1.bf16.msra.mxu1 %v10400_v32  ;;  %4925 = vmatprep.subr.bf16.mxu0 %v10405_v33 }
 0x6d1   :  { %5562 = vmatprep.subr.bf16.mxu1 %v10405_v33 }
 0x6d3   :  { %4926 = vmatpush1.bf16.msra.mxu0 %v10403_v34 }
 0x6d4   :  { %5563 = vmatpush1.bf16.msra.mxu1 %v10403_v34  ;;  %4927 = vmatprep.subr.bf16.mxu0 %v10408_v55 }
 0x6d5   :  { %5564 = vmatprep.subr.bf16.mxu1 %v10408_v55 }
 0x6d7   :  { %4928 = vmatpush1.bf16.msra.mxu0 %v10406_v56 }
 0x6d8   :  { %5565 = vmatpush1.bf16.msra.mxu1 %v10406_v56  ;;  %4929 = vmatprep.subr.bf16.mxu0 %v10411_v35 }
 0x6d9   :  { %5566 = vmatprep.subr.bf16.mxu1 %v10411_v35 }
 0x6db   :  { %4930 = vmatpush1.bf16.msra.mxu0 %v10409_v37 }
 0x6dc   :  { %5567 = vmatpush1.bf16.msra.mxu1 %v10409_v37  ;;  %4931 = vmatprep.subr.bf16.mxu0 %v10414_v38 }
 0x6dd   :  { %5568 = vmatprep.subr.bf16.mxu1 %v10414_v38 }
 0x6df   :  { %4932 = vmatpush1.bf16.msra.mxu0 %v10412_v63 }
 0x6e0   :  { %5569 = vmatpush1.bf16.msra.mxu1 %v10412_v63  ;;  %4933 = vmatprep.subr.bf16.mxu0 %v10417_v9 }
 0x6e1   :  { %5570 = vmatprep.subr.bf16.mxu1 %v10417_v9  ;;  %v10448_v9 = vld [vmem:[#allocation10 + $0x870] ss:$8 sps:$4 sm:$0xff]  }
 0x6e3   :  { %4934 = vmatpush1.bf16.msra.mxu0 %v10415_v42 }
 0x6e4   :  { %5571 = vmatpush1.bf16.msra.mxu1 %v10415_v42  ;;  %4935 = vmatprep.subr.bf16.mxu0 %v10420_v43 }
 0x6e5   :  { %5572 = vmatprep.subr.bf16.mxu1 %v10420_v43 }
 0x6e7   :  { %4936 = vmatpush1.bf16.msra.mxu0 %v10418_v46 }
 0x6e8   :  { %5573 = vmatpush1.bf16.msra.mxu1 %v10418_v46  ;;  %4937 = vmatprep.subr.bf16.mxu0 %v10423_v4 }
 0x6e9   :  { %5574 = vmatprep.subr.bf16.mxu1 %v10423_v4 }
 0x6eb   :  { %4938 = vmatpush1.bf16.msra.mxu0 %v10421_v36 }
 0x6ec   :  { %5575 = vmatpush1.bf16.msra.mxu1 %v10421_v36  ;;  %4939 = vmatprep.subr.bf16.mxu0 %v10426_v5  ;;  %v10453_v36 = vld [vmem:[#allocation10 + $0x884] ss:$8 sps:$4 sm:$0xff]  }
 0x6ed   :  { %5576 = vmatprep.subr.bf16.mxu1 %v10426_v5 }
 0x6ef   :  { %4940 = vmatpush1.bf16.msra.mxu0 %v10424_v22 }
 0x6f0   :  { %5577 = vmatpush1.bf16.msra.mxu1 %v10424_v22  ;;  %5149 = vmatprep.subr.bf16.mxu0 %v10429_v20 }
 0x6f1   :  { %5593 = vmatprep.subr.bf16.mxu1 %v10429_v20 }
 0x6f2   :  { %4942 = vmatmul.mubr.bf16.vlgmr.msra.gmra.mrb[44].mxu0 %v12191_v48  ;;  %v10436_v48 = vld [vmem:[#allocation10 + $0x830] ss:$8 sps:$4 sm:$0xff]  }
 0x6f3   :  { %5579 = vmatmul.mubr.bf16.vlgmr.msra.gmra.mrb[44].mxu1 %v12193_v25  ;;  %5150 = vmatpush1.bf16.msra.mxu0 %v10427_v50 }
 0x6f4   :  { %5181 = vmatprep.mubr.bf16.mxu0 %v12197_v57  ;;  %5594 = vmatpush1.bf16.msra.mxu1 %v10427_v50  ;;  %v10439_v57 = vld [vmem:[#allocation10 + $0x840] ss:$8 sps:$4 sm:$0xff]  }
 0x6f5   :  { %5625 = vmatprep.mubr.bf16.mxu1 %v12202_v39  ;;  %5151 = vmatprep.subr.bf16.mxu0 %v10432_v60 }
 0x6f6   :  { %5595 = vmatprep.subr.bf16.mxu1 %v10432_v60 }
 0x6f7   :  { %5152 = vmatpush1.bf16.msra.mxu0 %v10430_v0 }
 0x6f8   :  { %5596 = vmatpush1.bf16.msra.mxu1 %v10430_v0  ;;  %5153 = vmatprep.subr.bf16.mxu0 %v10435_v1 }
 0x6f9   :  { %5597 = vmatprep.subr.bf16.mxu1 %v10435_v1 }
 0x6fb   :  { %5154 = vmatpush1.bf16.msra.mxu0 %v10433_v2 }
 0x6fc   :  { %5598 = vmatpush1.bf16.msra.mxu1 %v10433_v2  ;;  %5155 = vmatprep.subr.bf16.mxu0 %v10438_v14 }
 0x6fd   :  { %5599 = vmatprep.subr.bf16.mxu1 %v10438_v14 }
 0x6ff   :  { %5156 = vmatpush1.bf16.msra.mxu0 %v10436_v48 }
 0x700   :  { %5600 = vmatpush1.bf16.msra.mxu1 %v10436_v48  ;;  %5157 = vmatprep.subr.bf16.mxu0 %v10441_v6 }
 0x701   :  { %5601 = vmatprep.subr.bf16.mxu1 %v10441_v6  ;;  %v10451_v6 = vld [vmem:[#allocation10 + $0x880] ss:$8 sps:$4 sm:$0xff]  }
 0x703   :  { %5158 = vmatpush1.bf16.msra.mxu0 %v10439_v57 }
 0x704   :  { %5602 = vmatpush1.bf16.msra.mxu1 %v10439_v57  ;;  %5159 = vmatprep.subr.bf16.mxu0 %v10444_v8 }
 0x705   :  { %v3938_v21 = vpop.f32.mrb[40].mxu0  ;;  %5603 = vmatprep.subr.bf16.mxu1 %v10444_v8  ;;  %v10456_v8 = vld [vmem:[#allocation10 + $0x894] ss:$8 sps:$4 sm:$0xff]  }
 0x706   :  { %v9740_v23 = vadd.f32 %v3938_v21, %v12237_v10  ;;  %v4207_v17 = vpop.f32.mrb[40].mxu1  ;;  %v3940_v45 = vpop.f32.mrb[41].mxu0  ;;  %v10457_v21 = vld [vmem:[#allocation10 + $0x8a0] ss:$8 sps:$4 sm:$0xff]  }
 0x707   :  { %v9744_v24 = vadd.f32 %v4207_v17, %v12237_v10  ;;  %v9741_v26 = vadd.f32 %v3940_v45, %v12240_v47  ;;  %v4209_v27 = vpop.f32.mrb[41].mxu1  ;;  %v3942_v29 = vpop.f32.mrb[42].mxu0  ;;  %5160 = vmatpush1.bf16.msra.mxu0 %v10442_v15  ;;  %v10460_v17 = vld [vmem:[#allocation10 + $0x8b0] ss:$8 sps:$4 sm:$0xff]   ;;  %v10465_v45 = vld [vmem:[#allocation10 + $0x8c4] ss:$8 sps:$4 sm:$0xff]  }
 0x708   :  { %v3951_v58 = vmax.f32 %v9740_v23, 0.0  ;;  %v9745_v59 = vadd.f32 %v4209_v27, %v12240_v47  ;;  %v9742_v11 = vadd.f32 %v3942_v29, %v12237_v10  ;;  %v4211_v54 = vpop.f32.mrb[42].mxu1  ;;  %5604 = vmatpush1.bf16.msra.mxu1 %v10442_v15  ;;  %v3944_v51 = vpop.f32.mrb[43].mxu0  ;;  %5161 = vmatprep.subr.bf16.mxu0 %v10447_v19  ;;  %v10462_v23 = vld [vmem:[#allocation10 + $0x8b4] ss:$8 sps:$4 sm:$0xff]  }
 0x709   :  { %v4220_v61 = vmax.f32 %v9744_v24, 0.0  ;;  %v3952_v30 = vmax.f32 %v9741_v26, 0.0  ;;  %v9746_v31 = vadd.f32 %v4211_v54, %v12237_v10  ;;  %v9743_v32 = vadd.f32 %v3944_v51, %v12240_v47  ;;  %v4213_v33 = vpop.f32.mrb[43].mxu1  ;;  %5605 = vmatprep.subr.bf16.mxu1 %v10447_v19  ;;  %v10459_v19 = vld [vmem:[#allocation10 + $0x8a4] ss:$8 sps:$4 sm:$0xff]  }
 0x70a   :  { %v3966_v13 = vmul.f32 %v12244_v44, %v3951_v58  ;;  %v4221_v34 = vmax.f32 %v9745_v59, 0.0  ;;  %v3953_v55 = vmax.f32 %v9742_v11, 0.0  ;;  %v9747_v56 = vadd.f32 %v4213_v33, %v12240_v47  ;;  %v10463_v24 = vld [vmem:[#allocation10 + $0x8c0] ss:$8 sps:$4 sm:$0xff]   ;;  %v10468_v26 = vld [vmem:[#allocation10 + $0x8d4] ss:$8 sps:$4 sm:$0xff]  }
 0x70b   :  { %v4224_v35 = vmul.f32 %v4220_v61, %v12244_v44  ;;  %v3967_v37 = vmul.f32 %v12252_v28, %v3952_v30  ;;  %v4222_v38 = vmax.f32 %v9746_v31, 0.0  ;;  %v3954_v63 = vmax.f32 %v9743_v32, 0.0  ;;  %5162 = vmatpush1.bf16.msra.mxu0 %v10445_v49  ;;  %v10466_v27 = vld [vmem:[#allocation10 + $0x8d0] ss:$8 sps:$4 sm:$0xff]   ;;  %v10471_v29 = vld [vmem:[#allocation10 + $0x8e4] ss:$8 sps:$4 sm:$0xff]  }
 0x70c   :  { %v12266_v42 = vadd.f32 %v12247_v53, %v3966_v13  ;;  %v4225_v43 = vmul.f32 %v4221_v34, %v12252_v28  ;;  %v3968_v46 = vmul.f32 %v12244_v44, %v3953_v55  ;;  %v4223_v4 = vmax.f32 %v9747_v56, 0.0  ;;  %5606 = vmatpush1.bf16.msra.mxu1 %v10445_v49  ;;  %5163 = vmatprep.subr.bf16.mxu0 %v10450_v52  ;;  %v10469_v49 = vld [vmem:[#allocation10 + $0x8e0] ss:$8 sps:$4 sm:$0xff]   ;;  %v10474_v58 = vld [vmem:[#allocation10 + $0x8f4] ss:$8 sps:$4 sm:$0xff]  }
 0x70d   :  { %v12271_v5 = vadd.f32 %v4224_v35, %v12247_v53  ;;  %v12274_v22 = vadd.f32 %v12255_v40, %v3967_v37  ;;  %v4226_v20 = vmul.f32 %v4222_v38, %v12244_v44  ;;  %v3969_v50 = vmul.f32 %v12252_v28, %v3954_v63  ;;  %5607 = vmatprep.subr.bf16.mxu1 %v10450_v52  ;;  %v10472_v59 = vld [vmem:[#allocation10 + $0x8f0] ss:$8 sps:$4 sm:$0xff]   ;;  %v10477_v11 = vld [vmem:[#allocation10 + $0x904] ss:$8 sps:$4 sm:$0xff]   ;;  %v10475_v54 = vld [vmem:[#allocation10 + $0x900] ss:$8 sps:$4 sm:$0xff]  }
 0x70e   :  { %v12279_v60 = vadd.f32 %v4225_v43, %v12255_v40  ;;  %v12282_v0 = vadd.f32 %v12247_v53, %v3968_v46  ;;  %v4227_v1 = vmul.f32 %v4223_v4, %v12252_v28  ;;  %v10480_v51 = vld [vmem:[#allocation10 + $0x914] ss:$8 sps:$4 sm:$0xff]   ;;  %v10478_v52 = vld [vmem:[#allocation10 + $0x910] ss:$8 sps:$4 sm:$0xff]   ;;  %v10483_v61 = vld [vmem:[#allocation10 + $0x924] ss:$8 sps:$4 sm:$0xff]  }
 0x70f   :  { %v4232_v2 = vmax.f32 %v12266_v42, %v12271_v5  ;;  %v12288_v14 = vadd.f32 %v4226_v20, %v12247_v53  ;;  %v12291_v48 = vadd.f32 %v12255_v40, %v3969_v50  ;;  %5164 = vmatpush1.bf16.msra.mxu0 %v10448_v9  ;;  %v10481_v30 = vld [vmem:[#allocation10 + $0x920] ss:$8 sps:$4 sm:$0xff]   ;;  %v10486_v31 = vld [vmem:[#allocation10 + $0x934] ss:$8 sps:$4 sm:$0xff]   ;;  %v10489_v32 = vld [vmem:[#allocation10 + $0x944] ss:$8 sps:$4 sm:$0xff]  }
 0x710   :  { %v4233_v57 = vmax.f32 %v12274_v22, %v12279_v60  ;;  %v12296_v7 = vadd.f32 %v4227_v1, %v12255_v40  ;;  %5608 = vmatpush1.bf16.msra.mxu1 %v10448_v9  ;;  %5165 = vmatprep.subr.bf16.mxu0 %v10453_v36  ;;  %v10492_v33 = vld [vmem:[#allocation10 + $0x954] ss:$8 sps:$4 sm:$0xff]   ;;  %v10495_v13 = vld [vmem:[#allocation10 + $0x964] ss:$8 sps:$4 sm:$0xff]   ;;  %v10493_v34 = vld [vmem:[#allocation10 + $0x960] ss:$8 sps:$4 sm:$0xff]  }
 0x711   :  { %v4234_v12 = vmax.f32 %v12282_v0, %v12288_v14  ;;  %5609 = vmatprep.subr.bf16.mxu1 %v10453_v36  ;;  %v10498_v55 = vld [vmem:[#allocation10 + $0x974] ss:$8 sps:$4 sm:$0xff]   ;;  %v10496_v56 = vld [vmem:[#allocation10 + $0x970] ss:$8 sps:$4 sm:$0xff]   ;;  %v10501_v35 = vld [vmem:[#allocation10 + $0x984] ss:$8 sps:$4 sm:$0xff]  }
 0x712   :  { %v4235_v15 = vmax.f32 %v12291_v48, %v12296_v7  ;;  %v10499_v37 = vld [vmem:[#allocation10 + $0x980] ss:$8 sps:$4 sm:$0xff]   ;;  %v10504_v38 = vld [vmem:[#allocation10 + $0x994] ss:$8 sps:$4 sm:$0xff]   ;;  %v10502_v63 = vld [vmem:[#allocation10 + $0x990] ss:$8 sps:$4 sm:$0xff]  }
 0x713   :  { %5166 = vmatpush1.bf16.msra.mxu0 %v10451_v6  ;;  %v10507_v9 = vld [vmem:[#allocation10 + $0x9a4] ss:$8 sps:$4 sm:$0xff]   ;;  %v10505_v43 = vld [vmem:[#allocation10 + $0x9a0] ss:$8 sps:$4 sm:$0xff]   ;;  %v10510_v46 = vld [vmem:[#allocation10 + $0x9b4] ss:$8 sps:$4 sm:$0xff]  }
 0x714   :  { %5610 = vmatpush1.bf16.msra.mxu1 %v10451_v6  ;;  %5167 = vmatprep.subr.bf16.mxu0 %v10456_v8  ;;  %v10508_v4 = vld [vmem:[#allocation10 + $0x9b0] ss:$8 sps:$4 sm:$0xff]   ;;  %v10513_v36 = vld [vmem:[#allocation10 + $0x9c4] ss:$8 sps:$4 sm:$0xff]   ;;  %v10511_v20 = vld [vmem:[#allocation10 + $0x9c0] ss:$8 sps:$4 sm:$0xff]  }
 0x715   :  { %5611 = vmatprep.subr.bf16.mxu1 %v10456_v8  ;;  %v10516_v50 = vld [vmem:[#allocation10 + $0x9d4] ss:$8 sps:$4 sm:$0xff]   ;;  %v10514_v1 = vld [vmem:[#allocation10 + $0x9d0] ss:$8 sps:$4 sm:$0xff]   ;;  %v10519_v6 = vld [vmem:[#allocation10 + $0x9e4] ss:$8 sps:$4 sm:$0xff]  }
 0x716   :  { %v10517_v8 = vld [vmem:[#allocation10 + $0x9e0] ss:$8 sps:$4 sm:$0xff]   ;;  %v10529_v48 = vld [vmem:[%s12915_s18 + $0x48] sm:$0xff]  }
 0x717   :  { %5168 = vmatpush1.bf16.msra.mxu0 %v10454_v16  ;;  %v10523_v0 = vld [vmem:[#allocation6] sm:$0xff]   ;;  %v10524_v14 = vld [vmem:[#allocation6 + $0x8] sm:$0xff]   ;;  %v10531_v7 = vld [vmem:[%s12915_s18 + $0x8] sm:$0xff]  }
 0x718   :  { %5612 = vmatpush1.bf16.msra.mxu1 %v10454_v16  ;;  %5169 = vmatprep.subr.bf16.mxu0 %v10459_v19  ;;  %v10522_v16 = vld [vmem:[#allocation10 + $0x9f4] ss:$8 sps:$4 sm:$0xff]  }
 0x719   :  { %5613 = vmatprep.subr.bf16.mxu1 %v10459_v19  ;;  %v10520_v19 = vld [vmem:[#allocation10 + $0x9f0] ss:$8 sps:$4 sm:$0xff]  }
 0x71b   :  { %5170 = vmatpush1.bf16.msra.mxu0 %v10457_v21 }
 0x71c   :  { %5614 = vmatpush1.bf16.msra.mxu1 %v10457_v21  ;;  %5171 = vmatprep.subr.bf16.mxu0 %v10462_v23 }
 0x71d   :  { %5615 = vmatprep.subr.bf16.mxu1 %v10462_v23 }
 0x71f   :  { %5172 = vmatpush1.bf16.msra.mxu0 %v10460_v17 }
 0x720   :  { %5616 = vmatpush1.bf16.msra.mxu1 %v10460_v17  ;;  %5173 = vmatprep.subr.bf16.mxu0 %v10465_v45 }
 0x721   :  { %5617 = vmatprep.subr.bf16.mxu1 %v10465_v45 }
 0x723   :  { %5174 = vmatpush1.bf16.msra.mxu0 %v10463_v24 }
 0x724   :  { %5618 = vmatpush1.bf16.msra.mxu1 %v10463_v24  ;;  %5175 = vmatprep.subr.bf16.mxu0 %v10468_v26 }
 0x725   :  { %5619 = vmatprep.subr.bf16.mxu1 %v10468_v26 }
 0x727   :  { %5176 = vmatpush1.bf16.msra.mxu0 %v10466_v27 }
 0x728   :  { %5620 = vmatpush1.bf16.msra.mxu1 %v10466_v27  ;;  %5177 = vmatprep.subr.bf16.mxu0 %v10471_v29 }
 0x729   :  { %5621 = vmatprep.subr.bf16.mxu1 %v10471_v29 }
 0x72b   :  { %5178 = vmatpush1.bf16.msra.mxu0 %v10469_v49 }
 0x72c   :  { %5622 = vmatpush1.bf16.msra.mxu1 %v10469_v49  ;;  %5179 = vmatprep.subr.bf16.mxu0 %v10474_v58 }
 0x72d   :  { %5623 = vmatprep.subr.bf16.mxu1 %v10474_v58 }
 0x72f   :  { %5180 = vmatpush1.bf16.msra.mxu0 %v10472_v59 }
 0x730   :  { %5624 = vmatpush1.bf16.msra.mxu1 %v10472_v59  ;;  %5389 = vmatprep.subr.bf16.mxu0 %v10477_v11 }
 0x731   :  { %5640 = vmatprep.subr.bf16.mxu1 %v10477_v11 }
 0x732   :  { %5182 = vmatmul.mubr.bf16.vlgmr.msra.gmra.mrb[44].mxu0 %v12193_v25  ;;  %v10484_v25 = vld [vmem:[#allocation10 + $0x930] ss:$8 sps:$4 sm:$0xff]  }
 0x733   :  { %5626 = vmatmul.mubr.bf16.vlgmr.msra.gmra.mrb[44].mxu1 %v12200_v3  ;;  %5390 = vmatpush1.bf16.msra.mxu0 %v10475_v54 }
 0x734   :  { %5421 = vmatprep.mubr.bf16.mxu0 %v12202_v39  ;;  %5641 = vmatpush1.bf16.msra.mxu1 %v10475_v54  ;;  %v10487_v39 = vld [vmem:[#allocation10 + $0x940] ss:$8 sps:$4 sm:$0xff]  }
 0x735   :  { %5672 = vmatprep.mubr.bf16.mxu1 %v12206_v41  ;;  %5391 = vmatprep.subr.bf16.mxu0 %v10480_v51  ;;  %v10490_v41 = vld [vmem:[#allocation10 + $0x950] ss:$8 sps:$4 sm:$0xff]  }
 0x736   :  { %5642 = vmatprep.subr.bf16.mxu1 %v10480_v51 }
 0x737   :  { %5392 = vmatpush1.bf16.msra.mxu0 %v10478_v52 }
 0x738   :  { %5643 = vmatpush1.bf16.msra.mxu1 %v10478_v52  ;;  %5393 = vmatprep.subr.bf16.mxu0 %v10483_v61 }
 0x739   :  { %5644 = vmatprep.subr.bf16.mxu1 %v10483_v61 }
 0x73b   :  { %5394 = vmatpush1.bf16.msra.mxu0 %v10481_v30 }
 0x73c   :  { %5645 = vmatpush1.bf16.msra.mxu1 %v10481_v30  ;;  %5395 = vmatprep.subr.bf16.mxu0 %v10486_v31 }
 0x73d   :  { %5646 = vmatprep.subr.bf16.mxu1 %v10486_v31 }
 0x73f   :  { %5396 = vmatpush1.bf16.msra.mxu0 %v10484_v25 }
 0x740   :  { %5647 = vmatpush1.bf16.msra.mxu1 %v10484_v25  ;;  %5397 = vmatprep.subr.bf16.mxu0 %v10489_v32 }
 0x741   :  { %5648 = vmatprep.subr.bf16.mxu1 %v10489_v32 }
 0x743   :  { %5398 = vmatpush1.bf16.msra.mxu0 %v10487_v39 }
 0x744   :  { %5649 = vmatpush1.bf16.msra.mxu1 %v10487_v39  ;;  %5399 = vmatprep.subr.bf16.mxu0 %v10492_v33 }
 0x745   :  { %5650 = vmatprep.subr.bf16.mxu1 %v10492_v33 }
 0x747   :  { %5400 = vmatpush1.bf16.msra.mxu0 %v10490_v41 }
 0x748   :  { %5651 = vmatpush1.bf16.msra.mxu1 %v10490_v41  ;;  %5401 = vmatprep.subr.bf16.mxu0 %v10495_v13 }
 0x749   :  { %5652 = vmatprep.subr.bf16.mxu1 %v10495_v13 }
 0x74b   :  { %5402 = vmatpush1.bf16.msra.mxu0 %v10493_v34 }
 0x74c   :  { %5653 = vmatpush1.bf16.msra.mxu1 %v10493_v34  ;;  %5403 = vmatprep.subr.bf16.mxu0 %v10498_v55 }
 0x74d   :  { %5654 = vmatprep.subr.bf16.mxu1 %v10498_v55 }
 0x74f   :  { %5404 = vmatpush1.bf16.msra.mxu0 %v10496_v56 }
 0x750   :  { %5655 = vmatpush1.bf16.msra.mxu1 %v10496_v56  ;;  %5405 = vmatprep.subr.bf16.mxu0 %v10501_v35 }
 0x751   :  { %5656 = vmatprep.subr.bf16.mxu1 %v10501_v35 }
 0x753   :  { %5406 = vmatpush1.bf16.msra.mxu0 %v10499_v37 }
 0x754   :  { %5657 = vmatpush1.bf16.msra.mxu1 %v10499_v37  ;;  %5407 = vmatprep.subr.bf16.mxu0 %v10504_v38 }
 0x755   :  { %5658 = vmatprep.subr.bf16.mxu1 %v10504_v38 }
 0x757   :  { %5408 = vmatpush1.bf16.msra.mxu0 %v10502_v63 }
 0x758   :  { %5659 = vmatpush1.bf16.msra.mxu1 %v10502_v63  ;;  %5409 = vmatprep.subr.bf16.mxu0 %v10507_v9 }
 0x759   :  { %5660 = vmatprep.subr.bf16.mxu1 %v10507_v9 }
 0x75b   :  { %5410 = vmatpush1.bf16.msra.mxu0 %v10505_v43 }
 0x75c   :  { %5661 = vmatpush1.bf16.msra.mxu1 %v10505_v43  ;;  %5411 = vmatprep.subr.bf16.mxu0 %v10510_v46 }
 0x75d   :  { %5662 = vmatprep.subr.bf16.mxu1 %v10510_v46 }
 0x75f   :  { %5412 = vmatpush1.bf16.msra.mxu0 %v10508_v4 }
 0x760   :  { %5663 = vmatpush1.bf16.msra.mxu1 %v10508_v4  ;;  %5413 = vmatprep.subr.bf16.mxu0 %v10513_v36 }
 0x761   :  { %5664 = vmatprep.subr.bf16.mxu1 %v10513_v36 }
 0x763   :  { %5414 = vmatpush1.bf16.msra.mxu0 %v10511_v20 }
 0x764   :  { %5665 = vmatpush1.bf16.msra.mxu1 %v10511_v20  ;;  %5415 = vmatprep.subr.bf16.mxu0 %v10516_v50 }
 0x765   :  { %5666 = vmatprep.subr.bf16.mxu1 %v10516_v50 }
 0x767   :  { %5416 = vmatpush1.bf16.msra.mxu0 %v10514_v1 }
 0x768   :  { %5667 = vmatpush1.bf16.msra.mxu1 %v10514_v1  ;;  %5417 = vmatprep.subr.bf16.mxu0 %v10519_v6  ;;  %v10526_v1 = vld [vmem:[%s12915_s18 + $0x40] sm:$0xff]  }
 0x769   :  { %5668 = vmatprep.subr.bf16.mxu1 %v10519_v6  ;;  %v10530_v6 = vld [vmem:[%s12915_s18 + $0x80] sm:$0xff]  }
 0x76b   :  { %5418 = vmatpush1.bf16.msra.mxu0 %v10517_v8 }
 0x76c   :  { %5669 = vmatpush1.bf16.msra.mxu1 %v10517_v8  ;;  %5419 = vmatprep.subr.bf16.mxu0 %v10522_v16  ;;  %v10535_v8 = vld [vmem:[%s12915_s18 + $0x10] sm:$0xff]  }
 0x76d   :  { %5670 = vmatprep.subr.bf16.mxu1 %v10522_v16  ;;  %v10537_v16 = vld [vmem:[%s12915_s18 + $0x58] sm:$0xff]  }
 0x76f   :  { %5420 = vmatpush1.bf16.msra.mxu0 %v10520_v19 }
 0x770   :  { %5671 = vmatpush1.bf16.msra.mxu1 %v10520_v19  ;;  %v10534_v19 = vld [vmem:[%s12915_s18 + $0x88] sm:$0xff]  }
 0x772   :  { %5422 = vmatmul.mubr.bf16.vlgmr.msra.gmra.mrb[44].mxu0 %v12200_v3 }
 0x773   :  { %5673 = vmatmul.mubr.bf16.vlgmr.msra.gmra.mrb[44].mxu1 %v12204_v62  ;;  %5747 = vmatprep.mubr.bf16.mxu0 %v11233_v18 }
 0x774   :  { %5803 = vmatprep.mubr.bf16.mxu1 %v11233_v18 }
 0x845   :  { %v5423_v21 = vpop.f32.mrb[44].mxu0 }
 0x846   :  { %v9748_v23 = vadd.f32 %v5423_v21, %v12237_v10  ;;  %v5674_v17 = vpop.f32.mrb[44].mxu1  ;;  %v5425_v45 = vpop.f32.mrb[45].mxu0  ;;  %v10536_v21 = vld [vmem:[%s12915_s18 + $0xd0] sm:$0xff]  }
 0x847   :  { %v9752_v24 = vadd.f32 %v5674_v17, %v12237_v10  ;;  %v9749_v26 = vadd.f32 %v5425_v45, %v12240_v47  ;;  %v5676_v27 = vpop.f32.mrb[45].mxu1  ;;  %v5427_v29 = vpop.f32.mrb[46].mxu0  ;;  %v10541_v17 = vld [vmem:[%s12915_s18 + $0x60] sm:$0xff]   ;;  %v10538_v45 = vld [vmem:[%s12915_s18 + $0x90] sm:$0xff]  }
 0x848   :  { %v5436_v49 = vmax.f32 %v9748_v23, 0.0  ;;  %v9753_v3 = vadd.f32 %v5676_v27, %v12240_v47  ;;  %v9750_v62 = vadd.f32 %v5427_v29, %v12237_v10  ;;  %v5678_v58 = vpop.f32.mrb[46].mxu1  ;;  %v5429_v59 = vpop.f32.mrb[47].mxu0  ;;  %v10539_v23 = vld [vmem:[%s12915_s18 + $0x18] sm:$0xff]   ;;  %v10545_v27 = vld [vmem:[%s12915_s18 + $0x68] sm:$0xff]  }
 0x849   :  { %v5687_v11 = vmax.f32 %v9752_v24, 0.0  ;;  %v5437_v54 = vmax.f32 %v9749_v26, 0.0  ;;  %v9754_v51 = vadd.f32 %v5678_v58, %v12237_v10  ;;  %v9751_v52 = vadd.f32 %v5429_v59, %v12240_v47  ;;  %v5680_v61 = vpop.f32.mrb[47].mxu1  ;;  %v10540_v24 = vld [vmem:[%s12915_s18 + $0xd8] sm:$0xff]   ;;  %v10543_v26 = vld [vmem:[%s12915_s18 + $0x20] sm:$0xff]   ;;  %v10548_v59 = vld [vmem:[%s12915_s18 + $0xe8] sm:$0xff]  }
 0x84a   :  { %v5440_v30 = vmul.f32 %v5436_v49, %v12244_v44  ;;  %v5688_v31 = vmax.f32 %v9753_v3, 0.0  ;;  %v5438_v25 = vmax.f32 %v9750_v62, 0.0  ;;  %v9755_v32 = vadd.f32 %v5680_v61, %v12240_v47  ;;  %v10542_v29 = vld [vmem:[%s12915_s18 + $0x98] sm:$0xff]   ;;  %v10544_v49 = vld [vmem:[%s12915_s18 + $0xe0] sm:$0xff]   ;;  %v10547_v3 = vld [vmem:[%s12915_s18 + $0x28] sm:$0xff]  }
 0x84b   :  { %v5691_v39 = vmul.f32 %v5687_v11, %v12244_v44  ;;  %v5441_v33 = vmul.f32 %v5437_v54, %v12252_v28  ;;  %v5689_v41 = vmax.f32 %v9754_v51, 0.0  ;;  %v5439_v13 = vmax.f32 %v9751_v52, 0.0  ;;  %v10549_v62 = vld [vmem:[%s12915_s18 + $0x70] sm:$0xff]   ;;  %v10546_v58 = vld [vmem:[%s12915_s18 + $0xa0] sm:$0xff]   ;;  %v10550_v54 = vld [vmem:[%s12915_s18 + $0xa8] sm:$0xff]  }
 0x84c   :  { %v5444_v34 = vadd.f32 %v5440_v30, %v12247_v53  ;;  %v5692_v55 = vmul.f32 %v5688_v31, %v12252_v28  ;;  %v5442_v10 = vmul.f32 %v5438_v25, %v12244_v44  ;;  %v5690_v56 = vmax.f32 %v9755_v32, 0.0  ;;  %v10551_v11 = vld [vmem:[%s12915_s18 + $0x30] sm:$0xff]   ;;  %v10553_v52 = vld [vmem:[%s12915_s18 + $0x78] sm:$0xff]   ;;  %v10558_v32 = vld [vmem:[%s12915_s18 + $0x140] sm:$0xff]  }
 0x84d   :  { %v5445_v35 = vadd.f32 %v5441_v33, %v12255_v40  ;;  %v5693_v37 = vmul.f32 %v5689_v41, %v12244_v44  ;;  %v5443_v38 = vmul.f32 %v5439_v13, %v12252_v28  ;;  %v5695_v63 = vadd.f32 %v5691_v39, %v12247_v53  ;;  %v10552_v51 = vld [vmem:[%s12915_s18 + $0xf0] sm:$0xff]   ;;  %v10555_v30 = vld [vmem:[%s12915_s18 + $0x38] sm:$0xff]  }
 0x84e   :  { %v5448_v47 = vmax.f32 %v4232_v2, %v5444_v34  ;;  %v5446_v9 = vadd.f32 %v5442_v10, %v12247_v53  ;;  %v5694_v43 = vmul.f32 %v5690_v56, %v12252_v28  ;;  %v5696_v4 = vadd.f32 %v5692_v55, %v12255_v40  ;;  %v10554_v61 = vld [vmem:[%s12915_s18 + $0xb0] sm:$0xff]   ;;  %v10556_v31 = vld [vmem:[%s12915_s18 + $0xf8] sm:$0xff]  }
 0x84f   :  { %v5449_v46 = vmax.f32 %v4233_v57, %v5445_v35  ;;  %v5447_v44 = vadd.f32 %v5443_v38, %v12255_v40  ;;  %v5697_v5 = vadd.f32 %v5693_v37, %v12247_v53  ;;  %v10527_v53 = vld [vmem:[%s12915_s18] sm:$0xff]   ;;  %v10557_v25 = vld [vmem:[%s12915_s18 + $0xb8] sm:$0xff]  }
 0x850   :  { %v5699_v36 = vmax.f32 %v5448_v47, %v5695_v63  ;;  %v5450_v42 = vmax.f32 %v4234_v12, %v5446_v9  ;;  %v5698_v28 = vadd.f32 %v5694_v43, %v12255_v40  ;;  %v10528_v40 = vld [vmem:[%s12915_s18 + $0xc0] sm:$0xff]   ;;  %v10533_v12 = vld [vmem:[%s12915_s18 + $0x50] sm:$0xff]   ;;  %v10560_v9 = vld [vmem:[%s12915_s18 + $0x148] sm:$0xff]  }
 0x851   :  { %v5451_v2 = vmax.f32 %v4235_v15, %v5447_v44  ;;  %v5700_v20 = vmax.f32 %v5449_v46, %v5696_v4  ;;  %v10525_v15 = vld [vmem:[#allocation6 + $0x10] sm:$0xff]   ;;  %v10561_v43 = vld [vmem:[%s12915_s18 + $0x108] sm:$0xff]   ;;  %v10562_v4 = vld [vmem:[%s12915_s18 + $0x150] sm:$0xff]  }
 0x852   :  { %v5701_v22 = vmax.f32 %v5450_v42, %v5697_v5  ;;  %v10559_v63 = vld [vmem:[%s12915_s18 + $0x100] sm:$0xff]  }
 0x853   :  { %v5702_v60 = vmax.f32 %v5451_v2, %v5698_v28  ;;  %v10563_v2 = vld [vmem:[%s12915_s18 + $0x110] sm:$0xff]  }
 0x854   :  { %v5703_v57 = vpack.c.bf16 %v5701_v22, %v5699_v36  ;;  %v10565_v22 = vld [vmem:[%s12915_s18 + $0x118] sm:$0xff]  }
 0x855   :  { %v5704_v50 = vpack.c.bf16 %v5702_v60, %v5700_v20  ;;  %v10564_v20 = vld [vmem:[%s12915_s18 + $0x158] sm:$0xff]   ;;  %v10566_v60 = vld [vmem:[%s12915_s18 + $0x160] sm:$0xff]  }
 0x857   :  { %5715 = vmatprep.subr.bf16.mxu0 %v5704_v50  ;;  %5771 = vmatprep.subr.bf16.mxu1 %v5704_v50 }
 0x858   :  { %5716 = vmatpush1.bf16.msra.mxu0 %v5703_v57  ;;  %5772 = vmatpush1.bf16.msra.mxu1 %v5703_v57 }
 0x859   :  { %5827 = vmatprep.subr.bf16.mxu0 %v5704_v50  ;;  %9276 = vmatprep.subr.bf16.mxu1 %v10526_v1  ;;  %v10568_v50 = vld [vmem:[%s12915_s18 + $0x168] sm:$0xff]  }
 0x85a   :  { %v10569_v1 = vld [vmem:[%s12915_s18 + $0x128] sm:$0xff]  }
 0x85b   :  { %9045 = vmatmul.mubr.msk.bf16.vlgmr.msra.gmra.mrb[48].mxu0 %vm869_vm1, %v10523_v0  ;;  %9047 = vmatmul.mubr.msk.bf16.vlgmr.msra.gmra.mrb[48].mxu1 %vm869_vm1, %v10524_v14  ;;  %v10570_v0 = vld [vmem:[%s12915_s18 + $0x170] sm:$0xff]  }
 0x85c   :  { %5828 = vmatpush1.bf16.msra.mxu0 %v5703_v57  ;;  %5859 = vmatprep.mubr.bf16.mxu0 %v11233_v18  ;;  %v10532_v18 = vld [vmem:[%s12915_s18 + $0xc8] sm:$0xff]   ;;  %v10567_v57 = vld [vmem:[%s12915_s18 + $0x120] sm:$0xff]   ;;  %v10571_v14 = vld [vmem:[%s12915_s18 + $0x130] sm:$0xff]  }
 0x85d   :  { %9277 = vmatpush3.bf16.msra.mxu1 %v10527_v53  ;;  %9298 = vmatprep.subr.bf16.mxu0 %v10528_v40  ;;  %v10572_v53 = vld [vmem:[%s12915_s18 + $0x178] sm:$0xff]  }
 0x85e   :  { %9278 = vmatprep.subr.bf16.mxu1 %v10529_v48  ;;  %v10573_v40 = vld [vmem:[%s12915_s18 + $0x138] sm:$0xff]   ;;  %v10574_v48 = vld [vmem:[#allocation18] sm:$0xff]  }
 0x861   :  { %9279 = vmatpush3.bf16.msra.mxu1 %v10531_v7  ;;  %v11234_v7 = vmov 0.0  }
 0x862   :  { %9280 = vmatprep.subr.bf16.mxu1 %v10533_v12  ;;  %v10575_v12 = vld [vmem:[#allocation18 + $0x8] sm:$0xff]  }
 0x863   :  { %9049 = vmatmul.mubr.msk.bf16.vlgmr.msra.gmra.mrb[52].mxu0 %vm869_vm1, %v10525_v15 }
 0x864   :  { %9299 = vmatpush3.bf16.msra.mxu0 %v10530_v6 }
 0x865   :  { %9300 = vmatprep.subr.bf16.mxu0 %v10532_v18  ;;  %9281 = vmatpush3.bf16.msra.mxu1 %v10535_v8  ;;  %v9066_v18 = vld [vmem:[#allocation13] ss:$0 sm:$0xff] }
 0x866   :  { %9282 = vmatprep.subr.bf16.mxu1 %v10537_v16 }
 0x868   :  { %9301 = vmatpush3.bf16.msra.mxu0 %v10534_v19 }
 0x869   :  { %9302 = vmatprep.subr.bf16.mxu0 %v10536_v21  ;;  %9283 = vmatpush3.bf16.msra.mxu1 %v10539_v23 }
 0x86a   :  { %9284 = vmatprep.subr.bf16.mxu1 %v10541_v17 }
 0x86c   :  { %9303 = vmatpush3.bf16.msra.mxu0 %v10538_v45 }
 0x86d   :  { %9304 = vmatprep.subr.bf16.mxu0 %v10540_v24  ;;  %9285 = vmatpush3.bf16.msra.mxu1 %v10543_v26 }
 0x86e   :  { %9286 = vmatprep.subr.bf16.mxu1 %v10545_v27 }
 0x870   :  { %9305 = vmatpush3.bf16.msra.mxu0 %v10542_v29 }
 0x871   :  { %9306 = vmatprep.subr.bf16.mxu0 %v10544_v49  ;;  %9287 = vmatpush3.bf16.msra.mxu1 %v10547_v3 }
 0x872   :  { %9288 = vmatprep.subr.bf16.mxu1 %v10549_v62 }
 0x874   :  { %9307 = vmatpush3.bf16.msra.mxu0 %v10546_v58 }
 0x875   :  { %9308 = vmatprep.subr.bf16.mxu0 %v10548_v59  ;;  %9289 = vmatpush3.bf16.msra.mxu1 %v10551_v11 }
 0x876   :  { %9290 = vmatprep.subr.bf16.mxu1 %v10553_v52 }
 0x878   :  { %9309 = vmatpush3.bf16.msra.mxu0 %v10550_v54 }
 0x879   :  { %9310 = vmatprep.subr.bf16.mxu0 %v10552_v51  ;;  %9291 = vmatpush3.bf16.msra.mxu1 %v10555_v30  ;;  %v9163_v30 = vld [vmem:[#allocation13 + $0x1] ss:$0 sm:$0xff] }
 0x87a   :  { %9320 = vmatprep.subr.bf16.mxu1 %v10558_v32  ;;  %v9164_v32 = vld [vmem:[#allocation13 + $0x2] ss:$0 sm:$0xff] }
 0x87c   :  { %9311 = vmatpush3.bf16.msra.mxu0 %v10554_v61 }
 0x87d   :  { %9312 = vmatprep.subr.bf16.mxu0 %v10556_v31 }
 0x880   :  { %9313 = vmatpush3.bf16.msra.mxu0 %v10557_v25 }
 0x881   :  { %9490 = vmatprep.subr.bf16.mxu0 %v11234_v7 }
 0x92e   :  { %v5749_v39 = vpop.f32.mrb[48].mxu0  ;;  %v5805_v33 = vpop.f32.mrb[48].mxu1 }
 0x92f   :  { %v5751_v41 = vpop.f32.mrb[49].mxu0  ;;  %v5807_v13 = vpop.f32.mrb[49].mxu1 }
 0x930   :  { %v5753_v34 = vpop.f32.mrb[50].mxu0  ;;  %v5809_v55 = vpop.f32.mrb[50].mxu1 }
 0x931   :  { %v5758_v10 = vpack.c.bf16 %v5753_v34, %v5749_v39  ;;  %v5755_v56 = vpop.f32.mrb[51].mxu0  ;;  %v5814_v35 = vpack.c.bf16 %v5809_v55, %v5805_v33  ;;  %v5811_v37 = vpop.f32.mrb[51].mxu1  ;;  %v6408_v34 = vld [vmem:[%s12916_s16] sm:$0xff]  ;;  %v6409_v55 = vld [vmem:[%s12916_s16 + $0x8] sm:$0xff] }
 0x932   :  { %v5759_v38 = vpack.c.bf16 %v5755_v56, %v5751_v41  ;;  %v5815_v47 = vpack.c.bf16 %v5811_v37, %v5807_v13 }
 0x934   :  { %6033 = vmatprep.mubr.bf16.mxu1 %v5759_v38  ;;  %6209 = vmatprep.mubr.bf16.mxu0 %v5815_v47  ;;  %v9165_v38 = vld [vmem:[#allocation19] ss:$0 sm:$0xff] }
 0x935   :  { %6034 = vmatmul.mubr.bf16.vlgmr.msra.gmra.mrb[52].mxu1 %v5758_v10  ;;  %6210 = vmatmul.mubr.bf16.vlgmr.msra.gmra.mrb[56].mxu0 %v5814_v35 }
 0x936   :  { %9321 = vmatpush3.bf16.msra.mxu1 %v10559_v63  ;;  %v5861_v46 = vpop.f32.mrb[52].mxu0  ;;  %9491 = vmatpush3.bf16.msra.mxu0 %v10574_v48 }
 0x937   :  { %9322 = vmatprep.subr.bf16.mxu1 %v10560_v9  ;;  %v5863_v44 = vpop.f32.mrb[53].mxu0  ;;  %9492 = vmatprep.subr.bf16.mxu0 %v11234_v7 }
 0x938   :  { %v5865_v36 = vpop.f32.mrb[54].mxu0  ;;  %9494 = vmatprep.mubr.msk.bf16.mxu0 %vm11235_vm3, %v11234_v7 }
 0x939   :  { %v5870_v42 = vpack.c.bf16 %v5865_v36, %v5861_v46  ;;  %v5867_v5 = vpop.f32.mrb[55].mxu0 }
 0x93a   :  { %9323 = vmatpush3.bf16.msra.mxu1 %v10561_v43  ;;  %v5871_v28 = vpack.c.bf16 %v5867_v5, %v5863_v44  ;;  %9493 = vmatpush3.bf16.msra.mxu0 %v10575_v12 }
 0x93b   :  { %9324 = vmatprep.subr.bf16.mxu1 %v10562_v4  ;;  %9498 = vmatprep.subr.bf16.mxu0 %v11234_v7 }
 0x93c   :  { %6381 = vmatprep.mubr.bf16.mxu1 %v5871_v28 }
 0x93e   :  { %9325 = vmatpush3.bf16.msra.mxu1 %v10563_v2 }
 0x93f   :  { %9326 = vmatprep.subr.bf16.mxu1 %v10564_v20 }
 0x942   :  { %9327 = vmatpush3.bf16.msra.mxu1 %v10565_v22 }
 0x943   :  { %9328 = vmatprep.subr.bf16.mxu1 %v10566_v60 }
 0x946   :  { %9329 = vmatpush3.bf16.msra.mxu1 %v10567_v57  ;;  %v12538_v57 = vld [vmem:[#allocation15] sm:$0xff] }
 0x947   :  { %9330 = vmatprep.subr.bf16.mxu1 %v10568_v50 }
 0x94a   :  { %9331 = vmatpush3.bf16.msra.mxu1 %v10569_v1  ;;  %v12540_v1 = vld [vmem:[#allocation15 + $0x8] sm:$0xff] }
 0x94b   :  { %9332 = vmatprep.subr.bf16.mxu1 %v10570_v0 }
 0x94e   :  { %9333 = vmatpush3.bf16.msra.mxu1 %v10571_v14 }
 0x94f   :  { %9334 = vmatprep.subr.bf16.mxu1 %v10572_v53 }
 0x952   :  { %9335 = vmatpush3.bf16.msra.mxu1 %v10573_v40 }
 0x953   :  { %9516 = vmatprep.subr.bf16.mxu1 %v11234_v7 }
 0x955   :  { %6382 = vmatmul.mubr.bf16.vlgmr.msra.gmra.mrb[56].mxu1 %v5870_v42 }
 0x956   :  { %9518 = vmatprep.mubr.msk.bf16.mxu1 %vm11235_vm3, %v11234_v7 }
 0xa08   :  { %v9292_v15 = vpop.f32.mrb[52].mxu1  ;;  %v9314_v6 = vpop.f32.mrb[56].mxu0 }
 0xa09   :  { %v9293_v8 = vpop.f32.mrb[53].mxu1  ;;  %v9315_v16 = vpop.f32.mrb[57].mxu0 }
 0xa0a   :  { %v9294_v19 = vadd.f32 %v9293_v8, %v9292_v15  ;;  %v9295_v21 = vpop.f32.mrb[54].mxu1  ;;  %v9316_v23 = vadd.f32 %v9315_v16, %v9314_v6  ;;  %v9317_v17 = vpop.f32.mrb[58].mxu0 }
 0xa0b   :  { %v9296_v45 = vpop.f32.mrb[55].mxu1  ;;  %v9318_v24 = vpop.f32.mrb[59].mxu0 }
 0xa0c   :  { %v6046_v26 = vadd.f32 %v9294_v19, %v9066_v18  ;;  %v9297_v27 = vadd.f32 %v9296_v45, %v9295_v21  ;;  %v9319_v29 = vadd.f32 %v9318_v24, %v9317_v17 }
 0xa0e   :  { %v6047_v49 = vadd.f32 %v9297_v27, %v9066_v18  ;;  %v6218_v3 = vadd.f32 %v9316_v23, %v6046_v26 }
 0xa10   :  { %v6219_v62 = vadd.f32 %v9319_v29, %v6047_v49 }
 0xa28   :  { %v9336_v58 = vpop.f32.mrb[56].mxu1 }
 0xa29   :  { %v9337_v59 = vpop.f32.mrb[57].mxu1 }
 0xa2a   :  { %v9338_v11 = vadd.f32 %v9337_v59, %v9336_v58  ;;  %v9339_v54 = vpop.f32.mrb[58].mxu1 }
 0xa2b   :  { %v9340_v51 = vpop.f32.mrb[59].mxu1 }
 0xa2c   :  { %v6390_v52 = vadd.f32 %v9338_v11, %v6218_v3  ;;  %v9341_v61 = vadd.f32 %v9340_v51, %v9339_v54 }
 0xa2e   :  { %v6392_v31 = vmax.f32 %v6390_v52, 0.0  ;;  %v6391_v25 = vadd.f32 %v9341_v61, %v6219_v62 }
 0xa30   :  { %v6399_v39 = vmul.f32 %v9163_v30, %v6392_v31  ;;  %v6393_v33 = vmax.f32 %v6391_v25, 0.0 }
 0xa32   :  { %v6406_v41 = vadd.f32 %v9164_v32, %v6399_v39  ;;  %v6400_v13 = vmul.f32 %v9163_v30, %v6393_v33 }
 0xa34   :  { %v6407_v10 = vadd.f32 %v9164_v32, %v6400_v13  ;;  %v12508_v56 = vadd.f32 %v6408_v34, %v6406_v41 }
 0xa36   :  { %v12510_v35 = vadd.f32 %v6409_v55, %v6407_v10 }
 0xa38   :  { %v6418_v37 = vpack.c.bf16 %v12510_v35, %v12508_v56 }
 0xa3a   :  { %9495 = vmatmul.mubr.msk.bf16.vlgmr.msra.gmra.mrb[60].mxu0 %vm2407_vm2, %v6418_v37 }
 0xa3b   :  { %9500 = vmatprep.mubr.msk.bf16.mxu0 %vm11235_vm3, %v11234_v7 }
 0xb0d   :  { %v6475_v47 = vpop.f32.mrb[60].mxu0 }
 0xb0e   :  { %v6476_v63 = vadd.f32 %v9165_v38, %v6475_v47  ;;  %v9496_v9 = vpop.f32.mrb[61].mxu0  ;;  %v6608_v47 = vld [vmem:[#allocation21] sm:$0xf] }
 0xb0f   :  { %v6478_v43 = vpop.f32.mrb[62].mxu0 }
 0xb10   :  { %v6479_v46 = vadd.f32 %v9165_v38, %v6478_v43  ;;  %v9497_v4 = vpop.f32.mrb[63].mxu0  ;;  %v6483_v44 = vmul.f32 0.35355338, %v6476_v63 }
 0xb12   :  { %v6484_v36 = vmul.f32 0.35355338, %v6479_v46  ;;  %v12517_v42 = vpack.c.bf16 %v6479_v46, %v6476_v63  ;;  %v6615_v63 = vsel %vm6613_vm5, %v6608_v47, 0 }
 0xb14   :  { %v12519_v5 = vpack.c.bf16 %v6484_v36, %v6483_v44  ;;  %6488 = vrot.lane.b32.xlu0 %v12517_v42, %s11236_s26 }
 0xb16   :  { %6667 = vrot.lane.b32.xlu1 %v12519_v5, %s11237_s8 }
 0xb18   :  { %6669 = vrot.lane.b32.xlu0 %v12517_v42, %s11238_s4 }
 0xb86   :  { %v6489_v2 = vpop.permute.xlu0 %6488 }
 0xb87   :  { %v6495_v28 = vsel %vm6490_vm4, %v6489_v2, 0 }
 0xb88   :  { %9499 = vmatpush3.bf16.xpose.msra.mxu0 %v6495_v28  ;;  %v6668_v60 = vpop.permute.xlu1 %6667 }
 0xb89   :  { %9504 = vmatprep.subr.bf16.mxu0 %v11234_v7 }
 0xb8a   :  { %v6670_v20 = vpop.permute.xlu0 %6669 }
 0xb8b   :  { %v6675_v22 = vsel %vm6490_vm4, %v6670_v20, 0 }
 0xb8c   :  { %9517 = vmatpush3.bf16.xpose.msra.mxu1 %v6675_v22 }
 0xb8d   :  { %9528 = vmatprep.subr.bf16.mxu1 %v11234_v7 }
 0xb8f   :  { %9501 = vmatmul.mubr.msk.bf16.vlgmr.msra.gmra.mrb[64].mxu0 %vm6490_vm4, %v12519_v5 }
 0xb90   :  { %9506 = vmatprep.mubr.msk.bf16.mxu0 %vm11235_vm3, %v11234_v7 }
 0xb93   :  { %9519 = vmatmul.mubr.msk.bf16.vlgmr.msra.gmra.mrb[60].mxu1 %vm6490_vm4, %v6668_v60 }
 0xb94   :  { %9530 = vmatprep.mubr.msk.bf16.mxu1 %vm11235_vm3, %v11234_v7 }
 0xc62   :  { %v6531_v50 = vpop.f32.mrb[64].mxu0 }
 0xc63   :  { %v6532_v0 = vadd.f32 %v6531_v50, %v12538_v57  ;;  %v9502_v14 = vpop.f32.mrb[65].mxu0 }
 0xc64   :  { %v6534_v53 = vpop.f32.mrb[66].mxu0 }
 0xc65   :  { %v6535_v40 = vadd.f32 %v6534_v53, %v12540_v1  ;;  %v9503_v48 = vpop.f32.mrb[67].mxu0  ;;  %v6538_v12 = vsel %vm869_vm1, %v6532_v0, -inf }
 0xc66   :  { %v6711_v15 = vpop.f32.mrb[60].mxu1  ;;  %6539 = vmax.xlane.f32.xlu1 %v6538_v12  ;;  %v6789_v48 = vld [vmem:[#allocation21 + $0x4] sm:$0xf] }
 0xc67   :  { %v9520_v6 = vpop.f32.mrb[61].mxu1  ;;  %v6541_v18 = vsel %vm869_vm1, %v6535_v40, -inf  ;;  %v6712_v49 = vadd.f32 %v6711_v15, %v12538_v57  ;;  %v6795_v12 = vsel %vm6613_vm5, %v6789_v48, 0 }
 0xc68   :  { %v6714_v8 = vpop.f32.mrb[62].mxu1  ;;  %6542 = vmax.xlane.f32.xlu0 %v6541_v18  ;;  %9529 = vmatpush3.bf16.msra.mxu1 %v6795_v12 }
 0xc69   :  { %v9521_v16 = vpop.f32.mrb[63].mxu1  ;;  %v6715_v62 = vadd.f32 %v6714_v8, %v12540_v1  ;;  %v6718_v58 = vsel %vm869_vm1, %v6712_v49, -inf  ;;  %9540 = vmatprep.subr.bf16.mxu1 %v11234_v7 }
 0xc6b   :  { %v6721_v59 = vsel %vm869_vm1, %v6715_v62, -inf }
 0xcf3   :  { %v6540_v19 = vpop.xlane.xlu1 %6539 }
 0xcf4   :  { %v6544_v21 = vsub.f32 %v6532_v0, %v6540_v19 }
 0xcf5   :  { %v6543_v23 = vpop.xlane.xlu0 %6542 }
 0xcf6   :  { %v6546_v17 = vmul.f32 1.442695, %v6544_v21  ;;  %v6545_v45 = vsub.f32 %v6535_v40, %v6543_v23 }
 0xcf8   :  { %10592 = vpow2.f32 %v6546_v17  ;;  %v6548_v24 = vmul.f32 1.442695, %v6545_v45 }
 0xcfa   :  { %10594 = vpow2.f32 %v6548_v24 }
 0xd02   :  { %v10593_v26 = vpop.eup %10592 }
 0xd03   :  { %v6550_v27 = vsel %vm869_vm1, %v10593_v26, 0.0 }
 0xd04   :  { %v10595_v29 = vpop.eup %10594  ;;  %6551 = vadd.xlane.f32.xlu0 %v6550_v27 }
 0xd05   :  { %v6553_v3 = vsel %vm869_vm1, %v10595_v29, 0.0 }
 0xd06   :  { %6554 = vadd.xlane.f32.xlu1 %v6553_v3 }
 0xd0a   :  { %6719 = vmax.xlane.f32.xlu1 %v6718_v58 }
 0xd0e   :  { %6722 = vmax.xlane.f32.xlu1 %v6721_v59 }
 0xd1a   :  { %6561 = vrot.lane.b32.xlu0 %v12517_v42, %s12907_s29 }
 0xd1e   :  { %6842 = vrot.lane.b32.xlu0 %v12517_v42, %s11239_s28 }
 0xd22   :  { %6840 = vrot.lane.b32.xlu0 %v12519_v5, %s11240_s24 }
 0xd91   :  { %v6552_v11 = vpop.xlane.xlu0 %6551 }
 0xd92   :  { %10596 = vrcp.f32 %v6552_v11 }
 0xd93   :  { %v6555_v54 = vpop.xlane.xlu1 %6554 }
 0xd94   :  { %10598 = vrcp.f32 %v6555_v54 }
 0xd95   :  { %v6562_v51 = vpop.permute.xlu0 %6561 }
 0xd96   :  { %9505 = vmatpush3.bf16.msra.mxu0 %v6562_v51 }
 0xd97   :  { %v6720_v52 = vpop.xlane.xlu1 %6719  ;;  %9510 = vmatprep.subr.bf16.mxu0 %v11234_v7 }
 0xd98   :  { %v6724_v61 = vsub.f32 %v6712_v49, %v6720_v52 }
 0xd99   :  { %v6843_v0 = vpop.permute.xlu0 %6842 }
 0xd9a   :  { %v6726_v30 = vmul.f32 1.442695, %v6724_v61  ;;  %v6848_v53 = vsel %vm6490_vm4, %v6843_v0, 0 }
 0xd9b   :  { %v6723_v31 = vpop.xlane.xlu1 %6722 }
 0xd9c   :  { %v10597_v25 = vpop.eup %10596  ;;  %10600 = vpow2.f32 %v6726_v30  ;;  %v6725_v32 = vsub.f32 %v6715_v62, %v6723_v31 }
 0xd9d   :  { %v6557_v41 = vmul.f32 %v10597_v25, %v10593_v26  ;;  %v6841_v40 = vpop.permute.xlu0 %6840 }
 0xd9e   :  { %v10599_v39 = vpop.eup %10598  ;;  %v6728_v33 = vmul.f32 1.442695, %v6725_v32 }
 0xd9f   :  { %v6559_v13 = vmul.f32 %v10599_v39, %v10595_v29 }
 0xda0   :  { %10602 = vpow2.f32 %v6728_v33 }
 0xda1   :  { %v6560_v34 = vpack.c.bf16 %v6559_v13, %v6557_v41 }
 0xda3   :  { %9507 = vmatmul.mubr.msk.bf16.vlgmr.msra.gmra.mrb[68].mxu0 %vm869_vm1, %v6560_v34 }
 0xda4   :  { %9512 = vmatprep.mubr.msk.bf16.mxu0 %vm11235_vm3, %v11234_v7  ;;  %9511 = vmatpush3.bf16.msra.mxu0 %v6615_v63 }
 0xda5   :  { %9522 = vmatprep.subr.bf16.mxu0 %v11234_v7 }
 0xda6   :  { %v10601_v55 = vpop.eup %10600 }
 0xda7   :  { %v6730_v10 = vsel %vm869_vm1, %v10601_v55, 0.0 }
 0xda8   :  { %6731 = vadd.xlane.f32.xlu1 %v6730_v10 }
 0xdaa   :  { %v10603_v37 = vpop.eup %10602 }
 0xdab   :  { %v6733_v38 = vsel %vm869_vm1, %v10603_v37, 0.0 }
 0xdac   :  { %6734 = vadd.xlane.f32.xlu1 %v6733_v38 }
 0xdbd   :  { %6741 = vrot.lane.b32.xlu1 %v12517_v42, %s11241_s12 }
 0xe35   :  { %v6732_v9 = vpop.xlane.xlu1 %6731 }
 0xe39   :  { %v6735_v43 = vpop.xlane.xlu1 %6734 }
 0xe3a   :  { %10604 = vrcp.f32 %v6735_v43 }
 0xe3b   :  { %10606 = vrcp.f32 %v6732_v9 }
 0xe3d   :  { %v6742_v20 = vpop.permute.xlu1 %6741 }
 0xe44   :  { %v10605_v28 = vpop.eup %10604 }
 0xe45   :  { %v10607_v22 = vpop.eup %10606  ;;  %v6739_v60 = vmul.f32 %v10605_v28, %v10603_v37  ;;  %v6962_v28 = vld [vmem:[#allocation21 + $0x8] sm:$0xf] }
 0xe46   :  { %v6737_v50 = vmul.f32 %v10607_v22, %v10601_v55 }
 0xe48   :  { %v6740_v14 = vpack.c.bf16 %v6739_v60, %v6737_v50 }
 0xe76   :  { %v6601_v46 = vpop.f32.mrb[68].mxu0 }
 0xe77   :  { %v9508_v4 = vpop.f32.mrb[69].mxu0 }
 0xe78   :  { %v6604_v44 = vpop.f32.mrb[70].mxu0 }
 0xe79   :  { %v6609_v36 = vpack.c.bf16 %v6604_v44, %v6601_v46  ;;  %v9509_v2 = vpop.f32.mrb[71].mxu0 }
 0xe7b   :  { %9513 = vmatmul.mubr.msk.bf16.vlgmr.msra.gmra.mrb[72].mxu0 %vm6490_vm4, %v6609_v36 }
 0xe7c   :  { %9523 = vmatpush3.bf16.msra.mxu0 %v6742_v20  ;;  %9524 = vmatprep.mubr.msk.bf16.mxu0 %vm11235_vm3, %v11234_v7  ;;  %v6968_v20 = vsel %vm6613_vm5, %v6962_v28, 0 }
 0xe7d   :  { %9534 = vmatprep.subr.bf16.mxu0 %v11234_v7 }
 0xe83   :  { %9525 = vmatmul.mubr.msk.bf16.vlgmr.msra.gmra.mrb[76].mxu0 %vm869_vm1, %v6740_v14 }
 0xe84   :  { %9536 = vmatprep.mubr.msk.bf16.mxu0 %vm11235_vm3, %v11234_v7 }
 0xe85   :  { %9535 = vmatpush3.bf16.xpose.msra.mxu0 %v6848_v53 }
 0xe86   :  { %9546 = vmatprep.subr.bf16.mxu0 %v11234_v7 }
 0xe8c   :  { %9537 = vmatmul.mubr.msk.bf16.vlgmr.msra.gmra.mrb[80].mxu0 %vm6490_vm4, %v6841_v40 }
 0xe8d   :  { %9548 = vmatprep.mubr.msk.bf16.mxu0 %vm11235_vm3, %v11234_v7  ;;  %9547 = vmatpush3.bf16.msra.mxu0 %v6968_v20 }
 0xe8e   :  { %9558 = vmatprep.subr.bf16.mxu0 %v11234_v7 }
 0xf4e   :  { %v6651_v15 = vpop.f32.mrb[72].mxu0 }
 0xf4f   :  { %v9514_v6 = vpop.f32.mrb[73].mxu0 }
 0xf50   :  { %v6654_v18 = vpop.f32.mrb[74].mxu0 }
 0xf51   :  { %v9515_v8 = vpop.f32.mrb[75].mxu0 }
 0xf56   :  { %v6781_v16 = vpop.f32.mrb[76].mxu0 }
 0xf57   :  { %v9526_v19 = vpop.f32.mrb[77].mxu0 }
 0xf58   :  { %v6784_v21 = vpop.f32.mrb[78].mxu0 }
 0xf59   :  { %v6790_v23 = vpack.c.bf16 %v6784_v21, %v6781_v16  ;;  %v9527_v17 = vpop.f32.mrb[79].mxu0 }
 0xf5b   :  { %9531 = vmatmul.mubr.msk.bf16.vlgmr.msra.gmra.mrb[64].mxu1 %vm6490_vm4, %v6790_v23 }
 0xf5c   :  { %9542 = vmatprep.mubr.msk.bf16.mxu1 %vm11235_vm3, %v11234_v7 }
 0xf5f   :  { %v6884_v45 = vpop.f32.mrb[80].mxu0 }
 0xf60   :  { %v6885_v24 = vadd.f32 %v6884_v45, %v12538_v57  ;;  %v9538_v26 = vpop.f32.mrb[81].mxu0 }
 0xf61   :  { %v6887_v27 = vpop.f32.mrb[82].mxu0 }
 0xf62   :  { %v6888_v29 = vadd.f32 %v6887_v27, %v12540_v1  ;;  %v9539_v49 = vpop.f32.mrb[83].mxu0  ;;  %v6891_v3 = vsel %vm869_vm1, %v6885_v24, -inf }
 0xf63   :  { %6892 = vmax.xlane.f32.xlu0 %v6891_v3 }
 0xf64   :  { %v6894_v62 = vsel %vm869_vm1, %v6888_v29, -inf }
 0xf65   :  { %6895 = vmax.xlane.f32.xlu1 %v6894_v62 }
 0xf76   :  { %7015 = vrot.lane.b32.xlu1 %v12517_v42, %s11242_s30 }
 0xf7a   :  { %7013 = vrot.lane.b32.xlu1 %v12519_v5, %s11243_s2  ;;  %v9172_v5 = vld [vmem:[#allocation22] ss:$0 sm:$0xff] }
 0xf7b   :  { %v6664_v32 = vadd.f32 %v9172_v5, %v6651_v15  ;;  %v6665_v33 = vadd.f32 %v9172_v5, %v6654_v18  ;;  %v7135_v5 = vld [vmem:[#allocation21 + $0xc] sm:$0xf] }
 0xff0   :  { %v6893_v58 = vpop.xlane.xlu0 %6892 }
 0xff1   :  { %v6897_v59 = vsub.f32 %v6885_v24, %v6893_v58 }
 0xff2   :  { %v6896_v11 = vpop.xlane.xlu1 %6895 }
 0xff3   :  { %v6899_v54 = vmul.f32 1.442695, %v6897_v59  ;;  %v6898_v51 = vsub.f32 %v6888_v29, %v6896_v11 }
 0xff5   :  { %10608 = vpow2.f32 %v6899_v54  ;;  %v6901_v52 = vmul.f32 1.442695, %v6898_v51 }
 0xff6   :  { %v7016_v4 = vpop.permute.xlu1 %7015 }
 0xff7   :  { %10610 = vpow2.f32 %v6901_v52  ;;  %v7021_v36 = vsel %vm6490_vm4, %v7016_v4, 0 }
 0xffa   :  { %v7014_v2 = vpop.permute.xlu1 %7013 }
 0xfff   :  { %v10609_v61 = vpop.eup %10608 }
0x1000   :  { %v6903_v30 = vsel %vm869_vm1, %v10609_v61, 0.0 }
0x1001   :  { %v10611_v31 = vpop.eup %10610  ;;  %6904 = vadd.xlane.f32.xlu0 %v6903_v30 }
0x1002   :  { %v6906_v25 = vsel %vm869_vm1, %v10611_v31, 0.0 }
0x1005   :  { %6907 = vadd.xlane.f32.xlu0 %v6906_v25 }
0x101b   :  { %6914 = vrot.lane.b32.xlu0 %v12517_v42, %s11244_s27 }
0x102e   :  { %v6831_v39 = vpop.f32.mrb[64].mxu1 }
0x102f   :  { %v12597_v41 = vadd.f32 %v6831_v39, %v6664_v32  ;;  %v9532_v13 = vpop.f32.mrb[65].mxu1  ;;  %v7141_v32 = vsel %vm6613_vm5, %v7135_v5, 0  ;;  %v9193_v5 = vld [vmem:[#allocation30] ss:$0 sm:$0xff] }
0x1030   :  { %v6834_v34 = vpop.f32.mrb[66].mxu1 }
0x1031   :  { %v12599_v55 = vadd.f32 %v6834_v34, %v6665_v33  ;;  %v9533_v10 = vpop.f32.mrb[67].mxu1 }
0x108e   :  { %v6905_v37 = vpop.xlane.xlu0 %6904 }
0x108f   :  { %10612 = vrcp.f32 %v6905_v37 }
0x1092   :  { %v6908_v38 = vpop.xlane.xlu0 %6907 }
0x1093   :  { %10614 = vrcp.f32 %v6908_v38 }
0x1096   :  { %v6915_v47 = vpop.permute.xlu0 %6914 }
0x1097   :  { %9541 = vmatpush3.bf16.msra.mxu1 %v6915_v47 }
0x1098   :  { %9552 = vmatprep.subr.bf16.mxu1 %v11234_v7 }
0x1099   :  { %v10613_v63 = vpop.eup %10612 }
0x109a   :  { %v6910_v43 = vmul.f32 %v10613_v63, %v10609_v61 }
0x109d   :  { %v10615_v9 = vpop.eup %10614 }
0x109e   :  { %v6912_v46 = vmul.f32 %v10615_v9, %v10611_v31 }
0x10a0   :  { %v6913_v44 = vpack.c.bf16 %v6912_v46, %v6910_v43 }
0x10a2   :  { %9543 = vmatmul.mubr.msk.bf16.vlgmr.msra.gmra.mrb[68].mxu1 %vm869_vm1, %v6913_v44 }
0x10a3   :  { %9553 = vmatpush3.bf16.xpose.msra.mxu1 %v7021_v36  ;;  %9554 = vmatprep.mubr.msk.bf16.mxu1 %vm11235_vm3, %v11234_v7 }
0x10a4   :  { %9564 = vmatprep.subr.bf16.mxu1 %v11234_v7 }
0x10aa   :  { %9555 = vmatmul.mubr.msk.bf16.vlgmr.msra.gmra.mrb[72].mxu1 %vm6490_vm4, %v7014_v2 }
0x10ab   :  { %9566 = vmatprep.mubr.msk.bf16.mxu1 %vm11235_vm3, %v11234_v7  ;;  %9565 = vmatpush3.bf16.msra.mxu1 %v7141_v32 }
0x10ac   :  { %9578 = vmatprep.subr.bf16.mxu1 %v11234_v7 }
0x1175   :  { %v6954_v22 = vpop.f32.mrb[68].mxu1 }
0x1176   :  { %v9544_v60 = vpop.f32.mrb[69].mxu1 }
0x1177   :  { %v6957_v50 = vpop.f32.mrb[70].mxu1 }
0x1178   :  { %v6963_v0 = vpack.c.bf16 %v6957_v50, %v6954_v22  ;;  %v9545_v14 = vpop.f32.mrb[71].mxu1 }
0x1179   :  { %v10576_v14 = vld [vmem:[#allocation27] sm:$0xff]  }
0x117a   :  { %9549 = vmatmul.mubr.msk.bf16.vlgmr.msra.gmra.mrb[84].mxu0 %vm6490_vm4, %v6963_v0 }
0x117b   :  { %9560 = vmatprep.mubr.msk.bf16.mxu0 %vm11235_vm3, %v11234_v7 }
0x117d   :  { %v7057_v53 = vpop.f32.mrb[72].mxu1 }
0x117e   :  { %v7058_v40 = vadd.f32 %v7057_v53, %v12538_v57  ;;  %v9556_v48 = vpop.f32.mrb[73].mxu1  ;;  %v10578_v53 = vld [vmem:[%s12917_s23] sm:$0xff]  }
0x117f   :  { %v7060_v12 = vpop.f32.mrb[74].mxu1 }
0x1180   :  { %v7061_v15 = vadd.f32 %v7060_v12, %v12540_v1  ;;  %v9557_v6 = vpop.f32.mrb[75].mxu1  ;;  %v7064_v18 = vsel %vm869_vm1, %v7058_v40, -inf }
0x1181   :  { %7065 = vmax.xlane.f32.xlu0 %v7064_v18 }
0x1182   :  { %v7067_v8 = vsel %vm869_vm1, %v7061_v15, -inf }
0x1183   :  { %7068 = vmax.xlane.f32.xlu1 %v7067_v8 }
0x1194   :  { %7087 = vrot.lane.b32.xlu1 %v12517_v42, %s11245_s15 }
0x120e   :  { %v7066_v16 = vpop.xlane.xlu0 %7065 }
0x120f   :  { %v7070_v19 = vsub.f32 %v7058_v40, %v7066_v16  ;;  %v10579_v40 = vld [vmem:[%s12917_s23 + $0x8] sm:$0xff]  }
0x1210   :  { %v7069_v21 = vpop.xlane.xlu1 %7068 }
0x1211   :  { %v7072_v23 = vmul.f32 1.442695, %v7070_v19  ;;  %v7071_v17 = vsub.f32 %v7061_v15, %v7069_v21  ;;  %v9182_v21 = vld [vmem:[#allocation24] ss:$0 sm:$0xff] }
0x1213   :  { %10616 = vpow2.f32 %v7072_v23  ;;  %v7074_v45 = vmul.f32 1.442695, %v7071_v17 }
0x1214   :  { %v7088_v24 = vpop.permute.xlu1 %7087 }
0x1215   :  { %10618 = vpow2.f32 %v7074_v45  ;;  %9559 = vmatpush3.bf16.msra.mxu0 %v7088_v24  ;;  %v9183_v24 = vld [vmem:[#allocation25] ss:$0 sm:$0xff] }
0x1216   :  { %9570 = vmatprep.subr.bf16.mxu0 %v11234_v7 }
0x121d   :  { %v10617_v26 = vpop.eup %10616 }
0x121e   :  { %v7076_v27 = vsel %vm869_vm1, %v10617_v26, 0.0 }
0x121f   :  { %v10619_v29 = vpop.eup %10618  ;;  %7077 = vadd.xlane.f32.xlu0 %v7076_v27 }
0x1220   :  { %v7079_v49 = vsel %vm869_vm1, %v10619_v29, 0.0 }
0x1223   :  { %7080 = vadd.xlane.f32.xlu0 %v7079_v49 }
0x124d   :  { %v7004_v42 = vpop.f32.mrb[84].mxu0 }
0x124e   :  { %v7011_v3 = vadd.f32 %v7004_v42, %v12597_v41  ;;  %v9550_v62 = vpop.f32.mrb[85].mxu0  ;;  %v10580_v42 = vld [vmem:[%s12917_s23 + $0x10] sm:$0xff]  }
0x124f   :  { %v7007_v58 = vpop.f32.mrb[86].mxu0  ;;  %v9184_v62 = vld [vmem:[#allocation28] ss:$0 sm:$0xff] }
0x1250   :  { %v7012_v59 = vadd.f32 %v7007_v58, %v12599_v55  ;;  %v9551_v11 = vpop.f32.mrb[87].mxu0 }
0x12ac   :  { %v7078_v54 = vpop.xlane.xlu0 %7077 }
0x12ad   :  { %10620 = vrcp.f32 %v7078_v54 }
0x12b0   :  { %v7081_v51 = vpop.xlane.xlu0 %7080 }
0x12b1   :  { %10622 = vrcp.f32 %v7081_v51 }
0x12b7   :  { %v10621_v52 = vpop.eup %10620 }
0x12b8   :  { %v7083_v30 = vmul.f32 %v10621_v52, %v10617_v26 }
0x12bb   :  { %v10623_v61 = vpop.eup %10622 }
0x12bc   :  { %v7085_v31 = vmul.f32 %v10623_v61, %v10619_v29 }
0x12be   :  { %v7086_v25 = vpack.c.bf16 %v7085_v31, %v7083_v30 }
0x12c0   :  { %9561 = vmatmul.mubr.msk.bf16.vlgmr.msra.gmra.mrb[88].mxu0 %vm869_vm1, %v7086_v25 }
0x12c1   :  { %9574 = vmatprep.mubr.msk.bf16.mxu0 %vm11235_vm3, %v11234_v7  ;;  %9571 = vmatpush3.bf16.msra.mxu0 %v10576_v14 }
0x12c2   :  { %9572 = vmatprep.subr.bf16.mxu0 %v11234_v7 }
0x1393   :  { %v7127_v39 = vpop.f32.mrb[88].mxu0 }
0x1394   :  { %v9562_v33 = vpop.f32.mrb[89].mxu0 }
0x1395   :  { %v7130_v41 = vpop.f32.mrb[90].mxu0 }
0x1396   :  { %v7136_v13 = vpack.c.bf16 %v7130_v41, %v7127_v39  ;;  %v9563_v34 = vpop.f32.mrb[91].mxu0 }
0x1398   :  { %9567 = vmatmul.mubr.msk.bf16.vlgmr.msra.gmra.mrb[76].mxu1 %vm6490_vm4, %v7136_v13 }
0x1399   :  { %9586 = vmatprep.mubr.msk.bf16.mxu1 %vm11235_vm3, %v11234_v7  ;;  %9579 = vmatpush3.bf16.msra.mxu1 %v10578_v53 }
0x139a   :  { %9580 = vmatprep.subr.bf16.mxu1 %v11234_v7 }
0x139d   :  { %9581 = vmatpush3.bf16.msra.mxu1 %v10579_v40  ;;  %v9194_v40 = vld [vmem:[#allocation31] ss:$0 sm:$0xff] }
0x139e   :  { %9582 = vmatprep.subr.bf16.mxu1 %v11234_v7 }
0x13a1   :  { %9583 = vmatpush3.bf16.msra.mxu1 %v10580_v42 }
0x13a2   :  { %9584 = vmatprep.subr.bf16.mxu1 %v11234_v7 }
0x146b   :  { %v7177_v55 = vpop.f32.mrb[76].mxu1 }
0x146c   :  { %v7184_v10 = vadd.f32 %v7177_v55, %v7011_v3  ;;  %v9568_v37 = vpop.f32.mrb[77].mxu1  ;;  %v10581_v3 = vld [vmem:[%s12917_s23 + $0x18] sm:$0xff]  }
0x146d   :  { %v7180_v38 = vpop.f32.mrb[78].mxu1  ;;  %9585 = vmatpush3.bf16.msra.mxu1 %v10581_v3 }
0x146e   :  { %v7185_v47 = vadd.f32 %v7180_v38, %v7012_v59  ;;  %v9569_v63 = vpop.f32.mrb[79].mxu1  ;;  %v7186_v9 = vadd.f32 %v7184_v10, %v12508_v56  ;;  %9604 = vmatprep.subr.bf16.mxu1 %v11234_v7 }
0x1470   :  { %v7190_v43 = vsel %vm2407_vm2, %v7186_v9, 0.0  ;;  %v7187_v46 = vadd.f32 %v7185_v47, %v12510_v35  ;;  %v10577_v35 = vld [vmem:[#allocation27 + $0x8] sm:$0xff]  }
0x1471   :  { %7191 = vadd.xlane.f32.xlu0 %v7190_v43  ;;  %9573 = vmatpush3.bf16.msra.mxu0 %v10577_v35 }
0x1472   :  { %v7193_v4 = vsel %vm2407_vm2, %v7187_v46, 0.0  ;;  %9590 = vmatprep.subr.bf16.mxu0 %v11234_v7 }
0x1475   :  { %7194 = vadd.xlane.f32.xlu0 %v7193_v4 }
0x14fe   :  { %v7192_v44 = vpop.xlane.xlu0 %7191 }
0x14ff   :  { %v7197_v36 = vmul.f32 0.03125, %v7192_v44 }
0x1501   :  { %v7199_v2 = vsub.f32 %v7186_v9, %v7197_v36 }
0x1502   :  { %v7195_v28 = vpop.xlane.xlu0 %7194 }
0x1503   :  { %v7198_v20 = vmul.f32 0.03125, %v7195_v28  ;;  %v7201_v22 = vmul.f32 %v7199_v2, %v7199_v2  ;;  %v10582_v28 = vld [vmem:[#allocation18 + $0x10] sm:$0xff]  }
0x1505   :  { %v7200_v60 = vsub.f32 %v7187_v46, %v7198_v20  ;;  %v7203_v50 = vsel %vm2407_vm2, %v7201_v22, 0.0  ;;  %v10583_v20 = vld [vmem:[#allocation18 + $0x18] sm:$0xff]  }
0x1506   :  { %7204 = vadd.xlane.f32.xlu0 %v7203_v50 }
0x1507   :  { %v7202_v0 = vmul.f32 %v7200_v60, %v7200_v60 }
0x1509   :  { %v7206_v56 = vsel %vm2407_vm2, %v7202_v0, 0.0 }
0x150a   :  { %7207 = vadd.xlane.f32.xlu0 %v7206_v56 }
0x1593   :  { %v7205_v48 = vpop.xlane.xlu0 %7204 }
0x1594   :  { %v7209_v12 = vmul.f32 0.03125, %v7205_v48 }
0x1596   :  { %v7211_v15 = vadd.f32 1e-05, %v7209_v12 }
0x1597   :  { %v7208_v6 = vpop.xlane.xlu0 %7207 }
0x1598   :  { %10624 = vrsqrt.f32 %v7211_v15  ;;  %v7210_v18 = vmul.f32 0.03125, %v7208_v6  ;;  %v9195_v6 = vld [vmem:[#allocation33] ss:$0 sm:$0xff] }
0x159a   :  { %v7212_v8 = vadd.f32 1e-05, %v7210_v18 }
0x159c   :  { %10626 = vrsqrt.f32 %v7212_v8 }
0x15a2   :  { %v10625_v16 = vpop.eup %10624 }
0x15a3   :  { %v7215_v19 = vmul.f32 %v10625_v16, %v7199_v2 }
0x15a5   :  { %v7223_v17 = vmul.f32 %v9182_v21, %v7215_v19 }
0x15a6   :  { %v10627_v23 = vpop.eup %10626 }
0x15a7   :  { %v7216_v45 = vmul.f32 %v10627_v23, %v7200_v60  ;;  %v7231_v27 = vadd.f32 %v9183_v24, %v7223_v17 }
0x15a9   :  { %v7224_v26 = vmul.f32 %v9182_v21, %v7216_v45  ;;  %v9196_v21 = vld [vmem:[#allocation19 + $0x1] ss:$0 sm:$0xff] }
0x15ab   :  { %v7232_v29 = vadd.f32 %v9183_v24, %v7224_v26 }
0x15ad   :  { %v7237_v49 = vpack.c.bf16 %v7232_v29, %v7231_v27 }
0x15af   :  { %9575 = vmatmul.mubr.msk.bf16.vlgmr.msra.gmra.mrb[92].mxu0 %vm2407_vm2, %v7237_v49 }
0x15b0   :  { %9594 = vmatprep.mubr.msk.bf16.mxu0 %vm11235_vm3, %v11234_v7  ;;  %9591 = vmatpush3.bf16.msra.mxu0 %v10582_v28  ;;  %v7632_v28 = vld [vmem:[#allocation21 + $0x10] sm:$0xf] }
0x15b1   :  { %9592 = vmatprep.subr.bf16.mxu0 %v11234_v7 }
0x15b4   :  { %9593 = vmatpush3.bf16.msra.mxu0 %v10583_v20  ;;  %v7638_v20 = vsel %vm6613_vm5, %v7632_v28, 0 }
0x15b5   :  { %9598 = vmatprep.subr.bf16.mxu0 %v11234_v7 }
0x1682   :  { %v7294_v58 = vpop.f32.mrb[92].mxu0 }
0x1683   :  { %v7295_v59 = vadd.f32 %v9184_v62, %v7294_v58  ;;  %v9576_v11 = vpop.f32.mrb[93].mxu0 }
0x1684   :  { %v7297_v54 = vpop.f32.mrb[94].mxu0 }
0x1685   :  { %v7298_v51 = vadd.f32 %v9184_v62, %v7297_v54  ;;  %v9577_v52 = vpop.f32.mrb[95].mxu0  ;;  %v7301_v61 = vmax.f32 %v7295_v59, 0.0 }
0x1687   :  { %v7302_v30 = vmax.f32 %v7298_v51, 0.0 }
0x1689   :  { %v7311_v31 = vpack.c.bf16 %v7302_v30, %v7301_v61 }
0x168b   :  { %9587 = vmatmul.mubr.msk.bf16.vlgmr.msra.gmra.mrb[80].mxu1 %vm434_vm0, %v7311_v31 }
0x168c   :  { %9606 = vmatprep.mubr.msk.bf16.mxu1 %vm11235_vm3, %v11234_v7 }
0x175e   :  { %v7373_v25 = vpop.f32.mrb[80].mxu1 }
0x175f   :  { %v7380_v32 = vadd.f32 %v7373_v25, %v7231_v27  ;;  %v9588_v39 = vpop.f32.mrb[81].mxu1 }
0x1760   :  { %v7376_v33 = vpop.f32.mrb[82].mxu1 }
0x1761   :  { %v7381_v41 = vadd.f32 %v7376_v33, %v7232_v29  ;;  %v9589_v13 = vpop.f32.mrb[83].mxu1  ;;  %v7389_v34 = vadd.f32 %v9193_v5, %v7380_v32 }
0x1763   :  { %v7393_v55 = vsel %vm2407_vm2, %v7389_v34, 0.0  ;;  %v7390_v10 = vadd.f32 %v9193_v5, %v7381_v41 }
0x1764   :  { %7394 = vadd.xlane.f32.xlu1 %v7393_v55 }
0x1765   :  { %v7396_v37 = vsel %vm2407_vm2, %v7390_v10, 0.0 }
0x1766   :  { %7397 = vadd.xlane.f32.xlu0 %v7396_v37 }
0x17f1   :  { %v7395_v38 = vpop.xlane.xlu1 %7394 }
0x17f2   :  { %v7399_v47 = vmul.f32 0.03125, %v7395_v38 }
0x17f3   :  { %v7398_v63 = vpop.xlane.xlu0 %7397 }
0x17f4   :  { %v7401_v9 = vsub.f32 %v7389_v34, %v7399_v47  ;;  %v7400_v43 = vmul.f32 0.03125, %v7398_v63 }
0x17f6   :  { %v7402_v46 = vsub.f32 %v7390_v10, %v7400_v43  ;;  %v7403_v4 = vmul.f32 %v7401_v9, %v7401_v9 }
0x17f8   :  { %v7405_v44 = vsel %vm2407_vm2, %v7403_v4, 0.0  ;;  %v7404_v36 = vmul.f32 %v7402_v46, %v7402_v46 }
0x17f9   :  { %7406 = vadd.xlane.f32.xlu0 %v7405_v44 }
0x17fa   :  { %v7408_v2 = vsel %vm2407_vm2, %v7404_v36, 0.0 }
0x17fd   :  { %7409 = vadd.xlane.f32.xlu0 %v7408_v2 }
0x1886   :  { %v7407_v22 = vpop.xlane.xlu0 %7406 }
0x1887   :  { %v7411_v60 = vmul.f32 0.03125, %v7407_v22 }
0x1889   :  { %v7413_v50 = vadd.f32 1e-05, %v7411_v60 }
0x188a   :  { %v7410_v0 = vpop.xlane.xlu0 %7409 }
0x188b   :  { %10628 = vrsqrt.f32 %v7413_v50  ;;  %v7412_v56 = vmul.f32 0.03125, %v7410_v0 }
0x188d   :  { %v7414_v14 = vadd.f32 1e-05, %v7412_v56 }
0x188f   :  { %10630 = vrsqrt.f32 %v7414_v14 }
0x1895   :  { %v10629_v35 = vpop.eup %10628 }
0x1896   :  { %v7417_v53 = vmul.f32 %v10629_v35, %v7401_v9 }
0x1898   :  { %v7425_v12 = vmul.f32 %v9194_v40, %v7417_v53 }
0x1899   :  { %v10631_v48 = vpop.eup %10630 }
0x189a   :  { %v7418_v15 = vmul.f32 %v10631_v48, %v7402_v46  ;;  %v12670_v8 = vadd.f32 %v9195_v6, %v7425_v12 }
0x189c   :  { %v7426_v18 = vmul.f32 %v9194_v40, %v7418_v15 }
0x189e   :  { %v12672_v16 = vadd.f32 %v9195_v6, %v7426_v18 }
0x18a0   :  { %v7440_v19 = vpack.c.bf16 %v12672_v16, %v12670_v8 }
0x18a2   :  { %9595 = vmatmul.mubr.msk.bf16.vlgmr.msra.gmra.mrb[96].mxu0 %vm2407_vm2, %v7440_v19 }
0x18a3   :  { %9600 = vmatprep.mubr.msk.bf16.mxu0 %vm11235_vm3, %v11234_v7 }
0x1975   :  { %v7498_v23 = vpop.f32.mrb[96].mxu0 }
0x1976   :  { %v7499_v17 = vadd.f32 %v9196_v21, %v7498_v23  ;;  %v9596_v45 = vpop.f32.mrb[97].mxu0 }
0x1977   :  { %v7501_v24 = vpop.f32.mrb[98].mxu0 }
0x1978   :  { %v7502_v26 = vadd.f32 %v9196_v21, %v7501_v24  ;;  %v9597_v27 = vpop.f32.mrb[99].mxu0  ;;  %v7507_v29 = vmul.f32 0.35355338, %v7499_v17 }
0x197a   :  { %v7508_v49 = vmul.f32 0.35355338, %v7502_v26  ;;  %v12679_v42 = vpack.c.bf16 %v7502_v26, %v7499_v17 }
0x197c   :  { %v12681_v3 = vpack.c.bf16 %v7508_v49, %v7507_v29  ;;  %7512 = vrot.lane.b32.xlu0 %v12679_v42, %s11236_s26 }
0x19ee   :  { %v7513_v62 = vpop.permute.xlu0 %7512 }
0x19ef   :  { %v7518_v58 = vsel %vm6490_vm4, %v7513_v62, 0 }
0x19f0   :  { %9599 = vmatpush3.bf16.xpose.msra.mxu0 %v7518_v58 }
0x19f1   :  { %9610 = vmatprep.subr.bf16.mxu0 %v11234_v7 }
0x19f7   :  { %9601 = vmatmul.mubr.msk.bf16.vlgmr.msra.gmra.mrb[100].mxu0 %vm6490_vm4, %v12681_v3 }
0x19f8   :  { %9612 = vmatprep.mubr.msk.bf16.mxu0 %vm11235_vm3, %v11234_v7  ;;  %9611 = vmatpush3.bf16.msra.mxu0 %v7638_v20 }
0x19f9   :  { %9622 = vmatprep.subr.bf16.mxu0 %v11234_v7 }
0x1aca   :  { %v7554_v59 = vpop.f32.mrb[100].mxu0 }
0x1acb   :  { %v7555_v11 = vadd.f32 %v7554_v59, %v12538_v57  ;;  %v9602_v54 = vpop.f32.mrb[101].mxu0 }
0x1acc   :  { %v7557_v51 = vpop.f32.mrb[102].mxu0 }
0x1acd   :  { %v7558_v52 = vadd.f32 %v7557_v51, %v12540_v1  ;;  %v9603_v61 = vpop.f32.mrb[103].mxu0  ;;  %v7561_v30 = vsel %vm869_vm1, %v7555_v11, -inf }
0x1ace   :  { %7562 = vmax.xlane.f32.xlu0 %v7561_v30 }
0x1acf   :  { %v7564_v31 = vsel %vm869_vm1, %v7558_v52, -inf }
0x1ad0   :  { %7565 = vmax.xlane.f32.xlu1 %v7564_v31 }
0x1ae1   :  { %7584 = vrot.lane.b32.xlu1 %v12679_v42, %s12907_s29 }
0x1ae4   :  { %7690 = vrot.lane.b32.xlu0 %v12681_v3, %s11237_s8 }
0x1b5b   :  { %v7563_v25 = vpop.xlane.xlu0 %7562 }
0x1b5c   :  { %v7567_v5 = vsub.f32 %v7555_v11, %v7563_v25 }
0x1b5d   :  { %v7566_v32 = vpop.xlane.xlu1 %7565 }
0x1b5e   :  { %v7569_v39 = vmul.f32 1.442695, %v7567_v5  ;;  %v7568_v33 = vsub.f32 %v7558_v52, %v7566_v32  ;;  %v7812_v32 = vld [vmem:[#allocation21 + $0x14] sm:$0xf] }
0x1b5f   :  { %v7691_v2 = vpop.permute.xlu0 %7690 }
0x1b60   :  { %10632 = vpow2.f32 %v7569_v39  ;;  %v7571_v41 = vmul.f32 1.442695, %v7568_v33  ;;  %v7818_v39 = vsel %vm6613_vm5, %v7812_v32, 0 }
0x1b61   :  { %v7585_v13 = vpop.permute.xlu1 %7584 }
0x1b62   :  { %10634 = vpow2.f32 %v7571_v41  ;;  %9605 = vmatpush3.bf16.msra.mxu1 %v7585_v13 }
0x1b63   :  { %9616 = vmatprep.subr.bf16.mxu1 %v11234_v7 }
0x1b6a   :  { %v10633_v34 = vpop.eup %10632 }
0x1b6b   :  { %v7573_v55 = vsel %vm869_vm1, %v10633_v34, 0.0 }
0x1b6c   :  { %v10635_v10 = vpop.eup %10634  ;;  %7574 = vadd.xlane.f32.xlu1 %v7573_v55 }
0x1b6d   :  { %v7576_v37 = vsel %vm869_vm1, %v10635_v10, 0.0 }
0x1b70   :  { %7577 = vadd.xlane.f32.xlu1 %v7576_v37  ;;  %v12747_v37 = vld [vmem:[#allocation15] sm:$0xff] }
0x1b81   :  { %7692 = vrot.lane.b32.xlu1 %v12679_v42, %s11238_s4 }
0x1bf9   :  { %v7575_v38 = vpop.xlane.xlu1 %7574 }
0x1bfa   :  { %10636 = vrcp.f32 %v7575_v38 }
0x1bfd   :  { %v7578_v47 = vpop.xlane.xlu1 %7577 }
0x1bfe   :  { %10638 = vrcp.f32 %v7578_v47 }
0x1c01   :  { %v7693_v4 = vpop.permute.xlu1 %7692 }
0x1c02   :  { %v7698_v36 = vsel %vm6490_vm4, %v7693_v4, 0 }
0x1c04   :  { %v10637_v63 = vpop.eup %10636 }
0x1c05   :  { %v7580_v43 = vmul.f32 %v10637_v63, %v10633_v34 }
0x1c08   :  { %v10639_v9 = vpop.eup %10638 }
0x1c09   :  { %v7582_v46 = vmul.f32 %v10639_v9, %v10635_v10  ;;  %v12750_v9 = vld [vmem:[#allocation15 + $0x8] sm:$0xff] }
0x1c0b   :  { %v7583_v44 = vpack.c.bf16 %v7582_v46, %v7580_v43 }
0x1c0d   :  { %9607 = vmatmul.mubr.msk.bf16.vlgmr.msra.gmra.mrb[84].mxu1 %vm869_vm1, %v7583_v44 }
0x1c0e   :  { %9617 = vmatpush3.bf16.xpose.msra.mxu1 %v7698_v36  ;;  %9618 = vmatprep.mubr.msk.bf16.mxu1 %vm11235_vm3, %v11234_v7 }
0x1c0f   :  { %9628 = vmatprep.subr.bf16.mxu1 %v11234_v7 }
0x1c15   :  { %9619 = vmatmul.mubr.msk.bf16.vlgmr.msra.gmra.mrb[88].mxu1 %vm6490_vm4, %v7691_v2 }
0x1c16   :  { %9630 = vmatprep.mubr.msk.bf16.mxu1 %vm11235_vm3, %v11234_v7  ;;  %9629 = vmatpush3.bf16.msra.mxu1 %v7818_v39 }
0x1c17   :  { %9640 = vmatprep.subr.bf16.mxu1 %v11234_v7 }
0x1ce0   :  { %v7624_v22 = vpop.f32.mrb[84].mxu1 }
0x1ce1   :  { %v9608_v60 = vpop.f32.mrb[85].mxu1 }
0x1ce2   :  { %v7627_v50 = vpop.f32.mrb[86].mxu1 }
0x1ce3   :  { %v7633_v0 = vpack.c.bf16 %v7627_v50, %v7624_v22  ;;  %v9609_v56 = vpop.f32.mrb[87].mxu1 }
0x1ce5   :  { %9613 = vmatmul.mubr.msk.bf16.vlgmr.msra.gmra.mrb[104].mxu0 %vm6490_vm4, %v7633_v0 }
0x1ce6   :  { %9624 = vmatprep.mubr.msk.bf16.mxu0 %vm11235_vm3, %v11234_v7 }
0x1ce8   :  { %v7734_v14 = vpop.f32.mrb[88].mxu1 }
0x1ce9   :  { %v7735_v35 = vadd.f32 %v7734_v14, %v12538_v57  ;;  %v9620_v53 = vpop.f32.mrb[89].mxu1 }
0x1cea   :  { %v7737_v40 = vpop.f32.mrb[90].mxu1 }
0x1ceb   :  { %v7738_v48 = vadd.f32 %v7737_v40, %v12540_v1  ;;  %v9621_v12 = vpop.f32.mrb[91].mxu1  ;;  %v7741_v15 = vsel %vm869_vm1, %v7735_v35, -inf }
0x1cec   :  { %7742 = vmax.xlane.f32.xlu1 %v7741_v15 }
0x1ced   :  { %v7744_v6 = vsel %vm869_vm1, %v7738_v48, -inf }
0x1cee   :  { %7745 = vmax.xlane.f32.xlu0 %v7744_v6 }
0x1d04   :  { %7865 = vrot.lane.b32.xlu0 %v12679_v42, %s11239_s28 }
0x1d79   :  { %v7743_v18 = vpop.xlane.xlu1 %7742 }
0x1d7a   :  { %v7747_v19 = vsub.f32 %v7735_v35, %v7743_v18  ;;  %v9203_v35 = vld [vmem:[#allocation22 + $0x1] ss:$0 sm:$0xff] }
0x1d7b   :  { %v7746_v21 = vpop.xlane.xlu0 %7745 }
0x1d7c   :  { %v7749_v23 = vmul.f32 1.442695, %v7747_v19  ;;  %v7748_v17 = vsub.f32 %v7738_v48, %v7746_v21 }
0x1d7e   :  { %10640 = vpow2.f32 %v7749_v23  ;;  %v7751_v57 = vmul.f32 1.442695, %v7748_v17 }
0x1d7f   :  { %v7866_v30 = vpop.permute.xlu0 %7865 }
0x1d80   :  { %10642 = vpow2.f32 %v7751_v57  ;;  %v7871_v25 = vsel %vm6490_vm4, %v7866_v30, 0 }
0x1d88   :  { %v10641_v45 = vpop.eup %10640 }
0x1d89   :  { %v7753_v1 = vsel %vm869_vm1, %v10641_v45, 0.0 }
0x1d8a   :  { %v10643_v24 = vpop.eup %10642  ;;  %7754 = vadd.xlane.f32.xlu1 %v7753_v1 }
0x1d8b   :  { %v7756_v26 = vsel %vm869_vm1, %v10643_v24, 0.0 }
0x1d8e   :  { %7757 = vadd.xlane.f32.xlu1 %v7756_v26 }
0x1d9f   :  { %7764 = vrot.lane.b32.xlu1 %v12679_v42, %s11241_s12 }
0x1da3   :  { %7863 = vrot.lane.b32.xlu1 %v12681_v3, %s11240_s24 }
0x1db8   :  { %v12729_v27 = vpop.f32.mrb[104].mxu0 }
0x1db9   :  { %v9614_v29 = vpop.f32.mrb[105].mxu0  ;;  %v7687_v53 = vadd.f32 %v9203_v35, %v12729_v27 }
0x1dba   :  { %v12731_v49 = vpop.f32.mrb[106].mxu0 }
0x1dbb   :  { %v9615_v62 = vpop.f32.mrb[107].mxu0  ;;  %v7688_v48 = vadd.f32 %v9203_v35, %v12731_v49  ;;  %v7985_v49 = vld [vmem:[#allocation21 + $0x18] sm:$0xf] }
0x1dbc   :  { %v7991_v62 = vsel %vm6613_vm5, %v7985_v49, 0 }
0x1e17   :  { %v7755_v58 = vpop.xlane.xlu1 %7754 }
0x1e18   :  { %10644 = vrcp.f32 %v7755_v58 }
0x1e1b   :  { %v7758_v59 = vpop.xlane.xlu1 %7757 }
0x1e1c   :  { %10646 = vrcp.f32 %v7758_v59 }
0x1e1f   :  { %v7765_v11 = vpop.permute.xlu1 %7764 }
0x1e20   :  { %9623 = vmatpush3.bf16.msra.mxu0 %v7765_v11 }
0x1e21   :  { %9634 = vmatprep.subr.bf16.mxu0 %v11234_v7 }
0x1e22   :  { %v10645_v54 = vpop.eup %10644 }
0x1e23   :  { %v7760_v52 = vmul.f32 %v10645_v54, %v10641_v45  ;;  %v7864_v5 = vpop.permute.xlu1 %7863 }
0x1e26   :  { %v10647_v51 = vpop.eup %10646 }
0x1e27   :  { %v7762_v61 = vmul.f32 %v10647_v51, %v10643_v24 }
0x1e29   :  { %v7763_v31 = vpack.c.bf16 %v7762_v61, %v7760_v52 }
0x1e2b   :  { %9625 = vmatmul.mubr.msk.bf16.vlgmr.msra.gmra.mrb[108].mxu0 %vm869_vm1, %v7763_v31 }
0x1e2c   :  { %9635 = vmatpush3.bf16.xpose.msra.mxu0 %v7871_v25  ;;  %9636 = vmatprep.mubr.msk.bf16.mxu0 %vm11235_vm3, %v11234_v7 }
0x1e2d   :  { %9646 = vmatprep.subr.bf16.mxu0 %v11234_v7 }
0x1e33   :  { %9637 = vmatmul.mubr.msk.bf16.vlgmr.msra.gmra.mrb[112].mxu0 %vm6490_vm4, %v7864_v5 }
0x1e34   :  { %9648 = vmatprep.mubr.msk.bf16.mxu0 %vm11235_vm3, %v11234_v7  ;;  %9647 = vmatpush3.bf16.msra.mxu0 %v7991_v62 }
0x1e35   :  { %9658 = vmatprep.subr.bf16.mxu0 %v11234_v7 }
0x1efe   :  { %v7804_v33 = vpop.f32.mrb[108].mxu0 }
0x1eff   :  { %v9626_v41 = vpop.f32.mrb[109].mxu0 }
0x1f00   :  { %v7807_v13 = vpop.f32.mrb[110].mxu0 }
0x1f01   :  { %v7813_v34 = vpack.c.bf16 %v7807_v13, %v7804_v33  ;;  %v9627_v55 = vpop.f32.mrb[111].mxu0 }
0x1f03   :  { %9631 = vmatmul.mubr.msk.bf16.vlgmr.msra.gmra.mrb[92].mxu1 %vm6490_vm4, %v7813_v34 }
0x1f04   :  { %9642 = vmatprep.mubr.msk.bf16.mxu1 %vm11235_vm3, %v11234_v7 }
0x1f06   :  { %v7907_v10 = vpop.f32.mrb[112].mxu0 }
0x1f07   :  { %v7908_v38 = vadd.f32 %v12747_v37, %v7907_v10  ;;  %v9638_v47 = vpop.f32.mrb[113].mxu0 }
0x1f08   :  { %v7910_v63 = vpop.f32.mrb[114].mxu0 }
0x1f09   :  { %v7911_v43 = vadd.f32 %v12750_v9, %v7910_v63  ;;  %v9639_v46 = vpop.f32.mrb[115].mxu0  ;;  %v7914_v4 = vsel %vm869_vm1, %v7908_v38, -inf }
0x1f0a   :  { %7915 = vmax.xlane.f32.xlu1 %v7914_v4 }
0x1f0b   :  { %v7917_v44 = vsel %vm869_vm1, %v7911_v43, -inf }
0x1f0c   :  { %7918 = vmax.xlane.f32.xlu0 %v7917_v44 }
0x1f97   :  { %v7916_v36 = vpop.xlane.xlu1 %7915 }
0x1f98   :  { %v7920_v2 = vsub.f32 %v7908_v38, %v7916_v36 }
0x1f99   :  { %v7919_v28 = vpop.xlane.xlu0 %7918 }
0x1f9a   :  { %v7922_v20 = vmul.f32 1.442695, %v7920_v2  ;;  %v7921_v22 = vsub.f32 %v7911_v43, %v7919_v28 }
0x1f9c   :  { %10648 = vpow2.f32 %v7922_v20  ;;  %v7924_v60 = vmul.f32 1.442695, %v7921_v22 }
0x1f9e   :  { %10650 = vpow2.f32 %v7924_v60 }
0x1fa6   :  { %v10649_v50 = vpop.eup %10648 }
0x1fa7   :  { %v7926_v0 = vsel %vm869_vm1, %v10649_v50, 0.0 }
0x1fa8   :  { %v10651_v56 = vpop.eup %10650  ;;  %7927 = vadd.xlane.f32.xlu1 %v7926_v0 }
0x1fa9   :  { %v7929_v14 = vsel %vm869_vm1, %v10651_v56, 0.0 }
0x1faa   :  { %7930 = vadd.xlane.f32.xlu0 %v7929_v14 }
0x1fb9   :  { %7937 = vrot.lane.b32.xlu1 %v12679_v42, %s11244_s27 }
0x1fbd   :  { %8036 = vrot.lane.b32.xlu1 %v12681_v3, %s11243_s2 }
0x1fc0   :  { %8038 = vrot.lane.b32.xlu0 %v12679_v42, %s11242_s30 }
0x1fd6   :  { %v7854_v40 = vpop.f32.mrb[92].mxu1 }
0x1fd7   :  { %v12765_v12 = vadd.f32 %v7854_v40, %v7687_v53  ;;  %v9632_v15 = vpop.f32.mrb[93].mxu1 }
0x1fd8   :  { %v7857_v6 = vpop.f32.mrb[94].mxu1 }
0x1fd9   :  { %v12767_v18 = vadd.f32 %v7857_v6, %v7688_v48  ;;  %v9633_v19 = vpop.f32.mrb[95].mxu1 }
0x2035   :  { %v7928_v21 = vpop.xlane.xlu1 %7927 }
0x2036   :  { %10652 = vrcp.f32 %v7928_v21 }
0x2037   :  { %v7931_v23 = vpop.xlane.xlu0 %7930 }
0x2038   :  { %10654 = vrcp.f32 %v7931_v23 }
0x2039   :  { %v7938_v3 = vpop.permute.xlu1 %7937 }
0x203a   :  { %9641 = vmatpush3.bf16.msra.mxu1 %v7938_v3 }
0x203b   :  { %9652 = vmatprep.subr.bf16.mxu1 %v11234_v7  ;;  %v8039_v24 = vpop.permute.xlu0 %8038 }
0x203c   :  { %v8044_v27 = vsel %vm6490_vm4, %v8039_v24, 0 }
0x203d   :  { %v8037_v29 = vpop.permute.xlu1 %8036 }
0x2040   :  { %v10653_v17 = vpop.eup %10652 }
0x2041   :  { %v7933_v45 = vmul.f32 %v10653_v17, %v10649_v50 }
0x2042   :  { %v10655_v57 = vpop.eup %10654 }
0x2043   :  { %v7935_v1 = vmul.f32 %v10655_v57, %v10651_v56  ;;  %v8158_v56 = vld [vmem:[#allocation21 + $0x1c] sm:$0xf] }
0x2044   :  { %v8164_v14 = vsel %vm6613_vm5, %v8158_v56, 0 }
0x2045   :  { %v7936_v26 = vpack.c.bf16 %v7935_v1, %v7933_v45 }
0x2047   :  { %9643 = vmatmul.mubr.msk.bf16.vlgmr.msra.gmra.mrb[96].mxu1 %vm869_vm1, %v7936_v26 }
0x2048   :  { %9653 = vmatpush3.bf16.xpose.msra.mxu1 %v8044_v27  ;;  %9654 = vmatprep.mubr.msk.bf16.mxu1 %vm11235_vm3, %v11234_v7 }
0x2049   :  { %9664 = vmatprep.subr.bf16.mxu1 %v11234_v7 }
0x204f   :  { %9655 = vmatmul.mubr.msk.bf16.vlgmr.msra.gmra.mrb[100].mxu1 %vm6490_vm4, %v8037_v29 }
0x2050   :  { %9666 = vmatprep.mubr.msk.bf16.mxu1 %vm11235_vm3, %v11234_v7  ;;  %9665 = vmatpush3.bf16.msra.mxu1 %v8164_v14 }
0x2051   :  { %9678 = vmatprep.subr.bf16.mxu1 %v11234_v7 }
0x211a   :  { %v7977_v58 = vpop.f32.mrb[96].mxu1 }
0x211b   :  { %v9644_v59 = vpop.f32.mrb[97].mxu1 }
0x211c   :  { %v7980_v11 = vpop.f32.mrb[98].mxu1 }
0x211d   :  { %v7986_v54 = vpack.c.bf16 %v7980_v11, %v7977_v58  ;;  %v9645_v51 = vpop.f32.mrb[99].mxu1  ;;  %v10584_v11 = vld [vmem:[#allocation27 + $0x10] sm:$0xff]  }
0x211e   :  { %v10587_v51 = vld [vmem:[%s12917_s23 + $0x28] sm:$0xff]  }
0x211f   :  { %9649 = vmatmul.mubr.msk.bf16.vlgmr.msra.gmra.mrb[116].mxu0 %vm6490_vm4, %v7986_v54  ;;  %v10586_v54 = vld [vmem:[%s12917_s23 + $0x20] sm:$0xff]  }
0x2120   :  { %9660 = vmatprep.mubr.msk.bf16.mxu0 %vm11235_vm3, %v11234_v7 }
0x2122   :  { %v8080_v52 = vpop.f32.mrb[100].mxu1 }
0x2123   :  { %v8081_v61 = vadd.f32 %v12747_v37, %v8080_v52  ;;  %v9656_v30 = vpop.f32.mrb[101].mxu1 }
0x2124   :  { %v8083_v31 = vpop.f32.mrb[102].mxu1 }
0x2125   :  { %v8084_v25 = vadd.f32 %v12750_v9, %v8083_v31  ;;  %v9657_v5 = vpop.f32.mrb[103].mxu1  ;;  %v8087_v32 = vsel %vm869_vm1, %v8081_v61, -inf }
0x2126   :  { %8088 = vmax.xlane.f32.xlu1 %v8087_v32 }
0x2127   :  { %v8090_v39 = vsel %vm869_vm1, %v8084_v25, -inf }
0x2128   :  { %8091 = vmax.xlane.f32.xlu0 %v8090_v39 }
0x21b3   :  { %v8089_v33 = vpop.xlane.xlu1 %8088 }
0x21b4   :  { %v8093_v41 = vsub.f32 %v8081_v61, %v8089_v33  ;;  %v9213_v33 = vld [vmem:[#allocation24 + $0x1] ss:$0 sm:$0xff] }
0x21b5   :  { %v8092_v13 = vpop.xlane.xlu0 %8091 }
0x21b6   :  { %v8095_v34 = vmul.f32 1.442695, %v8093_v41  ;;  %v8094_v55 = vsub.f32 %v8084_v25, %v8092_v13 }
0x21b8   :  { %10656 = vpow2.f32 %v8095_v34  ;;  %v8097_v10 = vmul.f32 1.442695, %v8094_v55  ;;  %v9214_v55 = vld [vmem:[#allocation25 + $0x1] ss:$0 sm:$0xff] }
0x21ba   :  { %10658 = vpow2.f32 %v8097_v10 }
0x21c2   :  { %v10657_v37 = vpop.eup %10656 }
0x21c3   :  { %v8099_v38 = vsel %vm869_vm1, %v10657_v37, 0.0 }
0x21c4   :  { %v10659_v47 = vpop.eup %10658  ;;  %8100 = vadd.xlane.f32.xlu0 %v8099_v38 }
0x21c5   :  { %v8102_v63 = vsel %vm869_vm1, %v10659_v47, 0.0 }
0x21c6   :  { %8103 = vadd.xlane.f32.xlu1 %v8102_v63  ;;  %v10588_v63 = vld [vmem:[%s12917_s23 + $0x30] sm:$0xff]  }
0x21da   :  { %8110 = vrot.lane.b32.xlu0 %v12679_v42, %s11245_s15 }
0x21f2   :  { %v8027_v9 = vpop.f32.mrb[116].mxu0 }
0x21f3   :  { %v8034_v43 = vadd.f32 %v8027_v9, %v12765_v12  ;;  %v9650_v46 = vpop.f32.mrb[117].mxu0  ;;  %v10589_v9 = vld [vmem:[%s12917_s23 + $0x38] sm:$0xff]  }
0x21f4   :  { %v8030_v4 = vpop.f32.mrb[118].mxu0 }
0x21f5   :  { %v8035_v44 = vadd.f32 %v8030_v4, %v12767_v18  ;;  %v9651_v36 = vpop.f32.mrb[119].mxu0 }
0x2251   :  { %v8101_v2 = vpop.xlane.xlu0 %8100 }
0x2252   :  { %10660 = vrcp.f32 %v8101_v2 }
0x2253   :  { %v8104_v28 = vpop.xlane.xlu1 %8103 }
0x2254   :  { %10662 = vrcp.f32 %v8104_v28 }
0x2255   :  { %v8111_v20 = vpop.permute.xlu0 %8110 }
0x2256   :  { %9659 = vmatpush3.bf16.msra.mxu0 %v8111_v20 }
0x2257   :  { %9670 = vmatprep.subr.bf16.mxu0 %v11234_v7 }
0x225c   :  { %v10661_v22 = vpop.eup %10660 }
0x225d   :  { %v8106_v50 = vmul.f32 %v10661_v22, %v10657_v37 }
0x225e   :  { %v10663_v60 = vpop.eup %10662 }
0x225f   :  { %v8108_v42 = vmul.f32 %v10663_v60, %v10659_v47 }
0x2261   :  { %v8109_v0 = vpack.c.bf16 %v8108_v42, %v8106_v50  ;;  %v9232_v42 = vld [vmem:[#allocation30 + $0x1] ss:$0 sm:$0xff] }
0x2263   :  { %9661 = vmatmul.mubr.msk.bf16.vlgmr.msra.gmra.mrb[120].mxu0 %vm869_vm1, %v8109_v0 }
0x2264   :  { %9674 = vmatprep.mubr.msk.bf16.mxu0 %vm11235_vm3, %v11234_v7  ;;  %9671 = vmatpush3.bf16.msra.mxu0 %v10584_v11 }
0x2265   :  { %9672 = vmatprep.subr.bf16.mxu0 %v11234_v7 }
0x2336   :  { %v8150_v35 = vpop.f32.mrb[120].mxu0 }
0x2337   :  { %v9662_v53 = vpop.f32.mrb[121].mxu0 }
0x2338   :  { %v8153_v40 = vpop.f32.mrb[122].mxu0 }
0x2339   :  { %v8159_v48 = vpack.c.bf16 %v8153_v40, %v8150_v35  ;;  %v9663_v12 = vpop.f32.mrb[123].mxu0 }
0x233b   :  { %9667 = vmatmul.mubr.msk.bf16.vlgmr.msra.gmra.mrb[104].mxu1 %vm6490_vm4, %v8159_v48 }
0x233c   :  { %9686 = vmatprep.mubr.msk.bf16.mxu1 %vm11235_vm3, %v11234_v7  ;;  %9679 = vmatpush3.bf16.msra.mxu1 %v10586_v54 }
0x233d   :  { %9680 = vmatprep.subr.bf16.mxu1 %v11234_v7 }
0x2340   :  { %9681 = vmatpush3.bf16.msra.mxu1 %v10587_v51 }
0x2341   :  { %9682 = vmatprep.subr.bf16.mxu1 %v11234_v7 }
0x2344   :  { %9683 = vmatpush3.bf16.msra.mxu1 %v10588_v63 }
0x2345   :  { %9684 = vmatprep.subr.bf16.mxu1 %v11234_v7 }
0x2348   :  { %9685 = vmatpush3.bf16.msra.mxu1 %v10589_v9 }
0x240e   :  { %v8200_v15 = vpop.f32.mrb[104].mxu1 }
0x240f   :  { %v8207_v6 = vadd.f32 %v8200_v15, %v8034_v43  ;;  %v9668_v18 = vpop.f32.mrb[105].mxu1  ;;  %v9215_v43 = vld [vmem:[#allocation28 + $0x1] ss:$0 sm:$0xff] }
0x2410   :  { %v8203_v19 = vpop.f32.mrb[106].mxu1 }
0x2411   :  { %v8208_v21 = vadd.f32 %v8203_v19, %v8035_v44  ;;  %v9669_v23 = vpop.f32.mrb[107].mxu1  ;;  %v8209_v3 = vadd.f32 %v8207_v6, %v12670_v8 }
0x2413   :  { %v8215_v17 = vsel %vm2407_vm2, %v8209_v3, 0.0  ;;  %v8210_v57 = vadd.f32 %v8208_v21, %v12672_v16  ;;  %v10585_v16 = vld [vmem:[#allocation27 + $0x18] sm:$0xff]  }
0x2414   :  { %8216 = vadd.xlane.f32.xlu1 %v8215_v17  ;;  %9673 = vmatpush3.bf16.msra.mxu0 %v10585_v16  ;;  %v9233_v16 = vld [vmem:[#allocation31 + $0x1] ss:$0 sm:$0xff] }
0x2415   :  { %v8218_v45 = vsel %vm2407_vm2, %v8210_v57, 0.0  ;;  %9697 = vmatprep.subr.bf16.mxu0 %v11234_v7 }
0x2418   :  { %8219 = vadd.xlane.f32.xlu1 %v8218_v45 }
0x24a1   :  { %v8217_v1 = vpop.xlane.xlu1 %8216 }
0x24a2   :  { %v8221_v24 = vmul.f32 0.03125, %v8217_v1 }
0x24a4   :  { %v8223_v26 = vsub.f32 %v8209_v3, %v8221_v24  ;;  %v11246_v24 = vmov 0.0|0.0  }
0x24a5   :  { %v8220_v27 = vpop.xlane.xlu1 %8219  ;;  %9705 = vmatprep.subr.bf16.mxu1 %v11246_v24 }
0x24a6   :  { %v8222_v29 = vmul.f32 0.03125, %v8220_v27  ;;  %v8225_v49 = vmul.f32 %v8223_v26, %v8223_v26 }
0x24a8   :  { %v8224_v62 = vsub.f32 %v8210_v57, %v8222_v29  ;;  %v8227_v58 = vsel %vm2407_vm2, %v8225_v49, 0.0 }
0x24a9   :  { %8228 = vadd.xlane.f32.xlu1 %v8227_v58 }
0x24aa   :  { %v8226_v59 = vmul.f32 %v8224_v62, %v8224_v62 }
0x24ac   :  { %v8230_v8 = vsel %vm2407_vm2, %v8226_v59, 0.0 }
0x24ad   :  { %8231 = vadd.xlane.f32.xlu1 %v8230_v8 }
0x2536   :  { %v8229_v52 = vpop.xlane.xlu1 %8228 }
0x2537   :  { %v8233_v61 = vmul.f32 0.03125, %v8229_v52 }
0x2539   :  { %v8235_v30 = vadd.f32 1e-05, %v8233_v61  ;;  %v9234_v61 = vld [vmem:[#allocation33 + $0x1] ss:$0 sm:$0xff] }
0x253a   :  { %v8232_v31 = vpop.xlane.xlu1 %8231 }
0x253b   :  { %10664 = vrsqrt.f32 %v8235_v30  ;;  %v8234_v25 = vmul.f32 0.03125, %v8232_v31 }
0x253d   :  { %v8236_v5 = vadd.f32 1e-05, %v8234_v25 }
0x253f   :  { %10666 = vrsqrt.f32 %v8236_v5 }
0x2545   :  { %v10665_v32 = vpop.eup %10664 }
0x2546   :  { %v8239_v39 = vmul.f32 %v10665_v32, %v8223_v26  ;;  %v10590_v26 = vld [vmem:[#allocation34] sm:$0xff]   ;;  %v10591_v32 = vld [vmem:[#allocation34 + $0x8] sm:$0xff]  }
0x2548   :  { %v8247_v13 = vmul.f32 %v9213_v33, %v8239_v39 }
0x2549   :  { %v10667_v41 = vpop.eup %10666 }
0x254a   :  { %v8240_v34 = vmul.f32 %v10667_v41, %v8224_v62  ;;  %v8255_v37 = vadd.f32 %v9214_v55, %v8247_v13  ;;  %v9236_v13 = vld [vmem:[#allocation36] ss:$0 sm:$0xff] }
0x254c   :  { %v8248_v10 = vmul.f32 %v9213_v33, %v8240_v34 }
0x254e   :  { %v8256_v38 = vadd.f32 %v9214_v55, %v8248_v10 }
0x2550   :  { %v8262_v47 = vpack.c.bf16 %v8256_v38, %v8255_v37 }
0x2552   :  { %9675 = vmatmul.mubr.msk.bf16.vlgmr.msra.gmra.mrb[124].mxu0 %vm2407_vm2, %v8262_v47 }
0x2553   :  { %9701 = vmatprep.mubr.msk.bf16.mxu0 %vm11235_vm3, %v11234_v7  ;;  %9698 = vmatpush3.bf16.msra.mxu0 %v10590_v26 }
0x2554   :  { %9699 = vmatprep.subr.bf16.mxu0 %v11234_v7 }
0x2557   :  { %9700 = vmatpush3.bf16.msra.mxu0 %v10591_v32 }
0x2625   :  { %v8320_v46 = vpop.f32.mrb[124].mxu0 }
0x2626   :  { %v8321_v4 = vadd.f32 %v9215_v43, %v8320_v46  ;;  %v9676_v44 = vpop.f32.mrb[125].mxu0 }
0x2627   :  { %v8323_v36 = vpop.f32.mrb[126].mxu0 }
0x2628   :  { %v8324_v2 = vadd.f32 %v9215_v43, %v8323_v36  ;;  %v9677_v28 = vpop.f32.mrb[127].mxu0  ;;  %v8327_v20 = vmax.f32 %v8321_v4, 0.0 }
0x262a   :  { %v8328_v22 = vmax.f32 %v8324_v2, 0.0 }
0x262c   :  { %v8338_v60 = vpack.c.bf16 %v8328_v22, %v8327_v20 }
0x262e   :  { %9687 = vmatmul.mubr.msk.bf16.vlgmr.msra.gmra.mrb[108].mxu1 %vm434_vm0, %v8338_v60 }
0x262f   :  { %9694 = vmatprep.mubr.msk.f32.mxu1 %vm11235_vm3, %v11234_v7  ;;  %v8465_v7 = vld [vmem:[#allocation16] sm:$0xf] }
0x2701   :  { %v8400_v50 = vpop.f32.mrb[108].mxu1 }
0x2702   :  { %v8407_v0 = vadd.f32 %v8400_v50, %v8255_v37  ;;  %v9688_v56 = vpop.f32.mrb[109].mxu1 }
0x2703   :  { %v8403_v14 = vpop.f32.mrb[110].mxu1 }
0x2704   :  { %v8408_v35 = vadd.f32 %v8403_v14, %v8256_v38  ;;  %v9689_v53 = vpop.f32.mrb[111].mxu1  ;;  %v8417_v40 = vadd.f32 %v9232_v42, %v8407_v0 }
0x2706   :  { %v8423_v48 = vsel %vm2407_vm2, %v8417_v40, 0.0  ;;  %v8418_v12 = vadd.f32 %v9232_v42, %v8408_v35 }
0x2707   :  { %8424 = vadd.xlane.f32.xlu1 %v8423_v48 }
0x2708   :  { %v8426_v15 = vsel %vm2407_vm2, %v8418_v12, 0.0 }
0x270b   :  { %8427 = vadd.xlane.f32.xlu1 %v8426_v15 }
0x2794   :  { %v8425_v6 = vpop.xlane.xlu1 %8424 }
0x2795   :  { %v8429_v18 = vmul.f32 0.03125, %v8425_v6 }
0x2797   :  { %v8431_v19 = vsub.f32 %v8417_v40, %v8429_v18 }
0x2798   :  { %v8428_v21 = vpop.xlane.xlu1 %8427 }
0x2799   :  { %v8430_v23 = vmul.f32 0.03125, %v8428_v21  ;;  %v8433_v3 = vmul.f32 %v8431_v19, %v8431_v19 }
0x279b   :  { %v8432_v17 = vsub.f32 %v8418_v12, %v8430_v23  ;;  %v8435_v57 = vsel %vm2407_vm2, %v8433_v3, 0.0 }
0x279c   :  { %8436 = vadd.xlane.f32.xlu0 %v8435_v57 }
0x279d   :  { %v8434_v45 = vmul.f32 %v8432_v17, %v8432_v17 }
0x279f   :  { %v8438_v1 = vsel %vm2407_vm2, %v8434_v45, 0.0 }
0x27a0   :  { %8439 = vadd.xlane.f32.xlu1 %v8438_v1 }
0x2829   :  { %v8437_v27 = vpop.xlane.xlu0 %8436 }
0x282a   :  { %v8441_v29 = vmul.f32 0.03125, %v8437_v27 }
0x282c   :  { %v8443_v49 = vadd.f32 1e-05, %v8441_v29 }
0x282d   :  { %v8440_v62 = vpop.xlane.xlu1 %8439 }
0x282e   :  { %10668 = vrsqrt.f32 %v8443_v49  ;;  %v8442_v58 = vmul.f32 0.03125, %v8440_v62 }
0x2830   :  { %v8444_v59 = vadd.f32 1e-05, %v8442_v58 }
0x2832   :  { %10670 = vrsqrt.f32 %v8444_v59 }
0x2838   :  { %v10669_v8 = vpop.eup %10668 }
0x2839   :  { %v8447_v11 = vmul.f32 %v10669_v8, %v8431_v19 }
0x283b   :  { %v8455_v52 = vmul.f32 %v9233_v16, %v8447_v11 }
0x283c   :  { %v10671_v54 = vpop.eup %10670 }
0x283d   :  { %v8448_v51 = vmul.f32 %v10671_v54, %v8432_v17  ;;  %v8463_v31 = vadd.f32 %v9234_v61, %v8455_v52 }
0x283f   :  { %v8456_v30 = vmul.f32 %v9233_v16, %v8448_v51 }
0x2841   :  { %v8464_v25 = vadd.f32 %v9234_v61, %v8456_v30 }
0x2843   :  { %v9706_v5 = vpack.c.bf16 %v8464_v25, %v8463_v31 }
0x2845   :  { %9707 = vmatpush3.bf16.msra.mxu1 %v9706_v5 }
0x2848   :  { %9695 = vmatmul.mubr.msk.f32.vlgmr.msra.gmra.mrb[112].mxu1 %vm869_vm1, %v8465_v7 }
0x291b   :  { %v8535_v39 = vpop.f32.mrb[112].mxu1 }
0x291c   :  { %v8543_v33 = vpack.c.bf16 %v8535_v39, %v8535_v39  ;;  %v9696_v41 = vpop.f32.mrb[113].mxu1 }
0x291e   :  { %9702 = vmatmul.mubr.msk.bf16.vlgmr.msra.gmra.mrb[128].mxu0 %vm2407_vm2, %v8543_v33 }
0x29f1   :  { %v8600_v34 = vpop.f32.mrb[128].mxu0 }
0x29f2   :  { %v8601_v55 = vadd.f32 %v9236_v13, %v8600_v34  ;;  %v9703_v10 = vpop.f32.mrb[129].mxu0 }
0x29f3   :  { %v8603_v37 = vpop.f32.mrb[130].mxu0 }
0x29f4   :  { %8607 = vst.msk [vmem:[%s12918_s25] sm:$0xf] %vm8606_vm6, %v8601_v55  ;;  %v9704_v38 = vpop.f32.mrb[131].mxu0 }
0x29f5   :  { %8612 = vsyncpa [#allocation3], 1 }
0x29f6   :  { %8613 = vsyncpa [#allocation5], 1 }
0x29f7   :  { %8614 = vsyncpa [#allocation8], 1 }
0x29f8   :  { %8615 = vsyncpa [#allocation11], 1 }
0x29f9   :  { %8616 = vsyncpa [#allocation14], 1 }
0x29fa   :  { %8617 = vsyncpa [#allocation17], 1 }
0x29fb   :  { %8618 = vsyncpa [#allocation20], 1 }
0x29fc   :  { %8619 = vsyncpa [#allocation23], 1 }
0x29fd   :  { %8620 = vsyncpa [#allocation26], 1 }
0x29fe   :  { %8621 = vsyncpa [#allocation29], 1 }
0x29ff   :  { %8622 = vsyncpa [#allocation32], 1 }
0x2a00   :  { %8623 = vsyncpa [#allocation35], 1 }

</bundles_post_ra>
